<compile_context>
chip_gen: v7x
topology: tpu7x:2x2x1
jax: 0.10.0
libtpu: 0.0.40
codegen_flags: <defaults>
</compile_context>

<pallas_src>
import numpy as np
import jax
import jax.numpy as jnp
from jax.experimental import pallas as pl
from jax.experimental.pallas import tpu as pltpu

EPS = 1e-5
LANES = 128


def _round_up(x, m):
    return (x + m - 1) // m * m


def _vmem_limit_bytes():
    # 128 MiB physical on v5e/v6e -> 96 MiB scoped; 64 MiB on v7x -> 48 MiB (headroom for
    # Mosaic internal scratch).
    try:
        cap = int(pltpu.get_tpu_info().vmem_capacity_bytes)
    except Exception:
        cap = 64 * 1024 * 1024
    return int(min(96 * 1024 * 1024, cap * 3 // 4))


# ------------------------------- parameters --------------------------------

def init_params(key, in_channels, out_channels, expansion=4):
    ks = jax.random.split(key, 9)
    C, E = out_channels, out_channels * expansion
    p = {
        "w1": 0.1 * jax.random.normal(ks[0], (C, in_channels), jnp.float32),  # OIHW (1x1)
        "b1": 0.1 * jax.random.normal(ks[1], (C,), jnp.float32),
        "w2": 0.1 * jax.random.normal(ks[2], (C, C, 3, 3), jnp.float32),       # OIHW
        "b2": 0.1 * jax.random.normal(ks[3], (C,), jnp.float32),
        "w3": 0.1 * jax.random.normal(ks[4], (E, C), jnp.float32),             # OIHW (1x1)
        "b3": 0.1 * jax.random.normal(ks[5], (E,), jnp.float32),
    }

    def bn(k, n):
        k1, k2, k3, k4 = jax.random.split(k, 4)
        return dict(
            gamma=1.0 + 0.1 * jax.random.normal(k1, (n,), jnp.float32),
            beta=0.1 * jax.random.normal(k2, (n,), jnp.float32),
            mean=0.1 * jax.random.normal(k3, (n,), jnp.float32),
            var=0.5 + jnp.abs(jax.random.normal(k4, (n,), jnp.float32)),
        )

    p["bn1"], p["bn2"], p["bn3"] = bn(ks[6], C), bn(ks[7], C), bn(ks[8], E)
    return p


def _bn_scale_bias(conv_bias, bn):
    scale = bn["gamma"] / jnp.sqrt(bn["var"] + EPS)
    bias = (conv_bias - bn["mean"]) * scale + bn["beta"]
    return scale, bias


# ------------------------------ fused forward -------------------------------

def bottleneck_forward(x_nchw, p):
    N, Cin, H, W = x_nchw.shape
    C = p["w1"].shape[0]
    E = p["w3"].shape[0]
    assert Cin == E, "i_downsample is None -> residual requires in_channels == out_channels*4"

    CPI = _round_up(Cin, LANES)            # padded input / identity channels
    CPM = _round_up(C, LANES)              # padded mid channels
    CPO = _round_up(E, LANES)              # padded output channels
    assert CPI == CPO                      # residual add is done on padded lanes

    # Column-padded row layout: col 0 = left halo, cols [1, W] = real pixels,
    # cols [W+1, WP) = right halo + sublane-alignment padding (WP % 8 == 0).
    WP = _round_up(W + 2, 8)
    M2 = H * WP                            # rows of one column-padded image (no top/bottom rows)
    CANVAS_OFF = _round_up(WP + 1, 16)     # 16: bf16 sublane packing alignment
    ROWS = _round_up(CANVAS_OFF + M2 + WP + 1, 16)
    TAIL = ROWS - CANVAS_OFF - M2

    # ---- fold BN scale into conv weights (per output channel); keep bias separate ----
    s1, b1 = _bn_scale_bias(p["b1"], p["bn1"])
    s2, b2 = _bn_scale_bias(p["b2"], p["bn2"])
    s3, b3 = _bn_scale_bias(p["b3"], p["bn3"])
    w1 = p["w1"].T * s1[None, :]                                            # (Cin, C)
    w2 = jnp.transpose(p["w2"], (2, 3, 1, 0)) * s2[None, None, None, :]     # (ky, kx, I, O)
    w3 = p["w3"].T * s3[None, :]                                            # (C, E)

    # ---- lane-pad channels; conv2's three kx taps are stacked into K = 3*CPM ----
    w1p = jnp.zeros((CPI, CPM), jnp.float32).at[:Cin, :C].set(w1).astype(jnp.bfloat16)
    w2p = (jnp.zeros((3, 3, CPM, CPM), jnp.float32).at[:, :, :C, :C].set(w2)
           .reshape(3, 3 * CPM, CPM).astype(jnp.bfloat16))
    w3p = jnp.zeros((CPM, CPO), jnp.float32).at[:C, :E].set(w3).astype(jnp.bfloat16)
    b1p = jnp.zeros((1, CPM), jnp.float32).at[0, :C].set(b1)
    b2p = jnp.zeros((1, CPM), jnp.float32).at[0, :C].set(b2)
    b3p = jnp.zeros((1, CPO), jnp.float32).at[0, :E].set(b3)

    # ---- NCHW -> NHWC, column halo + channel pad, flatten to rows, stream as bf16 ----
    x_nhwc = jnp.transpose(x_nchw, (0, 2, 3, 1))
    x_rows = jnp.pad(x_nhwc, ((0, 0), (0, 0), (1, WP - 1 - W), (0, CPI - Cin)))
    x_rows = x_rows.reshape(N, M2, CPI).astype(jnp.bfloat16)

    def kernel(x_ref, w1_ref, b1_ref, w2_ref, b2_ref, w3_ref, b3_ref, o_ref, canvas_ref):
        xp = x_ref[0]                                               # (M2, CPI) bf16
        # Interior-column mask built in-kernel (no DMA'd mask input).  Column index is
        # recovered without integer div/rem: exact for M2 << 2^23 (see f32 analysis).
        r = jax.lax.broadcasted_iota(jnp.int32, (M2, 1), 0)
        q = ((r.astype(jnp.float32) + 0.5) * (1.0 / WP)).astype(jnp.int32)   # row index
        col = r - q * WP
        interior = (col >= 1) & (col <= W)

        # conv1 (1x1) + folded BN1 + ReLU; halo columns forced back to zero.
        h1 = jnp.dot(xp, w1_ref[...], preferred_element_type=jnp.float32)
        h1 = jnp.where(interior, jnp.maximum(h1 + b1_ref[...], 0.0), 0.0)

        # Zero only the top/bottom halo strips; the interior is fully overwritten below.
        # (Per-step, not "once": scratch is per-core under the parallel batch axis on v7x.)
        canvas_ref[pl.ds(0, CANVAS_OFF), :] = jnp.zeros((CANVAS_OFF, CPM), jnp.bfloat16)
        canvas_ref[pl.ds(CANVAS_OFF + M2, TAIL), :] = jnp.zeros((TAIL, CPM), jnp.bfloat16)
        canvas_ref[pl.ds(CANVAS_OFF, M2), :] = h1.astype(jnp.bfloat16)

        # conv2 (3x3, pad=1): 3 accumulating MXU matmuls with K = 3*CPM (kx taps
        # concatenated along lanes) over row-shifted views of the zero-bordered canvas.
        acc = jnp.zeros((M2, CPM), jnp.float32)
        for dy in range(3):
            base = CANVAS_OFF + (dy - 1) * WP
            taps = jnp.concatenate(
                [canvas_ref[pl.ds(base + dx - 1, M2), :] for dx in range(3)], axis=1)
            acc = acc + jnp.dot(taps, w2_ref[dy], preferred_element_type=jnp.float32)
        h2 = jnp.maximum(acc + b2_ref[...], 0.0).astype(jnp.bfloat16)

        # conv3 (1x1) + folded BN3, residual add in f32, ReLU, bf16 writeback.
        h3 = jnp.dot(h2, w3_ref[...], preferred_element_type=jnp.float32) + b3_ref[...]
        o_ref[0] = jnp.maximum(h3 + xp.astype(jnp.float32), 0.0).astype(jnp.bfloat16)

    flops = 2 * N * M2 * (CPI * CPM + 9 * CPM * CPM + CPM * CPO)
    bytes_accessed = (2 * N * M2 * (CPI + CPO)                        # bf16 activations
                      + 2 * (CPI * CPM + 9 * CPM * CPM + CPM * CPO)   # bf16 weights
                      + 4 * (2 * CPM + CPO))                          # f32 biases

    out_rows = pl.pallas_call(
        kernel,
        out_shape=jax.ShapeDtypeStruct((N, M2, CPO), jnp.bfloat16),
        grid=(N,),
        in_specs=[
            pl.BlockSpec((1, M2, CPI), lambda n: (n, 0, 0)),        # x tile (streamed, bf16)
            # TODO(synk): mark the constant-index weight/bias specs single-buffered
            #             (pipeline_mode=pl.Buffered(1)) once that API is stable everywhere;
            #             saves the redundant second VMEM copy on v7x.
            pl.BlockSpec((CPI, CPM), lambda n: (0, 0)),             # w1 (VMEM-resident)
            pl.BlockSpec((1, CPM), lambda n: (0, 0)),               # b1
            pl.BlockSpec((3, 3 * CPM, CPM), lambda n: (0, 0, 0)),   # w2 (kx-fused taps)
            pl.BlockSpec((1, CPM), lambda n: (0, 0)),               # b2
            pl.BlockSpec((CPM, CPO), lambda n: (0, 0)),             # w3
            pl.BlockSpec((1, CPO), lambda n: (0, 0)),               # b3
        ],
        out_specs=pl.BlockSpec((1, M2, CPO), lambda n: (n, 0, 0)),
        scratch_shapes=[pltpu.VMEM((ROWS, CPM), jnp.bfloat16)],     # bf16 h1 canvas
        compiler_params=pltpu.CompilerParams(
            dimension_semantics=("parallel",),                      # N>=2 steps feeds both v7x TCs
            vmem_limit_bytes=_vmem_limit_bytes(),
        ),
        cost_estimate=pl.CostEstimate(
            flops=flops, transcendentals=0, bytes_accessed=bytes_accessed),
    )(x_rows, w1p, b1p, w2p, b2p, w3p, b3p)

    out = out_rows.reshape(N, H, WP, CPO)[:, :, 1:W + 1, :E]
    return jnp.transpose(out, (0, 3, 1, 2)).astype(jnp.float32)


# ------------------------------ pure-JAX reference ---------------------------

def bottleneck_reference(x, p):
    def conv(x, w, b, pad=0):
        w4 = w if w.ndim == 4 else w[:, :, None, None]
        y = jax.lax.conv_general_dilated(
            x, w4, (1, 1), [(pad, pad), (pad, pad)],
            dimension_numbers=("NCHW", "OIHW", "NCHW"))
        return y + b[None, :, None, None]

    def bn(x, s):
        return ((x - s["mean"][None, :, None, None])
                / jnp.sqrt(s["var"][None, :, None, None] + EPS)
                * s["gamma"][None, :, None, None] + s["beta"][None, :, None, None])

    h = jax.nn.relu(bn(conv(x, p["w1"], p["b1"]), p["bn1"]))
    h = jax.nn.relu(bn(conv(h, p["w2"], p["b2"], pad=1), p["bn2"]))
    h = bn(conv(h, p["w3"], p["b3"]), p["bn3"])
    return jax.nn.relu(h + x)


# ------------------------------------ main -----------------------------------

if __name__ == "__main__":
    key = jax.random.PRNGKey(0)
    kx, kp = jax.random.split(key)

    in_channels, out_channels = 16, 4          # expansion=4 -> output channels = 16
    N, H, W = 2, 16, 16
    x = jax.random.normal(kx, (N, in_channels, H, W), jnp.float32)   # NCHW, as in PyTorch

    params = init_params(kp, in_channels, out_channels)

    fwd = jax.jit(bottleneck_forward)
    out = jax.block_until_ready(fwd(x, params))

    ref = jax.block_until_ready(bottleneck_reference(x, params))
    # bf16 activation I/O (incl. the identity path) -> slightly looser tolerance than f32.
    np.testing.assert_allclose(np.asarray(out), np.asarray(ref), rtol=3e-2, atol=3e-2)
    assert out.shape == (N, out_channels * 4, H, W)

    print("KERNEL_OK")
</pallas_src>

<mosaic_0001>
module attributes {stable_mosaic.version = 11 : i64} {
  func.func @kernel(%arg0: i32, %arg1: memref<1x384x128xbf16, #tpu.memory_space<vmem>>, %arg2: memref<128x128xbf16, #tpu.memory_space<vmem>>, %arg3: memref<1x128xf32, #tpu.memory_space<vmem>>, %arg4: memref<3x384x128xbf16, #tpu.memory_space<vmem>>, %arg5: memref<1x128xf32, #tpu.memory_space<vmem>>, %arg6: memref<128x128xbf16, #tpu.memory_space<vmem>>, %arg7: memref<1x128xf32, #tpu.memory_space<vmem>>, %arg8: memref<1x384x128xbf16, #tpu.memory_space<vmem>>, %arg9: memref<448x128xbf16, #tpu.memory_space<vmem>>) attributes {dimension_semantics = [#tpu.dimension_semantics<parallel>], iteration_bounds = array<i64: 2>, scalar_prefetch = 0 : i64, scratch_operands = 1 : i64, tpu.core_type = #tpu.core_type<tc>, window_params = [{transform_indices = @transform_0, window_bounds = array<i64: 1, 384, 128>}, {pipeline_mode = #tpu.pipeline_mode<synchronous>, transform_indices = @transform_1, window_bounds = array<i64: 128, 128>}, {pipeline_mode = #tpu.pipeline_mode<synchronous>, transform_indices = @transform_2, window_bounds = array<i64: 1, 128>}, {pipeline_mode = #tpu.pipeline_mode<synchronous>, transform_indices = @transform_3, window_bounds = array<i64: 3, 384, 128>}, {pipeline_mode = #tpu.pipeline_mode<synchronous>, transform_indices = @transform_4, window_bounds = array<i64: 1, 128>}, {pipeline_mode = #tpu.pipeline_mode<synchronous>, transform_indices = @transform_5, window_bounds = array<i64: 128, 128>}, {pipeline_mode = #tpu.pipeline_mode<synchronous>, transform_indices = @transform_6, window_bounds = array<i64: 1, 128>}, {transform_indices = @transform_7, window_bounds = array<i64: 1, 384, 128>}]} {
    %c0 = arith.constant 0 : index
    %c0_0 = arith.constant 0 : index
    %c0_1 = arith.constant 0 : index
    %0 = vector.load %arg1[%c0, %c0_0, %c0_1] : memref<1x384x128xbf16, #tpu.memory_space<vmem>>, vector<1x384x128xbf16>
    %1 = vector.shape_cast %0 : vector<1x384x128xbf16> to vector<384x128xbf16>
    %2 = tpu.iota {dimensions = array<i32: 0>} : vector<384x1xi32>
    %3 = arith.sitofp %2 : vector<384x1xi32> to vector<384x1xf32>
    %cst = arith.constant 5.000000e-01 : f32
    %4 = vector.broadcast %cst : f32 to vector<384x1xf32>
    %5 = arith.addf %3, %4 : vector<384x1xf32>
    %cst_2 = arith.constant 0.0416666679 : f32
    %6 = vector.broadcast %cst_2 : f32 to vector<384x1xf32>
    %7 = arith.mulf %5, %6 : vector<384x1xf32>
    %8 = arith.fptosi %7 : vector<384x1xf32> to vector<384x1xi32>
    %c24_i32 = arith.constant 24 : i32
    %9 = vector.broadcast %c24_i32 : i32 to vector<384x1xi32>
    %10 = arith.muli %8, %9 : vector<384x1xi32>
    %11 = arith.subi %2, %10 : vector<384x1xi32>
    %c1_i32 = arith.constant 1 : i32
    %12 = vector.broadcast %c1_i32 : i32 to vector<384x1xi32>
    %13 = arith.cmpi sge, %11, %12 : vector<384x1xi32>
    %c16_i32 = arith.constant 16 : i32
    %14 = vector.broadcast %c16_i32 : i32 to vector<384x1xi32>
    %15 = arith.cmpi sle, %11, %14 : vector<384x1xi32>
    %16 = arith.andi %13, %15 : vector<384x1xi1>
    %c0_3 = arith.constant 0 : index
    %c0_4 = arith.constant 0 : index
    %17 = vector.load %arg2[%c0_3, %c0_4] : memref<128x128xbf16, #tpu.memory_space<vmem>>, vector<128x128xbf16>
    %cst_5 = arith.constant dense<0.000000e+00> : vector<384x128xf32>
    %18 = tpu.matmul %1, %17, %cst_5 {dimension_numbers = #tpu.dot_dimension_numbers<[1], [0], [0], [1], [0, 0, 1, 1], [], []>} : vector<384x128xbf16>, vector<128x128xbf16>, vector<384x128xf32> -> vector<384x128xf32>
    %c0_6 = arith.constant 0 : index
    %c0_7 = arith.constant 0 : index
    %19 = vector.load %arg3[%c0_6, %c0_7] : memref<1x128xf32, #tpu.memory_space<vmem>>, vector<1x128xf32>
    %20 = vector.broadcast %19 : vector<1x128xf32> to vector<384x128xf32>
    %21 = arith.addf %18, %20 : vector<384x128xf32>
    %cst_8 = arith.constant 0.000000e+00 : f32
    %22 = vector.broadcast %cst_8 : f32 to vector<384x128xf32>
    %23 = arith.maximumf %21, %22 : vector<384x128xf32>
    %cst_9 = arith.constant 0.000000e+00 : f32
    %24 = vector.shape_cast %16 : vector<384x1xi1> to vector<384x1xi1>
    %25 = vector.broadcast %24 : vector<384x1xi1> to vector<384x128xi1>
    %26 = vector.broadcast %cst_9 : f32 to vector<384x128xf32>
    %27 = arith.select %25, %23, %26 : vector<384x128xi1>, vector<384x128xf32>
    %cst_10 = arith.constant 0.000000e+00 : bf16
    %28 = vector.broadcast %cst_10 : bf16 to vector<32x128xbf16>
    %c0_11 = arith.constant 0 : index
    %c0_12 = arith.constant 0 : index
    %29 = vector.load %arg9[%c0_11, %c0_12] : memref<448x128xbf16, #tpu.memory_space<vmem>>, vector<32x128xbf16>
    tpu.vector_store %arg9[%c0_11, %c0_12], %28 {strides = array<i32>} : memref<448x128xbf16, #tpu.memory_space<vmem>>, vector<32x128xbf16>,
    %cst_13 = arith.constant 0.000000e+00 : bf16
    %30 = vector.broadcast %cst_13 : bf16 to vector<32x128xbf16>
    %c416 = arith.constant 416 : index
    %c0_14 = arith.constant 0 : index
    %31 = vector.load %arg9[%c416, %c0_14] : memref<448x128xbf16, #tpu.memory_space<vmem>>, vector<32x128xbf16>
    tpu.vector_store %arg9[%c416, %c0_14], %30 {strides = array<i32>} : memref<448x128xbf16, #tpu.memory_space<vmem>>, vector<32x128xbf16>,
    %32 = arith.truncf %27 : vector<384x128xf32> to vector<384x128xbf16>
    %c32 = arith.constant 32 : index
    %c0_15 = arith.constant 0 : index
    %33 = vector.load %arg9[%c32, %c0_15] : memref<448x128xbf16, #tpu.memory_space<vmem>>, vector<384x128xbf16>
    tpu.vector_store %arg9[%c32, %c0_15], %32 {strides = array<i32>} : memref<448x128xbf16, #tpu.memory_space<vmem>>, vector<384x128xbf16>,
    %cst_16 = arith.constant 0.000000e+00 : f32
    %34 = vector.broadcast %cst_16 : f32 to vector<384x128xf32>
    %c7 = arith.constant 7 : index
    %c0_17 = arith.constant 0 : index
    %35 = vector.load %arg9[%c7, %c0_17] : memref<448x128xbf16, #tpu.memory_space<vmem>>, vector<384x128xbf16>
    %c8 = arith.constant 8 : index
    %c0_18 = arith.constant 0 : index
    %36 = vector.load %arg9[%c8, %c0_18] : memref<448x128xbf16, #tpu.memory_space<vmem>>, vector<384x128xbf16>
    %c9 = arith.constant 9 : index
    %c0_19 = arith.constant 0 : index
    %37 = vector.load %arg9[%c9, %c0_19] : memref<448x128xbf16, #tpu.memory_space<vmem>>, vector<384x128xbf16>
    %38 = tpu.concatenate %35, %36, %37 in 1 : vector<384x128xbf16>, vector<384x128xbf16>, vector<384x128xbf16> -> vector<384x384xbf16>
    %c0_20 = arith.constant 0 : index
    %c0_21 = arith.constant 0 : index
    %c0_22 = arith.constant 0 : index
    %39 = vector.load %arg4[%c0_20, %c0_21, %c0_22] : memref<3x384x128xbf16, #tpu.memory_space<vmem>>, vector<1x384x128xbf16>
    %40 = vector.shape_cast %39 : vector<1x384x128xbf16> to vector<384x128xbf16>
    %cst_23 = arith.constant dense<0.000000e+00> : vector<384x128xf32>
    %41 = tpu.matmul %38, %40, %cst_23 {dimension_numbers = #tpu.dot_dimension_numbers<[1], [0], [0], [1], [0, 0, 1, 1], [], []>} : vector<384x384xbf16>, vector<384x128xbf16>, vector<384x128xf32> -> vector<384x128xf32>
    %42 = arith.addf %34, %41 : vector<384x128xf32>
    %c31 = arith.constant 31 : index
    %c0_24 = arith.constant 0 : index
    %43 = vector.load %arg9[%c31, %c0_24] : memref<448x128xbf16, #tpu.memory_space<vmem>>, vector<384x128xbf16>
    %c32_25 = arith.constant 32 : index
    %c0_26 = arith.constant 0 : index
    %44 = vector.load %arg9[%c32_25, %c0_26] : memref<448x128xbf16, #tpu.memory_space<vmem>>, vector<384x128xbf16>
    %c33 = arith.constant 33 : index
    %c0_27 = arith.constant 0 : index
    %45 = vector.load %arg9[%c33, %c0_27] : memref<448x128xbf16, #tpu.memory_space<vmem>>, vector<384x128xbf16>
    %46 = tpu.concatenate %43, %44, %45 in 1 : vector<384x128xbf16>, vector<384x128xbf16>, vector<384x128xbf16> -> vector<384x384xbf16>
    %c1 = arith.constant 1 : index
    %c0_28 = arith.constant 0 : index
    %c0_29 = arith.constant 0 : index
    %47 = vector.load %arg4[%c1, %c0_28, %c0_29] : memref<3x384x128xbf16, #tpu.memory_space<vmem>>, vector<1x384x128xbf16>
    %48 = vector.shape_cast %47 : vector<1x384x128xbf16> to vector<384x128xbf16>
    %cst_30 = arith.constant dense<0.000000e+00> : vector<384x128xf32>
    %49 = tpu.matmul %46, %48, %cst_30 {dimension_numbers = #tpu.dot_dimension_numbers<[1], [0], [0], [1], [0, 0, 1, 1], [], []>} : vector<384x384xbf16>, vector<384x128xbf16>, vector<384x128xf32> -> vector<384x128xf32>
    %50 = arith.addf %42, %49 : vector<384x128xf32>
    %c55 = arith.constant 55 : index
    %c0_31 = arith.constant 0 : index
    %51 = vector.load %arg9[%c55, %c0_31] : memref<448x128xbf16, #tpu.memory_space<vmem>>, vector<384x128xbf16>
    %c56 = arith.constant 56 : index
    %c0_32 = arith.constant 0 : index
    %52 = vector.load %arg9[%c56, %c0_32] : memref<448x128xbf16, #tpu.memory_space<vmem>>, vector<384x128xbf16>
    %c57 = arith.constant 57 : index
    %c0_33 = arith.constant 0 : index
    %53 = vector.load %arg9[%c57, %c0_33] : memref<448x128xbf16, #tpu.memory_space<vmem>>, vector<384x128xbf16>
    %54 = tpu.concatenate %51, %52, %53 in 1 : vector<384x128xbf16>, vector<384x128xbf16>, vector<384x128xbf16> -> vector<384x384xbf16>
    %c2 = arith.constant 2 : index
    %c0_34 = arith.constant 0 : index
    %c0_35 = arith.constant 0 : index
    %55 = vector.load %arg4[%c2, %c0_34, %c0_35] : memref<3x384x128xbf16, #tpu.memory_space<vmem>>, vector<1x384x128xbf16>
    %56 = vector.shape_cast %55 : vector<1x384x128xbf16> to vector<384x128xbf16>
    %cst_36 = arith.constant dense<0.000000e+00> : vector<384x128xf32>
    %57 = tpu.matmul %54, %56, %cst_36 {dimension_numbers = #tpu.dot_dimension_numbers<[1], [0], [0], [1], [0, 0, 1, 1], [], []>} : vector<384x384xbf16>, vector<384x128xbf16>, vector<384x128xf32> -> vector<384x128xf32>
    %58 = arith.addf %50, %57 : vector<384x128xf32>
    %c0_37 = arith.constant 0 : index
    %c0_38 = arith.constant 0 : index
    %59 = vector.load %arg5[%c0_37, %c0_38] : memref<1x128xf32, #tpu.memory_space<vmem>>, vector<1x128xf32>
    %60 = vector.broadcast %59 : vector<1x128xf32> to vector<384x128xf32>
    %61 = arith.addf %58, %60 : vector<384x128xf32>
    %cst_39 = arith.constant 0.000000e+00 : f32
    %62 = vector.broadcast %cst_39 : f32 to vector<384x128xf32>
    %63 = arith.maximumf %61, %62 : vector<384x128xf32>
    %64 = arith.truncf %63 : vector<384x128xf32> to vector<384x128xbf16>
    %c0_40 = arith.constant 0 : index
    %c0_41 = arith.constant 0 : index
    %65 = vector.load %arg6[%c0_40, %c0_41] : memref<128x128xbf16, #tpu.memory_space<vmem>>, vector<128x128xbf16>
    %cst_42 = arith.constant dense<0.000000e+00> : vector<384x128xf32>
    %66 = tpu.matmul %64, %65, %cst_42 {dimension_numbers = #tpu.dot_dimension_numbers<[1], [0], [0], [1], [0, 0, 1, 1], [], []>} : vector<384x128xbf16>, vector<128x128xbf16>, vector<384x128xf32> -> vector<384x128xf32>
    %c0_43 = arith.constant 0 : index
    %c0_44 = arith.constant 0 : index
    %67 = vector.load %arg7[%c0_43, %c0_44] : memref<1x128xf32, #tpu.memory_space<vmem>>, vector<1x128xf32>
    %68 = vector.broadcast %67 : vector<1x128xf32> to vector<384x128xf32>
    %69 = arith.addf %66, %68 : vector<384x128xf32>
    %70 = arith.extf %1 : vector<384x128xbf16> to vector<384x128xf32>
    %71 = arith.addf %69, %70 : vector<384x128xf32>
    %cst_45 = arith.constant 0.000000e+00 : f32
    %72 = vector.broadcast %cst_45 : f32 to vector<384x128xf32>
    %73 = arith.maximumf %71, %72 : vector<384x128xf32>
    %74 = arith.truncf %73 : vector<384x128xf32> to vector<384x128xbf16>
    %c0_46 = arith.constant 0 : index
    %c0_47 = arith.constant 0 : index
    %c0_48 = arith.constant 0 : index
    %75 = vector.load %arg8[%c0_46, %c0_47, %c0_48] : memref<1x384x128xbf16, #tpu.memory_space<vmem>>, vector<1x384x128xbf16>
    %76 = vector.shape_cast %75 : vector<1x384x128xbf16> to vector<384x128xbf16>
    %77 = vector.shape_cast %74 : vector<384x128xbf16> to vector<1x384x128xbf16>
    tpu.vector_store %arg8[%c0_46, %c0_47, %c0_48], %77 {strides = array<i32>} : memref<1x384x128xbf16, #tpu.memory_space<vmem>>, vector<1x384x128xbf16>,
    return
  }
  func.func @transform_0(%arg0: i32) -> (i32, i32, i32) {
    %c0_i32 = arith.constant 0 : i32
    %c0_i32_0 = arith.constant 0 : i32
    %c0_i32_1 = arith.constant 0 : i32
    return %arg0, %c0_i32, %c0_i32_0 : i32, i32, i32
  }
  func.func @transform_1(%arg0: i32) -> (i32, i32) {
    %c0_i32 = arith.constant 0 : i32
    %c0_i32_0 = arith.constant 0 : i32
    %c0_i32_1 = arith.constant 0 : i32
    return %c0_i32, %c0_i32_0 : i32, i32
  }
  func.func @transform_2(%arg0: i32) -> (i32, i32) {
    %c0_i32 = arith.constant 0 : i32
    %c0_i32_0 = arith.constant 0 : i32
    %c0_i32_1 = arith.constant 0 : i32
    return %c0_i32, %c0_i32_0 : i32, i32
  }
  func.func @transform_3(%arg0: i32) -> (i32, i32, i32) {
    %c0_i32 = arith.constant 0 : i32
    %c0_i32_0 = arith.constant 0 : i32
    %c0_i32_1 = arith.constant 0 : i32
    %c0_i32_2 = arith.constant 0 : i32
    return %c0_i32, %c0_i32_0, %c0_i32_1 : i32, i32, i32
  }
  func.func @transform_4(%arg0: i32) -> (i32, i32) {
    %c0_i32 = arith.constant 0 : i32
    %c0_i32_0 = arith.constant 0 : i32
    %c0_i32_1 = arith.constant 0 : i32
    return %c0_i32, %c0_i32_0 : i32, i32
  }
  func.func @transform_5(%arg0: i32) -> (i32, i32) {
    %c0_i32 = arith.constant 0 : i32
    %c0_i32_0 = arith.constant 0 : i32
    %c0_i32_1 = arith.constant 0 : i32
    return %c0_i32, %c0_i32_0 : i32, i32
  }
  func.func @transform_6(%arg0: i32) -> (i32, i32) {
    %c0_i32 = arith.constant 0 : i32
    %c0_i32_0 = arith.constant 0 : i32
    %c0_i32_1 = arith.constant 0 : i32
    return %c0_i32, %c0_i32_0 : i32, i32
  }
  func.func @transform_7(%arg0: i32) -> (i32, i32, i32) {
    %c0_i32 = arith.constant 0 : i32
    %c0_i32_0 = arith.constant 0 : i32
    %c0_i32_1 = arith.constant 0 : i32
    return %arg0, %c0_i32, %c0_i32_0 : i32, i32, i32
  }
}

</mosaic_0001>

<bundles_post_ra>
// kernel: bottleneck_forward.1
= control target key start
LH: loop header
LB: loop body
LE: loop exit
PB: predicated region body
PF: predicated region fallthrough
CT: control target
= control target key end

     0   :  { %s7821_s24 = smov 0   ;;  %s12156_s0 = inlined_call_operand.vmem [shape: bf16[2,384,128], index: 0, kind: input, shape index: {}]   ;;  %s12157_s1 = inlined_call_operand.vmem [shape: bf16[128,128], index: 1, kind: input, shape index: {}]   ;;  %s12158_s2 = inlined_call_operand.vmem [shape: f32[1,128], index: 2, kind: input, shape index: {}]   ;;  %s12159_s3 = inlined_call_operand.vmem [shape: bf16[3,384,128], index: 3, kind: input, shape index: {}]   ;;  %s12160_s4 = inlined_call_operand.vmem [shape: f32[1,128], index: 4, kind: input, shape index: {}]   ;;  %s12161_s5 = inlined_call_operand.vmem [shape: bf16[128,128], index: 5, kind: input, shape index: {}]   ;;  %s12162_s6 = inlined_call_operand.vmem [shape: f32[1,128], index: 6, kind: input, shape index: {}]   ;;  %s12163_s7 = inlined_call_operand.vmem [shape: bf16[2,384,128], index: 7, kind: output, shape index: {}]  }
   0x1 LB: > { %s6542_s25 = sadd.s32 4294967295, %s7778_s24   ;;  %p6546_p0 = scmp.ge.s32.totalorder %s7778_s24, 1  ;;  %s7778_s24 = sphi %s7821_s24, %s17_s24  }
   0x2   : > { %p237_p1 = scmp.lt.s32.totalorder %s7778_s24, 3 }
   0x4   : > { %p238_p2 = pnand %p6546_p0, %p237_p1 }
   0x6   : > { %241 = sbr.rel (%p238_p2) target bundleno = 1253 (0x4e5), region = 48 }
   0xd   : > { %v7603_v0 = vld [vmem:[%s12157_s1] sm:$0xff]   ;;  %p269_p3 = scmp.lt.s32.totalorder %s6542_s25, 1  ;;  %v7604_v1 = vld [vmem:[%s12157_s1 + $0x8] sm:$0xff]   ;;  %v7780_v2 = vmov 0   ;;  %v7605_v3 = vld [vmem:[%s12157_s1 + $0x10] sm:$0xff]   ;;  %v328_v52 = vlaneseq }
   0xe   : > { %7161 = vmatprep.subr.bf16.mxu0 %v7603_v0  ;;  %7481 = vmatprep.subr.bf16.mxu1 %v7603_v0  ;;  %1441 = vst [vmem:[#allocation2] sm:$0xff] %v7780_v2  ;;  %1442 = vst [vmem:[#allocation2 + $0x8] sm:$0xff] %v7780_v2  ;;  %v7606_v4 = vld [vmem:[%s12157_s1 + $0x18] sm:$0xff]   ;;  %v7607_v7 = vld [vmem:[%s12157_s1 + $0x20] sm:$0xff]   ;;  %vm12186_vm4 = vsmask.f32 7424 }
   0xf   : > { %s13067_s25 = smov (!%p269_p3, %s6542_s25), 1  ;;  %1443 = vst [vmem:[#allocation2 + $0xd0] sm:$0xff] %v7780_v2  ;;  %1444 = vst [vmem:[#allocation2 + $0xd8] sm:$0xff] %v7780_v2  ;;  %7162 = vmatpush3.bf16.msra.mxu0 %v7603_v0  ;;  %7489 = vmatpush3.bf16.msra.mxu1 %v7603_v0  ;;  %v7608_v8 = vld [vmem:[%s12157_s1 + $0x28] sm:$0xff]   ;;  %v7609_v9 = vld [vmem:[%s12157_s1 + $0x30] sm:$0xff]   ;;  %v7972_v56 = vshrl.u32 %v328_v52, 7 }
  0x10   : > { %7163 = vmatprep.subr.bf16.mxu0 %v7604_v1  ;;  %s7497_s9 = smul.u32 192, %s13067_s25  ;;  %7482 = vmatprep.subr.bf16.mxu1 %v7604_v1  ;;  %v7610_v10 = vld [vmem:[%s12157_s1 + $0x38] sm:$0xff]   ;;  %v7635_v15 = vld [vmem:[%s12159_s3 + $0xc0] sm:$0xff]   ;;  %v7636_v19 = vld [vmem:[%s12159_s3 + $0xc8] sm:$0xff]  }
  0x11   : > { %v7637_v21 = vld [vmem:[%s12159_s3 + $0xd0] sm:$0xff]   ;;  %v7638_v25 = vld [vmem:[%s12159_s3 + $0xd8] sm:$0xff]   ;;  %v7639_v27 = vld [vmem:[%s12159_s3 + $0xe0] sm:$0xff]   ;;  %v7979_v58 = vadd.s32 16, %v7972_v56  ;;  %v7986_v61 = vadd.s32 24, %v7972_v56  ;;  %v377_v62 = vcvt.s32.f32 %v7972_v56  ;;  %v7991_v63 = vadd.s32 8, %v7972_v56 }
  0x12   : > { %s7850_s12 = scalar_lea.vmem %s12156_s0, %s7497_s9  ;;  %v7640_v30 = vld [vmem:[%s12159_s3 + $0xe8] sm:$0xff]   ;;  %v7641_v32 = vld [vmem:[%s12159_s3 + $0xf0] sm:$0xff]   ;;  %v7642_v34 = vld [vmem:[%s12159_s3 + $0xf8] sm:$0xff]   ;;  %s12061_s26 = scalar_lea.vmem %s12163_s7, %s7497_s9 }
  0x13   : > { %7164 = vmatpush3.bf16.msra.mxu0 %v7604_v1  ;;  %7490 = vmatpush3.bf16.msra.mxu1 %v7604_v1  ;;  %v280_v5 = vld [vmem:[%s7850_s12] sm:$0xff]   ;;  %v282_v11 = vld [vmem:[%s7850_s12 + $0x8] sm:$0xff]   ;;  %v284_v12 = vld [vmem:[%s7850_s12 + $0x10] sm:$0xff]   ;;  %v379_v60 = vcvt.s32.f32 %v7979_v58  ;;  %v7994_v1 = vadd.s32 48, %v7972_v56 }
  0x14   : > { %7165 = vmatprep.subr.bf16.mxu0 %v7605_v3  ;;  %7483 = vmatprep.subr.bf16.mxu1 %v7605_v3  ;;  %v296_v6 = vld [vmem:[%s7850_s12 + $0x40] sm:$0xff]   ;;  %v298_v13 = vld [vmem:[%s7850_s12 + $0x48] sm:$0xff]   ;;  %v300_v14 = vld [vmem:[%s7850_s12 + $0x50] sm:$0xff]  }
  0x15   : > { %7177 = vmatprep.mubr.bf16.mxu0 %v280_v5  ;;  %7193 = vmatprep.mubr.bf16.mxu1 %v296_v6  ;;  %v286_v16 = vld [vmem:[%s7850_s12 + $0x18] sm:$0xff]   ;;  %v288_v17 = vld [vmem:[%s7850_s12 + $0x20] sm:$0xff]   ;;  %v290_v22 = vld [vmem:[%s7850_s12 + $0x28] sm:$0xff]   ;;  %v427_v0 = vadd.f32 0.5, %v379_v60  ;;  %v425_v5 = vadd.f32 0.5, %v377_v62  ;;  %v8001_v6 = vadd.s32 56, %v7972_v56 }
  0x16   : > { %v302_v18 = vld [vmem:[%s7850_s12 + $0x58] sm:$0xff]   ;;  %v304_v20 = vld [vmem:[%s7850_s12 + $0x60] sm:$0xff]   ;;  %v292_v23 = vld [vmem:[%s7850_s12 + $0x30] sm:$0xff]  }
  0x17   : > { %7166 = vmatpush3.bf16.msra.mxu0 %v7605_v3  ;;  %7491 = vmatpush3.bf16.msra.mxu1 %v7605_v3  ;;  %v306_v24 = vld [vmem:[%s7850_s12 + $0x68] sm:$0xff]   ;;  %v308_v26 = vld [vmem:[%s7850_s12 + $0x70] sm:$0xff]   ;;  %v294_v28 = vld [vmem:[%s7850_s12 + $0x38] sm:$0xff]   ;;  %v380_v3 = vcvt.s32.f32 %v7986_v61 }
  0x18   : > { %7167 = vmatprep.subr.bf16.mxu0 %v7606_v4  ;;  %7484 = vmatprep.subr.bf16.mxu1 %v7606_v4  ;;  %v310_v29 = vld [vmem:[%s7850_s12 + $0x78] sm:$0xff]   ;;  %v312_v31 = vld [vmem:[%s7850_s12 + $0x80] sm:$0xff]   ;;  %v314_v33 = vld [vmem:[%s7850_s12 + $0x88] sm:$0xff]  }
  0x19   : > { %v316_v35 = vld [vmem:[%s7850_s12 + $0x90] sm:$0xff]   ;;  %v318_v36 = vld [vmem:[%s7850_s12 + $0x98] sm:$0xff]   ;;  %v320_v37 = vld [vmem:[%s7850_s12 + $0xa0] sm:$0xff]  }
  0x1a   : > { %v322_v38 = vld [vmem:[%s7850_s12 + $0xa8] sm:$0xff]   ;;  %v324_v39 = vld [vmem:[%s7850_s12 + $0xb0] sm:$0xff]   ;;  %v326_v40 = vld [vmem:[%s7850_s12 + $0xb8] sm:$0xff]  }
  0x1b   : > { %7168 = vmatpush3.bf16.msra.mxu0 %v7606_v4  ;;  %7492 = vmatpush3.bf16.msra.mxu1 %v7606_v4  ;;  %v7643_v41 = vld [vmem:[%s12159_s3 + $0x100] sm:$0xff]   ;;  %v7645_v43 = vld [vmem:[%s12159_s3 + $0x108] sm:$0xff]   ;;  %v7647_v45 = vld [vmem:[%s12159_s3 + $0x110] sm:$0xff]   ;;  %v7998_v4 = vadd.s32 32, %v7972_v56 }
  0x1c   : > { %7169 = vmatprep.subr.bf16.mxu0 %v7607_v7  ;;  %7485 = vmatprep.subr.bf16.mxu1 %v7607_v7  ;;  %v7644_v42 = vld [vmem:[%s12159_s3 + $0x140] sm:$0xff]   ;;  %v7646_v44 = vld [vmem:[%s12159_s3 + $0x148] sm:$0xff]   ;;  %v7648_v46 = vld [vmem:[%s12159_s3 + $0x150] sm:$0xff]  }
  0x1d   : > { %v7649_v47 = vld [vmem:[%s12159_s3 + $0x118] sm:$0xff]   ;;  %v7651_v49 = vld [vmem:[%s12159_s3 + $0x120] sm:$0xff]   ;;  %v7653_v51 = vld [vmem:[%s12159_s3 + $0x128] sm:$0xff]  }
  0x1e   : > { %v7650_v48 = vld [vmem:[%s12159_s3 + $0x158] sm:$0xff]   ;;  %v7652_v50 = vld [vmem:[%s12159_s3 + $0x160] sm:$0xff]   ;;  %v7654_v53 = vld [vmem:[%s12159_s3 + $0x168] sm:$0xff]  }
  0x1f   : > { %7170 = vmatpush3.bf16.msra.mxu0 %v7607_v7  ;;  %7493 = vmatpush3.bf16.msra.mxu1 %v7607_v7  ;;  %v7655_v54 = vld [vmem:[%s12159_s3 + $0x130] sm:$0xff]   ;;  %v7657_v57 = vld [vmem:[%s12159_s3 + $0x138] sm:$0xff]   ;;  %v8004_v7 = vadd.s32 40, %v7972_v56 }
  0x20   : > { %7171 = vmatprep.subr.bf16.mxu0 %v7608_v8  ;;  %7486 = vmatprep.subr.bf16.mxu1 %v7608_v8  ;;  %v7656_v55 = vld [vmem:[%s12159_s3 + $0x170] sm:$0xff]   ;;  %v7658_v59 = vld [vmem:[%s12159_s3 + $0x178] sm:$0xff]  }
  0x23   : > { %7172 = vmatpush3.bf16.msra.mxu0 %v7608_v8  ;;  %7494 = vmatpush3.bf16.msra.mxu1 %v7608_v8  ;;  %v8008_v8 = vadd.s32 80, %v7972_v56 }
  0x24   : > { %7173 = vmatprep.subr.bf16.mxu0 %v7609_v9  ;;  %7487 = vmatprep.subr.bf16.mxu1 %v7609_v9 }
  0x27   : > { %7174 = vmatpush3.bf16.msra.mxu0 %v7609_v9  ;;  %7495 = vmatpush3.bf16.msra.mxu1 %v7609_v9  ;;  %v8011_v9 = vadd.s32 64, %v7972_v56 }
  0x28   : > { %7175 = vmatprep.subr.bf16.mxu0 %v7610_v10  ;;  %7488 = vmatprep.subr.bf16.mxu1 %v7610_v10 }
  0x2b   : > { %7176 = vmatpush3.bf16.msra.mxu0 %v7610_v10  ;;  %7496 = vmatpush3.bf16.msra.mxu1 %v7610_v10  ;;  %v7659_v10 = vld [vmem:[%s12159_s3 + $0x80] sm:$0xff]  }
  0x2c   : > { %2606 = vmatprep.subr.bf16.mxu1 %v7780_v2  ;;  %7225 = vmatprep.subr.bf16.mxu0 %v7644_v42 }
  0x2e   : > { %7178 = vmatmul.mubr.bf16.vlgmr.msra.gmra.mrb[0].mxu0 %v282_v11  ;;  %7194 = vmatmul.mubr.bf16.vlgmr.msra.gmra.mrb[0].mxu1 %v298_v13  ;;  %v475_v11 = vmul.f32 0.041666668, %v427_v0  ;;  %v8018_v13 = vadd.s32 88, %v7972_v56 }
  0x2f   : > { %7181 = vmatprep.mubr.bf16.mxu0 %v284_v12  ;;  %7197 = vmatprep.mubr.bf16.mxu1 %v300_v14  ;;  %v383_v12 = vcvt.s32.f32 %v7994_v1  ;;  %v8021_v14 = vadd.s32 72, %v7972_v56 }
  0x30   : > { %2607 = vmatpush1.bf16.msra.mxu1 %v7635_v15  ;;  %7226 = vmatpush3.bf16.msra.mxu0 %v7644_v42  ;;  %v428_v15 = vadd.f32 0.5, %v380_v3 }
  0x31   : > { %2608 = vmatprep.subr.bf16.mxu1 %v7780_v2  ;;  %7227 = vmatprep.subr.bf16.mxu0 %v7646_v44 }
  0x34   : > { %2609 = vmatpush1.bf16.msra.mxu1 %v7636_v19  ;;  %7228 = vmatpush3.bf16.msra.mxu0 %v7646_v44  ;;  %v473_v19 = vmul.f32 0.041666668, %v425_v5 }
  0x35   : > { %2610 = vmatprep.subr.bf16.mxu1 %v7780_v2  ;;  %7229 = vmatprep.subr.bf16.mxu0 %v7648_v46 }
  0x36   : > { %7182 = vmatmul.mubr.bf16.gmra.mrb[4].mxu0 %v286_v16  ;;  %7198 = vmatmul.mubr.bf16.gmra.mrb[4].mxu1 %v302_v18  ;;  %v381_v16 = vcvt.s32.f32 %v7998_v4  ;;  %v8028_v18 = vadd.s32 96, %v7972_v56 }
  0x37   : > { %7185 = vmatprep.mubr.bf16.mxu0 %v288_v17  ;;  %7201 = vmatprep.mubr.bf16.mxu1 %v304_v20  ;;  %v8025_v17 = vadd.s32 112, %v7972_v56  ;;  %v384_v20 = vcvt.s32.f32 %v8001_v6 }
  0x38   : > { %2611 = vmatpush1.bf16.msra.mxu1 %v7637_v21  ;;  %7230 = vmatpush3.bf16.msra.mxu0 %v7648_v46  ;;  %v382_v21 = vcvt.s32.f32 %v8004_v7 }
  0x39   : > { %2612 = vmatprep.subr.bf16.mxu1 %v7780_v2  ;;  %7231 = vmatprep.subr.bf16.mxu0 %v7650_v48 }
  0x3c   : > { %2613 = vmatpush1.bf16.msra.mxu1 %v7638_v25  ;;  %7232 = vmatpush3.bf16.msra.mxu0 %v7650_v48  ;;  %v8035_v25 = vadd.s32 120, %v7972_v56 }
  0x3d   : > { %2614 = vmatprep.subr.bf16.mxu1 %v7780_v2  ;;  %7233 = vmatprep.subr.bf16.mxu0 %v7652_v50 }
  0x3e   : > { %7186 = vmatmul.mubr.bf16.gmra.mrb[8].mxu0 %v290_v22  ;;  %7202 = vmatmul.mubr.bf16.gmra.mrb[8].mxu1 %v306_v24  ;;  %v385_v24 = vcvt.s32.f32 %v8011_v9 }
  0x3f   : > { %7189 = vmatprep.mubr.bf16.mxu0 %v292_v23  ;;  %7205 = vmatprep.mubr.bf16.mxu1 %v308_v26  ;;  %v387_v23 = vcvt.s32.f32 %v8008_v8  ;;  %v7502_v26 = vtrunc.f32 %v475_v11 }
  0x40   : > { %2615 = vmatpush1.bf16.msra.mxu1 %v7639_v27  ;;  %7234 = vmatpush3.bf16.msra.mxu0 %v7652_v50  ;;  %v431_v27 = vadd.f32 0.5, %v383_v12 }
  0x41   : > { %2616 = vmatprep.subr.bf16.mxu1 %v7780_v2  ;;  %7235 = vmatprep.subr.bf16.mxu0 %v7654_v53  ;;  %v7503_v42 = vcvt.f32.s32 %v7502_v26 }
  0x43   : > { %v571_v60 = vmul.u32 24, %v7503_v42 }
  0x44   : > { %2617 = vmatpush1.bf16.msra.mxu1 %v7640_v30  ;;  %7236 = vmatpush3.bf16.msra.mxu0 %v7654_v53  ;;  %v476_v30 = vmul.f32 0.041666668, %v428_v15 }
  0x45   : > { %2618 = vmatprep.subr.bf16.mxu1 %v7780_v2  ;;  %7237 = vmatprep.subr.bf16.mxu0 %v7656_v55 }
  0x46   : > { %7190 = vmatmul.mubr.bf16.gmra.mrb[12].mxu0 %v294_v28  ;;  %7206 = vmatmul.mubr.bf16.gmra.mrb[12].mxu1 %v310_v29  ;;  %v388_v28 = vcvt.s32.f32 %v8018_v13  ;;  %v386_v29 = vcvt.s32.f32 %v8021_v14  ;;  %v7504_v46 = vtrunc.f32 %v476_v30 }
  0x47   : > { %7209 = vmatprep.mubr.bf16.mxu1 %v312_v31  ;;  %v429_v31 = vadd.f32 0.5, %v381_v16 }
  0x48   : > { %2619 = vmatpush1.bf16.msra.mxu1 %v7641_v32  ;;  %7238 = vmatpush3.bf16.msra.mxu0 %v7656_v55  ;;  %v391_v32 = vcvt.s32.f32 %v8025_v17  ;;  %v436_v44 = vadd.f32 0.5, %v388_v28  ;;  %v7505_v5 = vcvt.f32.s32 %v7504_v46 }
  0x49   : > { %2620 = vmatprep.subr.bf16.mxu1 %v7780_v2  ;;  %7239 = vmatprep.subr.bf16.mxu0 %v7658_v59 }
  0x4a   : > { %v439_v48 = vadd.f32 0.5, %v391_v32  ;;  %v484_v0 = vmul.f32 0.041666668, %v436_v44  ;;  %v8053_v44 = vadd.s32 144, %v7972_v56 }
  0x4c   : > { %2621 = vmatpush1.bf16.msra.mxu1 %v7642_v34  ;;  %7240 = vmatpush3.bf16.msra.mxu0 %v7658_v59  ;;  %v7498_v34 = vtrunc.f32 %v473_v19 }
  0x4d   : > { %2622 = vmatprep.subr.bf16.mxu1 %v7780_v2  ;;  %3615 = vmatprep.subr.bf16.mxu0 %v7780_v2 }
  0x4e   : > { %7210 = vmatmul.mubr.bf16.gmra.mrb[16].mxu1 %v314_v33  ;;  %v389_v33 = vcvt.s32.f32 %v8028_v18  ;;  %v7499_v50 = vcvt.f32.s32 %v7498_v34 }
  0x4f   : > { %7213 = vmatprep.mubr.bf16.mxu1 %v316_v35  ;;  %v432_v35 = vadd.f32 0.5, %v384_v20 }
  0x50   : > { %2623 = vmatpush1.bf16.msra.mxu1 %v7643_v41  ;;  %v392_v41 = vcvt.s32.f32 %v8035_v25  ;;  %v569_v12 = vmul.u32 24, %v7499_v50 }
  0x51   : > { %2624 = vmatprep.subr.bf16.mxu1 %v7780_v2 }
  0x52   : > { %v440_v59 = vadd.f32 0.5, %v392_v41 }
  0x54   : > { %2625 = vmatpush1.bf16.msra.mxu1 %v7645_v43  ;;  %v479_v43 = vmul.f32 0.041666668, %v431_v27  ;;  %v7520_v27 = vtrunc.f32 %v484_v0  ;;  %v395_v0 = vcvt.s32.f32 %v8053_v44 }
  0x55   : > { %2626 = vmatprep.subr.bf16.mxu1 %v7780_v2 }
  0x56   : > { %7214 = vmatmul.mubr.bf16.gmra.mrb[20].mxu1 %v318_v36  ;;  %v430_v36 = vadd.f32 0.5, %v382_v21  ;;  %v7510_v62 = vtrunc.f32 %v479_v43 }
  0x57   : > { %7217 = vmatprep.mubr.bf16.mxu1 %v320_v37  ;;  %v8042_v37 = vadd.s32 104, %v7972_v56 }
  0x58   : > { %2627 = vmatpush1.bf16.msra.mxu1 %v7647_v45  ;;  %v434_v45 = vadd.f32 0.5, %v386_v29  ;;  %v478_v52 = vmul.f32 0.041666668, %v430_v36  ;;  %v7511_v26 = vcvt.f32.s32 %v7510_v62  ;;  %v572_v29 = vmul.u32 24, %v7505_v5 }
  0x59   : > { %2628 = vmatprep.subr.bf16.mxu1 %v7780_v2  ;;  %v390_v53 = vcvt.s32.f32 %v8042_v37 }
  0x5a   : > { %v482_v3 = vmul.f32 0.041666668, %v434_v45  ;;  %v7508_v16 = vtrunc.f32 %v478_v52  ;;  %v575_v42 = vmul.u32 24, %v7511_v26 }
  0x5b   : > { %v438_v19 = vadd.f32 0.5, %v390_v53 }
  0x5c   : > { %2629 = vmatpush1.bf16.msra.mxu1 %v7649_v47  ;;  %v477_v47 = vmul.f32 0.041666668, %v429_v31  ;;  %v7516_v28 = vtrunc.f32 %v482_v3  ;;  %v1843_v3 = vld [vmem:[#allocation2 + $0x8] sm:$0x80] }
  0x5d   : > { %2630 = vmatprep.subr.bf16.mxu1 %v7780_v2  ;;  %v486_v36 = vmul.f32 0.041666668, %v438_v19  ;;  %v1923_v19 = vshrl.u32 %v1843_v3, 16 }
  0x5e   : > { %7218 = vmatmul.mubr.bf16.gmra.mrb[24].mxu1 %v322_v38  ;;  %v7517_v43 = vcvt.f32.s32 %v7516_v28 }
  0x5f   : > { %7221 = vmatprep.mubr.bf16.mxu1 %v324_v39  ;;  %v435_v39 = vadd.f32 0.5, %v387_v23  ;;  %v488_v23 = vmul.f32 0.041666668, %v440_v59  ;;  %v7524_v52 = vtrunc.f32 %v486_v36  ;;  %v8065_v59 = vsub.s32 %v7994_v1, %v575_v42 }
  0x60   : > { %2631 = vmatpush1.bf16.msra.mxu1 %v7651_v49  ;;  %v437_v49 = vadd.f32 0.5, %v389_v33  ;;  %v8050_v33 = vsub.s32 %v7972_v56, %v569_v12  ;;  %v578_v62 = vmul.u32 24, %v7517_v43  ;;  %v8079_v12 = vadd.s32 152, %v7972_v56 }
  0x61   : > { %2632 = vmatprep.subr.bf16.mxu1 %v7780_v2  ;;  %v483_v55 = vmul.f32 0.041666668, %v435_v39  ;;  %v7528_v41 = vtrunc.f32 %v488_v23  ;;  %v7525_v1 = vcvt.f32.s32 %v7524_v52  ;;  %v8103_v23 = vadd.s32 176, %v7972_v56 }
  0x62   : > { %v485_v11 = vmul.f32 0.041666668, %v437_v49  ;;  %v8059_v49 = vsub.s32 %v7986_v61, %v572_v29  ;;  %v8121_v29 = vadd.s32 208, %v7972_v56  ;;  %v8132_v36 = vadd.s32 200, %v7972_v56 }
  0x63   : > { %v7518_v21 = vtrunc.f32 %v483_v55  ;;  %v582_v26 = vmul.u32 24, %v7525_v1  ;;  %v8140_v42 = vadd.s32 224, %v7972_v56  ;;  %v8157_v1 = vadd.s32 232, %v7972_v56 }
  0x64   : > { %2633 = vmatpush1.bf16.msra.mxu1 %v7653_v51  ;;  %v480_v51 = vmul.f32 0.041666668, %v432_v35  ;;  %v7522_v32 = vtrunc.f32 %v485_v11  ;;  %v7509_v35 = vcvt.f32.s32 %v7508_v16  ;;  %vm665_vm2 = vcmp.ge.s32.totalorder %v8050_v33, 1 }
  0x65   : > { %2634 = vmatprep.subr.bf16.mxu1 %v7780_v2  ;;  %v7519_v39 = vcvt.f32.s32 %v7518_v21  ;;  %v8094_v21 = vadd.s32 136, %v7972_v56  ;;  %v405_v3 = vcvt.s32.f32 %v8140_v42  ;;  %vm713_vm3 = vcmp.le.s32.totalorder %v8050_v33, 16 }
  0x66   : > { %7222 = vmatmul.mubr.bf16.gmra.mrb[28].mxu1 %v326_v40  ;;  %v433_v40 = vadd.f32 0.5, %v385_v24  ;;  %v7512_v15 = vtrunc.f32 %v480_v51  ;;  %v8047_v24 = vsub.s32 %v7979_v58, %v571_v60  ;;  %v7521_v58 = vcvt.f32.s32 %v7520_v27 }
  0x67   : > { %v574_v51 = vmul.u32 24, %v7509_v35  ;;  %v8110_v27 = vadd.s32 184, %v7972_v56  ;;  %vm668_vm5 = vcmp.ge.s32.totalorder %v8059_v49, 1  ;;  %vm716_vm6 = vcmp.le.s32.totalorder %v8059_v49, 16 }
  0x68   : > { %2635 = vmatpush1.bf16.msra.mxu1 %v7655_v54  ;;  %v7513_v34 = vcvt.f32.s32 %v7512_v15  ;;  %v580_v60 = vmul.u32 24, %v7521_v58  ;;  %v8143_v58 = vsub.s32 %v8042_v37, %v582_v26  ;;  %vm667_vm0 = vcmp.ge.s32.totalorder %v8047_v24, 1 }
  0x69   : > { %2636 = vmatprep.subr.bf16.mxu1 %v7780_v2  ;;  %v378_v2 = vcvt.s32.f32 %v7991_v63  ;;  %v8076_v11 = vsub.s32 %v8004_v7, %v574_v51  ;;  %v443_v7 = vadd.f32 0.5, %v395_v0  ;;  %vm715_vm1 = vcmp.le.s32.totalorder %v8047_v24, 16 }
  0x6a   : > { %v576_v50 = vmul.u32 24, %v7513_v34  ;;  %v8128_v34 = vadd.s32 216, %v7972_v56  ;;  %12386 = vst [vmem:[#allocation11_spill] sm:$0xff] %v8143_v58  ;;  %vm8326_vm15 = vmand %vm667_vm0, %vm715_vm1  ;;  %vm719_vm13 = vcmp.le.s32.totalorder %v8065_v59, 16 }
  0x6b   : > { %v426_v22 = vadd.f32 0.5, %v378_v2  ;;  %v7506_v2 = vtrunc.f32 %v477_v47  ;;  %v7523_v47 = vcvt.f32.s32 %v7522_v32  ;;  %v8125_v32 = vadd.s32 192, %v7972_v56  ;;  %vm8345_vm0 = vmand %vm665_vm2, %vm713_vm3 }
  0x6c   : > { %2637 = vmatpush1.bf16.msra.mxu1 %v7657_v57  ;;  %v481_v57 = vmul.f32 0.041666668, %v433_v40  ;;  %v404_v52 = vcvt.s32.f32 %v8128_v34  ;;  %vm8368_vm2 = vmand %vm668_vm5, %vm716_vm6 }
  0x6d   : > { %7289 = vmatprep.subr.bf16.mxu1 %v7659_v10  ;;  %v474_v38 = vmul.f32 0.041666668, %v426_v22  ;;  %v487_v10 = vmul.f32 0.041666668, %v439_v48  ;;  %v7507_v30 = vcvt.f32.s32 %v7506_v2  ;;  %v8056_v48 = vadd.s32 128, %v7972_v56 }
  0x6e   : > { %v7514_v22 = vtrunc.f32 %v481_v57  ;;  %v7529_v57 = vcvt.f32.s32 %v7528_v41  ;;  %v581_v2 = vmul.u32 24, %v7523_v47  ;;  %v400_v41 = vcvt.s32.f32 %v8110_v27 }
  0x6f   : > { %v7500_v54 = vtrunc.f32 %v474_v38  ;;  %v7526_v31 = vtrunc.f32 %v487_v10  ;;  %v573_v45 = vmul.u32 24, %v7507_v30  ;;  %v393_v10 = vcvt.s32.f32 %v8056_v48 }
  0x70   : > { %v7515_v40 = vcvt.f32.s32 %v7514_v22  ;;  %v584_v16 = vmul.u32 24, %v7529_v57  ;;  %v491_v30 = vmul.f32 0.041666668, %v443_v7  ;;  %v401_v51 = vcvt.s32.f32 %v8125_v32 }
  0x71   : > { %v7501_v20 = vcvt.f32.s32 %v7500_v54  ;;  %v7527_v46 = vcvt.f32.s32 %v7526_v31  ;;  %v579_v54 = vmul.u32 24, %v7519_v39  ;;  %v8069_v61 = vsub.s32 %v7998_v4, %v573_v45 }
  0x72   : > { %v577_v55 = vmul.u32 24, %v7515_v40  ;;  %v8113_v28 = vsub.s32 %v8035_v25, %v584_v16  ;;  %v394_v31 = vcvt.s32.f32 %v8094_v21  ;;  %v399_v25 = vcvt.s32.f32 %v8103_v23 }
  0x73   : > { %v570_v38 = vmul.u32 24, %v7501_v20  ;;  %v583_v5 = vmul.u32 24, %v7527_v46  ;;  %v8082_v15 = vsub.s32 %v8008_v8, %v579_v54  ;;  %v8088_v20 = vsub.s32 %v8018_v13, %v580_v60 }
  0x74   : > { %v8085_v4 = vsub.s32 %v8011_v9, %v577_v55  ;;  %v8100_v8 = vsub.s32 %v8028_v18, %v581_v2  ;;  %v441_v9 = vadd.f32 0.5, %v393_v10  ;;  %v396_v13 = vcvt.s32.f32 %v8079_v12  ;;  %12384 = vst [vmem:[#allocation9_spill] sm:$0xff] %v8113_v28 }
  0x75   : > { %v8062_v53 = vsub.s32 %v7991_v63, %v570_v38  ;;  %v8073_v63 = vsub.s32 %v8001_v6, %v576_v50  ;;  %12378 = vst [vmem:[#allocation3_spill] sm:$0xff] %v8082_v15  ;;  %12380 = vst [vmem:[#allocation5_spill] sm:$0xff] %v8088_v20  ;;  %v8091_v6 = vsub.s32 %v8021_v14, %v578_v62  ;;  %v8107_v14 = vadd.s32 160, %v7972_v56 }
  0x76   : > { %12379 = vst [vmem:[#allocation4_spill] sm:$0xff] %v8085_v4  ;;  %v8097_v22 = vsub.s32 %v8025_v17, %v583_v5  ;;  %12383 = vst [vmem:[#allocation8_spill] sm:$0xff] %v8100_v8  ;;  %v8115_v17 = vrot.slane %v1923_v19, 7  ;;  %v8118_v18 = vadd.s32 168, %v7972_v56  ;;  %v489_v35 = vmul.f32 0.041666668, %v441_v9 }
  0x77   : > { %12381 = vst [vmem:[#allocation6_spill] sm:$0xff] %v8091_v6  ;;  %v8135_v38 = vadd.s32 240, %v7972_v56  ;;  %v444_v39 = vadd.f32 0.5, %v396_v13  ;;  %v397_v40 = vcvt.s32.f32 %v8107_v14  ;;  %v403_v45 = vcvt.s32.f32 %v8121_v29 }
  0x78   : > { %12382 = vst [vmem:[#allocation7_spill] sm:$0xff] %v8097_v22  ;;  %12385 = vst [vmem:[#allocation10_spill] sm:$0xff] %v8115_v17  ;;  %v398_v43 = vcvt.s32.f32 %v8118_v18  ;;  %v8148_v46 = vadd.s32 248, %v7972_v56  ;;  %v7534_v47 = vtrunc.f32 %v491_v30  ;;  %v442_v50 = vadd.f32 0.5, %v394_v31 }
  0x79   : > { %v7530_v54 = vtrunc.f32 %v489_v35  ;;  %v447_v55 = vadd.f32 0.5, %v399_v25  ;;  %v402_v57 = vcvt.s32.f32 %v8132_v36  ;;  %v407_v37 = vcvt.s32.f32 %v8135_v38 }
  0x7a   : > { %v492_v60 = vmul.f32 0.041666668, %v444_v39  ;;  %v445_v62 = vadd.f32 0.5, %v397_v40  ;;  %v448_v0 = vadd.f32 0.5, %v400_v41  ;;  %v446_v5 = vadd.f32 0.5, %v398_v43 }
  0x7b   : > { %v451_v2 = vadd.f32 0.5, %v403_v45  ;;  %v408_v10 = vcvt.s32.f32 %v8148_v46  ;;  %v7535_v16 = vcvt.f32.s32 %v7534_v47  ;;  %v490_v19 = vmul.f32 0.041666668, %v442_v50 }
  0x7c   : > { %v449_v7 = vadd.f32 0.5, %v401_v51  ;;  %v452_v9 = vadd.f32 0.5, %v404_v52  ;;  %v7531_v26 = vcvt.f32.s32 %v7530_v54  ;;  %v495_v13 = vmul.f32 0.041666668, %v447_v55 }
  0x7d   : > { %v450_v30 = vadd.f32 0.5, %v402_v57  ;;  %v455_v31 = vadd.f32 0.5, %v407_v37  ;;  %v7536_v35 = vtrunc.f32 %v492_v60  ;;  %v493_v25 = vmul.f32 0.041666668, %v445_v62 }
  0x7e   : > { %v496_v39 = vmul.f32 0.041666668, %v448_v0  ;;  %v453_v40 = vadd.f32 0.5, %v405_v3  ;;  %v494_v41 = vmul.f32 0.041666668, %v446_v5  ;;  %v456_v45 = vadd.f32 0.5, %v408_v10 }
  0x7f   : > { %v499_v43 = vmul.f32 0.041666668, %v451_v2  ;;  %v406_v17 = vcvt.s32.f32 %v8157_v1  ;;  %v587_v58 = vmul.u32 24, %v7535_v16  ;;  %v7532_v28 = vtrunc.f32 %v490_v19 }
  0x80   : > { %v497_v8 = vmul.f32 0.041666668, %v449_v7  ;;  %v500_v47 = vmul.f32 0.041666668, %v452_v9  ;;  %v585_v50 = vmul.u32 24, %v7531_v26  ;;  %v7542_v51 = vtrunc.f32 %v495_v13 }
  0x81   : > { %v498_v52 = vmul.f32 0.041666668, %v450_v30  ;;  %v503_v54 = vmul.f32 0.041666668, %v455_v31  ;;  %v7537_v55 = vcvt.f32.s32 %v7536_v35  ;;  %v7538_v57 = vtrunc.f32 %v493_v25 }
  0x82   : > { %v7544_v37 = vtrunc.f32 %v496_v39  ;;  %v501_v60 = vmul.f32 0.041666668, %v453_v40  ;;  %v7540_v62 = vtrunc.f32 %v494_v41  ;;  %v7550_v0 = vtrunc.f32 %v499_v43 }
  0x83   : > { %v504_v3 = vmul.f32 0.041666668, %v456_v45  ;;  %v454_v5 = vadd.f32 0.5, %v406_v17  ;;  %v8161_v2 = vsub.s32 %v8053_v44, %v587_v58  ;;  %v7533_v10 = vcvt.f32.s32 %v7532_v28 }
  0x84   : > { %v7546_v16 = vtrunc.f32 %v497_v8  ;;  %v7552_v19 = vtrunc.f32 %v500_v47  ;;  %v8164_v7 = vsub.s32 %v8056_v48, %v585_v50  ;;  %v7543_v9 = vcvt.f32.s32 %v7542_v51 }
  0x85   : > { %v7548_v26 = vtrunc.f32 %v498_v52  ;;  %v7558_v13 = vtrunc.f32 %v503_v54  ;;  %v588_v30 = vmul.u32 24, %v7537_v55  ;;  %v7539_v31 = vcvt.f32.s32 %v7538_v57 }
  0x86   : > { %v7545_v35 = vcvt.f32.s32 %v7544_v37  ;;  %v7554_v25 = vtrunc.f32 %v501_v60  ;;  %v7541_v39 = vcvt.f32.s32 %v7540_v62  ;;  %v7551_v40 = vcvt.f32.s32 %v7550_v0 }
  0x87   : > { %v7560_v41 = vtrunc.f32 %v504_v3  ;;  %v502_v17 = vmul.f32 0.041666668, %v454_v5  ;;  %v586_v43 = vmul.u32 24, %v7533_v10  ;;  %v7547_v44 = vcvt.f32.s32 %v7546_v16 }
  0x88   : > { %v7553_v58 = vcvt.f32.s32 %v7552_v19  ;;  %v8167_v8 = vadd.s32 272, %v7972_v56  ;;  %v591_v28 = vmul.u32 24, %v7543_v9  ;;  %v7549_v48 = vcvt.f32.s32 %v7548_v26 }
  0x89   : > { %v7559_v45 = vcvt.f32.s32 %v7558_v13  ;;  %v8170_v47 = vadd.s32 256, %v7972_v56  ;;  %v8173_v50 = vsub.s32 %v8079_v12, %v588_v30  ;;  %v589_v51 = vmul.u32 24, %v7539_v31 }
  0x8a   : > { %v592_v52 = vmul.u32 24, %v7545_v35  ;;  %v7555_v54 = vcvt.f32.s32 %v7554_v25  ;;  %v590_v55 = vmul.u32 24, %v7541_v39  ;;  %v7561_v37 = vcvt.f32.s32 %v7560_v41 }
  0x8b   : > { %v595_v57 = vmul.u32 24, %v7551_v40  ;;  %v7556_v60 = vtrunc.f32 %v502_v17  ;;  %v8176_v62 = vsub.s32 %v8094_v21, %v586_v43  ;;  %v593_v0 = vmul.u32 24, %v7547_v44 }
  0x8c   : > { %v596_v3 = vmul.u32 24, %v7553_v58  ;;  %v411_v5 = vcvt.s32.f32 %v8167_v8  ;;  %v8180_v10 = vsub.s32 %v8103_v23, %v591_v28  ;;  %v594_v16 = vmul.u32 24, %v7549_v48 }
  0x8d   : > { %v599_v12 = vmul.u32 24, %v7559_v45  ;;  %v409_v19 = vcvt.s32.f32 %v8170_v47  ;;  %v8184_v9 = vsub.s32 %v8107_v14, %v589_v51  ;;  %v8187_v26 = vsub.s32 %v8110_v27, %v592_v52  ;;  %v8242_v51 = vld [vmem:[#allocation2] sm:$0xf0] }
  0x8e   : > { %12387 = vst [vmem:[#allocation12_spill] sm:$0xff] %v8180_v10  ;;  %v597_v13 = vmul.u32 24, %v7555_v54  ;;  %v8190_v21 = vadd.s32 280, %v7972_v56  ;;  %v8193_v30 = vsub.s32 %v8118_v18, %v590_v55  ;;  %v8196_v23 = vsub.s32 %v8121_v29, %v595_v57 }
  0x8f   : > { %12388 = vst [vmem:[#allocation13_spill] sm:$0xff] %v8184_v9  ;;  %12389 = vst [vmem:[#allocation14_spill] sm:$0xff] %v8187_v26  ;;  %v600_v31 = vmul.u32 24, %v7561_v37  ;;  %v7557_v35 = vcvt.f32.s32 %v7556_v60  ;;  %v8199_v25 = vsub.s32 %v8125_v32, %v593_v0  ;;  %v8202_v14 = vsub.s32 %v8128_v34, %v596_v3 }
  0x90   : > { %12390 = vst [vmem:[#allocation15_spill] sm:$0xff] %v8193_v30  ;;  %12391 = vst [vmem:[#allocation16_spill] sm:$0xff] %v8196_v23  ;;  %v459_v27 = vadd.f32 0.5, %v411_v5  ;;  %v8205_v39 = vadd.s32 264, %v7972_v56  ;;  %v8208_v40 = vsub.s32 %v8132_v36, %v594_v16  ;;  %v8211_v18 = vsub.s32 %v8135_v38, %v599_v12 }
  0x91   : > { %12392 = vst [vmem:[#allocation17_spill] sm:$0xff] %v8199_v25  ;;  %12393 = vst [vmem:[#allocation18_spill] sm:$0xff] %v8202_v14  ;;  %v457_v29 = vadd.f32 0.5, %v409_v19  ;;  %v8214_v41 = vadd.s32 304, %v7972_v56  ;;  %v8217_v32 = vsub.s32 %v8140_v42, %v597_v13  ;;  %v412_v34 = vcvt.s32.f32 %v8190_v21 }
  0x92   : > { %12394 = vst [vmem:[#allocation19_spill] sm:$0xff] %v8208_v40  ;;  %12395 = vst [vmem:[#allocation20_spill] sm:$0xff] %v8211_v18  ;;  %v8221_v17 = vadd.s32 288, %v7972_v56  ;;  %v8224_v43 = vadd.s32 312, %v7972_v56  ;;  %v8227_v36 = vsub.s32 %v8148_v46, %v600_v31  ;;  %v598_v38 = vmul.u32 24, %v7557_v35  ;;  %v8262_v35 = vld [vmem:[#allocation2] sm:$0xff] }
  0x93   : > { %12396 = vst [vmem:[#allocation21_spill] sm:$0xff] %v8217_v32  ;;  %v8230_v44 = vadd.s32 296, %v7972_v56  ;;  %v8233_v58 = vadd.s32 336, %v7972_v56  ;;  %v507_v42 = vmul.f32 0.041666668, %v459_v27  ;;  %v410_v28 = vcvt.s32.f32 %v8205_v39 }
  0x94   : > { %12397 = vst [vmem:[#allocation22_spill] sm:$0xff] %v8227_v36  ;;  %v8237_v48 = vadd.s32 320, %v7972_v56  ;;  %v8240_v45 = vadd.s32 344, %v7972_v56  ;;  %v505_v46 = vmul.f32 0.041666668, %v457_v29  ;;  %v415_v52 = vcvt.s32.f32 %v8214_v41 }
  0x95   : > { %v8246_v54 = vadd.s32 328, %v7972_v56  ;;  %v8249_v55 = vadd.s32 368, %v7972_v56  ;;  %v460_v57 = vadd.f32 0.5, %v412_v34  ;;  %v413_v37 = vcvt.s32.f32 %v8221_v17 }
  0x96   : > { %v416_v60 = vcvt.s32.f32 %v8224_v43  ;;  %v414_v3 = vcvt.s32.f32 %v8230_v44  ;;  %v419_v5 = vcvt.s32.f32 %v8233_v58  ;;  %v8257_v16 = vadd.s32 352, %v7972_v56 }
  0x97   : > { %v458_v19 = vadd.f32 0.5, %v410_v28  ;;  %v417_v13 = vcvt.s32.f32 %v8237_v48  ;;  %v420_v31 = vcvt.s32.f32 %v8240_v45  ;;  %v463_v29 = vadd.f32 0.5, %v415_v52 }
  0x98   : > { %v418_v34 = vcvt.s32.f32 %v8246_v54  ;;  %v423_v0 = vcvt.s32.f32 %v8249_v55  ;;  %v8268_v36 = vadd.s32 376, %v7972_v56  ;;  %v8271_v32 = vsub.s32 %v8157_v1, %v598_v38 }
  0x99   : > { %v461_v28 = vadd.f32 0.5, %v413_v37  ;;  %v464_v12 = vadd.f32 0.5, %v416_v60  ;;  %v8274_v18 = vadd.s32 360, %v7972_v56  ;;  %v508_v40 = vmul.f32 0.041666668, %v460_v57 }
  0x9a   : > { %12398 = vst [vmem:[#allocation23_spill] sm:$0xff] %v8268_v36  ;;  %12399 = vst [vmem:[#allocation24_spill] sm:$0xff] %v8271_v32  ;;  %v462_v14 = vadd.f32 0.5, %v414_v3  ;;  %v467_v25 = vadd.f32 0.5, %v419_v5  ;;  %v421_v52 = vcvt.s32.f32 %v8257_v16  ;;  %v7566_v27 = vtrunc.f32 %v507_v42 }
  0x9b   : > { %12400 = vst [vmem:[#allocation25_spill] sm:$0xff] %v8274_v18  ;;  %v506_v23 = vmul.f32 0.041666668, %v458_v19  ;;  %v465_v30 = vadd.f32 0.5, %v417_v13  ;;  %v468_v26 = vadd.f32 0.5, %v420_v31  ;;  %v466_v10 = vadd.f32 0.5, %v418_v34 }
  0x9c   : > { %v511_v9 = vmul.f32 0.041666668, %v463_v29  ;;  %v471_v22 = vadd.f32 0.5, %v423_v0  ;;  %v424_v1 = vcvt.s32.f32 %v8268_v36  ;;  %v7562_v38 = vtrunc.f32 %v505_v46 }
  0x9d   : > { %v509_v37 = vmul.f32 0.041666668, %v461_v28  ;;  %v512_v60 = vmul.f32 0.041666668, %v464_v12  ;;  %v422_v56 = vcvt.s32.f32 %v8274_v18  ;;  %v7568_v32 = vtrunc.f32 %v508_v40 }
  0x9e   : > { %v510_v57 = vmul.f32 0.041666668, %v462_v14  ;;  %v515_v3 = vmul.f32 0.041666668, %v467_v25  ;;  %v469_v5 = vadd.f32 0.5, %v421_v52  ;;  %v7567_v6 = vcvt.f32.s32 %v7566_v27 }
  0x9f   : > { %v7564_v20 = vtrunc.f32 %v506_v23  ;;  %v513_v42 = vmul.f32 0.041666668, %v465_v30  ;;  %v516_v19 = vmul.f32 0.041666668, %v468_v26  ;;  %v7574_v13 = vtrunc.f32 %v511_v9 }
  0xa0   : > { %v514_v31 = vmul.f32 0.041666668, %v466_v10  ;;  %v519_v29 = vmul.f32 0.041666668, %v471_v22  ;;  %v472_v34 = vadd.f32 0.5, %v424_v1  ;;  %v7563_v0 = vcvt.f32.s32 %v7562_v38 }
  0xa1   : > { %v7570_v4 = vtrunc.f32 %v509_v37  ;;  %v7576_v15 = vtrunc.f32 %v512_v60  ;;  %v470_v46 = vadd.f32 0.5, %v422_v56  ;;  %v7569_v28 = vcvt.f32.s32 %v7568_v32 }
  0xa2   : > { %v7572_v12 = vtrunc.f32 %v510_v57  ;;  %v7582_v36 = vtrunc.f32 %v515_v3  ;;  %v517_v18 = vmul.f32 0.041666668, %v469_v5  ;;  %v603_v25 = vmul.u32 24, %v7567_v6 }
  0xa3   : > { %v7565_v23 = vcvt.f32.s32 %v7564_v20  ;;  %v7578_v30 = vtrunc.f32 %v513_v42  ;;  %v7584_v26 = vtrunc.f32 %v516_v19  ;;  %v7575_v22 = vcvt.f32.s32 %v7574_v13 }
  0xa4   : > { %v7580_v10 = vtrunc.f32 %v514_v31  ;;  %v7590_v9 = vtrunc.f32 %v519_v29  ;;  %v520_v14 = vmul.f32 0.041666668, %v472_v34  ;;  %v601_v40 = vmul.u32 24, %v7563_v0 }
  0xa5   : > { %v7571_v32 = vcvt.f32.s32 %v7570_v4  ;;  %v7577_v27 = vcvt.f32.s32 %v7576_v15  ;;  %v518_v6 = vmul.f32 0.041666668, %v470_v46  ;;  %vm666_vm7 = vcmp.ge.s32.totalorder %v8062_v53, 1 }
  0xa6   : > { %vm714_vm8 = vcmp.le.s32.totalorder %v8062_v53, 16  ;;  %v604_v20 = vmul.u32 24, %v7569_v28  ;;  %v7573_v52 = vcvt.f32.s32 %v7572_v12  ;;  %v7583_v1 = vcvt.f32.s32 %v7582_v36 }
  0xa7   : > { %v7586_v38 = vtrunc.f32 %v517_v18  ;;  %vm683_vm9 = vcmp.ge.s32.totalorder %v8161_v2, 1  ;;  %vm731_vm10 = vcmp.le.s32.totalorder %v8161_v2, 16  ;;  %v602_v37 = vmul.u32 24, %v7565_v23  ;;  %vm8385_vm5 = vmand %vm666_vm7, %vm714_vm8 }
  0xa8   : > { %v7579_v60 = vcvt.f32.s32 %v7578_v30  ;;  %v7585_v56 = vcvt.f32.s32 %v7584_v26  ;;  %v12401_v57 = vshll.u32 %v8242_v51, 16  ;;  %vm729_vm12 = vcmp.le.s32.totalorder %v8164_v7, 16  ;;  %vm8401_vm7 = vmand %vm683_vm9, %vm731_vm10 }
  0xa9   : > { %v607_v15 = vmul.u32 24, %v7575_v22  ;;  %v7581_v3 = vcvt.f32.s32 %v7580_v10  ;;  %v7591_v5 = vcvt.f32.s32 %v7590_v9  ;;  %v7592_v42 = vtrunc.f32 %v520_v14 }
  0xaa   : > { %v1526_v4 = vrot.slane %v12401_v57, 1  ;;  %vm732_vm14 = vcmp.le.s32.totalorder %v8173_v50, 16  ;;  %v8296_v18 = vsub.s32 %v8167_v8, %v603_v25  ;;  %v605_v36 = vmul.u32 24, %v7571_v32 }
  0xab   : > { %v608_v19 = vmul.u32 24, %v7577_v27  ;;  %v7588_v13 = vtrunc.f32 %v518_v6  ;;  %v8301_v31 = vsub.s32 %v8170_v47, %v601_v40  ;;  %v606_v29 = vmul.u32 24, %v7573_v52  ;;  %v8314_v47 = vld [vmem:[%s12158_s2] ss:$0 sm:$0xff] }
  0xac   : > { %v611_v34 = vmul.u32 24, %v7583_v1  ;;  %v7587_v0 = vcvt.f32.s32 %v7586_v38  ;;  %v8304_v46 = vsub.s32 %v8190_v21, %v604_v20  ;;  %v609_v28 = vmul.u32 24, %v7579_v60 }
  0xad   : > { %v612_v12 = vmul.u32 24, %v7585_v56  ;;  %v12402_v8 = vshrl.u32 %v8242_v51, 16  ;;  %v8309_v23 = vsub.s32 %v8205_v39, %v602_v37  ;;  %v610_v30 = vmul.u32 24, %v7581_v3 }
  0xae   : > { %v615_v26 = vmul.u32 24, %v7591_v5  ;;  %v7593_v22 = vcvt.f32.s32 %v7592_v42  ;;  %v8317_v10 = vsub.s32 %v8214_v41, %v607_v15  ;;  %v7589_v21 = vcvt.f32.s32 %v7588_v13 }
  0xaf   : > { %v1527_v25 = vor.u32 %v1526_v4, %v12402_v8  ;;  %v12403_v9 = vshll.u32 %v8262_v35, 16  ;;  %v12189_v51 = vshrl.u32 %v8262_v35, 16  ;;  %v8333_v41 = vsub.s32 %v8221_v17, %v605_v36 }
  0xb0   : > { %v8336_v40 = vsub.s32 %v8224_v43, %v608_v19  ;;  %v8339_v32 = vsub.s32 %v8230_v44, %v606_v29  ;;  %v613_v27 = vmul.u32 24, %v7587_v0  ;;  %vm717_vm11 = vcmp.le.s32.totalorder %v8069_v61, 16 }
  0xb1   : > { %v1531_v14 = vrot.slane %v12403_v9, 1  ;;  %v8352_v17 = vsub.s32 %v8233_v58, %v611_v34  ;;  %v8355_v43 = vsub.s32 %v8237_v48, %v609_v28  ;;  %v8358_v44 = vsub.s32 %v8240_v45, %v612_v12 }
  0xb2   : > { %vm720_vm1 = vcmp.le.s32.totalorder %v8073_v63, 16  ;;  %v8375_v48 = vsub.s32 %v8246_v54, %v610_v30  ;;  %v8378_v45 = vsub.s32 %v8249_v55, %v615_v26  ;;  %v616_v38 = vmul.u32 24, %v7593_v22 }
  0xb3   : > { %12408 = vst [vmem:[#allocation26_spill] sm:$0xff] %v8352_v17  ;;  %12409 = vst [vmem:[#allocation27_spill] sm:$0xff] %v8355_v43  ;;  %v8361_v20 = vsel %vm12186_vm4, %v1527_v25, %v1531_v14  ;;  %vm718_vm4 = vcmp.le.s32.totalorder %v8076_v11, 16  ;;  %v614_v56 = vmul.u32 24, %v7589_v21  ;;  %v8394_v57 = vor.u32 %v12189_v51, %v1531_v14  ;;  %v12434_v21 = vld [vmem:[#allocation25_spill] sm:$0xff] }
  0xb4   : > { %12410 = vst [vmem:[#allocation28_spill] sm:$0xff] %v8358_v44  ;;  %12411 = vst [vmem:[#allocation29_spill] sm:$0xff] %v8361_v20  ;;  %v8407_v36 = vsub.s32 %v8257_v16, %v613_v27  ;;  %vm12422_vm8 = vcmp.ge.s32.totalorder %v8164_v7, 1  ;;  %vm12425_vm9 = vcmp.ge.s32.totalorder %v8173_v50, 1  ;;  %v12428_v7 = vld [vmem:[#allocation23_spill] sm:$0xff] }
  0xb5   : > { %12414 = vst [vmem:[#allocation30_spill] sm:$0xff] %v8375_v48  ;;  %12415 = vst [vmem:[#allocation31_spill] sm:$0xff] %v8378_v45  ;;  %v8429_v25 = vsub.s32 %v12428_v7, %v616_v38  ;;  %v8442_v9 = vsub.s32 %v12434_v21, %v614_v56  ;;  %v12438_v56 = vld [vmem:[#allocation5_spill] sm:$0xff] }
  0xb6   : > { %12418 = vst [vmem:[#allocation32_spill] sm:$0xff] %v8394_v57  ;;  %12421 = vst [vmem:[#allocation33_spill] sm:$0xff] %v8407_v36 }
  0xb7   : > { %vm8414_vm3 = vmand %vm12422_vm8, %vm729_vm12  ;;  %12429 = vst [vmem:[#allocation23_spill] sm:$0xff] %v8429_v25  ;;  %vm12430_vm12 = vcmp.le.s32.totalorder %v8176_v62, 16  ;;  %vm12431_vm8 = vcmp.ge.s32.totalorder %v8176_v62, 1 }
  0xb8   : > { %vm8423_vm10 = vmand %vm12425_vm9, %vm732_vm14  ;;  %12435 = vst [vmem:[#allocation25_spill] sm:$0xff] %v8442_v9 }
  0xb9   : > { %vm8437_vm6 = vmand %vm12431_vm8, %vm12430_vm12 }
 0x101   : > { %v7179_v6 = vpop.f32.mrb[0].mxu0  ;;  %v7195_v58 = vpop.f32.mrb[0].mxu1 }
 0x102   : > { %v1067_v33 = vadd.f32 %v7179_v6, %v8314_v47  ;;  %v1058_v52 = vpop.f32.mrb[1].mxu0  ;;  %v1131_v54 = vadd.f32 %v7195_v58, %v8314_v47  ;;  %v1122_v55 = vpop.f32.mrb[1].mxu1  ;;  %v12436_v6 = vld [vmem:[#allocation3_spill] sm:$0xff] }
 0x103   : > { %v1059_v37 = vadd.f32 %v8314_v47, %v1058_v52  ;;  %v7180_v60 = vpop.f32.mrb[2].mxu0  ;;  %v1123_v5 = vadd.f32 %v8314_v47, %v1122_v55  ;;  %v7196_v42 = vpop.f32.mrb[2].mxu1  ;;  %vm675_vm14 = vcmp.ge.s32.totalorder %v12436_v6, 1 }
 0x104   : > { %v1251_v4 = vmax.f32 %v1067_v33, 0.0  ;;  %v1070_v53 = vadd.f32 %v7180_v60, %v8314_v47  ;;  %v1061_v15 = vpop.f32.mrb[3].mxu0  ;;  %v1267_v29 = vmax.f32 %v1131_v54, 0.0  ;;  %v1134_v34 = vadd.f32 %v7196_v42, %v8314_v47  ;;  %v1125_v0 = vpop.f32.mrb[3].mxu1 }
 0x105   : > { %v1249_v19 = vmax.f32 %v1059_v37, 0.0  ;;  %v1062_v13 = vadd.f32 %v8314_v47, %v1061_v15  ;;  %v1265_v12 = vmax.f32 %v1123_v5, 0.0  ;;  %v1126_v8 = vadd.f32 %v8314_v47, %v1125_v0  ;;  %v12437_v37 = vld [vmem:[#allocation4_spill] sm:$0xff]  ;;  %v12442_v5 = vld [vmem:[#allocation6_spill] sm:$0xff] }
 0x106   : > { %v1252_v28 = vmax.f32 %v1070_v53, 0.0  ;;  %v1411_v26 = vsel %vm8401_vm7, %v1267_v29, 0.0  ;;  %v1268_v22 = vmax.f32 %v1134_v34, 0.0  ;;  %v1395_v14 = vsel %vm8326_vm15, %v1251_v4, 0.0 }
 0x107   : > { %v1250_v30 = vmax.f32 %v1062_v13, 0.0  ;;  %vm723_vm7 = vcmp.le.s32.totalorder %v12436_v6, 16  ;;  %v1409_v62 = vsel %vm8414_vm3, %v1265_v12, 0.0  ;;  %v1266_v33 = vmax.f32 %v1126_v8, 0.0 }
 0x108   : > { %v1396_v27 = vsel %vm8368_vm2, %v1252_v28, 0.0  ;;  %v1393_v52 = vsel %vm8345_vm0, %v1249_v19, 0.0  ;;  %vm673_vm15 = vcmp.ge.s32.totalorder %v12437_v37, 1  ;;  %vm721_vm2 = vcmp.le.s32.totalorder %v12437_v37, 16 }
 0x109   : > { %v8454_v58 = vpack.c.bf16 %v1396_v27, %v1395_v14  ;;  %v1394_v39 = vsel %vm8385_vm5, %v1250_v30, 0.0  ;;  %v7183_v38 = vpop.f32.mrb[4].mxu0  ;;  %v1412_v1 = vsel %vm8423_vm10, %v1268_v22, 0.0  ;;  %vm676_vm3 = vcmp.ge.s32.totalorder %v12438_v56, 1  ;;  %v8469_v4 = vpop.f32.mrb[4].mxu1 }
 0x10a   : > { %v1445_v60 = vpack.c.bf16 %v1394_v39, %v1393_v52  ;;  %v1083_v54 = vadd.f32 %v7183_v38, %v8314_v47  ;;  %v1074_v55 = vpop.f32.mrb[5].mxu0  ;;  %vm724_vm0 = vcmp.le.s32.totalorder %v12438_v56, 16  ;;  %v8465_v24 = vpack.c.bf16 %v1412_v1, %v1411_v26  ;;  %v12458_v52 = vld [vmem:[#allocation7_spill] sm:$0xff]  ;;  %v12459_v1 = vld [vmem:[#allocation8_spill] sm:$0xff] }
 0x10b   : > { %v1410_v49 = vsel %vm8437_vm6, %v1266_v33, 0.0  ;;  %1470 = vst [vmem:[#allocation2 + $0x18] sm:$0xff] %v8454_v58  ;;  %vm12439_vm5 = vcmp.ge.s32.totalorder %v8065_v59, 1  ;;  %v1075_v15 = vadd.f32 %v8314_v47, %v1074_v55  ;;  %v7184_v3 = vpop.f32.mrb[6].mxu0  ;;  %vm722_vm12 = vcmp.le.s32.totalorder %v12442_v5, 16  ;;  %v8489_v59 = vpop.f32.mrb[5].mxu1 }
 0x10c   : > { %vm8476_vm9 = vmand %vm12439_vm5, %vm719_vm13  ;;  %v12191_v42 = vrot.slane %v8454_v58, 1  ;;  %vm1921_vm6 = vsmask.f32 256  ;;  %v8485_v19 = vshll.u32 %v8454_v58, 16  ;;  %v8487_v13 = vpack.c.bf16 %v1410_v49, %v1409_v62  ;;  %v1077_v0 = vpop.f32.mrb[7].mxu0  ;;  %1478 = vst [vmem:[#allocation2 + $0x58] sm:$0xff] %v8465_v24 }
 0x10d   : > { %v1255_v29 = vmax.f32 %v1083_v54, 0.0  ;;  %vm12444_vm13 = vcmp.ge.s32.totalorder %v8069_v61, 1  ;;  %v1086_v34 = vadd.f32 %v7184_v3, %v8314_v47  ;;  %v8500_v28 = vshrl.u32 %v1445_v60, 16  ;;  %v8505_v16 = vpop.f32.mrb[6].mxu1  ;;  %v12461_v3 = vld [vmem:[#allocation9_spill] sm:$0xff]  ;;  %v12462_v61 = vld [vmem:[#allocation11_spill] sm:$0xff] }
 0x10e   : > { %12443 = vst [vmem:[#allocation3_spill] sm:$0xff] %v8485_v19  ;;  %vm8495_vm8 = vmand %vm12444_vm13, %vm717_vm11  ;;  %v8502_v12 = vrot.slane %v1445_v60, 1  ;;  %v1253_v8 = vmax.f32 %v1075_v15, 0.0  ;;  %vm12449_vm5 = vcmp.ge.s32.totalorder %v8073_v63, 1  ;;  %v1078_v7 = vadd.f32 %v8314_v47, %v1077_v0  ;;  %v8519_v26 = vpop.f32.mrb[7].mxu1 }
 0x10f   : > { %12447 = vst [vmem:[#allocation4_spill] sm:$0xff] %v8500_v28  ;;  %vm8511_vm11 = vmand %vm12449_vm5, %vm720_vm1  ;;  %v8516_v30 = vshll.u32 %v1445_v60, 16  ;;  %v1399_v50 = vsel %vm8476_vm9, %v1255_v29, 0.0  ;;  %v1256_v21 = vmax.f32 %v1086_v34, 0.0  ;;  %vm12453_vm1 = vcmp.ge.s32.totalorder %v8076_v11, 1 }
 0x110   : > { %12448 = vst [vmem:[#allocation5_spill] sm:$0xff] %v8502_v12  ;;  %1477 = vst [vmem:[#allocation2 + $0x50] sm:$0xff] %v8487_v13  ;;  %vm12456_vm5 = vcmask 1046528   ;;  %v1942_v27 = vshrl.u32 %v8502_v12, 16  ;;  %v1397_v62 = vsel %vm8495_vm8, %v1253_v8, 0.0  ;;  %v1254_v33 = vmax.f32 %v1078_v7, 0.0 }
 0x111   : > { %12452 = vst [vmem:[#allocation6_spill] sm:$0xff] %v8516_v30  ;;  %vm8528_vm13 = vmand %vm12453_vm1, %vm718_vm4  ;;  %v8536_v14 = vsel %vm12456_vm5, %v8502_v12, %v12191_v42  ;;  %vm679_vm9 = vcmp.ge.s32.totalorder %v12458_v52, 1  ;;  %vm727_vm10 = vcmp.le.s32.totalorder %v12458_v52, 16  ;;  %v12194_v39 = vrot.slane %v8485_v19, 1  ;;  %v7187_v15 = vpop.f32.mrb[8].mxu0 }
 0x112   : > { %12457 = vst [vmem:[#allocation34_spill] sm:$0xff] %v8536_v14  ;;  %v12187_v11 = vshrl.u32 %v8536_v14, 16  ;;  %v1400_v38 = vsel %vm8511_vm11, %v1256_v21, 0.0  ;;  %vm725_vm1 = vcmp.le.s32.totalorder %v12459_v1, 16  ;;  %v12188_v60 = vshll.u32 %v8536_v14, 16  ;;  %v1090_v8 = vpop.f32.mrb[9].mxu0 }
 0x113   : > { %v8551_v54 = vrot.slane %v8516_v30, 1  ;;  %v12190_v55 = vrot.slane %v8500_v28, 7  ;;  %v8554_v49 = vpack.c.bf16 %v1400_v38, %v1399_v50  ;;  %v1398_v53 = vsel %vm8528_vm13, %v1254_v33, 0.0  ;;  %v8572_v21 = vpop.f32.mrb[8].mxu1  ;;  %vm8579_vm13 = vmand %vm675_vm14, %vm723_vm7 }
 0x114   : > { %vm680_vm8 = vcmp.ge.s32.totalorder %v12461_v3, 1  ;;  %vm728_vm11 = vcmp.le.s32.totalorder %v12461_v3, 16  ;;  %v1944_v29 = vrot.slane %v1942_v27, 7  ;;  %v8562_v2 = vrot.slane %v12187_v11, 7  ;;  %v8593_v6 = vpop.f32.mrb[9].mxu1  ;;  %vm8600_vm7 = vmand %vm673_vm15, %vm721_vm2 }
 0x115   : > { %12460 = vst [vmem:[#allocation7_spill] sm:$0xff] %v8551_v54  ;;  %v8564_v34 = vpack.c.bf16 %v1398_v53, %v1397_v62  ;;  %v1099_v0 = vadd.f32 %v7187_v15, %v8314_v47  ;;  %vm726_vm4 = vcmp.le.s32.totalorder %v12462_v61, 16  ;;  %v1543_v7 = vor.u32 %v8500_v28, %v8551_v54  ;;  %1472 = vst [vmem:[#allocation2 + $0x28] sm:$0xff] %v8554_v49  ;;  %v7188_v62 = vpop.f32.mrb[10].mxu0  ;;  %v12465_v15 = vld [vmem:[#allocation12_spill] sm:$0xff]  ;;  %v8610_v53 = vpop.f32.mrb[10].mxu1 }
 0x116   : > { %v1930_v50 = vshrl.u32 %v8551_v54, 16  ;;  %v1091_v27 = vadd.f32 %v8314_v47, %v1090_v8  ;;  %v1951_v33 = vor.u32 %v12188_v60, %v8562_v2  ;;  %v1927_v38 = vor.u32 %v12190_v55, %v8516_v30  ;;  %v1093_v51 = vpop.f32.mrb[11].mxu0  ;;  %vm8616_vm15 = vmand %vm676_vm3, %vm724_vm0 }
 0x117   : > { %vm735_vm14 = vcmp.le.s32.totalorder %v12465_v15, 16  ;;  %1471 = vst [vmem:[#allocation2 + $0x20] sm:$0xff] %v8564_v34  ;;  %v1259_v8 = vmax.f32 %v1099_v0, 0.0  ;;  %v1102_v60 = vadd.f32 %v7188_v62, %v8314_v47  ;;  %vm12468_vm5 = vsmask.f32 7424 }
 0x118   : > { %v8608_v22 = vsel %vm12468_vm5, %v1543_v7, %v12194_v39  ;;  %v1932_v55 = vrot.slane %v1930_v50, 7  ;;  %v1257_v0 = vmax.f32 %v1091_v27, 0.0  ;;  %v1094_v62 = vadd.f32 %v8314_v47, %v1093_v51  ;;  %v8623_v7 = vpop.f32.mrb[11].mxu1 }
 0x119   : > { %12469 = vst [vmem:[#allocation8_spill] sm:$0xff] %v8608_v22  ;;  %v1952_v42 = vsel %vm1921_vm6, %v1944_v29, %v1951_v33  ;;  %v12195_v14 = vshrl.u32 %v8608_v22, 16  ;;  %v1403_v50 = vsel %vm8579_vm13, %v1259_v8, 0.0  ;;  %v1260_v27 = vmax.f32 %v1102_v60, 0.0  ;;  %v12475_v29 = vld [vmem:[#allocation10_spill] sm:$0xff]  ;;  %v12476_v8 = vld [vmem:[#allocation13_spill] sm:$0xff] }
 0x11a   : > { %vm12472_vm2 = vcmp.ge.s32.totalorder %v12442_v5, 1  ;;  %7241 = vmatprep.mubr.bf16.mxu0 %v1952_v42  ;;  %v1928_v33 = vsel %vm1921_vm6, %v12475_v29, %v1927_v38  ;;  %v1401_v39 = vsel %vm8600_vm7, %v1257_v0, 0.0  ;;  %v1258_v63 = vmax.f32 %v1094_v62, 0.0  ;;  %v12478_v0 = vld [vmem:[#allocation14_spill] sm:$0xff] }
 0x11b   : > { %vm8631_vm3 = vmand %vm12472_vm2, %vm722_vm12  ;;  %v8642_v60 = vrot.slane %v12195_v14, 7  ;;  %v1753_v5 = vrot.slane %v8564_v34, 1  ;;  %vm685_vm0 = vcmp.ge.s32.totalorder %v12476_v8, 1  ;;  %vm733_vm12 = vcmp.le.s32.totalorder %v12476_v8, 16 }
 0x11c   : > { %v1404_v42 = vsel %vm8616_vm15, %v1260_v27, 0.0  ;;  %v8650_v51 = vshrl.u32 %v8454_v58, 16  ;;  %v8653_v11 = vshll.u32 %v8564_v34, 16  ;;  %v8657_v38 = vadd.f32 %v8469_v4, %v8314_v47  ;;  %v7191_v27 = vpop.f32.mrb[12].mxu0  ;;  %v12483_v4 = vld [vmem:[#allocation15_spill] sm:$0xff] }
 0x11d   : > { %vm688_vm5 = vcmp.ge.s32.totalorder %v12478_v0, 1  ;;  %vm736_vm13 = vcmp.le.s32.totalorder %v12478_v0, 16  ;;  %v8661_v62 = vpack.c.bf16 %v1404_v42, %v1403_v50  ;;  %v1402_v37 = vsel %vm8631_vm3, %v1258_v63, 0.0  ;;  %vm8681_vm3 = vmand %vm679_vm9, %vm727_vm10  ;;  %v8688_v42 = vpop.f32.mrb[12].mxu1 }
 0x11e   : > { %12477 = vst [vmem:[#allocation9_spill] sm:$0xff] %v8653_v11  ;;  %v12479_v29 = vshll.u32 %v8608_v22, 16  ;;  %v12480_v12 = vrot.slane %v8454_v58, 1  ;;  %vm12481_vm7 = vcmask 1046528   ;;  %vm734_vm2 = vcmp.le.s32.totalorder %v12483_v4, 16  ;;  %v1106_v58 = vpop.f32.mrb[13].mxu0  ;;  %vm8719_vm9 = vmand %vm680_vm8, %vm728_vm11 }
 0x11f   : > { %v8675_v57 = vpack.c.bf16 %v1402_v37, %v1401_v39  ;;  %v1115_v56 = vadd.f32 %v7191_v27, %v8314_v47  ;;  %1474 = vst [vmem:[#allocation2 + $0x38] sm:$0xff] %v8661_v62  ;;  %v1107_v39 = vadd.f32 %v8314_v47, %v1106_v58  ;;  %v7192_v37 = vpop.f32.mrb[14].mxu0  ;;  %vm12490_vm10 = vcmask 1046528   ;;  %v8709_v54 = vpop.f32.mrb[13].mxu1 }
 0x120   : > { %v1939_v14 = vor.u32 %v12479_v29, %v8642_v60  ;;  %v8671_v30 = vsel %vm12481_vm7, %v12480_v12, %v1753_v5  ;;  %vm12486_vm7 = vcmp.ge.s32.totalorder %v12459_v1, 1  ;;  %v12489_v29 = vrot.slane %v8554_v49, 1  ;;  %v7660_v1 = vld [vmem:[%s12159_s3 + $0x88] sm:$0xff]   ;;  %v8727_v9 = vpop.f32.mrb[14].mxu1 }
 0x121   : > { %12482 = vst [vmem:[#allocation11_spill] sm:$0xff] %v8671_v30  ;;  %vm8695_vm15 = vmand %vm12486_vm7, %vm725_vm1  ;;  %v12492_v12 = vrot.slane %v8485_v19, 1  ;;  %v1263_v58 = vmax.f32 %v1115_v56, 0.0  ;;  %v1261_v56 = vmax.f32 %v1107_v39, 0.0  ;;  %vm12496_vm1 = vcmp.ge.s32.totalorder %v12462_v61, 1  ;;  %v8740_v25 = vpop.f32.mrb[15].mxu1 }
 0x122   : > { %v1940_v27 = vsel %vm1921_vm6, %v1932_v55, %v1939_v14  ;;  %v8704_v63 = vsel %vm12490_vm10, %v1753_v5, %v12489_v29  ;;  %1473 = vst [vmem:[#allocation2 + $0x30] sm:$0xff] %v8675_v57  ;;  %v1118_v55 = vadd.f32 %v7192_v37, %v8314_v47  ;;  %v1109_v5 = vpop.f32.mrb[15].mxu0  ;;  %vm8733_vm8 = vmand %vm12496_vm1, %vm726_vm4  ;;  %v7740_v61 = vld [vmem:[%s12159_s3 + $0x80] sm:$0xff]   ;;  %v12499_v36 = vshll.u32 %v8671_v30, 16  ;;  %v12509_v14 = vld [vmem:[#allocation18_spill] sm:$0xff] }
 0x123   : > { %12491 = vst [vmem:[#allocation12_spill] sm:$0xff] %v8704_v63  ;;  %v1551_v22 = vor.u32 %v8650_v51, %v12492_v12  ;;  %2638 = vmatprep.mubr.bf16.mxu1 %v1940_v27  ;;  %v12495_v12 = vshrl.u32 %v8671_v30, 16  ;;  %v1110_v37 = vadd.f32 %v8314_v47, %v1109_v5  ;;  %v1407_v39 = vsel %vm8681_vm3, %v1263_v58, 0.0  ;;  %v7661_v58 = vld [vmem:[%s12159_s3] sm:$0xff]  }
 0x124   : > { %2639 = vmatmul.mubr.bf16.vlgmr.msra.gmra.mrb[32].mxu1 %v1928_v33  ;;  %v1264_v20 = vmax.f32 %v1118_v55, 0.0  ;;  %v12500_v33 = vshrl.u32 %v8704_v63, 16  ;;  %vm12501_vm4 = vcmp.ge.s32.totalorder %v12465_v15, 1  ;;  %v1405_v55 = vsel %vm8695_vm15, %v1261_v56, 0.0  ;;  %v12506_v15 = vld [vmem:[#allocation16_spill] sm:$0xff] }
 0x125   : > { %v1967_v29 = vrot.slane %v12495_v12, 7  ;;  %v12207_v12 = vrot.slane %v8653_v11, 1  ;;  %7290 = vmatpush3.bf16.msra.mxu1 %v7740_v61  ;;  %vm8757_vm11 = vmand %vm12501_vm4, %vm735_vm14  ;;  %vm12504_vm3 = vsmask.f32 7424  ;;  %vm691_vm14 = vcmp.ge.s32.totalorder %v12506_v15, 1 }
 0x126   : > { %v8751_v5 = vrot.slane %v12500_v33, 7  ;;  %v1271_v33 = vmax.f32 %v8657_v38, 0.0  ;;  %vm739_vm7 = vcmp.le.s32.totalorder %v12506_v15, 16  ;;  %7291 = vmatprep.subr.bf16.mxu1 %v7660_v1  ;;  %v1408_v27 = vsel %vm8719_vm9, %v1264_v20, 0.0  ;;  %v7664_v38 = vld [vmem:[%s12159_s3 + $0x90] sm:$0xff]  }
 0x127   : > { %v1970_v45 = vor.u32 %v12499_v36, %v1967_v29  ;;  %v1262_v36 = vmax.f32 %v1110_v37, 0.0  ;;  %v8769_v61 = vsel %vm12504_vm3, %v1551_v22, %v12207_v12  ;;  %v12507_v56 = vshll.u32 %v8704_v63, 16  ;;  %v12508_v12 = vld [vmem:[#allocation17_spill] sm:$0xff] }
 0x128   : > { %12505 = vst [vmem:[#allocation10_spill] sm:$0xff] %v8769_v61  ;;  %vm689_vm15 = vcmp.ge.s32.totalorder %v12508_v12, 1  ;;  %vm737_vm10 = vcmp.le.s32.totalorder %v12508_v12, 16  ;;  %v8787_v30 = vpack.c.bf16 %v1408_v27, %v1407_v39  ;;  %vm692_vm9 = vcmp.ge.s32.totalorder %v12509_v14, 1  ;;  %v7680_v12 = vld [vmem:[%s12159_s3 + $0xa8] sm:$0xff]  }
 0x129   : > { %v1971_v52 = vsel %vm1921_vm6, %v8562_v2, %v1970_v45  ;;  %v1989_v37 = vor.u32 %v12507_v56, %v8751_v5  ;;  %v1406_v20 = vsel %vm8733_vm8, %v1262_v36, 0.0  ;;  %v12210_v45 = vshll.u32 %v8769_v61, 16  ;;  %vm8807_vm8 = vmand %vm685_vm0, %vm733_vm12  ;;  %v12513_v36 = vld [vmem:[#allocation19_spill] sm:$0xff]  ;;  %7292 = vmatpush3.bf16.msra.mxu1 %v7660_v1 }
 0x12a   : > { %7242 = vmatmul.mubr.bf16.vlgmr.msra.gmra.mrb[16].mxu0 %v1971_v52  ;;  %v1415_v2 = vsel %vm8757_vm11, %v1271_v33, 0.0  ;;  %vm740_vm1 = vcmp.le.s32.totalorder %v12509_v14, 16  ;;  %v8796_v56 = vpack.c.bf16 %v1406_v20, %v1405_v55  ;;  %v12510_v27 = vshrl.u32 %v8769_v61, 16  ;;  %v7662_v55 = vld [vmem:[%s12159_s3 + $0x8] sm:$0xff]   ;;  %1476 = vst [vmem:[#allocation2 + $0x48] sm:$0xff] %v8787_v30  ;;  %vm8825_vm0 = vmand %vm688_vm5, %vm736_vm13  ;;  %7293 = vmatprep.subr.bf16.mxu1 %v7664_v38  ;;  %v7671_v20 = vld [vmem:[%s12159_s3 + $0x98] sm:$0xff]  }
 0x12b   : > { %v1990_v22 = vsel %vm1921_vm6, %v1967_v29, %v1989_v37  ;;  %v1139_v50 = vadd.f32 %v8314_v47, %v8489_v59  ;;  %vm690_vm4 = vcmp.ge.s32.totalorder %v12513_v36, 1  ;;  %vm738_vm11 = vcmp.le.s32.totalorder %v12513_v36, 16  ;;  %v8815_v29 = vpop.f32.mrb[16].mxu1  ;;  %3616 = vmatpush1.bf16.msra.mxu0 %v7661_v58 }
 0x12c   : > { %v8801_v39 = vrot.slane %v12510_v27, 7  ;;  %7245 = vmatprep.mubr.bf16.mxu0 %v1990_v22  ;;  %v1150_v8 = vadd.f32 %v8505_v16, %v8314_v47  ;;  %v12224_v1 = vrot.slane %v8650_v51, 7  ;;  %v1142_v58 = vadd.f32 %v8314_v47, %v8519_v26  ;;  %v8837_v52 = vpop.f32.mrb[17].mxu1  ;;  %3617 = vmatprep.subr.bf16.mxu0 %v8262_v35  ;;  %1475 = vst [vmem:[#allocation2 + $0x40] sm:$0xff] %v8796_v56 }
 0x12d   : > { %v8835_v33 = vshrl.u32 %v8564_v34, 16  ;;  %v1269_v37 = vmax.f32 %v1139_v50, 0.0  ;;  %vm12516_vm12 = vcmp.ge.s32.totalorder %v12483_v4, 1  ;;  %v8853_v26 = vshll.u32 %v8554_v49, 16  ;;  %v8856_v22 = vpop.f32.mrb[18].mxu1  ;;  %7294 = vmatpush3.bf16.msra.mxu1 %v7664_v38 }
 0x12e   : > { %v1962_v0 = vor.u32 %v12210_v45, %v8801_v39  ;;  %vm8848_vm5 = vmand %vm12516_vm12, %vm734_vm2  ;;  %v1757_v34 = vrot.slane %v8675_v57, 1  ;;  %v1272_v27 = vmax.f32 %v1150_v8, 0.0  ;;  %v1954_v4 = vor.u32 %v12224_v1, %v8485_v19  ;;  %v8867_v61 = vpop.f32.mrb[19].mxu1  ;;  %7295 = vmatprep.subr.bf16.mxu1 %v7671_v20  ;;  %v12540_v19 = vld [vmem:[#allocation24_spill] sm:$0xff] }
 0x12f   : > { %v1270_v50 = vmax.f32 %v1142_v58, 0.0  ;;  %v12519_v45 = vrot.slane %v8653_v11, 1  ;;  %v1413_v44 = vsel %vm8807_vm8, %v1269_v37, 0.0  ;;  %v12220_v43 = vrot.slane %v8853_v26, 1  ;;  %3618 = vmatpush1.bf16.msra.mxu0 %v7662_v55  ;;  %v7678_v55 = vld [vmem:[%s12159_s3 + $0xa0] sm:$0xff]   ;;  %vm12524_vm2 = vmmov %vm12504_vm3  ;;  %v8934_v15 = vpop.f32.mrb[20].mxu1 }
 0x130   : > { %v1963_v48 = vsel %vm1921_vm6, %v8642_v60, %v1962_v0  ;;  %v12520_v8 = vrot.slane %v8554_v49, 1  ;;  %vm12521_vm13 = vcmask 1046528   ;;  %v1416_v60 = vsel %vm8825_vm0, %v1272_v27, 0.0  ;;  %3619 = vmatprep.subr.bf16.mxu0 %v8262_v35  ;;  %v12526_v27 = vld [vmem:[#allocation20_spill] sm:$0xff] }
 0x131   : > { %v1559_v63 = vor.u32 %v8835_v33, %v12519_v45  ;;  %v7663_v45 = vld [vmem:[%s12159_s3 + $0x10] sm:$0xff]   ;;  %2646 = vmatprep.mubr.bf16.mxu1 %v1963_v48  ;;  %v12523_v3 = vrot.slane %v8500_v28, 7  ;;  %v1414_v0 = vsel %vm8848_vm5, %v1270_v50, 0.0  ;;  %v8894_v38 = vpack.c.bf16 %v1416_v60, %v1415_v2  ;;  %vm8921_vm5 = vmand %vm691_vm14, %vm739_vm7  ;;  %7296 = vmatpush3.bf16.msra.mxu1 %v7671_v20 }
 0x132   : > { %v8877_v17 = vsel %vm12521_vm13, %v12520_v8, %v1757_v34  ;;  %v8896_v48 = vpack.c.bf16 %v1414_v0, %v1413_v44  ;;  %vm695_vm3 = vcmp.ge.s32.totalorder %v12526_v27, 1  ;;  %vm743_vm8 = vcmp.le.s32.totalorder %v12526_v27, 16  ;;  %v12527_v8 = vld [vmem:[#allocation21_spill] sm:$0xff]  ;;  %vm8952_vm7 = vmand %vm689_vm15, %vm737_vm10  ;;  %7297 = vmatprep.subr.bf16.mxu1 %v7678_v55  ;;  %v7667_v27 = vld [vmem:[%s12159_s3 + $0x28] sm:$0xff]  }
 0x133   : > { %12522 = vst [vmem:[#allocation13_spill] sm:$0xff] %v8877_v17  ;;  %v1955_v58 = vsel %vm1921_vm6, %v12523_v3, %v1954_v4  ;;  %v12219_v37 = vshrl.u32 %v8877_v17, 16  ;;  %v8901_v59 = vsel %vm12524_vm2, %v1559_v63, %v12220_v43  ;;  %v12221_v16 = vshll.u32 %v8877_v17, 16  ;;  %1480 = vst [vmem:[#allocation2 + $0x68] sm:$0xff] %v8894_v38  ;;  %3620 = vmatpush1.bf16.msra.mxu0 %v7663_v45  ;;  %v8958_v45 = vpop.f32.mrb[21].mxu1 }
 0x134   : > { %2647 = vmatmul.mubr.bf16.gmra.mrb[36].mxu1 %v1955_v58  ;;  %12525 = vst [vmem:[#allocation14_spill] sm:$0xff] %v8901_v59  ;;  %v12222_v4 = vshrl.u32 %v8901_v59, 16  ;;  %v12228_v2 = vshll.u32 %v8901_v59, 16  ;;  %v12223_v50 = vrot.slane %v8661_v62, 1  ;;  %vm693_vm0 = vcmp.ge.s32.totalorder %v12527_v8, 1  ;;  %1479 = vst [vmem:[#allocation2 + $0x60] sm:$0xff] %v8896_v48  ;;  %3621 = vmatprep.subr.bf16.mxu0 %v8262_v35 }
 0x135   : > { %v8910_v44 = vrot.slane %v12219_v37, 7  ;;  %vm741_vm12 = vcmp.le.s32.totalorder %v12527_v8, 16  ;;  %v1163_v60 = vadd.f32 %v8572_v21, %v8314_v47  ;;  %v1155_v3 = vadd.f32 %v8314_v47, %v8593_v6  ;;  %v12530_v37 = vld [vmem:[#allocation22_spill] sm:$0xff]  ;;  %vm8973_vm15 = vmand %vm692_vm9, %vm740_vm1  ;;  %v8977_v0 = vpop.f32.mrb[22].mxu1  ;;  %7298 = vmatpush3.bf16.msra.mxu1 %v7678_v55 }
 0x136   : > { %v1166_v58 = vadd.f32 %v8610_v53, %v8314_v47  ;;  %vm696_vm13 = vcmp.ge.s32.totalorder %v12530_v37, 1  ;;  %vm744_vm2 = vcmp.le.s32.totalorder %v12530_v37, 16  ;;  %v8938_v43 = vrot.slane %v12222_v4, 7  ;;  %vm8991_vm10 = vmand %vm690_vm4, %vm738_vm11  ;;  %7299 = vmatprep.subr.bf16.mxu1 %v7680_v12 }
 0x137   : > { %v2008_v21 = vor.u32 %v12221_v16, %v8910_v44  ;;  %vm12531_vm14 = vcmask 1046528   ;;  %v1158_v20 = vadd.f32 %v8314_v47, %v8623_v7  ;;  %v1273_v1 = vmax.f32 %v1155_v3, 0.0 }
 0x138   : > { %v8946_v53 = vsel %vm12531_vm14, %v1757_v34, %v12223_v50  ;;  %v7665_v34 = vld [vmem:[%s12159_s3 + $0x18] sm:$0xff]   ;;  %v1275_v50 = vmax.f32 %v1163_v60, 0.0  ;;  %v1981_v17 = vor.u32 %v12228_v2, %v8938_v43  ;;  %v1276_v4 = vmax.f32 %v1166_v58, 0.0  ;;  %v8997_v2 = vpop.f32.mrb[23].mxu1 }
 0x139   : > { %12532 = vst [vmem:[#allocation15_spill] sm:$0xff] %v8946_v53  ;;  %v2009_v16 = vsel %vm1921_vm6, %v8751_v5, %v2008_v21  ;;  %v12537_v60 = vrot.slane %v8835_v33, 7  ;;  %vm694_vm9 = vcmp.ge.s32.totalorder %v12540_v19, 1  ;;  %vm742_vm1 = vcmp.le.s32.totalorder %v12540_v19, 16  ;;  %3622 = vmatpush1.bf16.msra.mxu0 %v7665_v34  ;;  %7300 = vmatpush3.bf16.msra.mxu1 %v7680_v12  ;;  %v7668_v19 = vld [vmem:[%s12159_s3 + $0x30] sm:$0xff]  }
 0x13a   : > { %7246 = vmatmul.mubr.bf16.gmra.mrb[20].mxu0 %v2009_v16  ;;  %v12541_v5 = vshrl.u32 %v8946_v53, 16  ;;  %v1419_v21 = vsel %vm8921_vm5, %v1275_v50, 0.0  ;;  %v1417_v36 = vsel %vm8952_vm7, %v1273_v1, 0.0  ;;  %v1420_v59 = vsel %vm8973_vm15, %v1276_v4, 0.0  ;;  %v7666_v1 = vld [vmem:[%s12159_s3 + $0x20] sm:$0xff]   ;;  %3623 = vmatprep.subr.bf16.mxu0 %v8262_v35 }
 0x13b   : > { %v1973_v3 = vor.u32 %v12537_v60, %v8653_v11  ;;  %v1274_v60 = vmax.f32 %v1158_v20, 0.0  ;;  %v1982_v11 = vsel %vm1921_vm6, %v8801_v39, %v1981_v17  ;;  %v12542_v16 = vrot.slane %v8650_v51, 7 }
 0x13c   : > { %v9001_v58 = vrot.slane %v12541_v5, 7  ;;  %v9015_v5 = vshrl.u32 %v8554_v49, 16  ;;  %2654 = vmatprep.mubr.bf16.mxu1 %v1982_v11  ;;  %v12543_v17 = vshll.u32 %v8946_v53, 16  ;;  %v9023_v55 = vpack.c.bf16 %v1420_v59, %v1419_v21 }
 0x13d   : > { %v1974_v28 = vsel %vm1921_vm6, %v12542_v16, %v1973_v3  ;;  %v1418_v4 = vsel %vm8991_vm10, %v1274_v60, 0.0  ;;  %v9028_v50 = vshll.u32 %v8675_v57, 16  ;;  %v12544_v63 = vrot.slane %v8853_v26, 1  ;;  %v9050_v3 = vpop.f32.mrb[24].mxu1  ;;  %vm9067_vm10 = vmand %vm695_vm3, %vm743_vm8  ;;  %3624 = vmatpush1.bf16.msra.mxu0 %v7666_v1 }
 0x13e   : > { %v2027_v39 = vor.u32 %v12543_v17, %v9001_v58  ;;  %2655 = vmatmul.mubr.bf16.gmra.mrb[40].mxu1 %v1974_v28  ;;  %v9031_v49 = vpack.c.bf16 %v1418_v4, %v1417_v36  ;;  %v1761_v6 = vrot.slane %v8796_v56, 1  ;;  %v12233_v59 = vrot.slane %v8787_v30, 1  ;;  %1482 = vst [vmem:[#allocation2 + $0x78] sm:$0xff] %v9023_v55  ;;  %v9076_v36 = vpop.f32.mrb[25].mxu1  ;;  %vm9093_vm8 = vmand %vm693_vm0, %vm741_vm12  ;;  %3625 = vmatprep.subr.bf16.mxu0 %v8262_v35 }
 0x13f   : > { %v1567_v11 = vor.u32 %v9015_v5, %v12544_v63  ;;  %vm699_vm4 = vcmp.ge.s32.totalorder %v8296_v18, 1  ;;  %vm747_vm11 = vcmp.le.s32.totalorder %v8296_v18, 16  ;;  %v12234_v28 = vrot.slane %v9028_v50, 1 }
 0x140   : > { %v2028_v20 = vsel %vm1921_vm6, %v8910_v44, %v2027_v39  ;;  %v1179_v34 = vadd.f32 %v8688_v42, %v8314_v47  ;;  %v1171_v7 = vadd.f32 %v8314_v47, %v8709_v54  ;;  %vm745_vm14 = vcmp.le.s32.totalorder %v8301_v31, 16  ;;  %1481 = vst [vmem:[#allocation2 + $0x70] sm:$0xff] %v9031_v49  ;;  %v9097_v39 = vpop.f32.mrb[26].mxu1 }
 0x141   : > { %7249 = vmatprep.mubr.bf16.mxu0 %v2028_v20  ;;  %v12545_v44 = vrot.slane %v8661_v62, 1  ;;  %vm12546_vm7 = vcmask 1046528   ;;  %v1182_v12 = vadd.f32 %v8727_v9, %v8314_v47  ;;  %v12239_v21 = vrot.slane %v9015_v5, 7  ;;  %v9111_v20 = vpop.f32.mrb[27].mxu1  ;;  %3626 = vmatpush1.bf16.msra.mxu0 %v7667_v27  ;;  %v9149_v27 = vld [vmem:[#allocation2] sm:$0xff] }
 0x142   : > { %vm12548_vm15 = vmmov %vm12546_vm7  ;;  %vm748_vm5 = vcmp.le.s32.totalorder %v8304_v46, 16  ;;  %vm12552_vm3 = vsmask.f32 7424  ;;  %vm698_vm0 = vcmp.ge.s32.totalorder %v8309_v23, 1  ;;  %vm746_vm12 = vcmp.le.s32.totalorder %v8309_v23, 16  ;;  %3627 = vmatprep.subr.bf16.mxu0 %v9149_v27 }
 0x143   : > { %v9056_v14 = vsel %vm12546_vm7, %v12545_v44, %v1761_v6  ;;  %v9061_v42 = vsel %vm12548_vm15, %v1761_v6, %v12233_v59  ;;  %vm700_vm7 = vcmp.ge.s32.totalorder %v8304_v46, 1  ;;  %v9084_v60 = vsel %vm12552_vm3, %v1567_v11, %v12234_v28  ;;  %vm9107_vm15 = vmand %vm696_vm13, %vm744_vm2 }
 0x144   : > { %12547 = vst [vmem:[#allocation16_spill] sm:$0xff] %v9056_v14  ;;  %12549 = vst [vmem:[#allocation17_spill] sm:$0xff] %v9061_v42  ;;  %v12235_v9 = vshrl.u32 %v9056_v14, 16  ;;  %v12237_v16 = vshll.u32 %v9056_v14, 16  ;;  %v12236_v17 = vshrl.u32 %v9061_v42, 16  ;;  %v12238_v4 = vshrl.u32 %v9084_v60, 16 }
 0x145   : > { %v1279_v6 = vmax.f32 %v1179_v34, 0.0  ;;  %v1277_v28 = vmax.f32 %v1171_v7, 0.0  ;;  %v1280_v63 = vmax.f32 %v1182_v12, 0.0  ;;  %v1992_v11 = vor.u32 %v12239_v21, %v8853_v26  ;;  %vm9145_vm13 = vmand %vm694_vm9, %vm742_vm1  ;;  %3628 = vmatpush1.bf16.msra.mxu0 %v7668_v19 }
 0x146   : > { %v2043_v44 = vrot.slane %v12235_v9, 7  ;;  %v9117_v59 = vrot.slane %v12236_v17, 7  ;;  %v9121_v34 = vrot.slane %v12238_v4, 7  ;;  %v1174_v9 = vadd.f32 %v8314_v47, %v8740_v25  ;;  %vm9196_vm1 = vmand %vm699_vm4, %vm747_vm11  ;;  %3629 = vmatprep.subr.bf16.mxu0 %v9149_v27 }
 0x147   : > { %v1423_v37 = vsel %vm9067_vm10, %v1279_v6, 0.0  ;;  %v12557_v12 = vshll.u32 %v9061_v42, 16  ;;  %v1421_v6 = vsel %vm9093_vm8, %v1277_v28, 0.0  ;;  %v1424_v17 = vsel %vm9107_vm15, %v1280_v63, 0.0 }
 0x148   : > { %v2046_v7 = vor.u32 %v12237_v16, %v2043_v44  ;;  %v9155_v28 = vpack.c.bf16 %v1424_v17, %v1423_v37  ;;  %v12561_v63 = vrot.slane %v8835_v33, 7  ;;  %v1278_v16 = vmax.f32 %v1174_v9, 0.0  ;;  %v9172_v37 = vpop.f32.mrb[28].mxu1 }
 0x149   : > { %v2065_v54 = vor.u32 %v12557_v12, %v9117_v59  ;;  %v12560_v12 = vshll.u32 %v9084_v60, 16  ;;  %v9167_v42 = vshrl.u32 %v8675_v57, 16  ;;  %v9170_v17 = vshll.u32 %v8661_v62, 16 }
 0x14a   : > { %v1993_v8 = vsel %vm1921_vm6, %v12561_v63, %v1992_v11  ;;  %v2047_v4 = vsel %vm1921_vm6, %v9001_v58, %v2046_v7  ;;  %1484 = vst [vmem:[#allocation2 + $0x88] sm:$0xff] %v9155_v28  ;;  %v1422_v11 = vsel %vm9145_vm13, %v1278_v16, 0.0  ;;  %v1765_v58 = vrot.slane %v8487_v13, 1  ;;  %v7669_v63 = vld [vmem:[%s12159_s3 + $0x38] sm:$0xff]  }
 0x14b   : > { %v2000_v1 = vor.u32 %v12560_v12, %v9121_v34  ;;  %v2066_v21 = vsel %vm1921_vm6, %v2043_v44, %v2065_v54  ;;  %7250 = vmatmul.mubr.bf16.gmra.mrb[24].mxu0 %v2047_v4  ;;  %v1195_v57 = vadd.f32 %v8815_v29, %v8314_v47  ;;  %vm703_vm2 = vcmp.ge.s32.totalorder %v8317_v10, 1  ;;  %v9184_v44 = vpop.f32.mrb[29].mxu1 }
 0x14c   : > { %vm751_vm9 = vcmp.le.s32.totalorder %v8317_v10, 16  ;;  %7253 = vmatprep.mubr.bf16.mxu0 %v2066_v21  ;;  %v12562_v4 = vrot.slane %v9028_v50, 1  ;;  %v1579_v16 = vrot.slane %v9170_v17, 1  ;;  %v1187_v29 = vadd.f32 %v8314_v47, %v8837_v52  ;;  %v9204_v21 = vpop.f32.mrb[30].mxu1  ;;  %3630 = vmatpush1.bf16.msra.mxu0 %v7669_v63  ;;  %v7670_v63 = vld [vmem:[%s12159_s3 + $0x40] sm:$0xff]   ;;  %v7672_v10 = vld [vmem:[%s12159_s3 + $0x48] sm:$0xff]  }
 0x14d   : > { %v2001_v9 = vsel %vm1921_vm6, %v8938_v43, %v2000_v1  ;;  %v9186_v43 = vpack.c.bf16 %v1422_v11, %v1421_v6  ;;  %vm701_vm10 = vcmp.ge.s32.totalorder %v8333_v41, 1  ;;  %vm749_vm3 = vcmp.le.s32.totalorder %v8333_v41, 16  ;;  %v9222_v1 = vpop.f32.mrb[31].mxu1  ;;  %3631 = vmatprep.subr.bf16.mxu0 %v9149_v27 }
 0x14e   : > { %2662 = vmatprep.mubr.bf16.mxu1 %v2001_v9  ;;  %v1575_v7 = vor.u32 %v9167_v42, %v12562_v4  ;;  %v12565_v54 = vrot.slane %v8787_v30, 1  ;;  %vm12566_vm8 = vcmask 1046528   ;;  %v1283_v18 = vmax.f32 %v1195_v57, 0.0 }
 0x14f   : > { %2663 = vmatmul.mubr.bf16.gmra.mrb[44].mxu1 %v1993_v8  ;;  %vm12568_vm4 = vcmp.ge.s32.totalorder %v8301_v31, 1  ;;  %v1198_v52 = vadd.f32 %v8856_v22, %v8314_v47  ;;  %v12244_v12 = vrot.slane %v9167_v42, 7  ;;  %1483 = vst [vmem:[#allocation2 + $0x80] sm:$0xff] %v9186_v43  ;;  %vm12571_vm15 = vsmask.f32 7424 }
 0x150   : > { %v9209_v6 = vsel %vm12566_vm8, %v12565_v54, %v1765_v58  ;;  %vm9215_vm11 = vmand %vm12568_vm4, %vm745_vm14  ;;  %v9229_v31 = vsel %vm12571_vm15, %v1575_v7, %v1579_v16  ;;  %v1281_v11 = vmax.f32 %v1187_v29, 0.0  ;;  %vm704_vm13 = vcmp.ge.s32.totalorder %v8336_v40, 1  ;;  %v7681_v7 = vld [vmem:[%s12159_s3 + $0xb0] sm:$0xff]   ;;  %3632 = vmatpush1.bf16.msra.mxu0 %v7670_v63  ;;  %v12587_v63 = vld [vmem:[#allocation27_spill] sm:$0xff] }
 0x151   : > { %12567 = vst [vmem:[#allocation18_spill] sm:$0xff] %v9209_v6  ;;  %v12242_v8 = vshrl.u32 %v9209_v6, 16  ;;  %vm796_vm14 = vmand %vm700_vm7, %vm748_vm5  ;;  %vm752_vm8 = vcmp.le.s32.totalorder %v8336_v40, 16  ;;  %v12243_v22 = vshrl.u32 %v9229_v31, 16  ;;  %v1427_v57 = vsel %vm9196_vm1, %v1283_v18, 0.0  ;;  %7301 = vmatprep.subr.bf16.mxu1 %v7681_v7  ;;  %3633 = vmatprep.subr.bf16.mxu0 %v9149_v27 }
 0x152   : > { %v1284_v4 = vmax.f32 %v1198_v52, 0.0  ;;  %v1425_v29 = vsel %vm9215_vm11, %v1281_v11, 0.0  ;;  %v2011_v54 = vor.u32 %v12244_v12, %v9028_v50  ;;  %v1767_v19 = vrot.slane %v8465_v24, 1  ;;  %vm9280_vm4 = vmand %vm698_vm0, %vm746_vm12  ;;  %7302 = vmatpush3.bf16.msra.mxu1 %v7681_v7 }
 0x153   : > { %v2081_v46 = vrot.slane %v12242_v8, 7  ;;  %v9257_v13 = vrot.slane %v12243_v22, 7  ;;  %v1190_v52 = vadd.f32 %v8314_v47, %v8867_v61  ;;  %v9262_v9 = vshrl.u32 %v8661_v62, 16  ;;  %vm9321_vm12 = vmand %vm703_vm2, %vm751_vm9 }
 0x154   : > { %v1428_v18 = vsel %vm796_vm14, %v1284_v4, 0.0  ;;  %vm702_vm5 = vcmp.ge.s32.totalorder %v8339_v32, 1  ;;  %vm750_vm7 = vcmp.le.s32.totalorder %v8339_v32, 16  ;;  %v12572_v25 = vshll.u32 %v9209_v6, 16  ;;  %vm9345_vm2 = vmand %vm701_vm10, %vm749_vm3  ;;  %3634 = vmatpush1.bf16.msra.mxu0 %v7672_v10  ;;  %v7673_v10 = vld [vmem:[%s12159_s3 + $0x50] sm:$0xff]  }
 0x155   : > { %v9268_v11 = vpack.c.bf16 %v1428_v18, %v1427_v57  ;;  %v12573_v8 = vrot.slane %v9015_v5, 7  ;;  %vm12574_vm1 = vcmask 1046528   ;;  %v1282_v18 = vmax.f32 %v1190_v52, 0.0  ;;  %3635 = vmatprep.subr.bf16.mxu0 %v9149_v27 }
 0x156   : > { %v2084_v24 = vor.u32 %v12572_v25, %v2081_v46  ;;  %v9274_v61 = vsel %vm12574_vm1, %v1765_v58, %v1767_v19  ;;  %v1583_v25 = vor.u32 %v9262_v9, %v1579_v16  ;;  %v9298_v22 = vshll.u32 %v8796_v56, 16  ;;  %vm12579_vm0 = vmmov %vm12574_vm1 }
 0x157   : > { %v2012_v4 = vsel %vm1921_vm6, %v12573_v8, %v2011_v54  ;;  %12575 = vst [vmem:[#allocation19_spill] sm:$0xff] %v9274_v61  ;;  %v12578_v8 = vshll.u32 %v9229_v31, 16  ;;  %v12245_v58 = vshrl.u32 %v9274_v61, 16  ;;  %1486 = vst [vmem:[#allocation2 + $0x98] sm:$0xff] %v9268_v11  ;;  %v12246_v12 = vrot.slane %v8896_v48, 1 }
 0x158   : > { %v2085_v23 = vsel %vm1921_vm6, %v9117_v59, %v2084_v24  ;;  %v1426_v7 = vsel %vm9280_vm4, %v1282_v18, 0.0  ;;  %v1211_v59 = vadd.f32 %v8934_v15, %v8314_v47  ;;  %v1587_v24 = vrot.slane %v9298_v22, 1  ;;  %v9328_v47 = vld [vmem:[%s12158_s2] ss:$0 sm:$0xff]  ;;  %vm800_vm4 = vmand %vm704_vm13, %vm752_vm8  ;;  %3636 = vmatpush1.bf16.msra.mxu0 %v7673_v10  ;;  %v12600_v10 = vld [vmem:[#allocation33_spill] sm:$0xff] }
 0x159   : > { %v2019_v57 = vor.u32 %v12578_v8, %v9257_v13  ;;  %7254 = vmatmul.mubr.bf16.gmra.mrb[28].mxu0 %v2085_v23  ;;  %v2100_v52 = vrot.slane %v12245_v58, 7  ;;  %v9309_v16 = vpack.c.bf16 %v1426_v7, %v1425_v29  ;;  %v9315_v54 = vsel %vm12579_vm0, %v1767_v19, %v12246_v12  ;;  %v12583_v29 = vld [vmem:[#allocation26_spill] sm:$0xff]  ;;  %vm798_vm13 = vmand %vm702_vm5, %vm750_vm7  ;;  %3637 = vmatprep.subr.bf16.mxu0 %v9149_v27 }
 0x15a   : > { %12580 = vst [vmem:[#allocation20_spill] sm:$0xff] %v9315_v54  ;;  %v1203_v15 = vadd.f32 %v9328_v47, %v8958_v45  ;;  %vm707_vm11 = vcmp.ge.s32.totalorder %v12583_v29, 1  ;;  %vm755_vm15 = vcmp.le.s32.totalorder %v12583_v29, 16  ;;  %v12584_v19 = vshll.u32 %v9274_v61, 16  ;;  %v12590_v12 = vld [vmem:[#allocation30_spill] sm:$0xff] }
 0x15b   : > { %v2020_v8 = vsel %vm1921_vm6, %v9121_v34, %v2019_v57  ;;  %v12248_v57 = vshrl.u32 %v9315_v54, 16  ;;  %v12247_v18 = vshll.u32 %v9315_v54, 16  ;;  %v1287_v23 = vmax.f32 %v1211_v59, 0.0  ;;  %1485 = vst [vmem:[#allocation2 + $0x90] sm:$0xff] %v9309_v16  ;;  %v12589_v59 = vld [vmem:[#allocation28_spill] sm:$0xff] }
 0x15c   : > { %2670 = vmatprep.mubr.bf16.mxu1 %v2020_v8  ;;  %v2103_v62 = vor.u32 %v12584_v19, %v2100_v52  ;;  %vm705_vm9 = vcmp.ge.s32.totalorder %v12587_v63, 1  ;;  %vm753_vm14 = vcmp.le.s32.totalorder %v12587_v63, 16  ;;  %vm12588_vm1 = vsmask.f32 7424 }
 0x15d   : > { %2671 = vmatmul.mubr.bf16.gmra.mrb[48].mxu1 %v2012_v4  ;;  %v9354_v4 = vsel %vm12588_vm1, %v1583_v25, %v1587_v24  ;;  %v1285_v8 = vmax.f32 %v1203_v15, 0.0  ;;  %v1214_v7 = vadd.f32 %v9328_v47, %v8977_v0  ;;  %v12250_v41 = vrot.slane %v9262_v9, 7 }
 0x15e   : > { %vm708_vm10 = vcmp.ge.s32.totalorder %v12589_v59, 1  ;;  %vm756_vm3 = vcmp.le.s32.totalorder %v12589_v59, 16  ;;  %v2104_v19 = vsel %vm1921_vm6, %v2081_v46, %v2103_v62  ;;  %v12249_v58 = vshrl.u32 %v9354_v4, 16 }
 0x15f   : > { %v9366_v25 = vrot.slane %v12248_v57, 7  ;;  %7257 = vmatprep.mubr.bf16.mxu0 %v2104_v19  ;;  %v1431_v0 = vsel %vm9321_vm12, %v1287_v23, 0.0  ;;  %v1429_v46 = vsel %vm9345_vm2, %v1285_v8, 0.0  ;;  %v1288_v15 = vmax.f32 %v1214_v7, 0.0 }
 0x160   : > { %v2030_v62 = vor.u32 %v12250_v41, %v9170_v17  ;;  %vm706_vm0 = vcmp.ge.s32.totalorder %v12590_v12, 1  ;;  %vm754_vm1 = vcmp.le.s32.totalorder %v12590_v12, 16  ;;  %v9383_v40 = vrot.slane %v12249_v58, 7 }
 0x161   : > { %v2122_v34 = vor.u32 %v12247_v18, %v9366_v25  ;;  %v1206_v23 = vadd.f32 %v9328_v47, %v8997_v2  ;;  %v9391_v45 = vshrl.u32 %v8796_v56, 16  ;;  %v1432_v8 = vsel %vm800_vm4, %v1288_v15, 0.0 }
 0x162   : > { %v12591_v7 = vrot.slane %v9167_v42, 7  ;;  %v9405_v2 = vshll.u32 %v8787_v30, 16  ;;  %v1771_v56 = vrot.slane %v8894_v38, 1  ;;  %v12592_v18 = vshll.u32 %v9354_v4, 16 }
 0x163   : > { %v2123_v15 = vsel %vm1921_vm6, %v2100_v52, %v2122_v34  ;;  %v9412_v58 = vpack.c.bf16 %v1432_v8, %v1431_v0  ;;  %v1286_v41 = vmax.f32 %v1206_v23, 0.0  ;;  %vm12594_vm8 = vcmask 1046528   ;;  %v7674_v23 = vld [vmem:[%s12159_s3 + $0x58] sm:$0xff]  }
 0x164   : > { %v2031_v19 = vsel %vm1921_vm6, %v12591_v7, %v2030_v62  ;;  %v2038_v57 = vor.u32 %v12592_v18, %v9383_v40  ;;  %7258 = vmatmul.mubr.bf16.gmra.mrb[32].mxu0 %v2123_v15  ;;  %v1591_v62 = vor.u32 %v9391_v45, %v1587_v24  ;;  %v12260_v32 = vrot.slane %v9405_v2, 1  ;;  %v12596_v24 = vld [vmem:[#allocation31_spill] sm:$0xff]  ;;  %vm12598_vm2 = vmmov %vm12594_vm8 }
 0x165   : > { %v12593_v7 = vrot.slane %v8896_v48, 1  ;;  %v12256_v61 = vrot.slane %v9031_v49, 1  ;;  %1488 = vst [vmem:[#allocation2 + $0xa8] sm:$0xff] %v9412_v58  ;;  %v1430_v52 = vsel %vm798_vm13, %v1286_v41, 0.0  ;;  %vm711_vm5 = vcmp.ge.s32.totalorder %v12596_v24, 1  ;;  %3638 = vmatpush1.bf16.msra.mxu0 %v7674_v23 }
 0x166   : > { %v2039_v18 = vsel %vm1921_vm6, %v9257_v13, %v2038_v57  ;;  %vm759_vm7 = vcmp.le.s32.totalorder %v12596_v24, 16  ;;  %v9432_v8 = vpack.c.bf16 %v1430_v52, %v1429_v46  ;;  %vm12597_vm12 = vsmask.f32 7424  ;;  %3639 = vmatprep.subr.bf16.mxu0 %v9149_v27 }
 0x167   : > { %v9419_v54 = vsel %vm12594_vm8, %v12593_v7, %v1771_v56  ;;  %2678 = vmatprep.mubr.bf16.mxu1 %v2039_v18  ;;  %v9437_v13 = vsel %vm12597_vm12, %v1591_v62, %v12260_v32  ;;  %v9442_v57 = vsel %vm12598_vm2, %v1771_v56, %v12256_v61  ;;  %v1227_v41 = vadd.f32 %v9328_v47, %v9050_v3  ;;  %vm9457_vm8 = vmand %vm707_vm11, %vm755_vm15 }
 0x168   : > { %12595 = vst [vmem:[#allocation21_spill] sm:$0xff] %v9419_v54  ;;  %v12255_v0 = vshrl.u32 %v9419_v54, 16  ;;  %v12258_v34 = vshll.u32 %v9419_v54, 16  ;;  %12599 = vst [vmem:[#allocation22_spill] sm:$0xff] %v9442_v57  ;;  %vm709_vm4 = vcmp.ge.s32.totalorder %v12600_v10, 1  ;;  %vm757_vm13 = vcmp.le.s32.totalorder %v12600_v10, 16  ;;  %2679 = vmatmul.mubr.bf16.gmra.mrb[52].mxu1 %v2031_v19 }
 0x169   : > { %v12257_v46 = vshrl.u32 %v9437_v13, 16  ;;  %v12263_v15 = vshll.u32 %v9437_v13, 16  ;;  %v12259_v7 = vshrl.u32 %v9442_v57, 16  ;;  %1487 = vst [vmem:[#allocation2 + $0xa0] sm:$0xff] %v9432_v8  ;;  %v1291_v56 = vmax.f32 %v1227_v41, 0.0  ;;  %vm9468_vm12 = vmand %vm705_vm9, %vm753_vm14 }
 0x16a   : > { %v2138_v62 = vrot.slane %v12255_v0, 7  ;;  %v1219_v29 = vadd.f32 %v9328_v47, %v9076_v36  ;;  %v1230_v52 = vadd.f32 %v9328_v47, %v9097_v39  ;;  %v12605_v0 = vld [vmem:[#allocation23_spill] sm:$0xff]  ;;  %vm9492_vm9 = vmand %vm708_vm10, %vm756_vm3  ;;  %v1222_v19 = vadd.f32 %v9328_v47, %v9111_v20 }
 0x16b   : > { %vm712_vm11 = vcmp.ge.s32.totalorder %v12605_v0, 1  ;;  %vm760_vm15 = vcmp.le.s32.totalorder %v12605_v0, 16  ;;  %v9480_v41 = vrot.slane %v12257_v46, 7  ;;  %v9486_v61 = vrot.slane %v12259_v7, 7  ;;  %v7675_v46 = vld [vmem:[%s12159_s3 + $0x60] sm:$0xff]   ;;  %vm9520_vm14 = vmand %vm706_vm0, %vm754_vm1 }
 0x16c   : > { %v2141_v63 = vor.u32 %v12258_v34, %v2138_v62  ;;  %v1435_v34 = vsel %vm9457_vm8, %v1291_v56, 0.0  ;;  %v1289_v7 = vmax.f32 %v1219_v29, 0.0  ;;  %v1292_v32 = vmax.f32 %v1230_v52, 0.0  ;;  %v12612_v29 = vld [vmem:[#allocation25_spill] sm:$0xff]  ;;  %3640 = vmatpush1.bf16.msra.mxu0 %v7675_v46  ;;  %vm12617_vm0 = vmmov %vm12598_vm2 }
 0x16d   : > { %v2057_v59 = vor.u32 %v12263_v15, %v9480_v41  ;;  %v12608_v39 = vshll.u32 %v9442_v57, 16  ;;  %v12609_v3 = vrot.slane %v9391_v45, 7  ;;  %vm710_vm10 = vcmp.ge.s32.totalorder %v12612_v29, 1  ;;  %3641 = vmatprep.subr.bf16.mxu0 %v9149_v27  ;;  %vm9574_vm1 = vmand %vm711_vm5, %vm759_vm7 }
 0x16e   : > { %v2142_v23 = vsel %vm1921_vm6, %v9366_v25, %v2141_v63  ;;  %vm758_vm3 = vcmp.le.s32.totalorder %v12612_v29, 16  ;;  %v1433_v25 = vsel %vm9468_vm12, %v1289_v7, 0.0  ;;  %v1436_v52 = vsel %vm9492_vm9, %v1292_v32, 0.0  ;;  %v7676_v32 = vld [vmem:[%s12159_s3 + $0x68] sm:$0xff]   ;;  %vm12621_vm2 = vmmov %vm12617_vm0 }
 0x16f   : > { %v2160_v54 = vor.u32 %v12608_v39, %v9486_v61  ;;  %v2049_v56 = vor.u32 %v12609_v3, %v9298_v22  ;;  %7261 = vmatprep.mubr.bf16.mxu0 %v2142_v23  ;;  %v1290_v63 = vmax.f32 %v1222_v19, 0.0  ;;  %v9531_v39 = vshrl.u32 %v8787_v30, 16  ;;  %v7682_v30 = vld [vmem:[%s12159_s3 + $0xb8] sm:$0xff]   ;;  %vm9593_vm5 = vmand %vm709_vm4, %vm757_vm13 }
 0x170   : > { %v2058_v12 = vsel %vm1921_vm6, %v9383_v40, %v2057_v59  ;;  %v9536_v15 = vpack.c.bf16 %v1436_v52, %v1435_v34  ;;  %v12613_v57 = vrot.slane %v9262_v9, 7  ;;  %v12614_v40 = vrot.slane %v9405_v2, 1  ;;  %7303 = vmatprep.subr.bf16.mxu1 %v7682_v30  ;;  %3642 = vmatpush1.bf16.msra.mxu0 %v7676_v32  ;;  %vm808_vm4 = vmand %vm712_vm11, %vm760_vm15 }
 0x171   : > { %v2161_v3 = vsel %vm1921_vm6, %v2138_v62, %v2160_v54  ;;  %2686 = vmatprep.mubr.bf16.mxu1 %v2058_v12  ;;  %v1434_v54 = vsel %vm9520_vm14, %v1290_v63, 0.0  ;;  %v7743_v62 = vld [vmem:[#allocation2 + $0x50] sm:$0xff]  ;;  %v1775_v46 = vrot.slane %v9023_v55, 1  ;;  %v12267_v19 = vrot.slane %v9186_v43, 1  ;;  %7304 = vmatpush3.bf16.msra.mxu1 %v7682_v30  ;;  %vm9644_vm13 = vmand %vm710_vm10, %vm758_vm3 }
 0x172   : > { %v2050_v23 = vsel %vm1921_vm6, %v12613_v57, %v2049_v56  ;;  %7262 = vmatmul.mubr.bf16.gmra.mrb[36].mxu0 %v2161_v3  ;;  %v1599_v34 = vor.u32 %v9531_v39, %v12614_v40  ;;  %v9552_v57 = vshll.u32 %v7743_v62, 16  ;;  %1490 = vst [vmem:[#allocation2 + $0xb8] sm:$0xff] %v9536_v15  ;;  %v9556_v7 = vpack.c.bf16 %v1434_v54, %v1433_v25  ;;  %v7677_v3 = vld [vmem:[%s12159_s3 + $0x70] sm:$0xff]   ;;  %vm12634_vm12 = vmmov %vm12617_vm0 }
 0x173   : > { %2687 = vmatmul.mubr.bf16.gmra.mrb[56].mxu1 %v2050_v23  ;;  %v1243_v18 = vadd.f32 %v9328_v47, %v9172_v37  ;;  %v1235_v36 = vadd.f32 %v9328_v47, %v9184_v44  ;;  %v12616_v56 = vrot.slane %v9031_v49, 1  ;;  %v1246_v37 = vadd.f32 %v9328_v47, %v9204_v21  ;;  %3643 = vmatprep.subr.bf16.mxu0 %v9149_v27  ;;  %vm12637_vm11 = vmmov %vm12617_vm0 }
 0x174   : > { %12615 = vst [vmem:[#allocation24_spill] sm:$0xff] %v9552_v57  ;;  %v1603_v59 = vrot.slane %v9552_v57, 1  ;;  %v12272_v44 = vrot.slane %v9531_v39, 7  ;;  %1489 = vst [vmem:[#allocation2 + $0xb0] sm:$0xff] %v9556_v7  ;;  %v9587_v24 = vsel %vm12621_vm2, %v1775_v46, %v12267_v19  ;;  %vm12625_vm7 = vsmask.f32 7424  ;;  %5182 = vmatprep.subr.bf16.mxu1 %v9149_v27  ;;  %3644 = vmatpush1.bf16.msra.mxu0 %v7677_v3 }
 0x175   : > { %v9568_v20 = vsel %vm12617_vm0, %v12616_v56, %v1775_v46  ;;  %12622 = vst [vmem:[#allocation27_spill] sm:$0xff] %v9587_v24  ;;  %v1295_v12 = vmax.f32 %v1243_v18, 0.0  ;;  %v12268_v54 = vshrl.u32 %v9587_v24, 16  ;;  %v12270_v40 = vshll.u32 %v9587_v24, 16  ;;  %3645 = vmatprep.subr.bf16.mxu0 %v9149_v27  ;;  %vm12631_vm8 = vmmov %vm12625_vm7 }
 0x176   : > { %12618 = vst [vmem:[#allocation26_spill] sm:$0xff] %v9568_v20  ;;  %v12266_v52 = vshrl.u32 %v9568_v20, 16  ;;  %v12269_v63 = vshll.u32 %v9568_v20, 16  ;;  %v9601_v23 = vsel %vm12625_vm7, %v1599_v34, %v1603_v59  ;;  %v1293_v46 = vmax.f32 %v1235_v36, 0.0  ;;  %vm12641_vm15 = vmmov %vm12625_vm7 }
 0x177   : > { %v12271_v10 = vshrl.u32 %v9601_v23, 16  ;;  %v12273_v32 = vshll.u32 %v9601_v23, 16  ;;  %v1439_v30 = vsel %vm9574_vm1, %v1295_v12, 0.0  ;;  %v9619_v34 = vrot.slane %v12268_v54, 7  ;;  %vm12643_vm9 = vmmov %vm12617_vm0 }
 0x178   : > { %v2176_v18 = vrot.slane %v12266_v52, 7  ;;  %v1437_v36 = vsel %vm9593_vm5, %v1293_v46, 0.0  ;;  %v1296_v56 = vmax.f32 %v1246_v37, 0.0  ;;  %v2068_v52 = vor.u32 %v12272_v44, %v9405_v2  ;;  %vm12645_vm14 = vmmov %vm12617_vm0 }
 0x179   : > { %v2073_v25 = vrot.slane %v12271_v10, 7  ;;  %v1238_v0 = vadd.f32 %v9328_v47, %v9222_v1  ;;  %v9632_v19 = vshrl.u32 %v7743_v62, 16  ;;  %v2198_v37 = vor.u32 %v12270_v40, %v9619_v34  ;;  %v7744_v1 = vld [vmem:[#allocation2 + $0x58] sm:$0xff]  ;;  %vm12653_vm10 = vmmov %vm12617_vm0 }
 0x17a   : > { %v2179_v12 = vor.u32 %v12269_v63, %v2176_v18  ;;  %v1440_v21 = vsel %vm808_vm4, %v1296_v56, 0.0  ;;  %v12627_v46 = vrot.slane %v9391_v45, 7  ;;  %v9648_v47 = vshll.u32 %v7744_v1, 16  ;;  %v7679_v62 = vld [vmem:[%s12159_s3 + $0x78] sm:$0xff]   ;;  %vm12655_vm3 = vmmov %vm12617_vm0 }
 0x17b   : > { %12626 = vst [vmem:[#allocation28_spill] sm:$0xff] %v9632_v19  ;;  %v9658_v29 = vpack.c.bf16 %v1440_v21, %v1439_v30  ;;  %v1294_v56 = vmax.f32 %v1238_v0, 0.0  ;;  %v1607_v40 = vor.u32 %v9632_v19, %v1603_v59  ;;  %v1779_v10 = vrot.slane %v9155_v28, 1  ;;  %3646 = vmatpush1.bf16.msra.mxu0 %v7679_v62  ;;  %vm12657_vm0 = vmmov %vm12625_vm7 }
 0x17c   : > { %v2069_v54 = vsel %vm1921_vm6, %v12627_v46, %v2068_v52  ;;  %12630 = vst [vmem:[#allocation30_spill] sm:$0xff] %v9648_v47  ;;  %v2076_v52 = vor.u32 %v12273_v32, %v2073_v25  ;;  %v2180_v3 = vsel %vm1921_vm6, %v9486_v61, %v2179_v12  ;;  %v2199_v46 = vsel %vm1921_vm6, %v2176_v18, %v2198_v37  ;;  %vm12665_vm1 = vmmov %vm12621_vm2 }
 0x17d   : > { %7265 = vmatprep.mubr.bf16.mxu0 %v2180_v3  ;;  %v1611_v27 = vrot.slane %v9648_v47, 1  ;;  %1492 = vst [vmem:[#allocation2 + $0xc8] sm:$0xff] %v9658_v29  ;;  %v1438_v61 = vsel %vm9644_vm13, %v1294_v56, 0.0  ;;  %v1781_v30 = vrot.slane %v9309_v16, 1  ;;  %v12276_v12 = vrot.slane %v9632_v19, 7  ;;  %vm12667_vm2 = vmmov %vm12665_vm1 }
 0x17e   : > { %v2077_v44 = vsel %vm1921_vm6, %v9480_v41, %v2076_v52  ;;  %7266 = vmatmul.mubr.bf16.gmra.mrb[40].mxu0 %v2199_v46  ;;  %v9671_v18 = vpack.c.bf16 %v1438_v61, %v1437_v36  ;;  %v12633_v0 = vrot.slane %v9186_v43, 1  ;;  %v9681_v37 = vshrl.u32 %v7744_v1, 16  ;;  %vm12668_vm5 = vmmov %vm12657_vm0 }
 0x17f   : > { %2694 = vmatprep.mubr.bf16.mxu1 %v2077_v44  ;;  %v9674_v59 = vsel %vm12631_vm8, %v1607_v40, %v1611_v27  ;;  %v9689_v40 = vsel %vm12637_vm11, %v1779_v10, %v1781_v30  ;;  %v2087_v1 = vor.u32 %v12276_v12, %v9552_v57  ;;  %v12640_v46 = vrot.slane %v9531_v39, 7  ;;  %vm12675_vm7 = vmmov %vm12657_vm0 }
 0x180   : > { %12632 = vst [vmem:[#allocation31_spill] sm:$0xff] %v9674_v59  ;;  %v9679_v41 = vsel %vm12634_vm12, %v12633_v0, %v1779_v10  ;;  %12636 = vst [vmem:[#allocation23_spill] sm:$0xff] %v9681_v37  ;;  %2695 = vmatmul.mubr.bf16.gmra.mrb[60].mxu1 %v2069_v54  ;;  %v12274_v63 = vshrl.u32 %v9674_v59, 16  ;;  %v12281_v21 = vshll.u32 %v9674_v59, 16  ;;  %v1615_v62 = vor.u32 %v9681_v37, %v1611_v27 }
 0x181   : > { %12635 = vst [vmem:[#allocation33_spill] sm:$0xff] %v9679_v41  ;;  %v12275_v44 = vshrl.u32 %v9679_v41, 16  ;;  %v12282_v36 = vshll.u32 %v9679_v41, 16  ;;  %1491 = vst [vmem:[#allocation2 + $0xc0] sm:$0xff] %v9671_v18  ;;  %v9696_v54 = vshll.u32 %v8896_v48, 16  ;;  %v12283_v56 = vshrl.u32 %v9689_v40, 16 }
 0x182   : > { %12638 = vst [vmem:[#allocation25_spill] sm:$0xff] %v9689_v40  ;;  %v2092_v52 = vrot.slane %v12274_v63, 7  ;;  %v2088_v61 = vsel %vm1921_vm6, %v12640_v46, %v2087_v1  ;;  %v1783_v27 = vrot.slane %v9268_v11, 1  ;;  %v1785_v32 = vrot.slane %v9432_v8, 1  ;;  %vm12677_vm4 = vmmov %vm12665_vm1 }
 0x183   : > { %12639 = vst [vmem:[#allocation35_spill] sm:$0xff] %v9696_v54  ;;  %v2214_v3 = vrot.slane %v12275_v44, 7  ;;  %v1619_v0 = vrot.slane %v9696_v54, 1  ;;  %v2233_v12 = vrot.slane %v12283_v56, 7  ;;  %v9727_v20 = vshrl.u32 %v8896_v48, 16  ;;  %vm12678_vm13 = vmmov %vm12665_vm1 }
 0x184   : > { %v2095_v63 = vor.u32 %v12281_v21, %v2092_v52  ;;  %v9721_v1 = vsel %vm12643_vm9, %v1781_v30, %v1783_v27  ;;  %v9724_v46 = vsel %vm12645_vm14, %v1783_v27, %v1785_v32  ;;  %v12647_v56 = vshll.u32 %v9689_v40, 16  ;;  %vm12679_vm8 = vmmov %vm12657_vm0 }
 0x185   : > { %v2217_v44 = vor.u32 %v12282_v36, %v2214_v3  ;;  %v9718_v24 = vsel %vm12641_vm15, %v1615_v62, %v1619_v0  ;;  %12644 = vst [vmem:[#allocation37_spill] sm:$0xff] %v9721_v1  ;;  %12646 = vst [vmem:[#allocation38_spill] sm:$0xff] %v9724_v46  ;;  %v12288_v27 = vshrl.u32 %v9721_v1, 16  ;;  %v12287_v48 = vshrl.u32 %v9724_v46, 16 }
 0x186   : > { %12642 = vst [vmem:[#allocation36_spill] sm:$0xff] %v9718_v24  ;;  %v2096_v21 = vsel %vm1921_vm6, %v2073_v25, %v2095_v63  ;;  %v2236_v10 = vor.u32 %v12647_v56, %v2233_v12  ;;  %v12286_v62 = vshrl.u32 %v9718_v24, 16  ;;  %v12298_v63 = vshll.u32 %v9724_v46, 16  ;;  %v1846_v46 = vld [vmem:[#allocation2 + $0xd0] sm:$0x1]  ;;  %vm12684_vm12 = vmmov %vm12657_vm0 }
 0x187   : > { %v2218_v36 = vsel %vm1921_vm6, %v9619_v34, %v2217_v44  ;;  %2702 = vmatprep.mubr.bf16.mxu1 %v2096_v21  ;;  %v12648_v44 = vld [vmem:[#allocation29_spill] sm:$0xff]  ;;  %v2252_v21 = vrot.slane %v12288_v27, 7  ;;  %v1623_v41 = vor.u32 %v9727_v20, %v1619_v0  ;;  %v9750_v30 = vshll.u32 %v8894_v38, 16  ;;  %vm12692_vm15 = vmmov %vm12657_vm0 }
 0x188   : > { %7269 = vmatprep.mubr.bf16.mxu0 %v2218_v36  ;;  %v2237_v25 = vsel %vm1921_vm6, %v2214_v3, %v2236_v10  ;;  %2703 = vmatmul.mubr.bf16.gmra.mrb[64].mxu1 %v2088_v61  ;;  %v2111_v34 = vrot.slane %v12286_v62, 7  ;;  %v2271_v36 = vrot.slane %v12287_v48, 7  ;;  %v12650_v3 = vshll.u32 %v9718_v24, 16  ;;  %v9762_v48 = vld [vmem:[%s12159_s3 + $0x200] sm:$0xff]   ;;  %vm12698_vm9 = vmmov %vm12657_vm0 }
 0x189   : > { %7270 = vmatmul.mubr.bf16.gmra.mrb[44].mxu0 %v2237_v25  ;;  %12649 = vst [vmem:[#allocation29_spill] sm:$0xff] %v9750_v30  ;;  %v12651_v61 = vrot.slane %v9681_v37, 7  ;;  %v1787_v25 = vrot.slane %v9412_v58, 1  ;;  %v1789_v56 = vrot.slane %v9556_v7, 1  ;;  %v12652_v0 = vshll.u32 %v9721_v1, 16  ;;  %7353 = vmatprep.subr.bf16.mxu0 %v9762_v48  ;;  %vm12701_vm14 = vmmov %vm12657_vm0 }
 0x18a   : > { %v2114_v10 = vor.u32 %v12650_v3, %v2111_v34  ;;  %v2274_v40 = vor.u32 %v12298_v63, %v2271_v36  ;;  %v1627_v3 = vrot.slane %v9750_v30, 1  ;;  %vm3056_vm11 = vsmask.f32 4352 }
 0x18b   : > { %v2106_v62 = vor.u32 %v12651_v61, %v9648_v47  ;;  %v2255_v27 = vor.u32 %v12652_v0, %v2252_v21  ;;  %v9772_v14 = vsel %vm12653_vm10, %v1785_v32, %v1787_v25  ;;  %v9775_v53 = vsel %vm12655_vm3, %v1787_v25, %v1789_v56  ;;  %vm12707_vm10 = vmmov %vm12657_vm0 }
 0x18c   : > { %v2115_v61 = vsel %vm1921_vm6, %v2092_v52, %v2114_v10  ;;  %12654 = vst [vmem:[#allocation39_spill] sm:$0xff] %v9772_v14  ;;  %12656 = vst [vmem:[#allocation40_spill] sm:$0xff] %v9775_v53  ;;  %v9778_v47 = vshrl.u32 %v8894_v38, 16  ;;  %v2275_v63 = vsel %vm1921_vm6, %v2252_v21, %v2274_v40  ;;  %v9784_v6 = vsel %vm12657_vm0, %v1623_v41, %v1627_v3 }
 0x18d   : > { %2710 = vmatprep.mubr.bf16.mxu1 %v2115_v61  ;;  %v2256_v0 = vsel %vm1921_vm6, %v2233_v12, %v2255_v27  ;;  %12658 = vst [vmem:[#allocation41_spill] sm:$0xff] %v9784_v6  ;;  %v12301_v52 = vshrl.u32 %v9772_v14, 16  ;;  %v12302_v32 = vshrl.u32 %v9784_v6, 16  ;;  %v12303_v25 = vshrl.u32 %v9775_v53, 16  ;;  %vm12711_vm3 = vmmov %vm12657_vm0 }
 0x18e   : > { %7273 = vmatprep.mubr.bf16.mxu0 %v2256_v0  ;;  %v12659_v61 = vrot.slane %v9632_v19, 7  ;;  %v1631_v27 = vor.u32 %v9778_v47, %v1627_v3  ;;  %v9803_v10 = vshll.u32 %v9031_v49, 16  ;;  %v9806_v38 = vrot.slane %v9536_v15, 1 }
 0x18f   : > { %v2290_v41 = vrot.slane %v12301_v52, 7  ;;  %v2130_v21 = vrot.slane %v12302_v32, 7  ;;  %v2309_v0 = vrot.slane %v12303_v25, 7  ;;  %v12662_v3 = vrot.slane %v9727_v20, 7 }
 0x190   : > { %v2107_v12 = vsel %vm1921_vm6, %v12659_v61, %v2106_v62  ;;  %12660 = vst [vmem:[#allocation42_spill] sm:$0xff] %v9806_v38  ;;  %v12661_v62 = vshll.u32 %v9772_v14, 16  ;;  %v1866_v52 = vrot.slane %v9671_v18, 1  ;;  %v1870_v32 = vrot.slane %v1846_v46, 1 }
 0x191   : > { %2711 = vmatmul.mubr.bf16.gmra.mrb[68].mxu1 %v2107_v12  ;;  %7274 = vmatmul.mubr.bf16.gmra.mrb[48].mxu0 %v2275_v63  ;;  %v2125_v12 = vor.u32 %v12662_v3, %v9696_v54  ;;  %v12663_v40 = vshll.u32 %v9784_v6, 16  ;;  %v12664_v1 = vshll.u32 %v9775_v53, 16  ;;  %v1635_v57 = vrot.slane %v9803_v10, 1 }
 0x192   : > { %v2293_v61 = vor.u32 %v12661_v62, %v2290_v41  ;;  %v9821_v63 = vsel %vm12665_vm1, %v1789_v56, %v9806_v38  ;;  %v1867_v46 = vsel %vm12667_vm2, %v9806_v38, %v1866_v52  ;;  %v12322_v54 = vrot.slane %v9778_v47, 7  ;;  %vm12716_vm1 = vmmov %vm12657_vm0 }
 0x193   : > { %v2133_v25 = vor.u32 %v12663_v40, %v2130_v21  ;;  %v2312_v24 = vor.u32 %v12664_v1, %v2309_v0  ;;  %12666 = vst [vmem:[#allocation43_spill] sm:$0xff] %v9821_v63  ;;  %v12317_v14 = vshrl.u32 %v9821_v63, 16  ;;  %v9830_v1 = vsel %vm12668_vm5, %v1631_v27, %v1635_v57  ;;  %vm12719_vm2 = vmmov %vm12657_vm0 }
 0x194   : > { %v2294_v62 = vsel %vm1921_vm6, %v2271_v36, %v2293_v61  ;;  %12669 = vst [vmem:[#allocation44_spill] sm:$0xff] %v9830_v1  ;;  %v2345_v53 = vshrl.u32 %v1867_v46, 16  ;;  %v12319_v36 = vshrl.u32 %v9830_v1, 16  ;;  %v2348_v6 = vshll.u32 %v1867_v46, 16  ;;  %v12673_v61 = vld [vmem:[#allocation7_spill] sm:$0xff]  ;;  %vm12722_vm5 = vmmov %vm12657_vm0 }
 0x195   : > { %v2134_v40 = vsel %vm1921_vm6, %v2111_v34, %v2133_v25  ;;  %7277 = vmatprep.mubr.bf16.mxu0 %v2294_v62  ;;  %v2313_v56 = vsel %vm1921_vm6, %v2290_v41, %v2312_v24  ;;  %v2328_v3 = vrot.slane %v12317_v14, 7  ;;  %v9839_v34 = vshrl.u32 %v9031_v49, 16 }
 0x196   : > { %2718 = vmatprep.mubr.bf16.mxu1 %v2134_v40  ;;  %v2347_v38 = vrot.slane %v2345_v53, 7  ;;  %v9842_v25 = vshll.u32 %v9023_v55, 16  ;;  %v12671_v27 = vrot.slane %v9681_v37, 7  ;;  %v2149_v24 = vrot.slane %v12319_v36, 7  ;;  %v12674_v37 = vld [vmem:[#allocation32_spill] sm:$0xff] }
 0x197   : > { %v12672_v41 = vshll.u32 %v9821_v63, 16  ;;  %v1868_v14 = vrot.slane %v9658_v29, 1  ;;  %v2144_v53 = vor.u32 %v12322_v54, %v9750_v30  ;;  %v1639_v49 = vor.u32 %v9839_v34, %v1635_v57 }
 0x198   : > { %12670 = vst [vmem:[#allocation45_spill] sm:$0xff] %v9842_v25  ;;  %v2126_v62 = vsel %vm1921_vm6, %v12671_v27, %v2125_v12  ;;  %v1643_v46 = vrot.slane %v9842_v25, 1  ;;  %v1540_v12 = vsel %vm12675_vm7, %v12674_v37, %v12673_v61  ;;  %v12676_v27 = vshll.u32 %v9830_v1, 16  ;;  %vm12737_vm7 = vmmov %vm12677_vm4 }
 0x199   : > { %v2331_v40 = vor.u32 %v12672_v41, %v2328_v3  ;;  %2719 = vmatmul.mubr.bf16.gmra.mrb[72].mxu1 %v2126_v62  ;;  %7278 = vmatmul.mubr.bf16.gmra.mrb[52].mxu0 %v2313_v56  ;;  %v1869_v62 = vsel %vm12677_vm4, %v1866_v52, %v1868_v14  ;;  %v1871_v63 = vsel %vm12678_vm13, %v1868_v14, %v1870_v32  ;;  %v12680_v52 = vshrl.u32 %v12648_v44, 16  ;;  %vm12826_vm13 = vmmov %vm12677_vm4 }
 0x19a   : > { %v2152_v36 = vor.u32 %v12676_v27, %v2149_v24  ;;  %v2350_v54 = vor.u32 %v2348_v6, %v2347_v38  ;;  %v9866_v57 = vsel %vm12679_vm8, %v1639_v49, %v1643_v46  ;;  %v2364_v30 = vshrl.u32 %v1869_v62, 16  ;;  %vm12838_vm8 = vmmov %vm12657_vm0 }
 0x19b   : > { %v2332_v41 = vsel %vm1921_vm6, %v2309_v0, %v2331_v40  ;;  %v2367_v19 = vshll.u32 %v1869_v62, 16  ;;  %v12327_v37 = vshrl.u32 %v9866_v57, 16  ;;  %v12330_v56 = vshll.u32 %v9866_v57, 16 }
 0x19c   : > { %7281 = vmatprep.mubr.bf16.mxu0 %v2332_v41  ;;  %v2153_v59 = vsel %vm1921_vm6, %v2130_v21, %v2152_v36  ;;  %v2383_v61 = vshrl.u32 %v1871_v63, 16  ;;  %v2366_v0 = vrot.slane %v2364_v30, 7  ;;  %v3072_v40 = vrot.slane %v12680_v52, 3 }
 0x19d   : > { %2726 = vmatprep.mubr.bf16.mxu1 %v2153_v59  ;;  %v3078_v14 = vshrl.u32 %v1540_v12, 16  ;;  %v3081_v32 = vshll.u32 %v1540_v12, 16  ;;  %v2168_v6 = vrot.slane %v12327_v37, 7  ;;  %v2386_v27 = vshll.u32 %v1871_v63, 16  ;;  %v1493_v37 = vld [vmem:[#allocation2] sm:$0xf8] }
 0x19e   : > { %v2385_v49 = vrot.slane %v2383_v61, 7  ;;  %v9876_v41 = vshrl.u32 %v9023_v55, 16  ;;  %v2351_v21 = vsel %vm1921_vm6, %v2328_v3, %v2350_v54  ;;  %v2369_v36 = vor.u32 %v2367_v19, %v2366_v0 }
 0x19f   : > { %v12682_v62 = vshll.u32 %v12648_v44, 16  ;;  %v9882_v30 = vshll.u32 %v9186_v43, 16  ;;  %v12683_v52 = vrot.slane %v9727_v20, 7  ;;  %v2171_v61 = vor.u32 %v12330_v56, %v2168_v6 }
 0x1a0   : > { %12681 = vst [vmem:[#allocation7_spill] sm:$0xff] %v9876_v41  ;;  %v12333_v63 = vrot.slane %v9839_v34, 7  ;;  %v1647_v55 = vor.u32 %v9876_v41, %v1643_v46  ;;  %v2370_v19 = vsel %vm1921_vm6, %v2347_v38, %v2369_v36  ;;  %v3080_v54 = vrot.slane %v3078_v14, 3 }
 0x1a1   : > { %v3075_v59 = vrot.slane %v12682_v62, 4  ;;  %v2145_v12 = vsel %vm1921_vm6, %v12683_v52, %v2144_v53  ;;  %v3083_v44 = vrot.slane %v3081_v32, 4  ;;  %v1651_v3 = vrot.slane %v9882_v30, 1  ;;  %7282 = vmatmul.mubr.bf16.gmra.mrb[56].mxu0 %v2351_v21 }
 0x1a2   : > { %2727 = vmatmul.mubr.bf16.gmra.mrb[76].mxu1 %v2145_v12  ;;  %v2172_v62 = vsel %vm1921_vm6, %v2149_v24, %v2171_v61  ;;  %v2388_v1 = vor.u32 %v2386_v27, %v2385_v49  ;;  %7285 = vmatprep.mubr.bf16.mxu0 %v2370_v19  ;;  %v3058_v52 = vshrl.u32 %v1493_v37, 16  ;;  %v3061_v56 = vshll.u32 %v1493_v37, 16 }
 0x1a3   : > { %2734 = vmatprep.mubr.bf16.mxu1 %v2172_v62  ;;  %v9895_v53 = vsel %vm12684_vm12, %v1647_v55, %v1651_v3  ;;  %v2163_v46 = vor.u32 %v12333_v63, %v9803_v10  ;;  %v3076_v32 = vor.u32 %v3075_v59, %v3072_v40  ;;  %v3084_v21 = vor.u32 %v3083_v44, %v3080_v54  ;;  %vm12839_vm12 = vmmov %vm12657_vm0 }
 0x1a4   : > { %v12331_v38 = vshrl.u32 %v9895_v53, 16  ;;  %v12332_v14 = vshll.u32 %v9895_v53, 16  ;;  %v9903_v24 = vshrl.u32 %v9186_v43, 16  ;;  %v9906_v49 = vshll.u32 %v9155_v28, 16 }
 0x1a5   : > { %v2389_v27 = vsel %vm1921_vm6, %v2366_v0, %v2388_v1  ;;  %v3060_v36 = vrot.slane %v3058_v52, 3  ;;  %v3063_v12 = vrot.slane %v3061_v56, 4  ;;  %v12687_v40 = vrot.slane %v9778_v47, 7 }
 0x1a6   : > { %12685 = vst [vmem:[#allocation32_spill] sm:$0xff] %v9903_v24  ;;  %12686 = vst [vmem:[#allocation46_spill] sm:$0xff] %v9906_v49  ;;  %v2187_v37 = vrot.slane %v12331_v38, 7  ;;  %v1655_v61 = vor.u32 %v9903_v24, %v1651_v3  ;;  %v1659_v55 = vrot.slane %v9906_v49, 1  ;;  %v12688_v19 = vshrl.u32 %v8262_v35, 16  ;;  %v12690_v3 = vld [vmem:[#allocation8_spill] sm:$0xff] }
 0x1a7   : > { %v2164_v43 = vsel %vm1921_vm6, %v12687_v40, %v2163_v46  ;;  %v2181_v0 = vrot.slane %v9876_v41, 7  ;;  %v3085_v54 = vsel %vm3056_vm11, %v3076_v32, %v3084_v21  ;;  %v12689_v56 = vshll.u32 %v8262_v35, 16 }
 0x1a8   : > { %v2190_v59 = vor.u32 %v12332_v14, %v2187_v37  ;;  %v3065_v1 = vrot.slane %v12688_v19, 3  ;;  %v12691_v62 = vshrl.u32 %v12690_v3, 16  ;;  %v9927_v38 = vsel %vm12692_vm15, %v1655_v61, %v1659_v55  ;;  %vm12841_vm15 = vmmov %vm12677_vm4 }
 0x1a9   : > { %v3066_v44 = vrot.slane %v12689_v56, 4  ;;  %7286 = vmatmul.mubr.bf16.gmra.mrb[60].mxu0 %v2389_v27  ;;  %v12693_v40 = vshll.u32 %v12690_v3, 16  ;;  %v12336_v14 = vshrl.u32 %v9927_v38, 16  ;;  %v12337_v32 = vshll.u32 %v9927_v38, 16 }
 0x1aa   : > { %2735 = vmatmul.mubr.bf16.gmra.mrb[80].mxu1 %v2164_v43  ;;  %v3107_v52 = vrot.slane %v12691_v62, 3  ;;  %v2191_v46 = vsel %vm1921_vm6, %v2168_v6, %v2190_v59  ;;  %3647 = vmatprep.mubr.bf16.mxu0 %v3085_v54  ;;  %v3064_v35 = vor.u32 %v3063_v12, %v3060_v36  ;;  %v9935_v43 = vshrl.u32 %v9155_v28, 16  ;;  %v12694_v59 = vld [vmem:[#allocation4_spill] sm:$0xff]  ;;  %v12695_v36 = vld [vmem:[#allocation6_spill] sm:$0xff] }
 0x1ab   : > { %v3108_v19 = vrot.slane %v12693_v40, 4  ;;  %2742 = vmatprep.mubr.bf16.mxu1 %v2191_v46  ;;  %v9938_v56 = vshll.u32 %v9309_v16, 16  ;;  %v2182_v27 = vor.u32 %v2181_v0, %v9842_v25  ;;  %v2206_v6 = vrot.slane %v12336_v14, 7  ;;  %v12696_v40 = vld [vmem:[#allocation10_spill] sm:$0xff] }
 0x1ac   : > { %v3067_v61 = vor.u32 %v3066_v44, %v3065_v1  ;;  %v3103_v3 = vrot.slane %v12694_v59, 3  ;;  %v1663_v62 = vor.u32 %v9935_v43, %v1659_v55  ;;  %v3104_v12 = vrot.slane %v12695_v36, 4 }
 0x1ad   : > { %v1667_v54 = vrot.slane %v9938_v56, 1  ;;  %v3109_v46 = vor.u32 %v3108_v19, %v3107_v52  ;;  %v2209_v28 = vor.u32 %v12337_v32, %v2206_v6  ;;  %v12697_v63 = vshrl.u32 %v12696_v40, 16 }
 0x1ae   : > { %v3068_v25 = vsel %vm3056_vm11, %v3064_v35, %v3067_v61  ;;  %v9956_v1 = vshrl.u32 %v9309_v16, 16  ;;  %v9959_v55 = vshll.u32 %v9268_v11, 16  ;;  %v12699_v44 = vrot.slane %v9839_v34, 7 }
 0x1af   : > { %v3119_v41 = vrot.slane %v12697_v63, 3  ;;  %v9953_v14 = vsel %vm12698_vm9, %v1663_v62, %v1667_v54  ;;  %v12700_v19 = vshll.u32 %v12696_v40, 16  ;;  %v2200_v63 = vrot.slane %v9903_v24, 7  ;;  %v7688_v62 = vld [vmem:[%s12159_s3 + $0x208] sm:$0xff]   ;;  %vm12843_vm9 = vmmov %vm12677_vm4 }
 0x1b0   : > { %v2183_v52 = vsel %vm1921_vm6, %v12699_v44, %v2182_v27  ;;  %v12340_v35 = vshrl.u32 %v9953_v14, 16  ;;  %v2210_v16 = vsel %vm1921_vm6, %v2187_v37, %v2209_v28  ;;  %v12339_v36 = vshll.u32 %v9953_v14, 16 }
 0x1b1   : > { %v3120_v59 = vrot.slane %v12700_v19, 4  ;;  %v1671_v32 = vor.u32 %v9956_v1, %v1667_v54  ;;  %v1675_v27 = vrot.slane %v9959_v55, 1  ;;  %3648 = vmatmul.mubr.bf16.vlgmr.msra.gmra.mrb[64].mxu0 %v3068_v25  ;;  %v3110_v40 = vsel %vm3056_vm11, %v3084_v21, %v3109_v46 }
 0x1b2   : > { %2743 = vmatmul.mubr.bf16.gmra.mrb[84].mxu1 %v2183_v52  ;;  %v2225_v44 = vrot.slane %v12340_v35, 7  ;;  %3655 = vmatprep.mubr.bf16.mxu0 %v3110_v40  ;;  %v3105_v19 = vor.u32 %v3104_v12, %v3103_v3  ;;  %v2201_v28 = vor.u32 %v2200_v63, %v9882_v30  ;;  %v9987_v54 = vshrl.u32 %v9268_v11, 16 }
 0x1b3   : > { %2750 = vmatprep.mubr.bf16.mxu1 %v2210_v16  ;;  %v9979_v24 = vsel %vm12701_vm14, %v1671_v32, %v1675_v27  ;;  %7354 = vmatpush3.bf16.msra.mxu0 %v9762_v48  ;;  %v3121_v37 = vor.u32 %v3120_v59, %v3119_v41  ;;  %v9990_v52 = vshll.u32 %v9432_v8, 16  ;;  %v3115_v3 = vrot.slane %v8650_v51, 3  ;;  %v12702_v48 = vld [vmem:[#allocation3_spill] sm:$0xff]  ;;  %v12703_v16 = vld [vmem:[#allocation14_spill] sm:$0xff]  ;;  %vm12849_vm14 = vmmov %vm12677_vm4 }
 0x1b4   : > { %7355 = vmatprep.subr.bf16.mxu0 %v7688_v62  ;;  %v2228_v25 = vor.u32 %v12339_v36, %v2225_v44  ;;  %v3106_v32 = vsel %vm3056_vm11, %v3067_v61, %v3105_v19  ;;  %v3116_v41 = vrot.slane %v12702_v48, 4  ;;  %v1679_v12 = vor.u32 %v9987_v54, %v1675_v27 }
 0x1b5   : > { %v2202_v59 = vsel %vm1921_vm6, %v2181_v0, %v2201_v28  ;;  %v12704_v40 = vshrl.u32 %v12703_v16, 16  ;;  %v2219_v11 = vrot.slane %v9935_v43, 7  ;;  %v1683_v35 = vrot.slane %v9990_v52, 1 }
 0x1b6   : > { %v3122_v21 = vsel %vm3056_vm11, %v3109_v46, %v3121_v37  ;;  %v2229_v61 = vsel %vm1921_vm6, %v2206_v6, %v2228_v25  ;;  %v12705_v51 = vshrl.u32 %v9979_v24, 16  ;;  %v12342_v27 = vshll.u32 %v9979_v24, 16  ;;  %v7693_v6 = vld [vmem:[%s12159_s3 + $0x210] sm:$0xff]  }
 0x1b7   : > { %7356 = vmatpush3.bf16.msra.mxu0 %v7688_v62  ;;  %v3131_v36 = vrot.slane %v12704_v40, 3  ;;  %v12706_v0 = vshll.u32 %v12703_v16, 16  ;;  %v10009_v28 = vsel %vm12707_vm10, %v1679_v12, %v1683_v35  ;;  %v10012_v40 = vshrl.u32 %v9432_v8, 16  ;;  %vm12851_vm10 = vmmov %vm12657_vm0 }
 0x1b8   : > { %v2244_v48 = vrot.slane %v12705_v51, 7  ;;  %v10015_v46 = vshll.u32 %v9412_v58, 16  ;;  %v3117_v25 = vor.u32 %v3116_v41, %v3115_v3  ;;  %v12351_v12 = vshrl.u32 %v10009_v28, 16  ;;  %7357 = vmatprep.subr.bf16.mxu0 %v7693_v6  ;;  %v12708_v51 = vld [vmem:[#allocation9_spill] sm:$0xff] }
 0x1b9   : > { %3656 = vmatmul.mubr.bf16.gmra.mrb[68].mxu0 %v3106_v32  ;;  %v3132_v62 = vrot.slane %v12706_v0, 4  ;;  %v2220_v32 = vor.u32 %v2219_v11, %v9906_v49  ;;  %v1687_v8 = vor.u32 %v10012_v40, %v1683_v35  ;;  %v3128_v0 = vrot.slane %v12708_v51, 4 }
 0x1ba   : > { %2751 = vmatmul.mubr.bf16.gmra.mrb[88].mxu1 %v2202_v59  ;;  %3663 = vmatprep.mubr.bf16.mxu0 %v3122_v21  ;;  %v2247_v59 = vor.u32 %v12342_v27, %v2244_v48  ;;  %v3127_v21 = vrot.slane %v8835_v33, 3  ;;  %v2238_v3 = vrot.slane %v9956_v1, 7  ;;  %v3118_v41 = vsel %vm3056_vm11, %v3105_v19, %v3117_v25 }
 0x1bb   : > { %2758 = vmatprep.mubr.bf16.mxu1 %v2229_v61  ;;  %v3133_v16 = vor.u32 %v3132_v62, %v3131_v36  ;;  %v1691_v61 = vrot.slane %v10015_v46, 1  ;;  %7358 = vmatpush3.bf16.msra.mxu0 %v7693_v6  ;;  %v2221_v49 = vsel %vm1921_vm6, %v2200_v63, %v2220_v32  ;;  %v12709_v36 = vshrl.u32 %v9084_v60, 16 }
 0x1bc   : > { %v2248_v27 = vsel %vm1921_vm6, %v2225_v44, %v2247_v59  ;;  %v2263_v35 = vrot.slane %v12351_v12, 7  ;;  %v12343_v6 = vshll.u32 %v10009_v28, 16  ;;  %v12710_v51 = vshll.u32 %v9084_v60, 16 }
 0x1bd   : > { %v3143_v62 = vrot.slane %v12709_v36, 3  ;;  %v3134_v33 = vsel %vm3056_vm11, %v3121_v37, %v3133_v16  ;;  %v10041_v63 = vsel %vm12711_vm3, %v1687_v8, %v1691_v61  ;;  %v3129_v44 = vor.u32 %v3128_v0, %v3127_v21  ;;  %vm12853_vm3 = vmmov %vm12677_vm4 }
 0x1be   : > { %v3144_v19 = vrot.slane %v12710_v51, 4  ;;  %v2239_v32 = vor.u32 %v2238_v3, %v9938_v56  ;;  %v10048_v59 = vshll.u32 %v9556_v7, 16  ;;  %v2266_v37 = vor.u32 %v12343_v6, %v2263_v35 }
 0x1bf   : > { %v3130_v8 = vsel %vm3056_vm11, %v3117_v25, %v3129_v44  ;;  %v3139_v36 = vrot.slane %v9015_v5, 3  ;;  %v3140_v21 = vrot.slane %v8853_v26, 4  ;;  %v12712_v0 = vshrl.u32 %v9229_v31, 16 }
 0x1c0   : > { %v3145_v60 = vor.u32 %v3144_v19, %v3143_v62  ;;  %v2257_v51 = vrot.slane %v9987_v54, 7  ;;  %v1699_v6 = vrot.slane %v10048_v59, 1  ;;  %v2267_v62 = vsel %vm1921_vm6, %v2244_v48, %v2266_v37 }
 0x1c1   : > { %3664 = vmatmul.mubr.bf16.gmra.mrb[72].mxu0 %v3118_v41  ;;  %v12347_v5 = vshll.u32 %v10041_v63, 16  ;;  %v10076_v48 = vshll.u32 %v9536_v15, 16 }
 0x1c2   : > { %2759 = vmatmul.mubr.bf16.gmra.mrb[92].mxu1 %v2221_v49  ;;  %v10044_v49 = vshrl.u32 %v9412_v58, 16  ;;  %3671 = vmatprep.mubr.bf16.mxu0 %v3134_v33  ;;  %v2240_v58 = vsel %vm1921_vm6, %v2219_v11, %v2239_v32  ;;  %v3155_v33 = vrot.slane %v12712_v0, 3  ;;  %v3146_v26 = vsel %vm3056_vm11, %v3133_v16, %v3145_v60 }
 0x1c3   : > { %2766 = vmatprep.mubr.bf16.mxu1 %v2248_v27  ;;  %v12350_v27 = vshrl.u32 %v10041_v63, 16  ;;  %v10073_v32 = vshrl.u32 %v9556_v7, 16  ;;  %v2258_v37 = vor.u32 %v2257_v51, %v9959_v55  ;;  %v3151_v7 = vrot.slane %v9167_v42, 3 }
 0x1c4   : > { %v1695_v41 = vor.u32 %v10044_v49, %v1691_v61  ;;  %v12713_v61 = vshll.u32 %v9229_v31, 16  ;;  %v3141_v31 = vor.u32 %v3140_v21, %v3139_v36  ;;  %v2276_v21 = vrot.slane %v10012_v40, 7 }
 0x1c5   : > { %v2282_v11 = vrot.slane %v12350_v27, 7  ;;  %v1703_v0 = vor.u32 %v10073_v32, %v1699_v6  ;;  %v2259_v36 = vsel %vm1921_vm6, %v2238_v3, %v2258_v37 }
 0x1c6   : > { %v3156_v19 = vrot.slane %v12713_v61, 4  ;;  %v10070_v25 = vsel %vm12657_vm0, %v1695_v41, %v1699_v6  ;;  %v1707_v41 = vrot.slane %v10076_v48, 1  ;;  %v3142_v61 = vsel %vm3056_vm11, %v3129_v44, %v3141_v31 }
 0x1c7   : > { %v12344_v16 = vshrl.u32 %v10070_v25, 16  ;;  %v12715_v44 = vshll.u32 %v9354_v4, 16 }
 0x1c8   : > { %v10099_v37 = vsel %vm12716_vm1, %v1703_v0, %v1707_v41 }
 0x1c9   : > { %3672 = vmatmul.mubr.bf16.gmra.mrb[76].mxu0 %v3130_v8  ;;  %v2285_v8 = vor.u32 %v12347_v5, %v2282_v11  ;;  %v2301_v6 = vrot.slane %v12344_v16, 7  ;;  %v3168_v3 = vrot.slane %v12715_v44, 4  ;;  %v12717_v44 = vshrl.u32 %v9437_v13, 16 }
 0x1ca   : > { %2767 = vmatmul.mubr.bf16.gmra.mrb[96].mxu1 %v2240_v58  ;;  %3679 = vmatprep.mubr.bf16.mxu0 %v3146_v26  ;;  %v3157_v58 = vor.u32 %v3156_v19, %v3155_v33  ;;  %v12345_v26 = vshll.u32 %v10070_v25, 16 }
 0x1cb   : > { %2774 = vmatprep.mubr.bf16.mxu1 %v2267_v62  ;;  %v3152_v62 = vrot.slane %v9028_v50, 4  ;;  %v2286_v19 = vsel %vm1921_vm6, %v2263_v35, %v2285_v8  ;;  %v12714_v50 = vshrl.u32 %v9354_v4, 16  ;;  %v7698_v8 = vld [vmem:[%s12159_s3 + $0x218] sm:$0xff]   ;;  %v3179_v16 = vrot.slane %v12717_v44, 3 }
 0x1cc   : > { %v3158_v33 = vsel %vm3056_vm11, %v3145_v60, %v3157_v58  ;;  %v10102_v60 = vshrl.u32 %v9536_v15, 16  ;;  %v2304_v4 = vor.u32 %v12345_v26, %v2301_v6  ;;  %7359 = vmatprep.subr.bf16.mxu0 %v7698_v8  ;;  %v2295_v26 = vrot.slane %v10044_v49, 7 }
 0x1cd   : > { %v3167_v42 = vrot.slane %v12714_v50, 3  ;;  %v3153_v35 = vor.u32 %v3152_v62, %v3151_v7  ;;  %7360 = vmatpush3.bf16.msra.mxu0 %v7698_v8  ;;  %v3163_v62 = vrot.slane %v9262_v9, 3 }
 0x1ce   : > { %v10113_v15 = vor.u32 %v10102_v60, %v1707_v41  ;;  %v2305_v41 = vsel %vm1921_vm6, %v2282_v11, %v2304_v4 }
 0x1cf   : > { %v3169_v0 = vor.u32 %v3168_v3, %v3167_v42  ;;  %v3154_v7 = vsel %vm3056_vm11, %v3141_v31, %v3153_v35  ;;  %v12718_v3 = vshll.u32 %v9437_v13, 16  ;;  %v2296_v13 = vor.u32 %v2295_v26, %v10015_v46 }
 0x1d1   : > { %3680 = vmatmul.mubr.bf16.gmra.mrb[80].mxu0 %v3142_v61  ;;  %v2277_v61 = vor.u32 %v2276_v21, %v9990_v52  ;;  %v3180_v31 = vrot.slane %v12718_v3, 4 }
 0x1d2   : > { %2775 = vmatmul.mubr.bf16.gmra.mrb[100].mxu1 %v2259_v36  ;;  %3687 = vmatprep.mubr.bf16.mxu0 %v3158_v33  ;;  %v1848_v36 = vshll.u32 %v9671_v18, 16  ;;  %v3164_v33 = vrot.slane %v9170_v17, 4  ;;  %v12348_v17 = vshll.u32 %v10099_v37, 16 }
 0x1d3   : > { %2782 = vmatprep.mubr.bf16.mxu1 %v2286_v19  ;;  %v12346_v19 = vshrl.u32 %v10099_v37, 16  ;;  %v2278_v50 = vsel %vm1921_vm6, %v2257_v51, %v2277_v61  ;;  %v3170_v51 = vsel %vm3056_vm11, %v3157_v58, %v3169_v0  ;;  %v1852_v61 = vshrl.u32 %v9671_v18, 16  ;;  %v12744_v18 = vld [vmem:[#allocation41_spill] sm:$0xff] }
 0x1d4   : > { %v1850_v42 = vrot.slane %v1848_v36, 1  ;;  %v3165_v11 = vor.u32 %v3164_v33, %v3163_v62  ;;  %v3181_v3 = vor.u32 %v3180_v31, %v3179_v16  ;;  %v3176_v62 = vrot.slane %v9298_v22, 4 }
 0x1d5   : > { %v2320_v9 = vrot.slane %v12346_v19, 7  ;;  %v3175_v19 = vrot.slane %v9391_v45, 3  ;;  %v12720_v33 = vshrl.u32 %v9601_v23, 16 }
 0x1d6   : > { %v1851_v8 = vsel %vm12719_vm2, %v10113_v15, %v1850_v42  ;;  %v1854_v58 = vor.u32 %v1852_v61, %v1850_v42  ;;  %v12721_v42 = vshll.u32 %v9601_v23, 16  ;;  %v3182_v45 = vsel %vm3056_vm11, %v3169_v0, %v3181_v3 }
 0x1d7   : > { %v2323_v4 = vor.u32 %v12348_v17, %v2320_v9  ;;  %v2337_v44 = vshrl.u32 %v1851_v8, 16  ;;  %v3191_v5 = vrot.slane %v12720_v33, 3  ;;  %v2314_v17 = vrot.slane %v10073_v32, 7 }
 0x1d8   : > { %v3192_v31 = vrot.slane %v12721_v42, 4  ;;  %v3177_v0 = vor.u32 %v3176_v62, %v3175_v19  ;;  %v2333_v62 = vrot.slane %v10102_v60, 7 }
 0x1d9   : > { %3688 = vmatmul.mubr.bf16.gmra.mrb[84].mxu0 %v3154_v7  ;;  %v2324_v16 = vsel %vm1921_vm6, %v2301_v6, %v2323_v4  ;;  %v7703_v6 = vld [vmem:[%s12159_s3 + $0x228] sm:$0xff]   ;;  %v2315_v23 = vor.u32 %v2314_v17, %v10048_v59 }
 0x1da   : > { %2783 = vmatmul.mubr.bf16.gmra.mrb[104].mxu1 %v2278_v50  ;;  %v12349_v50 = vshll.u32 %v9658_v29, 16  ;;  %3695 = vmatprep.mubr.bf16.mxu0 %v3170_v51  ;;  %v2297_v51 = vsel %vm1921_vm6, %v2276_v21, %v2296_v13  ;;  %v7701_v21 = vld [vmem:[%s12159_s3 + $0x220] sm:$0xff]   ;;  %v3193_v13 = vor.u32 %v3192_v31, %v3191_v5 }
 0x1db   : > { %2790 = vmatprep.mubr.bf16.mxu1 %v2305_v41  ;;  %v3166_v41 = vsel %vm3056_vm11, %v3153_v35, %v3165_v11  ;;  %v2340_v35 = vshll.u32 %v1851_v8, 16  ;;  %v1860_v8 = vshrl.u32 %v9658_v29, 16  ;;  %7361 = vmatprep.subr.bf16.mxu0 %v7701_v21  ;;  %v2316_v31 = vsel %vm1921_vm6, %v2295_v26, %v2315_v23 }
 0x1dc   : > { %v1858_v7 = vrot.slane %v12349_v50, 1  ;;  %v10152_v50 = vrot.slane %v2337_v44, 7  ;;  %7362 = vmatpush3.bf16.msra.mxu0 %v7701_v21  ;;  %v12728_v26 = vshrl.u32 %v9927_v38, 16 }
 0x1dd   : > { %7363 = vmatprep.subr.bf16.mxu0 %v7703_v6 }
 0x1de   : > { %v1859_v22 = vsel %vm12722_vm5, %v1854_v58, %v1858_v7  ;;  %v2342_v4 = vor.u32 %v2340_v35, %v10152_v50  ;;  %v3187_v58 = vrot.slane %v9531_v39, 3  ;;  %v3178_v35 = vsel %vm3056_vm11, %v3165_v11, %v3177_v0 }
 0x1df   : > { %v2356_v44 = vshrl.u32 %v1859_v22, 16  ;;  %v3275_v23 = vrot.slane %v12728_v26, 3  ;;  %v12733_v26 = vld [vmem:[#allocation24_spill] sm:$0xff] }
 0x1e0   : > { %7364 = vmatpush3.bf16.msra.mxu0 %v7703_v6 }
 0x1e1   : > { %3696 = vmatmul.mubr.bf16.gmra.mrb[88].mxu0 %v3166_v41  ;;  %v3188_v41 = vrot.slane %v9405_v2, 4  ;;  %v1862_v2 = vor.u32 %v1860_v8, %v1858_v7  ;;  %v10185_v21 = vrot.slane %v2356_v44, 7  ;;  %v7705_v7 = vld [vmem:[%s12159_s3 + $0x230] sm:$0xff]  }
 0x1e2   : > { %2791 = vmatmul.mubr.bf16.gmra.mrb[108].mxu1 %v2297_v51  ;;  %3703 = vmatprep.mubr.bf16.mxu0 %v3182_v45  ;;  %v12723_v51 = vshrl.u32 %v9895_v53, 16  ;;  %v12725_v45 = vld [vmem:[#allocation31_spill] sm:$0xff] }
 0x1e3   : > { %2798 = vmatprep.mubr.bf16.mxu1 %v2324_v16  ;;  %v12724_v16 = vshll.u32 %v9895_v53, 16  ;;  %v12726_v27 = vshrl.u32 %v12725_v45, 16  ;;  %v12727_v5 = vshll.u32 %v12725_v45, 16  ;;  %v2343_v53 = vsel %vm1921_vm6, %v2320_v9, %v2342_v4  ;;  %7365 = vmatprep.subr.bf16.mxu0 %v7705_v7 }
 0x1e4   : > { %v3263_v33 = vrot.slane %v12723_v51, 3  ;;  %v3194_v51 = vsel %vm3056_vm11, %v3181_v3, %v3193_v13  ;;  %v2334_v9 = vor.u32 %v2333_v62, %v10076_v48  ;;  %v7706_v3 = vld [vmem:[%s12159_s3 + $0x238] sm:$0xff]   ;;  %v2375_v4 = vshrl.u32 %v1862_v2, 16  ;;  %7366 = vmatpush3.bf16.msra.mxu0 %v7705_v7 }
 0x1e5   : > { %v3264_v42 = vrot.slane %v12724_v16, 4  ;;  %v3203_v12 = vrot.slane %v12726_v27, 3  ;;  %v3204_v19 = vrot.slane %v12727_v5, 4  ;;  %v2359_v27 = vshll.u32 %v1859_v22, 16  ;;  %7367 = vmatprep.subr.bf16.mxu0 %v7706_v3 }
 0x1e6   : > { %v3189_v16 = vor.u32 %v3188_v41, %v3187_v58  ;;  %v12729_v22 = vshll.u32 %v9927_v38, 16  ;;  %v7745_v58 = vld [vmem:[#allocation2] sm:$0xf0]  ;;  %v12730_v38 = vld [vmem:[#allocation28_spill] sm:$0xff]  ;;  %v10225_v7 = vrot.slane %v1852_v61, 7  ;;  %v12738_v61 = vld [vmem:[#allocation5_spill] sm:$0xff] }
 0x1e7   : > { %v10181_v39 = vor.u32 %v3264_v42, %v3263_v33  ;;  %v10193_v11 = vor.u32 %v3204_v19, %v3203_v12  ;;  %v2361_v44 = vor.u32 %v2359_v27, %v10185_v21  ;;  %v1746_v41 = vrot.slane %v7745_v58, 1  ;;  %v10204_v33 = vld [vmem:[#allocation2] sm:$0xff]  ;;  %v12734_v58 = vld [vmem:[#allocation36_spill] sm:$0xff] }
 0x1e8   : > { %v3276_v6 = vrot.slane %v12729_v22, 4  ;;  %v1747_v12 = vrot.slane %v10204_v33, 1  ;;  %v3190_v45 = vsel %vm3056_vm11, %v3177_v0, %v3189_v16  ;;  %v3199_v5 = vrot.slane %v12730_v38, 3  ;;  %7368 = vmatpush3.bf16.msra.mxu0 %v7706_v3 }
 0x1e9   : > { %3704 = vmatmul.mubr.bf16.gmra.mrb[92].mxu0 %v3178_v35  ;;  %v12731_v19 = vshrl.u32 %v9953_v14, 16  ;;  %v12732_v35 = vshll.u32 %v9953_v14, 16  ;;  %v3206_v27 = vsel %vm3056_vm11, %v3193_v13, %v10193_v11  ;;  %v2377_v14 = vrot.slane %v2375_v4, 7 }
 0x1ea   : > { %2799 = vmatmul.mubr.bf16.gmra.mrb[112].mxu1 %v2316_v31  ;;  %3711 = vmatprep.mubr.bf16.mxu0 %v3194_v51  ;;  %v3277_v42 = vor.u32 %v3276_v6, %v3275_v23  ;;  %v2335_v51 = vsel %vm1921_vm6, %v2314_v17, %v2334_v9  ;;  %v3200_v23 = vrot.slane %v12733_v26, 4  ;;  %v2378_v22 = vshll.u32 %v1862_v2, 16 }
 0x1eb   : > { %2806 = vmatprep.mubr.bf16.mxu1 %v2343_v53  ;;  %v3287_v31 = vrot.slane %v12731_v19, 3  ;;  %v3288_v53 = vrot.slane %v12732_v35, 4  ;;  %v2362_v13 = vsel %vm1921_vm6, %v10152_v50, %v2361_v44  ;;  %v12735_v38 = vshrl.u32 %v12734_v58, 16 }
 0x1ec   : > { %v10221_v0 = vsel %vm3056_vm11, %v10181_v39, %v3277_v42  ;;  %v12736_v9 = vshll.u32 %v12734_v58, 16  ;;  %v1748_v35 = vsel %vm12737_vm7, %v1746_v41, %v1747_v12  ;;  %v1750_v4 = vsel %vm12677_vm4, %v1747_v12, %v12738_v61  ;;  %v12742_v61 = vld [vmem:[#allocation30_spill] sm:$0xff]  ;;  %vm12867_vm4 = vmmov %vm12716_vm1 }
 0x1ed   : > { %v3289_v6 = vor.u32 %v3288_v53, %v3287_v31  ;;  %v3215_v17 = vrot.slane %v12735_v38, 3  ;;  %v12739_v31 = vshrl.u32 %v9979_v24, 16  ;;  %v12740_v44 = vshll.u32 %v9979_v24, 16  ;;  %v12741_v38 = vld [vmem:[#allocation23_spill] sm:$0xff] }
 0x1ee   : > { %v3216_v19 = vrot.slane %v12736_v9, 4  ;;  %v2353_v3 = vor.u32 %v10225_v7, %v1848_v36  ;;  %v2380_v41 = vor.u32 %v2378_v22, %v2377_v14  ;;  %v3090_v12 = vshll.u32 %v1748_v35, 16 }
 0x1ef   : > { %v10237_v2 = vsel %vm3056_vm11, %v3277_v42, %v3289_v6  ;;  %v3299_v50 = vrot.slane %v12739_v31, 3  ;;  %v3300_v53 = vrot.slane %v12740_v44, 4  ;;  %v3095_v58 = vshrl.u32 %v1750_v4, 16 }
 0x1f0   : > { %v3098_v42 = vshll.u32 %v1750_v4, 16  ;;  %v3211_v9 = vrot.slane %v12741_v38, 3  ;;  %v3212_v31 = vrot.slane %v12742_v61, 4  ;;  %v12746_v14 = vshll.u32 %v12744_v18, 16 }
 0x1f1   : > { %3712 = vmatmul.mubr.bf16.gmra.mrb[96].mxu0 %v3190_v45  ;;  %v3087_v45 = vshrl.u32 %v1748_v35, 16  ;;  %v3301_v26 = vor.u32 %v3300_v53, %v3299_v50  ;;  %v2381_v50 = vsel %vm1921_vm6, %v10185_v21, %v2380_v41  ;;  %v3092_v53 = vrot.slane %v3090_v12, 4 }
 0x1f2   : > { %2807 = vmatmul.mubr.bf16.gmra.mrb[116].mxu1 %v2335_v51  ;;  %3719 = vmatprep.mubr.bf16.mxu0 %v3206_v27  ;;  %v3201_v51 = vor.u32 %v3200_v23, %v3199_v5  ;;  %v12743_v5 = vshrl.u32 %v10009_v28, 16  ;;  %v12745_v23 = vshrl.u32 %v12744_v18, 16  ;;  %v3228_v22 = vrot.slane %v12746_v14, 4 }
 0x1f3   : > { %2814 = vmatprep.mubr.bf16.mxu1 %v2362_v13  ;;  %v3217_v13 = vor.u32 %v3216_v19, %v3215_v17  ;;  %v10249_v24 = vsel %vm3056_vm11, %v3289_v6, %v3301_v26  ;;  %v2371_v17 = vrot.slane %v1860_v8, 7  ;;  %v12747_v19 = vshll.u32 %v10009_v28, 16 }
 0x1f4   : > { %v3311_v27 = vrot.slane %v12743_v5, 3  ;;  %v3227_v36 = vrot.slane %v12745_v23, 3  ;;  %v3202_v4 = vsel %vm3056_vm11, %v3189_v16, %v3201_v51  ;;  %v2354_v6 = vsel %vm1921_vm6, %v2333_v62, %v2353_v3 }
 0x1f5   : > { %v3312_v35 = vrot.slane %v12747_v19, 4  ;;  %v3089_v44 = vrot.slane %v3087_v45, 3  ;;  %v3097_v38 = vrot.slane %v3095_v58, 3  ;;  %v3100_v61 = vrot.slane %v3098_v42, 4  ;;  %v12751_v42 = vld [vmem:[#allocation35_spill] sm:$0xff] }
 0x1f6   : > { %v3218_v28 = vsel %vm3056_vm11, %v10193_v11, %v3217_v13  ;;  %v12748_v8 = vshrl.u32 %v10041_v63, 16  ;;  %v12749_v18 = vshll.u32 %v10041_v63, 16  ;;  %v3213_v3 = vor.u32 %v3212_v31, %v3211_v9 }
 0x1f7   : > { %v3313_v5 = vor.u32 %v3312_v35, %v3311_v27  ;;  %v3229_v21 = vor.u32 %v3228_v22, %v3227_v36  ;;  %v12750_v41 = vshll.u32 %v9658_v29, 16  ;;  %v3223_v58 = vrot.slane %v9727_v20, 3  ;;  %v12754_v36 = vld [vmem:[#allocation34_spill] sm:$0xff] }
 0x1f8   : > { %v3323_v16 = vrot.slane %v12748_v8, 3  ;;  %v3324_v62 = vrot.slane %v12749_v18, 4  ;;  %v3224_v11 = vrot.slane %v12751_v42, 4  ;;  %v3093_v23 = vor.u32 %v3092_v53, %v3089_v44 }
 0x1f9   : > { %3720 = vmatmul.mubr.bf16.gmra.mrb[100].mxu0 %v3202_v4  ;;  %v2372_v45 = vor.u32 %v2371_v17, %v12750_v41  ;;  %v10276_v12 = vsel %vm3056_vm11, %v3301_v26, %v3313_v5  ;;  %v3101_v14 = vor.u32 %v3100_v61, %v3097_v38  ;;  %v12752_v63 = vshrl.u32 %v10070_v25, 16 }
 0x1fa   : > { %2815 = vmatmul.mubr.bf16.gmra.mrb[120].mxu1 %v2354_v6  ;;  %3727 = vmatprep.mubr.bf16.mxu0 %v3218_v28  ;;  %v3325_v27 = vor.u32 %v3324_v62, %v3323_v16  ;;  %v12753_v31 = vshll.u32 %v10070_v25, 16  ;;  %v12755_v22 = vshll.u32 %v12754_v36, 16  ;;  %v3214_v17 = vsel %vm3056_vm11, %v3201_v51, %v3213_v3  ;;  %v12756_v6 = vld [vmem:[#allocation44_spill] sm:$0xff]  ;;  %v12760_v28 = vld [vmem:[#allocation11_spill] sm:$0xff] }
 0x1fb   : > { %2822 = vmatprep.mubr.bf16.mxu1 %v2381_v50  ;;  %v3335_v9 = vrot.slane %v12752_v63, 3  ;;  %v3230_v20 = vsel %vm3056_vm11, %v3217_v13, %v3229_v21  ;;  %v2373_v35 = vsel %vm1921_vm6, %v10225_v7, %v2372_v45  ;;  %v10293_v4 = vor.u32 %v3224_v11, %v3223_v58  ;;  %vm12774_vm6 = vmmov %vm12657_vm0 }
 0x1fc   : > { %v10281_v19 = vsel %vm3056_vm11, %v3313_v5, %v3325_v27  ;;  %v3336_v29 = vrot.slane %v12753_v31, 4  ;;  %v3112_v26 = vrot.slane %v12755_v22, 4  ;;  %v12757_v50 = vshrl.u32 %v12756_v6, 16  ;;  %vm12858_vm0 = vmmov %vm12853_vm3 }
 0x1fd   : > { %v12758_v53 = vshrl.u32 %v12754_v36, 16  ;;  %v3102_v61 = vsel %vm3056_vm11, %v3093_v23, %v3101_v14  ;;  %v12759_v5 = vshll.u32 %v12756_v6, 16  ;;  %v12761_v13 = vshrl.u32 %v12760_v28, 16  ;;  %v10315_v23 = vld [vmem:[#allocation2 + $0xc0] sm:$0xf]  ;;  %vm12861_vm2 = vmmov %vm12858_vm0 }
 0x1fe   : > { %v3239_v44 = vrot.slane %v12757_v50, 3  ;;  %v3337_v25 = vor.u32 %v3336_v29, %v3335_v9  ;;  %v3331_v7 = vrot.slane %v10044_v49, 3  ;;  %v12762_v16 = vshll.u32 %v12760_v28, 16  ;;  %vm12864_vm5 = vmmov %vm12858_vm0 }
 0x1ff   : > { %v3111_v38 = vrot.slane %v12758_v53, 3  ;;  %v3240_v51 = vrot.slane %v12759_v5, 4  ;;  %v3123_v8 = vrot.slane %v12761_v13, 3  ;;  %v3332_v41 = vrot.slane %v10015_v46, 4  ;;  %vm12865_vm7 = vmmov %vm12858_vm0 }
 0x200   : > { %v3124_v18 = vrot.slane %v12762_v16, 4  ;;  %v10308_v62 = vsel %vm3056_vm11, %v3325_v27, %v3337_v25  ;;  %v12763_v45 = vshrl.u32 %v10099_v37, 16  ;;  %v12764_v42 = vshll.u32 %v10099_v37, 16  ;;  %v7684_v37 = vld [vmem:[%s12159_s3 + $0x180] sm:$0xff]  }
 0x201   : > { %3728 = vmatmul.mubr.bf16.gmra.mrb[104].mxu0 %v3214_v17  ;;  %v3226_v49 = vsel %vm3056_vm11, %v3213_v3, %v10293_v4  ;;  %v3113_v63 = vor.u32 %v3112_v26, %v3111_v38  ;;  %v3235_v9 = vrot.slane %v9778_v47, 3  ;;  %v10320_v31 = vor.u32 %v3332_v41, %v3331_v7  ;;  %v12765_v17 = vld [vmem:[#allocation29_spill] sm:$0xff] }
 0x202   : > { %2823 = vmatmul.mubr.bf16.gmra.mrb[124].mxu1 %v2373_v35  ;;  %v3347_v58 = vrot.slane %v12763_v45, 3  ;;  %3735 = vmatprep.mubr.bf16.mxu0 %v3230_v20  ;;  %v3348_v11 = vrot.slane %v12764_v42, 4  ;;  %v3343_v46 = vrot.slane %v10073_v32, 3  ;;  %v3344_v29 = vrot.slane %v10048_v59, 4  ;;  %v12767_v35 = vld [vmem:[#allocation12_spill] sm:$0xff] }
 0x203   : > { %7305 = vmatprep.mubr.bf16.mxu1 %v3102_v61  ;;  %v3241_v36 = vor.u32 %v3240_v51, %v3239_v44  ;;  %v3125_v22 = vor.u32 %v3124_v18, %v3123_v8  ;;  %v3236_v20 = vrot.slane %v12765_v17, 4  ;;  %v12352_v3 = vshll.u32 %v10315_v23, 16  ;;  %v12770_v51 = vld [vmem:[#allocation13_spill] sm:$0xff]  ;;  %v7685_v45 = vld [vmem:[%s12159_s3 + $0x188] sm:$0xff]  }
 0x204   : > { %v3349_v27 = vor.u32 %v3348_v11, %v3347_v58  ;;  %v12766_v26 = vshrl.u32 %v9866_v57, 16  ;;  %v12768_v6 = vshrl.u32 %v12767_v35, 16  ;;  %v3345_v59 = vor.u32 %v3344_v29, %v3343_v46 }
 0x205   : > { %v3114_v44 = vsel %vm3056_vm11, %v3101_v14, %v3113_v63  ;;  %v12769_v53 = vshll.u32 %v12767_v35, 16  ;;  %v10341_v61 = vrot.slane %v12352_v3, 1  ;;  %v3355_v5 = vrot.slane %v10102_v60, 3  ;;  %v7686_v35 = vld [vmem:[%s12159_s3 + $0x190] sm:$0xff]  }
 0x206   : > { %v3251_v47 = vrot.slane %v12766_v26, 3  ;;  %v3135_v50 = vrot.slane %v12768_v6, 3  ;;  %v10334_v32 = vsel %vm3056_vm11, %v3337_v25, %v3349_v27  ;;  %v12771_v28 = vshrl.u32 %v12770_v51, 16 }
 0x207   : > { %v3136_v38 = vrot.slane %v12769_v53, 4  ;;  %v12772_v8 = vshll.u32 %v12770_v51, 16  ;;  %v10350_v7 = vsel %vm3056_vm11, %v10320_v31, %v3345_v59  ;;  %v3356_v14 = vrot.slane %v10076_v48, 4 }
 0x208   : > { %v3147_v13 = vrot.slane %v12771_v28, 3  ;;  %v3242_v16 = vsel %vm3056_vm11, %v3229_v21, %v3241_v36  ;;  %v3126_v18 = vsel %vm3056_vm11, %v3113_v63, %v3125_v22  ;;  %v12773_v60 = vshll.u32 %v9866_v57, 16  ;;  %v12778_v28 = vld [vmem:[#allocation16_spill] sm:$0xff] }
 0x209   : > { %v3148_v25 = vrot.slane %v12772_v8, 4  ;;  %3736 = vmatmul.mubr.bf16.gmra.mrb[108].mxu0 %v3226_v49  ;;  %v1716_v58 = vsel %vm12774_vm6, %v10113_v15, %v10341_v61  ;;  %v3237_v48 = vor.u32 %v3236_v20, %v3235_v9  ;;  %v3137_v21 = vor.u32 %v3136_v38, %v3135_v50  ;;  %v2640_v49 = vpop.f32.mrb[32].mxu1  ;;  %vm12873_vm6 = vmmov %vm12858_vm0 }
 0x20a   : > { %7306 = vmatmul.mubr.bf16.vlgmr.msra.gmra.mrb[128].mxu1 %v3114_v44  ;;  %v3252_v41 = vrot.slane %v12773_v60, 4  ;;  %3743 = vmatprep.mubr.bf16.mxu0 %v3242_v16  ;;  %v3360_v42 = vshrl.u32 %v1716_v58, 16  ;;  %v3363_v11 = vshll.u32 %v1716_v58, 16  ;;  %v10364_v63 = vor.u32 %v3356_v14, %v3355_v5  ;;  %v2642_v46 = vpop.f32.mrb[33].mxu1 }
 0x20b   : > { %5183 = vmatpush1.bf16.msra.mxu1 %v7684_v37  ;;  %7309 = vmatprep.mubr.bf16.mxu1 %v3126_v18  ;;  %v3149_v57 = vor.u32 %v3148_v25, %v3147_v13  ;;  %v2643_v26 = vpop.f32.mrb[34].mxu1  ;;  %v3238_v9 = vsel %vm3056_vm11, %v10293_v4, %v3237_v48  ;;  %v3247_v20 = vrot.slane %v9839_v34, 3  ;;  %v3248_v44 = vrot.slane %v9803_v10, 4  ;;  %v7243_v34 = vpop.f32.mrb[16].mxu0 }
 0x20c   : > { %5184 = vmatprep.subr.bf16.mxu1 %v10204_v33  ;;  %v3362_v29 = vrot.slane %v3360_v42, 3  ;;  %v3365_v37 = vrot.slane %v3363_v11, 4  ;;  %v3253_v17 = vor.u32 %v3252_v41, %v3251_v47  ;;  %v10368_v15 = vsel %vm3056_vm11, %v3345_v59, %v10364_v63  ;;  %v2645_v6 = vpop.f32.mrb[35].mxu1  ;;  %v12775_v59 = vld [vmem:[#allocation15_spill] sm:$0xff]  ;;  %v2865_v16 = vpop.f32.mrb[17].mxu0  ;;  %v7687_v41 = vld [vmem:[%s12159_s3 + $0x198] sm:$0xff]  }
 0x20d   : > { %v3138_v47 = vsel %vm3056_vm11, %v3125_v22, %v3137_v21  ;;  %v12776_v53 = vshrl.u32 %v12775_v59, 16  ;;  %v12777_v4 = vshll.u32 %v12775_v59, 16  ;;  %v3150_v51 = vsel %vm3056_vm11, %v3137_v21, %v3149_v57  ;;  %v7244_v60 = vpop.f32.mrb[18].mxu0 }
 0x20e   : > { %v10377_v50 = vor.u32 %v3365_v37, %v3362_v29  ;;  %v12779_v13 = vshrl.u32 %v12778_v28, 16  ;;  %v12780_v25 = vshll.u32 %v12778_v28, 16  ;;  %v3254_v22 = vsel %vm3056_vm11, %v3241_v36, %v3253_v17  ;;  %v12781_v36 = vld [vmem:[#allocation7_spill] sm:$0xff]  ;;  %v2648_v37 = vpop.f32.mrb[36].mxu1 }
 0x20f   : > { %5185 = vmatpush1.bf16.msra.mxu1 %v7685_v45  ;;  %v3159_v38 = vrot.slane %v12776_v53, 3  ;;  %v3160_v5 = vrot.slane %v12777_v4, 4  ;;  %v10395_v18 = vadd.f32 %v2865_v16, %v2640_v49  ;;  %v2868_v45 = vpop.f32.mrb[19].mxu0  ;;  %v3259_v21 = vrot.slane %v12781_v36, 3  ;;  %v12782_v49 = vld [vmem:[#allocation45_spill] sm:$0xff]  ;;  %v7689_v29 = vld [vmem:[%s12159_s3 + $0x1a0] sm:$0xff]  }
 0x210   : > { %5186 = vmatprep.subr.bf16.mxu1 %v10204_v33  ;;  %v3171_v8 = vrot.slane %v12779_v13, 3  ;;  %v3172_v14 = vrot.slane %v12780_v25, 4  ;;  %v10392_v10 = vsel %vm3056_vm11, %v3349_v27, %v10377_v50  ;;  %v10401_v42 = vadd.f32 %v2868_v45, %v2643_v26  ;;  %v2650_v59 = vpop.f32.mrb[37].mxu1  ;;  %v12786_v4 = vld [vmem:[#allocation18_spill] sm:$0xff]  ;;  %v7691_v36 = vld [vmem:[%s12159_s3 + $0x1b0] sm:$0xff]  }
 0x211   : > { %3744 = vmatmul.mubr.bf16.gmra.mrb[112].mxu0 %v3238_v9  ;;  %v3161_v58 = vor.u32 %v3160_v5, %v3159_v38  ;;  %v3249_v27 = vor.u32 %v3248_v44, %v3247_v20  ;;  %v3260_v46 = vrot.slane %v12782_v49, 4  ;;  %v10414_v44 = vadd.f32 %v7243_v34, %v2648_v37  ;;  %v2651_v13 = vpop.f32.mrb[38].mxu1 }
 0x212   : > { %7310 = vmatmul.mubr.bf16.gmra.mrb[132].mxu1 %v3138_v47  ;;  %3751 = vmatprep.mubr.bf16.mxu0 %v3254_v22  ;;  %v3173_v11 = vor.u32 %v3172_v14, %v3171_v8  ;;  %v12787_v5 = vshrl.u32 %v12786_v4, 16  ;;  %v3266_v8 = vsel %vm3056_vm11, %v3253_v17, %v10181_v39  ;;  %v10424_v34 = vadd.f32 %v7244_v60, %v2651_v13  ;;  %v2653_v25 = vpop.f32.mrb[39].mxu1 }
 0x213   : > { %7313 = vmatprep.mubr.bf16.mxu1 %v3150_v51  ;;  %5187 = vmatpush1.bf16.msra.mxu1 %v7686_v35  ;;  %v3162_v9 = vsel %vm3056_vm11, %v3149_v57, %v3161_v58  ;;  %v12783_v35 = vld [vmem:[#allocation17_spill] sm:$0xff]  ;;  %v3250_v53 = vsel %vm3056_vm11, %v3237_v48, %v3249_v27  ;;  %v12788_v57 = vshll.u32 %v12786_v4, 16  ;;  %v7690_v48 = vld [vmem:[%s12159_s3 + $0x1a8] sm:$0xff]   ;;  %v3261_v14 = vor.u32 %v3260_v46, %v3259_v21  ;;  %v12790_v46 = vld [vmem:[#allocation19_spill] sm:$0xff] }
 0x214   : > { %5188 = vmatprep.subr.bf16.mxu1 %v10204_v33  ;;  %v12784_v6 = vshrl.u32 %v12783_v35, 16  ;;  %v12785_v20 = vshll.u32 %v12783_v35, 16  ;;  %v3174_v38 = vsel %vm3056_vm11, %v3161_v58, %v3173_v11  ;;  %v3195_v51 = vrot.slane %v12787_v5, 3  ;;  %v12789_v58 = vld [vmem:[#allocation32_spill] sm:$0xff] }
 0x215   : > { %v3196_v28 = vrot.slane %v12788_v57, 4  ;;  %v3271_v39 = vrot.slane %v12789_v58, 3  ;;  %v3272_v17 = vrot.slane %v9882_v30, 4  ;;  %v3262_v21 = vsel %vm3056_vm11, %v3249_v27, %v3261_v14  ;;  %v7692_v57 = vld [vmem:[%s12159_s3 + $0x1b8] sm:$0xff]  }
 0x216   : > { %v3183_v26 = vrot.slane %v12784_v6, 3  ;;  %v3184_v47 = vrot.slane %v12785_v20, 4  ;;  %v12793_v20 = vld [vmem:[#allocation20_spill] sm:$0xff]  ;;  %v3283_v25 = vrot.slane %v9935_v43, 3 }
 0x217   : > { %5189 = vmatpush1.bf16.msra.mxu1 %v7687_v41  ;;  %v3197_v22 = vor.u32 %v3196_v28, %v3195_v51  ;;  %v10430_v41 = vpop.f32.mrb[20].mxu0  ;;  %v12795_v27 = vshll.u32 %v12793_v20, 16  ;;  %v3273_v13 = vor.u32 %v3272_v17, %v3271_v39  ;;  %v7694_v39 = vld [vmem:[%s12159_s3 + $0x1c0] sm:$0xff]  }
 0x218   : > { %5190 = vmatprep.subr.bf16.mxu1 %v10204_v33  ;;  %v3185_v16 = vor.u32 %v3184_v47, %v3183_v26  ;;  %v2881_v45 = vpop.f32.mrb[21].mxu0  ;;  %v2656_v26 = vpop.f32.mrb[40].mxu1  ;;  %v12794_v47 = vshrl.u32 %v12793_v20, 16 }
 0x219   : > { %3752 = vmatmul.mubr.bf16.gmra.mrb[116].mxu0 %v3250_v53  ;;  %v10434_v60 = vpop.f32.mrb[22].mxu0  ;;  %v3220_v53 = vrot.slane %v12795_v27, 4  ;;  %v3274_v17 = vsel %vm3056_vm11, %v3261_v14, %v3273_v13  ;;  %v12805_v27 = vld [vmem:[#allocation26_spill] sm:$0xff] }
 0x21a   : > { %7314 = vmatmul.mubr.bf16.gmra.mrb[136].mxu1 %v3162_v9  ;;  %3759 = vmatprep.mubr.bf16.mxu0 %v3266_v8  ;;  %v3186_v49 = vsel %vm3056_vm11, %v3173_v11, %v3185_v16  ;;  %v12792_v9 = vshll.u32 %v12790_v46, 16  ;;  %v2884_v6 = vpop.f32.mrb[23].mxu0  ;;  %v3198_v30 = vsel %vm3056_vm11, %v3185_v16, %v3197_v22  ;;  %v3219_v59 = vrot.slane %v12794_v47, 3 }
 0x21b   : > { %7317 = vmatprep.mubr.bf16.mxu1 %v3174_v38  ;;  %5191 = vmatpush1.bf16.msra.mxu1 %v7689_v29  ;;  %v12791_v29 = vshrl.u32 %v12790_v46, 16  ;;  %v10451_v11 = vadd.f32 %v2881_v45, %v2656_v26  ;;  %v2658_v38 = vpop.f32.mrb[41].mxu1  ;;  %v12799_v45 = vld [vmem:[#allocation21_spill] sm:$0xff]  ;;  %v12806_v14 = vshrl.u32 %v12805_v27, 16 }
 0x21c   : > { %5192 = vmatprep.subr.bf16.mxu1 %v10204_v33  ;;  %v3208_v35 = vrot.slane %v12792_v9, 4  ;;  %v2659_v4 = vpop.f32.mrb[42].mxu1  ;;  %v3221_v8 = vor.u32 %v3220_v53, %v3219_v59  ;;  %v12800_v58 = vshrl.u32 %v12799_v45, 16  ;;  %v3296_v59 = vrot.slane %v9938_v56, 4  ;;  %v7695_v38 = vld [vmem:[%s12159_s3 + $0x1c8] sm:$0xff]  }
 0x21d   : > { %v3207_v37 = vrot.slane %v12791_v29, 3  ;;  %12796 = vst [vmem:[#allocation8_spill] sm:$0xff] %v10451_v11  ;;  %v10454_v5 = vadd.f32 %v2884_v6, %v2659_v4  ;;  %v2661_v51 = vpop.f32.mrb[43].mxu1  ;;  %v3255_v53 = vrot.slane %v12806_v14, 3  ;;  %v3319_v14 = vrot.slane %v10012_v40, 3 }
 0x21e   : > { %v10477_v26 = vpop.f32.mrb[24].mxu0 }
 0x21f   : > { %5193 = vmatpush1.bf16.msra.mxu1 %v7690_v48  ;;  %12797 = vst [vmem:[#allocation4_spill] sm:$0xff] %v10454_v5  ;;  %v3209_v28 = vor.u32 %v3208_v35, %v3207_v37  ;;  %v12798_v48 = vld [vmem:[#allocation46_spill] sm:$0xff]  ;;  %v10480_v20 = vpop.f32.mrb[25].mxu0 }
 0x220   : > { %5194 = vmatprep.subr.bf16.mxu1 %v10204_v33  ;;  %v3284_v16 = vrot.slane %v12798_v48, 4  ;;  %v10489_v4 = vpop.f32.mrb[26].mxu0 }
 0x221   : > { %3760 = vmatmul.mubr.bf16.gmra.mrb[120].mxu0 %v3262_v21  ;;  %v3210_v43 = vsel %vm3056_vm11, %v3197_v22, %v3209_v28  ;;  %v3222_v35 = vsel %vm3056_vm11, %v3209_v28, %v3221_v8  ;;  %v3295_v22 = vrot.slane %v9956_v1, 3  ;;  %v12808_v28 = vld [vmem:[#allocation27_spill] sm:$0xff] }
 0x222   : > { %7318 = vmatmul.mubr.bf16.gmra.mrb[140].mxu1 %v3186_v49  ;;  %3767 = vmatprep.mubr.bf16.mxu0 %v10221_v0  ;;  %v3231_v0 = vrot.slane %v12800_v58, 3  ;;  %v12802_v49 = vld [vmem:[#allocation22_spill] sm:$0xff]  ;;  %v3285_v6 = vor.u32 %v3284_v16, %v3283_v25  ;;  %v2664_v51 = vpop.f32.mrb[44].mxu1  ;;  %v12809_v25 = vshrl.u32 %v12808_v28, 16  ;;  %v12810_v1 = vshll.u32 %v12808_v28, 16  ;;  %v10499_v58 = vpop.f32.mrb[27].mxu0 }
 0x223   : > { %7321 = vmatprep.mubr.bf16.mxu1 %v3198_v30  ;;  %5195 = vmatpush1.bf16.msra.mxu1 %v7691_v36  ;;  %v12801_v36 = vshll.u32 %v12799_v45, 16  ;;  %v12803_v46 = vshrl.u32 %v12802_v49, 16  ;;  %v12804_v9 = vshll.u32 %v12802_v49, 16  ;;  %v3307_v16 = vrot.slane %v9987_v54, 3  ;;  %v1519_v45 = vld [vmem:[#allocation2 + $0xc0] sm:$0x1f] }
 0x224   : > { %5196 = vmatprep.subr.bf16.mxu1 %v10204_v33  ;;  %v3267_v48 = vrot.slane %v12809_v25, 3  ;;  %v3268_v56 = vrot.slane %v12810_v1, 4  ;;  %v12812_v49 = vld [vmem:[#allocation33_spill] sm:$0xff] }
 0x225   : > { %v3232_v21 = vrot.slane %v12801_v36, 4  ;;  %v3243_v29 = vrot.slane %v12803_v46, 3  ;;  %v3244_v37 = vrot.slane %v12804_v9, 4  ;;  %v2666_v36 = vpop.f32.mrb[45].mxu1  ;;  %v12813_v46 = vshrl.u32 %v12812_v49, 16  ;;  %v7696_v28 = vld [vmem:[%s12159_s3 + $0x1d0] sm:$0xff]  }
 0x226   : > { %v12814_v9 = vshll.u32 %v12812_v49, 16  ;;  %v12819_v25 = vld [vmem:[#allocation37_spill] sm:$0xff] }
 0x227   : > { %5197 = vmatpush1.bf16.msra.mxu1 %v7692_v57  ;;  %v3233_v30 = vor.u32 %v3232_v21, %v3231_v0  ;;  %v3245_v47 = vor.u32 %v3244_v37, %v3243_v29  ;;  %v10502_v0 = vadd.f32 %v10430_v41, %v2664_v51  ;;  %v3308_v21 = vrot.slane %v9959_v55, 4 }
 0x228   : > { %5198 = vmatprep.subr.bf16.mxu1 %v10204_v33  ;;  %v3279_v29 = vrot.slane %v12813_v46, 3  ;;  %v3280_v37 = vrot.slane %v12814_v9, 4  ;;  %v3320_v41 = vrot.slane %v9990_v52, 4  ;;  %v3286_v51 = vsel %vm3056_vm11, %v3273_v13, %v3285_v6 }
 0x229   : > { %3768 = vmatmul.mubr.bf16.gmra.mrb[124].mxu0 %v3274_v17  ;;  %12811 = vst [vmem:[#allocation6_spill] sm:$0xff] %v10502_v0  ;;  %v12820_v1 = vshrl.u32 %v12819_v25, 16  ;;  %v12821_v49 = vshll.u32 %v12819_v25, 16  ;;  %v3234_v40 = vsel %vm3056_vm11, %v3221_v8, %v3233_v30  ;;  %v3297_v52 = vor.u32 %v3296_v59, %v3295_v22  ;;  %v12822_v8 = vld [vmem:[#allocation38_spill] sm:$0xff] }
 0x22a   : > { %7322 = vmatmul.mubr.bf16.gmra.mrb[144].mxu1 %v3210_v43  ;;  %3775 = vmatprep.mubr.bf16.mxu0 %v10237_v2  ;;  %v12807_v2 = vshll.u32 %v12805_v27, 16  ;;  %v12815_v43 = vld [vmem:[#allocation25_spill] sm:$0xff]  ;;  %v3269_v13 = vor.u32 %v3268_v56, %v3267_v48  ;;  %v12823_v22 = vshrl.u32 %v12822_v8, 16  ;;  %v10539_v48 = vld [vmem:[#allocation2 + $0x18] sm:$0xf0] }
 0x22b   : > { %7325 = vmatprep.mubr.bf16.mxu1 %v3222_v35  ;;  %5199 = vmatpush1.bf16.msra.mxu1 %v7694_v39  ;;  %v2667_v39 = vpop.f32.mrb[46].mxu1  ;;  %v12816_v54 = vshrl.u32 %v12815_v43, 16  ;;  %v12817_v35 = vshll.u32 %v12815_v43, 16  ;;  %v3303_v36 = vrot.slane %v12820_v1, 3  ;;  %v3304_v46 = vrot.slane %v12821_v49, 4  ;;  %v7697_v56 = vld [vmem:[%s12159_s3 + $0x1d8] sm:$0xff]  }
 0x22c   : > { %v3256_v57 = vrot.slane %v12807_v2, 4  ;;  %5200 = vmatprep.subr.bf16.mxu1 %v10204_v33  ;;  %v10517_v55 = vadd.f32 %v10434_v60, %v2667_v39  ;;  %v2669_v2 = vpop.f32.mrb[47].mxu1  ;;  %v3246_v60 = vsel %vm3056_vm11, %v3233_v30, %v3245_v47  ;;  %v3281_v39 = vor.u32 %v3280_v37, %v3279_v29 }
 0x22d   : > { %v3291_v17 = vrot.slane %v12816_v54, 3  ;;  %v3292_v27 = vrot.slane %v12817_v35, 4  ;;  %v10529_v43 = vrot.slane %v1519_v45, 1  ;;  %v10531_v54 = vld [vmem:[#allocation2 + $0x20] sm:$0xff]  ;;  %v10533_v2 = vor.u32 %v3320_v41, %v3319_v14  ;;  %v10546_v45 = vpop.f32.mrb[28].mxu0 }
 0x22e   : > { %12818 = vst [vmem:[#allocation10_spill] sm:$0xff] %v10517_v55  ;;  %v3257_v9 = vor.u32 %v3256_v57, %v3255_v53  ;;  %v3315_v59 = vrot.slane %v12823_v22, 3  ;;  %v12824_v53 = vshll.u32 %v12822_v8, 16  ;;  %v3305_v30 = vor.u32 %v3304_v46, %v3303_v36  ;;  %v10589_v22 = vld [vmem:[#allocation2 + $0x28] sm:$0xff] }
 0x22f   : > { %5201 = vmatpush1.bf16.msra.mxu1 %v7695_v38  ;;  %v3309_v38 = vor.u32 %v3308_v21, %v3307_v16  ;;  %v3293_v35 = vor.u32 %v3292_v27, %v3291_v17  ;;  %v3298_v16 = vsel %vm3056_vm11, %v3285_v6, %v3297_v52  ;;  %v12353_v37 = vshll.u32 %v10531_v54, 16  ;;  %v10552_v17 = vpop.f32.mrb[29].mxu0  ;;  %v12825_v27 = vld [vmem:[#allocation42_spill] sm:$0xff] }
 0x230   : > { %5202 = vmatprep.subr.bf16.mxu1 %v10204_v33  ;;  %v3316_v57 = vrot.slane %v12824_v53, 4  ;;  %v3258_v21 = vsel %vm3056_vm11, %v3245_v47, %v3257_v9  ;;  %v3270_v29 = vsel %vm3056_vm11, %v3257_v9, %v3269_v13  ;;  %v1794_v14 = vsel %vm12826_vm13, %v12825_v27, %v10529_v43  ;;  %v10562_v47 = vpop.f32.mrb[30].mxu0  ;;  %v12828_v9 = vld [vmem:[#allocation39_spill] sm:$0xff]  ;;  %vm12877_vm13 = vmmov %vm12716_vm1 }
 0x231   : > { %3776 = vmatmul.mubr.bf16.gmra.mrb[128].mxu0 %v3286_v51  ;;  %v12354_v6 = vshrl.u32 %v10315_v23, 16  ;;  %v4095_v41 = vshll.u32 %v10539_v48, 16  ;;  %v2672_v51 = vpop.f32.mrb[48].mxu1  ;;  %v10568_v25 = vsel %vm3056_vm11, %v3281_v39, %v3293_v35  ;;  %v10572_v1 = vsel %vm3056_vm11, %v3309_v38, %v10533_v2  ;;  %v10577_v46 = vpop.f32.mrb[31].mxu0 }
 0x232   : > { %7326 = vmatmul.mubr.bf16.gmra.mrb[148].mxu1 %v3234_v40  ;;  %3783 = vmatprep.mubr.bf16.mxu0 %v10249_v24  ;;  %v10555_v24 = vsel %vm3056_vm11, %v3297_v52, %v3309_v38  ;;  %v3317_v36 = vor.u32 %v3316_v57, %v3315_v59  ;;  %v10575_v49 = vadd.f32 %v10480_v20, %v2672_v51  ;;  %v2674_v40 = vpop.f32.mrb[49].mxu1  ;;  %v7699_v38 = vld [vmem:[%s12159_s3 + $0x1e0] sm:$0xff]   ;;  %v12831_v59 = vld [vmem:[#allocation40_spill] sm:$0xff]  ;;  %v3369_v57 = vshrl.u32 %v1794_v14, 16 }
 0x233   : > { %7329 = vmatprep.mubr.bf16.mxu1 %v3246_v60  ;;  %5203 = vmatpush1.bf16.msra.mxu1 %v7696_v28  ;;  %v10565_v28 = vsel %vm3056_vm11, %v3269_v13, %v3281_v39  ;;  %v10580_v52 = vsel %vm3056_vm11, %v3293_v35, %v3305_v30  ;;  %v12829_v13 = vshrl.u32 %v12828_v9, 16  ;;  %v12830_v39 = vshll.u32 %v12828_v9, 16  ;;  %v2675_v20 = vpop.f32.mrb[50].mxu1 }
 0x234   : > { %5204 = vmatprep.subr.bf16.mxu1 %v10204_v33  ;;  %12827 = vst [vmem:[#allocation3_spill] sm:$0xff] %v10575_v49  ;;  %v12832_v53 = vshrl.u32 %v12831_v59, 16  ;;  %v4102_v27 = vrot.slane %v12353_v37, 1  ;;  %v10597_v51 = vadd.f32 %v10499_v58, %v2675_v20  ;;  %v2677_v40 = vpop.f32.mrb[51].mxu1  ;;  %v12834_v9 = vshll.u32 %v12831_v59, 16 }
 0x235   : > { %v3327_v60 = vrot.slane %v12829_v13, 3  ;;  %v3328_v8 = vrot.slane %v12830_v39, 4  ;;  %v1719_v39 = vor.u32 %v12354_v6, %v10341_v61  ;;  %v4097_v3 = vrot.slane %v4095_v41, 1  ;;  %v7700_v61 = vld [vmem:[%s12159_s3 + $0x1e8] sm:$0xff]  }
 0x236   : > { %v3339_v35 = vrot.slane %v12832_v53, 3  ;;  %12833 = vst [vmem:[#allocation14_spill] sm:$0xff] %v10597_v51  ;;  %v3340_v13 = vrot.slane %v12834_v9, 4  ;;  %v12835_v53 = vld [vmem:[#allocation43_spill] sm:$0xff]  ;;  %v12355_v58 = vshrl.u32 %v10531_v54, 16  ;;  %v12356_v20 = vshll.u32 %v10589_v22, 16 }
 0x237   : > { %5205 = vmatpush1.bf16.msra.mxu1 %v7697_v56  ;;  %v3372_v56 = vshll.u32 %v1794_v14, 16  ;;  %v12836_v14 = vshrl.u32 %v12835_v53, 16  ;;  %v12837_v37 = vshll.u32 %v12835_v53, 16  ;;  %v10612_v59 = vsel %vm3056_vm11, %v3305_v30, %v3317_v36  ;;  %v10623_v30 = vpop.f32.mrb[32].mxu0 }
 0x238   : > { %5206 = vmatprep.subr.bf16.mxu1 %v10204_v33  ;;  %v3329_v40 = vor.u32 %v3328_v8, %v3327_v60  ;;  %v3394_v9 = vshll.u32 %v10529_v43, 16  ;;  %v3382_v60 = vshrl.u32 %v1719_v39, 16  ;;  %v3385_v8 = vshll.u32 %v1719_v39, 16 }
 0x239   : > { %3784 = vmatmul.mubr.bf16.gmra.mrb[132].mxu0 %v3298_v16  ;;  %v3351_v49 = vrot.slane %v12836_v14, 3  ;;  %v3391_v16 = vshrl.u32 %v10529_v43, 16  ;;  %v3374_v41 = vrot.slane %v3372_v56, 4  ;;  %v4317_v53 = vrot.slane %v10531_v54, 1  ;;  %v10626_v14 = vpop.f32.mrb[33].mxu0 }
 0x23a   : > { %7330 = vmatmul.mubr.bf16.gmra.mrb[152].mxu1 %v3258_v21  ;;  %v3352_v21 = vrot.slane %v12837_v37, 4  ;;  %3791 = vmatprep.mubr.bf16.mxu0 %v10276_v12  ;;  %v3371_v37 = vrot.slane %v3369_v57, 3  ;;  %v4106_v12 = vor.u32 %v12355_v58, %v4102_v27  ;;  %v10631_v6 = vsel %vm3056_vm11, %v10533_v2, %v10320_v31  ;;  %v10637_v58 = vpop.f32.mrb[34].mxu0 }
 0x23b   : > { %7333 = vmatprep.mubr.bf16.mxu1 %v3270_v29  ;;  %5207 = vmatpush1.bf16.msra.mxu1 %v7699_v38  ;;  %v4093_v29 = vshrl.u32 %v10539_v48, 16  ;;  %v3341_v57 = vor.u32 %v3340_v13, %v3339_v35  ;;  %v10635_v43 = vrot.slane %v12356_v20, 1  ;;  %v10640_v39 = vsel %vm3056_vm11, %v3317_v36, %v3329_v40  ;;  %v10648_v35 = vpop.f32.mrb[35].mxu0  ;;  %v10659_v20 = vld [vmem:[#allocation2 + $0x30] sm:$0xff] }
 0x23c   : > { %5208 = vmatprep.subr.bf16.mxu1 %v10204_v33  ;;  %v3353_v56 = vor.u32 %v3352_v21, %v3351_v49  ;;  %v4316_v31 = vrot.slane %v10539_v48, 1  ;;  %v12357_v2 = vrot.slane %v10589_v22, 1  ;;  %v2680_v49 = vpop.f32.mrb[52].mxu1  ;;  %v10650_v13 = vor.u32 %v3374_v41, %v3371_v37 }
 0x23d   : > { %v4098_v38 = vor.u32 %v4097_v3, %v4093_v29  ;;  %v7702_v3 = vld [vmem:[%s12159_s3 + $0x1f0] sm:$0xff]   ;;  %v10653_v36 = vrot.slane %v3391_v16, 3  ;;  %v10655_v21 = vrot.slane %v3394_v9, 4  ;;  %v10663_v48 = vadd.f32 %v10477_v26, %v2680_v49 }
 0x23e   : > { %v10667_v37 = vrot.slane %v3385_v8, 4  ;;  %v4318_v16 = vsel %vm12841_vm15, %v4316_v31, %v4317_v53  ;;  %v10673_v9 = vsel %vm3056_vm11, %v3329_v40, %v3341_v57  ;;  %v12848_v5 = vrot.slane %v10589_v22, 1  ;;  %vm12886_vm15 = vmmov %vm12716_vm1 }
 0x23f   : > { %5209 = vmatpush1.bf16.msra.mxu1 %v7700_v61  ;;  %v4103_v29 = vsel %vm12838_vm8, %v4098_v38, %v4102_v27  ;;  %v4111_v61 = vsel %vm12839_vm12, %v4106_v12, %v10635_v43  ;;  %12840 = vst [vmem:[#allocation9_spill] sm:$0xff] %v10663_v48  ;;  %v2682_v27 = vpop.f32.mrb[53].mxu1  ;;  %v10665_v38 = vrot.slane %v3382_v60, 3  ;;  %vm12882_vm8 = vmmov %vm12858_vm0 }
 0x240   : > { %5210 = vmatprep.subr.bf16.mxu1 %v10204_v33  ;;  %v2683_v41 = vpop.f32.mrb[54].mxu1  ;;  %v4427_v26 = vshrl.u32 %v4103_v29, 16  ;;  %v4430_v12 = vshll.u32 %v4103_v29, 16  ;;  %v4435_v31 = vshrl.u32 %v4111_v61, 16  ;;  %v4447_v29 = vshll.u32 %v4318_v16, 16  ;;  %vm12884_vm12 = vmmov %vm12858_vm0 }
 0x241   : > { %3792 = vmatmul.mubr.bf16.gmra.mrb[136].mxu0 %v10555_v24  ;;  %v10680_v60 = vadd.f32 %v10489_v4, %v2683_v41  ;;  %v2685_v8 = vpop.f32.mrb[55].mxu1  ;;  %v7704_v24 = vld [vmem:[%s12159_s3 + $0x1f8] sm:$0xff]   ;;  %v4444_v4 = vshrl.u32 %v4318_v16, 16  ;;  %v12844_v27 = vshrl.u32 %v10315_v23, 16 }
 0x242   : > { %7334 = vmatmul.mubr.bf16.gmra.mrb[156].mxu1 %v10565_v28  ;;  %v10676_v28 = vsel %vm3056_vm11, %v3341_v57, %v3353_v56  ;;  %3799 = vmatprep.mubr.bf16.mxu0 %v10281_v19  ;;  %v3397_v57 = vor.u32 %v10655_v21, %v10653_v36  ;;  %v4438_v19 = vshll.u32 %v4111_v61, 16  ;;  %v4065_v41 = vld [vmem:[#allocation2 + $0x18] sm:$0xf8]  ;;  %v4321_v8 = vrot.slane %v10659_v20, 1 }
 0x243   : > { %7337 = vmatprep.mubr.bf16.mxu1 %v10568_v25  ;;  %12842 = vst [vmem:[#allocation31_spill] sm:$0xff] %v10680_v60  ;;  %5211 = vmatpush1.bf16.msra.mxu1 %v7702_v3  ;;  %v4320_v25 = vsel %vm12843_vm9, %v4317_v53, %v12357_v2  ;;  %v10694_v3 = vsel %vm3056_vm11, %v3353_v56, %v10650_v13  ;;  %v10700_v53 = vrot.slane %v12844_v27, 3  ;;  %v10703_v36 = vrot.slane %v4427_v26, 3  ;;  %v10709_v56 = vld [vmem:[#allocation2 + $0x38] sm:$0xff]  ;;  %vm12891_vm9 = vmmov %vm12858_vm0 }
 0x244   : > { %5212 = vmatprep.subr.bf16.mxu1 %v10204_v33  ;;  %v12845_v33 = vshll.u32 %v10315_v23, 16  ;;  %v4452_v61 = vshrl.u32 %v4320_v25, 16  ;;  %v4455_v16 = vshll.u32 %v4320_v25, 16  ;;  %v10713_v49 = vrot.slane %v4430_v12, 4 }
 0x245   : > { %v10711_v2 = vpop.f32.mrb[36].mxu0  ;;  %v4437_v40 = vrot.slane %v4435_v31, 3  ;;  %v4112_v27 = vshrl.u32 %v10589_v22, 16  ;;  %v12846_v60 = vshll.u32 %v10659_v20, 16  ;;  %v4440_v23 = vrot.slane %v4438_v19, 4 }
 0x246   : > { %v10707_v21 = vrot.slane %v12845_v33, 4  ;;  %v2688_v48 = vpop.f32.mrb[56].mxu1  ;;  %v10718_v51 = vpop.f32.mrb[37].mxu0  ;;  %v4446_v33 = vrot.slane %v4444_v4, 3  ;;  %v4449_v55 = vrot.slane %v4447_v29, 4  ;;  %v4415_v25 = vshrl.u32 %v4065_v41, 16 }
 0x247   : > { %5213 = vmatpush1.bf16.msra.mxu1 %v7704_v24  ;;  %v4118_v26 = vrot.slane %v12846_v60, 1  ;;  %v10722_v0 = vadd.f32 %v10552_v17, %v2688_v48  ;;  %v2690_v12 = vpop.f32.mrb[57].mxu1  ;;  %v10724_v31 = vpop.f32.mrb[38].mxu0  ;;  %v4114_v24 = vor.u32 %v4112_v27, %v10635_v43  ;;  %v4322_v60 = vsel %vm12849_vm14, %v12848_v5, %v4321_v8  ;;  %vm12895_vm14 = vmmov %vm12858_vm0 }
 0x248   : > { %v4323_v11 = vrot.slane %v10709_v56, 1  ;;  %v2691_v19 = vpop.f32.mrb[58].mxu1  ;;  %v10737_v17 = vsel %vm3056_vm11, %v10650_v13, %v3397_v57  ;;  %v3379_v43 = vor.u32 %v10707_v21, %v10700_v53  ;;  %v4454_v48 = vrot.slane %v4452_v61, 3 }
 0x249   : > { %12847 = vst [vmem:[#allocation28_spill] sm:$0xff] %v10722_v0  ;;  %3800 = vmatmul.mubr.bf16.gmra.mrb[140].mxu0 %v10572_v1  ;;  %v4457_v4 = vrot.slane %v4455_v16, 4  ;;  %v10743_v5 = vadd.f32 %v10577_v46, %v2691_v19  ;;  %v2693_v1 = vpop.f32.mrb[59].mxu1  ;;  %v4418_v29 = vshll.u32 %v4065_v41, 16  ;;  %v4119_v12 = vsel %vm12851_vm10, %v4114_v24, %v4118_v26  ;;  %v10756_v19 = vld [vmem:[#allocation2 + $0x40] sm:$0xff]  ;;  %vm12897_vm10 = vmmov %vm12716_vm1 }
 0x24a   : > { %7338 = vmatmul.mubr.bf16.gmra.mrb[160].mxu1 %v10580_v52  ;;  %v10733_v52 = vpop.f32.mrb[39].mxu0  ;;  %3807 = vmatprep.mubr.bf16.mxu0 %v10308_v62  ;;  %v10748_v0 = vor.u32 %v4440_v23, %v4437_v40  ;;  %v12852_v13 = vshrl.u32 %v10531_v54, 16  ;;  %v4474_v53 = vshrl.u32 %v4322_v60, 16  ;;  %v4477_v21 = vshll.u32 %v4322_v60, 16 }
 0x24b   : > { %7341 = vmatprep.mubr.bf16.mxu1 %v10612_v59  ;;  %12850 = vst [vmem:[#allocation24_spill] sm:$0xff] %v10743_v5  ;;  %v4433_v59 = vor.u32 %v10713_v49, %v10703_v36  ;;  %v4450_v61 = vor.u32 %v4449_v55, %v4446_v33  ;;  %v10752_v16 = vrot.slane %v4415_v25, 3  ;;  %v4324_v62 = vsel %vm12853_vm3, %v4321_v8, %v4323_v11  ;;  %v10766_v5 = vld [vmem:[#allocation2 + $0x48] sm:$0xff]  ;;  %vm12901_vm3 = vmmov %vm12858_vm0 }
 0x24c   : > { %v4422_v57 = vrot.slane %v12852_v13, 3  ;;  %v10758_v49 = vor.u32 %v4457_v4, %v4454_v48  ;;  %v12854_v41 = vshll.u32 %v10531_v54, 16  ;;  %v4465_v36 = vshrl.u32 %v4119_v12, 16 }
 0x24d   : > { %v4468_v23 = vshll.u32 %v4119_v12, 16  ;;  %v4420_v24 = vrot.slane %v4418_v29, 4  ;;  %v4460_v1 = vrot.slane %v4112_v27, 3  ;;  %v12855_v60 = vshll.u32 %v10589_v22, 16 }
 0x24e   : > { %v4423_v40 = vrot.slane %v12854_v41, 4  ;;  %v4120_v33 = vshrl.u32 %v10659_v20, 16  ;;  %v4476_v25 = vrot.slane %v4474_v53, 3  ;;  %v4479_v8 = vrot.slane %v4477_v21, 4 }
 0x24f   : > { %v4461_v55 = vrot.slane %v12855_v60, 4  ;;  %v4496_v13 = vshrl.u32 %v4324_v62, 16  ;;  %v4325_v46 = vrot.slane %v10756_v19, 1  ;;  %v12856_v54 = vor.u32 %v10667_v37, %v10665_v38  ;;  %v10816_v60 = vld [vmem:[#allocation2 + $0x58] sm:$0xff] }
 0x250   : > { %v10778_v22 = vsel %vm3056_vm11, %v10364_v63, %v3379_v43  ;;  %v4122_v48 = vor.u32 %v4120_v33, %v4118_v26  ;;  %v12857_v4 = vshll.u32 %v10709_v56, 16  ;;  %v4470_v37 = vrot.slane %v4468_v23, 4 }
 0x251   : > { %v10774_v27 = vsel %vm3056_vm11, %v10377_v50, %v12856_v54  ;;  %3808 = vmatmul.mubr.bf16.gmra.mrb[144].mxu0 %v10631_v6  ;;  %v10788_v38 = vpop.f32.mrb[40].mxu0  ;;  %v4467_v50 = vrot.slane %v4465_v36, 3  ;;  %v4499_v12 = vshll.u32 %v4324_v62, 16  ;;  %v10793_v63 = vsel %vm3056_vm11, %v4450_v61, %v10758_v49 }
 0x252   : > { %7342 = vmatmul.mubr.bf16.gmra.mrb[164].mxu1 %v10640_v39  ;;  %v4126_v29 = vrot.slane %v12857_v4, 1  ;;  %v10786_v39 = vsel %vm3056_vm11, %v4433_v59, %v10748_v0  ;;  %3815 = vmatprep.mubr.bf16.mxu0 %v10334_v32  ;;  %v10795_v26 = vpop.f32.mrb[41].mxu0  ;;  %v4421_v6 = vor.u32 %v4420_v24, %v10752_v16  ;;  %v4327_v43 = vrot.slane %v10766_v5, 1  ;;  %v10814_v24 = vld [vmem:[#allocation2 + $0x50] sm:$0xff] }
 0x253   : > { %7345 = vmatprep.mubr.bf16.mxu1 %v10673_v9  ;;  %v4424_v9 = vor.u32 %v4423_v40, %v4422_v57  ;;  %v2696_v59 = vpop.f32.mrb[60].mxu1  ;;  %v10799_v53 = vpop.f32.mrb[42].mxu0  ;;  %v10801_v21 = vor.u32 %v4479_v8, %v4476_v25  ;;  %v4498_v41 = vrot.slane %v4496_v13, 3  ;;  %v10803_v62 = vor.u32 %v4461_v55, %v4460_v1 }
 0x254   : > { %v4326_v32 = vsel %vm12858_vm0, %v4323_v11, %v4325_v46  ;;  %v10807_v61 = vadd.f32 %v10546_v45, %v2696_v59  ;;  %v2698_v36 = vpop.f32.mrb[61].mxu1  ;;  %v10809_v23 = vpop.f32.mrb[43].mxu0  ;;  %v4127_v57 = vsel %vm12716_vm1, %v4122_v48, %v4126_v29  ;;  %v4128_v16 = vshrl.u32 %v10709_v56, 16  ;;  %vm12909_vm1 = vmmov %vm12858_vm0 }
 0x255   : > { %v2699_v1 = vpop.f32.mrb[62].mxu1  ;;  %v10818_v55 = vor.u32 %v4470_v37, %v4467_v50  ;;  %v4501_v11 = vrot.slane %v4499_v12, 4  ;;  %v4482_v25 = vrot.slane %v4120_v33, 3  ;;  %v4329_v45 = vrot.slane %v10814_v24, 1 }
 0x256   : > { %12859 = vst [vmem:[#allocation36_spill] sm:$0xff] %v10807_v61  ;;  %v10822_v8 = vadd.f32 %v10562_v47, %v2699_v1  ;;  %v2701_v13 = vpop.f32.mrb[63].mxu1  ;;  %v4518_v54 = vshrl.u32 %v4326_v32, 16  ;;  %v4521_v48 = vshll.u32 %v4326_v32, 16  ;;  %v4328_v4 = vsel %vm12861_vm2, %v4325_v46, %v4327_v43  ;;  %vm12913_vm2 = vmmov %vm12867_vm4 }
 0x257   : > { %v4487_v59 = vshrl.u32 %v4127_v57, 16  ;;  %v4490_v36 = vshll.u32 %v4127_v57, 16  ;;  %v12862_v40 = vshll.u32 %v10659_v20, 16  ;;  %v12358_v50 = vrot.slane %v10816_v60, 1 }
 0x258   : > { %12860 = vst [vmem:[#allocation5_spill] sm:$0xff] %v10822_v8  ;;  %v10830_v33 = vsel %vm3056_vm11, %v4421_v6, %v4424_v9  ;;  %v10834_v47 = vsel %vm3056_vm11, %v4424_v9, %v10803_v62  ;;  %v4130_v37 = vor.u32 %v4128_v16, %v4126_v29  ;;  %v12863_v12 = vshll.u32 %v10756_v19, 16 }
 0x259   : > { %v4483_v61 = vrot.slane %v12862_v40, 4  ;;  %3816 = vmatmul.mubr.bf16.gmra.mrb[148].mxu0 %v10350_v7  ;;  %v10843_v20 = vsel %vm3056_vm11, %v10758_v49, %v10801_v21  ;;  %v4543_v6 = vshll.u32 %v4328_v4, 16  ;;  %v4330_v32 = vsel %vm12864_vm5, %v4327_v43, %v4329_v45  ;;  %vm12916_vm5 = vmmov %vm12858_vm0 }
 0x25a   : > { %7346 = vmatmul.mubr.bf16.gmra.mrb[168].mxu1 %v10676_v28  ;;  %v4134_v46 = vrot.slane %v12863_v12, 1  ;;  %v4540_v28 = vshrl.u32 %v4328_v4, 16  ;;  %3823 = vmatprep.mubr.bf16.mxu0 %v10392_v10  ;;  %v10850_v29 = vsel %vm3056_vm11, %v10748_v0, %v10818_v55  ;;  %v10852_v9 = vor.u32 %v4501_v11, %v4498_v41 }
 0x25b   : > { %7349 = vmatprep.mubr.bf16.mxu1 %v10694_v3  ;;  %v4520_v7 = vrot.slane %v4518_v54, 3  ;;  %v4523_v3 = vrot.slane %v4521_v48, 4  ;;  %v2704_v57 = vpop.f32.mrb[64].mxu1  ;;  %v4489_v40 = vrot.slane %v4487_v59, 3  ;;  %v4492_v1 = vrot.slane %v4490_v36, 4 }
 0x25c   : > { %v10854_v49 = vor.u32 %v4483_v61, %v4482_v25  ;;  %v4332_v43 = vsel %vm12865_vm7, %v4329_v45, %v12358_v50  ;;  %v10860_v10 = vadd.f32 %v10626_v14, %v2704_v57  ;;  %v2706_v13 = vpop.f32.mrb[65].mxu1  ;;  %v10862_v4 = vpop.f32.mrb[44].mxu0  ;;  %v4135_v0 = vsel %vm12867_vm4, %v4130_v37, %v4134_v46  ;;  %vm12919_vm7 = vmmov %vm12913_vm2 }
 0x25d   : > { %v4562_v41 = vshrl.u32 %v4330_v32, 16  ;;  %v4565_v11 = vshll.u32 %v4330_v32, 16  ;;  %v2707_v54 = vpop.f32.mrb[66].mxu1  ;;  %v10865_v48 = vpop.f32.mrb[45].mxu0  ;;  %v4542_v59 = vrot.slane %v4540_v28, 3  ;;  %v4545_v61 = vrot.slane %v4543_v6, 4  ;;  %vm12921_vm4 = vmmov %vm12858_vm0 }
 0x25e   : > { %12866 = vst [vmem:[#allocation23_spill] sm:$0xff] %v10860_v10  ;;  %v4504_v25 = vrot.slane %v4128_v16, 3  ;;  %v10869_v45 = vadd.f32 %v10648_v35, %v2707_v54  ;;  %v2709_v14 = vpop.f32.mrb[67].mxu1  ;;  %v10871_v12 = vpop.f32.mrb[46].mxu0  ;;  %v4584_v57 = vshrl.u32 %v4332_v43, 16  ;;  %v4587_v13 = vshll.u32 %v4332_v43, 16 }
 0x25f   : > { %12869 = vst [vmem:[#allocation41_spill] sm:$0xff] %v10871_v12  ;;  %v12870_v37 = vshll.u32 %v10709_v56, 16  ;;  %v10875_v32 = vld [vmem:[#allocation2 + $0x60] sm:$0xff]  ;;  %v10877_v10 = vpop.f32.mrb[47].mxu0  ;;  %v4509_v28 = vshrl.u32 %v4135_v0, 16  ;;  %v4512_v6 = vshll.u32 %v4135_v0, 16  ;;  %v10885_v35 = vsel %vm3056_vm11, %v10801_v21, %v10852_v9 }
 0x260   : > { %12868 = vst [vmem:[#allocation30_spill] sm:$0xff] %v10869_v45  ;;  %v4136_v16 = vshrl.u32 %v10756_v19, 16  ;;  %v4333_v36 = vrot.slane %v10875_v32, 1  ;;  %v4524_v43 = vor.u32 %v4523_v3, %v4520_v7  ;;  %v4564_v56 = vrot.slane %v4562_v41, 3  ;;  %v10898_v21 = vld [vmem:[#allocation2 + $0x68] sm:$0xff] }
 0x261   : > { %v4505_v50 = vrot.slane %v12870_v37, 4  ;;  %v4567_v54 = vrot.slane %v4565_v11, 4  ;;  %3824 = vmatmul.mubr.bf16.gmra.mrb[152].mxu0 %v10368_v15  ;;  %v10889_v14 = vor.u32 %v4492_v1, %v4489_v40  ;;  %v10894_v0 = vsel %vm3056_vm11, %v10803_v62, %v10854_v49 }
 0x262   : > { %7350 = vmatmul.mubr.bf16.gmra.mrb[172].mxu1 %v10737_v17  ;;  %v4138_v17 = vor.u32 %v4136_v16, %v4134_v46  ;;  %v12871_v37 = vshll.u32 %v10766_v5, 16  ;;  %3831 = vmatprep.mubr.bf16.mxu0 %v10774_v27  ;;  %v4546_v7 = vor.u32 %v4545_v61, %v4542_v59  ;;  %v4586_v3 = vrot.slane %v4584_v57, 3  ;;  %v10916_v61 = vld [vmem:[#allocation2 + $0x70] sm:$0xff]  ;;  %v10938_v59 = vld [vmem:[#allocation2 + $0x78] sm:$0xff] }
 0x263   : > { %5214 = vmatprep.mubr.bf16.mxu1 %v10786_v39  ;;  %v10901_v15 = vor.u32 %v4505_v50, %v4504_v25  ;;  %v12359_v39 = vshrl.u32 %v10766_v5, 16  ;;  %v4511_v1 = vrot.slane %v4509_v28, 3  ;;  %v4514_v41 = vrot.slane %v4512_v6, 4  ;;  %12880 = vst [vmem:[#allocation12_spill] sm:$0xff] %v10938_v59 }
 0x264   : > { %v4142_v45 = vrot.slane %v12871_v37, 1  ;;  %v2712_v40 = vpop.f32.mrb[68].mxu1  ;;  %v4589_v11 = vrot.slane %v4587_v13, 4  ;;  %v12872_v62 = vrot.slane %v10816_v60, 1  ;;  %v10910_v12 = vpop.f32.mrb[48].mxu0  ;;  %v10912_v27 = vor.u32 %v4567_v54, %v4564_v56 }
 0x265   : > { %v10908_v37 = vadd.f32 %v10623_v30, %v2712_v40  ;;  %v2714_v8 = vpop.f32.mrb[69].mxu1  ;;  %12875 = vst [vmem:[#allocation34_spill] sm:$0xff] %v10910_v12  ;;  %v4335_v50 = vrot.slane %v10898_v21, 1  ;;  %v10918_v57 = vpop.f32.mrb[49].mxu0  ;;  %v10923_v13 = vsel %vm3056_vm11, %v10818_v55, %v10889_v14  ;;  %v10927_v30 = vsel %vm3056_vm11, %v10852_v9, %v4524_v43 }
 0x266   : > { %v4334_v46 = vsel %vm12873_vm6, %v12872_v62, %v4333_v36  ;;  %v2715_v25 = vpop.f32.mrb[70].mxu1  ;;  %12876 = vst [vmem:[#allocation44_spill] sm:$0xff] %v10918_v57  ;;  %v4143_v8 = vsel %vm12877_vm13, %v4138_v17, %v4142_v45  ;;  %v4337_v28 = vrot.slane %v10916_v61, 1  ;;  %v10934_v54 = vpop.f32.mrb[50].mxu0  ;;  %v4146_v55 = vor.u32 %v12359_v39, %v4142_v45  ;;  %vm12931_vm6 = vmmov %vm12858_vm0 }
 0x267   : > { %12874 = vst [vmem:[#allocation35_spill] sm:$0xff] %v10908_v37  ;;  %v10932_v6 = vadd.f32 %v10637_v58, %v2715_v25  ;;  %v2717_v56 = vpop.f32.mrb[71].mxu1  ;;  %12879 = vst [vmem:[#allocation29_spill] sm:$0xff] %v10934_v54  ;;  %v4606_v40 = vshrl.u32 %v4334_v46, 16  ;;  %v4609_v62 = vshll.u32 %v4334_v46, 16  ;;  %v10940_v37 = vpop.f32.mrb[51].mxu0  ;;  %v10943_v9 = vsel %vm3056_vm11, %v4524_v43, %v4546_v7 }
 0x268   : > { %12881 = vst [vmem:[#allocation13_spill] sm:$0xff] %v10940_v37  ;;  %v10945_v17 = vor.u32 %v4514_v41, %v4511_v1  ;;  %v10947_v12 = vor.u32 %v4589_v11, %v4586_v3  ;;  %v10952_v58 = vsel %vm3056_vm11, %v10854_v49, %v10901_v15  ;;  %v10957_v45 = vsel %vm3056_vm11, %v4546_v7, %v10912_v27  ;;  %vm12932_vm13 = vmmov %vm12913_vm2 }
 0x269   : > { %12878 = vst [vmem:[#allocation11_spill] sm:$0xff] %v10932_v6  ;;  %v4531_v46 = vshrl.u32 %v4143_v8, 16  ;;  %v4336_v25 = vsel %vm12882_vm8, %v4333_v36, %v4335_v50  ;;  %v12883_v43 = vshll.u32 %v10814_v24, 16  ;;  %3832 = vmatmul.mubr.bf16.gmra.mrb[156].mxu0 %v10778_v22  ;;  %v4534_v3 = vshll.u32 %v4143_v8, 16  ;;  %vm12933_vm8 = vmmov %vm12858_vm0 }
 0x26a   : > { %5215 = vmatmul.mubr.bf16.vlgmr.msra.gmra.mrb[176].mxu1 %v10830_v33  ;;  %v4526_v41 = vrot.slane %v4136_v16, 3  ;;  %v4338_v49 = vsel %vm12884_vm12, %v4335_v50, %v4337_v28  ;;  %v4339_v33 = vrot.slane %v10938_v59, 1  ;;  %7369 = vmatprep.mubr.bf16.mxu0 %v10793_v63  ;;  %v4608_v7 = vrot.slane %v4606_v40, 3  ;;  %vm12944_vm12 = vmmov %vm12913_vm2 }
 0x26b   : > { %v4150_v1 = vrot.slane %v12883_v43, 1  ;;  %5222 = vmatprep.mubr.bf16.mxu1 %v10850_v29  ;;  %v4611_v11 = vrot.slane %v4609_v62, 4  ;;  %v12885_v56 = vshll.u32 %v10756_v19, 16  ;;  %v4628_v6 = vshrl.u32 %v4336_v25, 16  ;;  %v10977_v19 = vld [vmem:[#allocation2 + $0x80] sm:$0xff] }
 0x26c   : > { %v2720_v43 = vpop.f32.mrb[72].mxu1  ;;  %v4631_v22 = vshll.u32 %v4336_v25, 16  ;;  %v10975_v54 = vpop.f32.mrb[52].mxu0  ;;  %v4533_v63 = vrot.slane %v4531_v46, 3  ;;  %v4650_v40 = vshrl.u32 %v4338_v49, 16  ;;  %v4653_v62 = vshll.u32 %v4338_v49, 16 }
 0x26d   : > { %v4527_v36 = vrot.slane %v12885_v56, 4  ;;  %v4151_v39 = vsel %vm12886_vm15, %v4146_v55, %v4150_v1  ;;  %v10973_v50 = vadd.f32 %v10718_v51, %v2720_v43  ;;  %v2722_v8 = vpop.f32.mrb[73].mxu1  ;;  %12888 = vst [vmem:[#allocation16_spill] sm:$0xff] %v10975_v54  ;;  %12889 = vst [vmem:[#allocation7_spill] sm:$0xff] %v10977_v19  ;;  %v10979_v55 = vpop.f32.mrb[53].mxu0  ;;  %v4340_v29 = vsel %vm12891_vm9, %v4337_v28, %v4339_v33 }
 0x26e   : > { %v2723_v56 = vpop.f32.mrb[74].mxu1  ;;  %12890 = vst [vmem:[#allocation45_spill] sm:$0xff] %v10979_v55  ;;  %v4553_v37 = vshrl.u32 %v4151_v39, 16  ;;  %v4556_v25 = vshll.u32 %v4151_v39, 16  ;;  %v4341_v16 = vrot.slane %v10977_v19, 1  ;;  %v10986_v8 = vpop.f32.mrb[54].mxu0  ;;  %vm12953_vm15 = vmmov %vm12913_vm2 }
 0x26f   : > { %12887 = vst [vmem:[#allocation15_spill] sm:$0xff] %v10973_v50  ;;  %v10984_v51 = vadd.f32 %v10733_v52, %v2723_v56  ;;  %v2725_v43 = vpop.f32.mrb[75].mxu1  ;;  %v4536_v46 = vrot.slane %v4534_v3, 4  ;;  %v4612_v50 = vor.u32 %v4611_v11, %v4608_v7  ;;  %v10988_v49 = vor.u32 %v4527_v36, %v4526_v41  ;;  %v10990_v54 = vpop.f32.mrb[55].mxu0  ;;  %v10998_v52 = vld [vmem:[#allocation2 + $0x88] sm:$0xff]  ;;  %vm12956_vm9 = vmmov %vm12913_vm2 }
 0x270   : > { %v4630_v57 = vrot.slane %v4628_v6, 3  ;;  %v4633_v55 = vrot.slane %v4631_v22, 4  ;;  %v12893_v39 = vshrl.u32 %v10814_v24, 16  ;;  %v12894_v28 = vshll.u32 %v10816_v60, 16 }
 0x271   : > { %12892 = vst [vmem:[#allocation17_spill] sm:$0xff] %v10984_v51  ;;  %v11004_v3 = vsel %vm3056_vm11, %v10912_v27, %v10947_v12  ;;  %v4652_v41 = vrot.slane %v4650_v40, 3  ;;  %v4655_v7 = vrot.slane %v4653_v62, 4  ;;  %v4672_v6 = vshrl.u32 %v4340_v29, 16  ;;  %7370 = vmatmul.mubr.bf16.vlgmr.msra.gmra.mrb[160].mxu0 %v10843_v20 }
 0x272   : > { %v4154_v59 = vor.u32 %v12893_v39, %v4150_v1  ;;  %v10996_v19 = vrot.slane %v12894_v28, 1  ;;  %5223 = vmatmul.mubr.bf16.gmra.mrb[180].mxu1 %v10834_v47  ;;  %v4555_v1 = vrot.slane %v4553_v37, 3  ;;  %v4558_v11 = vrot.slane %v4556_v25, 4  ;;  %7373 = vmatprep.mubr.bf16.mxu0 %v10885_v35 }
 0x273   : > { %5230 = vmatprep.mubr.bf16.mxu1 %v10923_v13  ;;  %v4675_v36 = vshll.u32 %v4340_v29, 16  ;;  %v4342_v22 = vsel %vm12895_vm14, %v4339_v33, %v4341_v16  ;;  %v4516_v47 = vsel %vm3056_vm11, %v10889_v14, %v10945_v17  ;;  %v4537_v27 = vor.u32 %v4536_v46, %v4533_v63  ;;  %vm12957_vm14 = vmmov %vm12913_vm2 }
 0x274   : > { %v11016_v40 = vsel %vm3056_vm11, %v10901_v15, %v10988_v49  ;;  %v4343_v20 = vrot.slane %v10998_v52, 1  ;;  %v11021_v37 = vsel %vm3056_vm11, %v10947_v12, %v4612_v50  ;;  %v4634_v33 = vor.u32 %v4633_v55, %v4630_v57  ;;  %v11030_v15 = vpop.f32.mrb[56].mxu0 }
 0x275   : > { %v2728_v13 = vpop.f32.mrb[76].mxu1  ;;  %v12896_v35 = vshrl.u32 %v10766_v5, 16  ;;  %v4159_v14 = vsel %vm12897_vm10, %v4154_v59, %v10996_v19  ;;  %v11032_v56 = vor.u32 %v4655_v7, %v4652_v41  ;;  %v12899_v25 = vshll.u32 %v10766_v5, 16  ;;  %v11036_v57 = vpop.f32.mrb[57].mxu0  ;;  %vm12961_vm10 = vmmov %vm12858_vm0 }
 0x276   : > { %v11028_v63 = vadd.f32 %v10711_v2, %v2728_v13  ;;  %v2730_v62 = vpop.f32.mrb[77].mxu1  ;;  %v4694_v12 = vshrl.u32 %v4342_v22, 16  ;;  %v11038_v55 = vor.u32 %v4558_v11, %v4555_v1  ;;  %v4674_v39 = vrot.slane %v4672_v6, 3 }
 0x277   : > { %v4548_v29 = vrot.slane %v12896_v35, 3  ;;  %v4549_v43 = vrot.slane %v12899_v25, 4  ;;  %v2731_v46 = vpop.f32.mrb[78].mxu1  ;;  %v4677_v28 = vrot.slane %v4675_v36, 4  ;;  %v4697_v59 = vshll.u32 %v4342_v22, 16  ;;  %v11043_v35 = vpop.f32.mrb[58].mxu0 }
 0x278   : > { %12898 = vst [vmem:[#allocation18_spill] sm:$0xff] %v11028_v63  ;;  %v11041_v2 = vadd.f32 %v10724_v31, %v2731_v46  ;;  %v2733_v13 = vpop.f32.mrb[79].mxu1  ;;  %v4575_v41 = vshrl.u32 %v4159_v14, 16  ;;  %v4578_v7 = vshll.u32 %v4159_v14, 16  ;;  %v4344_v5 = vsel %vm12901_vm3, %v4341_v16, %v4343_v20  ;;  %v11046_v62 = vld [vmem:[#allocation2 + $0x98] sm:$0xff]  ;;  %v11048_v25 = vpop.f32.mrb[59].mxu0  ;;  %vm12974_vm3 = vmmov %vm12858_vm0 }
 0x279   : > { %v4538_v1 = vsel %vm3056_vm11, %v10945_v17, %v4537_v27  ;;  %v11053_v6 = vsel %vm3056_vm11, %v4612_v50, %v4634_v33  ;;  %v11057_v36 = vld [vmem:[#allocation2 + $0x90] sm:$0xff]  ;;  %v11062_v16 = vsel %vm3056_vm11, %v4634_v33, %v11032_v56  ;;  %v4550_v22 = vor.u32 %v4549_v43, %v4548_v29  ;;  %7374 = vmatmul.mubr.bf16.gmra.mrb[164].mxu0 %v10927_v30 }
 0x27a   : > { %12900 = vst [vmem:[#allocation32_spill] sm:$0xff] %v11041_v2  ;;  %5231 = vmatmul.mubr.bf16.gmra.mrb[184].mxu1 %v10894_v0  ;;  %v4696_v14 = vrot.slane %v4694_v12, 3  ;;  %v4345_v46 = vrot.slane %v11057_v36, 1  ;;  %v4699_v17 = vrot.slane %v4697_v59, 4  ;;  %v4716_v50 = vshrl.u32 %v4344_v5, 16  ;;  %7377 = vmatprep.mubr.bf16.mxu0 %v10943_v9 }
 0x27b   : > { %5238 = vmatprep.mubr.bf16.mxu1 %v4516_v47  ;;  %v4719_v13 = vshll.u32 %v4344_v5, 16  ;;  %v4347_v11 = vrot.slane %v11046_v62, 1  ;;  %v11070_v0 = vsel %vm3056_vm11, %v4537_v27, %v11038_v55  ;;  %v4678_v33 = vor.u32 %v4677_v28, %v4674_v39 }
 0x27c   : > { %v4577_v31 = vrot.slane %v4575_v41, 3  ;;  %v4580_v29 = vrot.slane %v4578_v7, 4  ;;  %v12902_v12 = vshrl.u32 %v10814_v24, 16  ;;  %v12903_v30 = vshll.u32 %v10814_v24, 16  ;;  %v11081_v51 = vpop.f32.mrb[60].mxu0 }
 0x27d   : > { %v2736_v43 = vpop.f32.mrb[80].mxu1  ;;  %v12904_v59 = vshrl.u32 %v10816_v60, 16  ;;  %v12905_v9 = vshll.u32 %v10875_v32, 16  ;;  %12906 = vst [vmem:[#allocation19_spill] sm:$0xff] %v11081_v51  ;;  %v4346_v28 = vsel %vm12858_vm0, %v4343_v20, %v4345_v46  ;;  %v11089_v7 = vpop.f32.mrb[61].mxu0  ;;  %v11094_v51 = vld [vmem:[#allocation2 + $0xa0] sm:$0xff]  ;;  %vm12977_vm0 = vmmov %vm12913_vm2 }
 0x27e   : > { %v4570_v2 = vrot.slane %v12902_v12, 3  ;;  %v4571_v47 = vrot.slane %v12903_v30, 4  ;;  %v11084_v27 = vadd.f32 %v10795_v26, %v2736_v43  ;;  %v2738_v39 = vpop.f32.mrb[81].mxu1  ;;  %12908 = vst [vmem:[#allocation46_spill] sm:$0xff] %v11089_v7  ;;  %v11091_v30 = vor.u32 %v4699_v17, %v4696_v14  ;;  %v11096_v26 = vpop.f32.mrb[62].mxu0  ;;  %v11108_v17 = vld [vmem:[#allocation2 + $0xa8] sm:$0xff] }
 0x27f   : > { %v4162_v5 = vor.u32 %v12904_v59, %v10996_v19  ;;  %v4166_v63 = vrot.slane %v12905_v9, 1  ;;  %v2739_v12 = vpop.f32.mrb[82].mxu1  ;;  %v4718_v19 = vrot.slane %v4716_v50, 3  ;;  %v4721_v59 = vrot.slane %v4719_v13, 4  ;;  %12910 = vst [vmem:[#allocation21_spill] sm:$0xff] %v11096_v26  ;;  %v11110_v50 = vpop.f32.mrb[63].mxu0 }
 0x280   : > { %12907 = vst [vmem:[#allocation20_spill] sm:$0xff] %v11084_v27  ;;  %v4348_v9 = vsel %vm12909_vm1, %v4345_v46, %v4347_v11  ;;  %v11099_v43 = vadd.f32 %v10809_v23, %v2739_v12  ;;  %v2741_v20 = vpop.f32.mrb[83].mxu1  ;;  %v11103_v39 = vsel %vm3056_vm11, %v10988_v49, %v4550_v22  ;;  %v11105_v24 = vor.u32 %v4580_v29, %v4577_v31 }
 0x281   : > { %v4349_v14 = vrot.slane %v11094_v51, 1  ;;  %12912 = vst [vmem:[#allocation26_spill] sm:$0xff] %v11110_v50  ;;  %v11112_v46 = vor.u32 %v4571_v47, %v4570_v2  ;;  %v4167_v13 = vsel %vm12913_vm2, %v4162_v5, %v4166_v63  ;;  %v4738_v41 = vshrl.u32 %v4346_v28, 16  ;;  %7378 = vmatmul.mubr.bf16.gmra.mrb[168].mxu0 %v10957_v45  ;;  %vm12986_vm2 = vmmov %vm12909_vm1 }
 0x282   : > { %12911 = vst [vmem:[#allocation22_spill] sm:$0xff] %v11099_v43  ;;  %v4741_v23 = vshll.u32 %v4346_v28, 16  ;;  %5239 = vmatmul.mubr.bf16.gmra.mrb[188].mxu1 %v10952_v58  ;;  %v4760_v12 = vshrl.u32 %v4348_v9, 16  ;;  %v4763_v20 = vshll.u32 %v4348_v9, 16  ;;  %v12914_v49 = vshrl.u32 %v10875_v32, 16  ;;  %7381 = vmatprep.mubr.bf16.mxu0 %v11004_v3 }
 0x283   : > { %v12915_v29 = vshll.u32 %v10898_v21, 16  ;;  %5246 = vmatprep.mubr.bf16.mxu1 %v4538_v1  ;;  %v11123_v2 = vsel %vm3056_vm11, %v11032_v56, %v4678_v33  ;;  %v11127_v47 = vsel %vm3056_vm11, %v4678_v33, %v11091_v30  ;;  %v11129_v58 = vor.u32 %v4721_v59, %v4718_v19 }
 0x284   : > { %v4170_v31 = vor.u32 %v12914_v49, %v4166_v63  ;;  %v11136_v63 = vsel %vm3056_vm11, %v11038_v55, %v11105_v24  ;;  %v4597_v45 = vshrl.u32 %v4167_v13, 16  ;;  %v4600_v1 = vshll.u32 %v4167_v13, 16  ;;  %v3649_v3 = vpop.f32.mrb[64].mxu0 }
 0x285   : > { %v4174_v43 = vrot.slane %v12915_v29, 1  ;;  %v4350_v56 = vsel %vm12916_vm5, %v4347_v11, %v4349_v14  ;;  %v2744_v28 = vpop.f32.mrb[84].mxu1  ;;  %v11141_v33 = vsel %vm3056_vm11, %v4550_v22, %v11112_v46  ;;  %v4740_v19 = vrot.slane %v4738_v41, 3  ;;  %v3651_v26 = vpop.f32.mrb[65].mxu0  ;;  %vm12987_vm5 = vmmov %vm12977_vm0 }
 0x286   : > { %v4743_v59 = vrot.slane %v4741_v23, 4  ;;  %v12917_v9 = vshrl.u32 %v10816_v60, 16  ;;  %v11146_v29 = vadd.f32 %v10788_v38, %v2744_v28  ;;  %v2746_v55 = vpop.f32.mrb[85].mxu1  ;;  %v4762_v5 = vrot.slane %v4760_v12, 3  ;;  %v3652_v7 = vpop.f32.mrb[66].mxu0 }
 0x287   : > { %v4765_v27 = vrot.slane %v4763_v20, 4  ;;  %v4175_v13 = vsel %vm12919_vm7, %v4170_v31, %v4174_v43  ;;  %v11150_v11 = vadd.f32 %v3649_v3, %v10395_v18  ;;  %v2747_v22 = vpop.f32.mrb[86].mxu1  ;;  %v4782_v50 = vshrl.u32 %v4350_v56, 16  ;;  %v3654_v26 = vpop.f32.mrb[67].mxu0  ;;  %vm12993_vm7 = vmmov %vm12977_vm0 }
 0x288   : > { %v4592_v49 = vrot.slane %v12917_v9, 3  ;;  %12918 = vst [vmem:[#allocation27_spill] sm:$0xff] %v11146_v29  ;;  %v4785_v41 = vshll.u32 %v4350_v56, 16  ;;  %v12920_v23 = vrot.slane %v11108_v17, 1  ;;  %v11156_v38 = vadd.f32 %v10799_v53, %v2747_v22  ;;  %v2749_v28 = vpop.f32.mrb[87].mxu1 }
 0x289   : > { %v4599_v12 = vrot.slane %v4597_v45, 3  ;;  %v4602_v20 = vrot.slane %v4600_v1, 4  ;;  %v12923_v31 = vshll.u32 %v10816_v60, 16  ;;  %v11161_v18 = vadd.f32 %v3652_v7, %v10401_v42  ;;  %7382 = vmatmul.mubr.bf16.gmra.mrb[172].mxu0 %v11021_v37 }
 0x28a   : > { %v4352_v9 = vsel %vm12921_vm4, %v4349_v14, %v12920_v23  ;;  %12922 = vst [vmem:[#allocation33_spill] sm:$0xff] %v11156_v38  ;;  %v4619_v3 = vshrl.u32 %v4175_v13, 16  ;;  %v4622_v56 = vshll.u32 %v4175_v13, 16  ;;  %v4176_v29 = vshrl.u32 %v10898_v21, 16  ;;  %5247 = vmatmul.mubr.bf16.gmra.mrb[192].mxu1 %v11016_v40  ;;  %v11177_v23 = vld [vmem:[#allocation2 + $0xb0] sm:$0xff]  ;;  %7385 = vmatprep.mubr.bf16.mxu0 %v11053_v6  ;;  %vm13000_vm4 = vmmov %vm12977_vm0 }
 0x28b   : > { %v4593_v55 = vrot.slane %v12923_v31, 4  ;;  %12924 = vst [vmem:[#allocation25_spill] sm:$0xff] %v11161_v18  ;;  %v11168_v53 = vsel %vm3056_vm11, %v11091_v30, %v11129_v58  ;;  %v4804_v14 = vshrl.u32 %v4352_v9, 16  ;;  %v12925_v45 = vshrl.u32 %v10875_v32, 16  ;;  %5254 = vmatprep.mubr.bf16.mxu1 %v11070_v0  ;;  %v11179_v30 = vld [vmem:[#allocation2 + $0xb8] sm:$0xff] }
 0x28c   : > { %v12926_v1 = vshll.u32 %v10875_v32, 16  ;;  %v4784_v7 = vrot.slane %v4782_v50, 3  ;;  %v4787_v13 = vrot.slane %v4785_v41, 4  ;;  %v4807_v22 = vshll.u32 %v4352_v9, 16  ;;  %v3657_v41 = vpop.f32.mrb[68].mxu0 }
 0x28d   : > { %v4614_v60 = vrot.slane %v12925_v45, 3  ;;  %v4744_v28 = vor.u32 %v4743_v59, %v4740_v19  ;;  %v4766_v31 = vor.u32 %v4765_v27, %v4762_v5  ;;  %v4594_v26 = vor.u32 %v4593_v55, %v4592_v49  ;;  %v2752_v45 = vpop.f32.mrb[88].mxu1  ;;  %v3659_v5 = vpop.f32.mrb[69].mxu0 }
 0x28e   : > { %v4615_v42 = vrot.slane %v12926_v1, 4  ;;  %v4353_v32 = vrot.slane %v11177_v23, 1  ;;  %v4603_v37 = vor.u32 %v4602_v20, %v4599_v12  ;;  %v4621_v1 = vrot.slane %v4619_v3, 3  ;;  %v2754_v40 = vpop.f32.mrb[89].mxu1 }
 0x28f   : > { %v4624_v0 = vrot.slane %v4622_v56, 4  ;;  %v4178_v50 = vor.u32 %v4176_v29, %v4174_v43  ;;  %v11184_v9 = vadd.f32 %v10865_v48, %v2752_v45  ;;  %v4806_v38 = vrot.slane %v4804_v14, 3  ;;  %v2755_v19 = vpop.f32.mrb[90].mxu1  ;;  %v3660_v48 = vpop.f32.mrb[70].mxu0  ;;  %v11243_v45 = vld [vmem:[#allocation2 + $0xc0] sm:$0xff] }
 0x290   : > { %v11186_v18 = vor.u32 %v4615_v42, %v4614_v60  ;;  %v12364_v6 = vrot.slane %v11179_v30, 1  ;;  %v11190_v27 = vadd.f32 %v3657_v41, %v10414_v44  ;;  %v11192_v59 = vor.u32 %v4787_v13, %v4784_v7  ;;  %v2757_v55 = vpop.f32.mrb[91].mxu1  ;;  %v3662_v42 = vpop.f32.mrb[71].mxu0 }
 0x291   : > { %12927 = vst [vmem:[#allocation37_spill] sm:$0xff] %v11184_v9  ;;  %v4809_v49 = vrot.slane %v4807_v22, 4  ;;  %v12928_v43 = vshll.u32 %v10916_v61, 16  ;;  %v11199_v20 = vadd.f32 %v10877_v10, %v2755_v19  ;;  %v11203_v3 = vsel %vm3056_vm11, %v11129_v58, %v4744_v28  ;;  %7386 = vmatmul.mubr.bf16.gmra.mrb[176].mxu0 %v11062_v16  ;;  %v12951_v9 = vld [vmem:[#allocation6_spill] sm:$0xff] }
 0x292   : > { %v12930_v44 = vrot.slane %v11108_v17, 1  ;;  %v4252_v14 = vshll.u32 %v11179_v30, 16  ;;  %v11210_v60 = vadd.f32 %v3660_v48, %v10424_v34  ;;  %v11213_v7 = vsel %vm3056_vm11, %v4744_v28, %v4766_v31  ;;  %5255 = vmatmul.mubr.bf16.gmra.mrb[196].mxu1 %v11103_v39  ;;  %7389 = vmatprep.mubr.bf16.mxu0 %v11123_v2 }
 0x293   : > { %v11196_v12 = vrot.slane %v12928_v43, 1  ;;  %12929 = vst [vmem:[#allocation38_spill] sm:$0xff] %v11199_v20  ;;  %v11215_v10 = vor.u32 %v4624_v0, %v4621_v1  ;;  %v4604_v58 = vsel %vm3056_vm11, %v11105_v24, %v4603_v37  ;;  %v11224_v22 = vsel %vm3056_vm11, %v11112_v46, %v4594_v26  ;;  %5262 = vmatprep.mubr.bf16.mxu1 %v11136_v63 }
 0x294   : > { %v4354_v56 = vsel %vm12931_vm6, %v12930_v44, %v4353_v32  ;;  %v11228_v34 = vsel %vm3056_vm11, %v4594_v26, %v11186_v18  ;;  %v11233_v40 = vsel %vm12933_vm8, %v4353_v32, %v12364_v6  ;;  %v11239_v24 = vsel %vm3056_vm11, %v4766_v31, %v11192_v59  ;;  %v3665_v2 = vpop.f32.mrb[72].mxu0  ;;  %vm13005_vm6 = vmmov %vm12977_vm0 }
 0x295   : > { %v4183_v13 = vsel %vm12932_vm13, %v4178_v50, %v11196_v12  ;;  %v11241_v39 = vor.u32 %v4809_v49, %v4806_v38  ;;  %v4826_v46 = vshrl.u32 %v4354_v56, 16  ;;  %v4829_v28 = vshll.u32 %v4354_v56, 16  ;;  %v2760_v63 = vpop.f32.mrb[92].mxu1  ;;  %v3667_v55 = vpop.f32.mrb[73].mxu0  ;;  %vm13012_vm13 = vmmov %vm12977_vm0 }
 0x296   : > { %v4641_v26 = vshrl.u32 %v4183_v13, 16  ;;  %v11246_v1 = vrot.slane %v4176_v29, 3  ;;  %v11248_v32 = vrot.slane %v4252_v14, 1  ;;  %v4256_v16 = vshrl.u32 %v11179_v30, 16  ;;  %v2762_v5 = vpop.f32.mrb[93].mxu1  ;;  %vm13020_vm8 = vmmov %vm12977_vm0 }
 0x297   : > { %v11253_v31 = vsel %vm3056_vm11, %v4603_v37, %v11215_v10  ;;  %v12935_v50 = vshll.u32 %v10898_v21, 16  ;;  %v11262_v29 = vadd.f32 %v10862_v4, %v2760_v63  ;;  %v4644_v19 = vshll.u32 %v4183_v13, 16  ;;  %v12937_v37 = vld [vmem:[#allocation8_spill] sm:$0xff]  ;;  %v2763_v44 = vpop.f32.mrb[94].mxu1  ;;  %v12939_v4 = vld [vmem:[#allocation41_spill] sm:$0xff] }
 0x298   : > { %12934 = vst [vmem:[#allocation42_spill] sm:$0xff] %v11248_v32  ;;  %v4258_v49 = vor.u32 %v4256_v16, %v11248_v32  ;;  %v4260_v43 = vshll.u32 %v11243_v45, 16  ;;  %v11267_v48 = vadd.f32 %v3665_v2, %v12937_v37  ;;  %v11269_v56 = vrot.slane %v4826_v46, 3  ;;  %v2765_v13 = vpop.f32.mrb[95].mxu1  ;;  %v12941_v2 = vld [vmem:[#allocation4_spill] sm:$0xff]  ;;  %v12952_v32 = vld [vmem:[#allocation13_spill] sm:$0xff] }
 0x299   : > { %v11259_v41 = vrot.slane %v12935_v50, 4  ;;  %12936 = vst [vmem:[#allocation39_spill] sm:$0xff] %v11262_v29  ;;  %v11271_v21 = vrot.slane %v4829_v28, 4  ;;  %v3668_v50 = vpop.f32.mrb[74].mxu0  ;;  %v11275_v63 = vadd.f32 %v12939_v4, %v2763_v44  ;;  %v11277_v5 = vrot.slane %v4641_v26, 3  ;;  %v12943_v46 = vld [vmem:[#allocation12_spill] sm:$0xff]  ;;  %7390 = vmatmul.mubr.bf16.gmra.mrb[180].mxu0 %v11127_v47 }
 0x29a   : > { %12938 = vst [vmem:[#allocation40_spill] sm:$0xff] %v11267_v48  ;;  %v4262_v0 = vrot.slane %v4260_v43, 1  ;;  %v4264_v38 = vshrl.u32 %v11243_v45, 16  ;;  %v11281_v37 = vadd.f32 %v3668_v50, %v12941_v2  ;;  %v3670_v55 = vpop.f32.mrb[75].mxu0  ;;  %v11284_v28 = vld [vmem:[#allocation2 + $0xc8] sm:$0xff]  ;;  %v4856_v29 = vrot.slane %v4256_v16, 3  ;;  %5263 = vmatmul.mubr.bf16.gmra.mrb[200].mxu1 %v11141_v33  ;;  %7393 = vmatprep.mubr.bf16.mxu0 %v11168_v53 }
 0x29b   : > { %12940 = vst [vmem:[#allocation43_spill] sm:$0xff] %v11275_v63  ;;  %v4857_v42 = vrot.slane %v4252_v14, 4  ;;  %v11287_v44 = vrot.slane %v4644_v19, 4  ;;  %v4879_v13 = vrot.slane %v4260_v43, 4  ;;  %5270 = vmatprep.mubr.bf16.mxu1 %v4604_v58  ;;  %v4268_v14 = vshll.u32 %v11284_v28, 16  ;;  %v11296_v19 = vld [vmem:[#allocation2] sm:$0xff] }
 0x29c   : > { %12942 = vst [vmem:[#allocation8_spill] sm:$0xff] %v11281_v37  ;;  %v4263_v26 = vsel %vm12944_vm12, %v4258_v49, %v4262_v0  ;;  %v4878_v4 = vrot.slane %v4264_v38, 3  ;;  %v4266_v6 = vor.u32 %v4264_v38, %v4262_v0  ;;  %v4272_v33 = vshrl.u32 %v11284_v28, 16  ;;  %v3673_v0 = vpop.f32.mrb[76].mxu0  ;;  %vm13029_vm12 = vmmov %vm12977_vm0 }
 0x29d   : > { %v4861_v50 = vshrl.u32 %v4263_v26, 16  ;;  %v4864_v2 = vshll.u32 %v4263_v26, 16  ;;  %v11291_v55 = vor.u32 %v4857_v42, %v4856_v29  ;;  %v2768_v43 = vpop.f32.mrb[96].mxu1  ;;  %v12946_v47 = vshrl.u32 %v10916_v61, 16  ;;  %v12948_v26 = vld [vmem:[#allocation44_spill] sm:$0xff] }
 0x29e   : > { %v4880_v16 = vor.u32 %v4879_v13, %v4878_v4  ;;  %v12947_v29 = vshll.u32 %v12943_v46, 16  ;;  %v11306_v4 = vadd.f32 %v12948_v26, %v2768_v43  ;;  %v2770_v13 = vpop.f32.mrb[97].mxu1  ;;  %v4270_v20 = vrot.slane %v4268_v14, 1 }
 0x29f   : > { %12945 = vst [vmem:[#allocation41_spill] sm:$0xff] %v11291_v55  ;;  %v4186_v58 = vor.u32 %v12946_v47, %v11196_v12  ;;  %v4863_v53 = vrot.slane %v4861_v50, 3  ;;  %v4866_v63 = vrot.slane %v4864_v2, 4  ;;  %v11313_v37 = vadd.f32 %v3673_v0, %v12951_v9  ;;  %v3675_v12 = vpop.f32.mrb[77].mxu0  ;;  %v2771_v47 = vpop.f32.mrb[98].mxu1  ;;  %v12955_v9 = vld [vmem:[#allocation10_spill] sm:$0xff] }
 0x2a0   : > { %v4190_v42 = vrot.slane %v12947_v29, 1  ;;  %12949 = vst [vmem:[#allocation4_spill] sm:$0xff] %v11306_v4  ;;  %v11310_v49 = vsel %vm3056_vm11, %v11291_v55, %v4880_v16  ;;  %v4900_v38 = vrot.slane %v4272_v33, 3  ;;  %v4901_v50 = vrot.slane %v4268_v14, 4  ;;  %v3676_v48 = vpop.f32.mrb[78].mxu0  ;;  %v2773_v26 = vpop.f32.mrb[99].mxu1 }
 0x2a1   : > { %12950 = vst [vmem:[#allocation12_spill] sm:$0xff] %v11310_v49  ;;  %v11317_v43 = vadd.f32 %v12952_v32, %v2771_v47  ;;  %v4271_v2 = vsel %vm12953_vm15, %v4266_v6, %v4270_v20  ;;  %v4274_v13 = vor.u32 %v4272_v33, %v4270_v20  ;;  %v12954_v49 = vshll.u32 %v11296_v19, 16  ;;  %v3678_v12 = vpop.f32.mrb[79].mxu0  ;;  %7394 = vmatmul.mubr.bf16.gmra.mrb[184].mxu0 %v11203_v3  ;;  %v12967_v32 = vld [vmem:[#allocation3_spill] sm:$0xff]  ;;  %vm13046_vm15 = vmmov %vm12977_vm0 }
 0x2a2   : > { %v11325_v0 = vadd.f32 %v3676_v48, %v12955_v9  ;;  %v4191_v29 = vsel %vm12956_vm9, %v4186_v58, %v4190_v42  ;;  %v4883_v55 = vshrl.u32 %v4271_v2, 16  ;;  %v4886_v14 = vshll.u32 %v4271_v2, 16  ;;  %5271 = vmatmul.mubr.bf16.gmra.mrb[204].mxu1 %v11224_v22  ;;  %7397 = vmatprep.mubr.bf16.mxu0 %v11213_v7  ;;  %v12964_v7 = vld [vmem:[#allocation34_spill] sm:$0xff] }
 0x2a3   : > { %v11322_v4 = vrot.slane %v12954_v49, 1  ;;  %v11330_v47 = vor.u32 %v4866_v63, %v4863_v53  ;;  %v11334_v20 = vor.u32 %v4901_v50, %v4900_v38  ;;  %5278 = vmatprep.mubr.bf16.mxu1 %v11253_v31  ;;  %v4663_v22 = vshrl.u32 %v4191_v29, 16  ;;  %v12963_v31 = vld [vmem:[#allocation7_spill] sm:$0xff] }
 0x2a4   : > { %v4885_v48 = vrot.slane %v4883_v55, 3  ;;  %v4888_v33 = vrot.slane %v4886_v14, 4  ;;  %v4666_v26 = vshll.u32 %v4191_v29, 16  ;;  %v12959_v63 = vrot.slane %v11243_v45, 1  ;;  %v3681_v12 = vpop.f32.mrb[80].mxu0 }
 0x2a5   : > { %v4279_v6 = vsel %vm12957_vm14, %v4274_v13, %v11322_v4  ;;  %12958 = vst [vmem:[#allocation44_spill] sm:$0xff] %v11334_v20  ;;  %v12960_v53 = vrot.slane %v11179_v30, 1  ;;  %v11346_v38 = vsel %vm3056_vm11, %v4880_v16, %v11334_v20  ;;  %v2776_v3 = vpop.f32.mrb[100].mxu1  ;;  %v11354_v30 = vor.u32 %v11287_v44, %v11277_v5 }
 0x2a6   : > { %v4905_v49 = vshrl.u32 %v4279_v6, 16  ;;  %v4908_v58 = vshll.u32 %v4279_v6, 16  ;;  %12962 = vst [vmem:[#allocation6_spill] sm:$0xff] %v11346_v38  ;;  %v4889_v50 = vor.u32 %v4888_v33, %v4885_v48  ;;  %v11350_v14 = vadd.f32 %v12964_v7, %v2776_v3  ;;  %v2778_v29 = vpop.f32.mrb[101].mxu1  ;;  %v3683_v48 = vpop.f32.mrb[81].mxu0  ;;  %v12970_v7 = vld [vmem:[#allocation29_spill] sm:$0xff] }
 0x2a7   : > { %v4358_v2 = vsel %vm12961_vm10, %v12960_v53, %v12959_v63  ;;  %v12965_v6 = vshrl.u32 %v11233_v40, 16  ;;  %v12966_v16 = vshll.u32 %v11233_v40, 16  ;;  %v11361_v55 = vadd.f32 %v3681_v12, %v12967_v32  ;;  %v2779_v33 = vpop.f32.mrb[102].mxu1  ;;  %v3684_v44 = vpop.f32.mrb[82].mxu0 }
 0x2a8   : > { %v4907_v13 = vrot.slane %v4905_v49, 3  ;;  %v4910_v9 = vrot.slane %v4908_v58, 4  ;;  %v12968_v49 = vshrl.u32 %v12943_v46, 16  ;;  %v11367_v3 = vsel %vm3056_vm11, %v11330_v47, %v4889_v50  ;;  %v2781_v40 = vpop.f32.mrb[103].mxu1  ;;  %v3686_v20 = vpop.f32.mrb[83].mxu0 }
 0x2a9   : > { %v4850_v63 = vrot.slane %v12965_v6, 3  ;;  %v4853_v53 = vrot.slane %v12966_v16, 4  ;;  %v11372_v29 = vadd.f32 %v12970_v7, %v2779_v33  ;;  %v4665_v6 = vrot.slane %v4663_v22, 3  ;;  %7398 = vmatmul.mubr.bf16.gmra.mrb[188].mxu0 %v11239_v24  ;;  %v4091_v7 = vld [vmem:[#allocation2 + $0xd8] sm:$0x1f] }
 0x2aa   : > { %v4194_v58 = vor.u32 %v12968_v49, %v4190_v42  ;;  %v11369_v5 = vor.u32 %v4910_v9, %v4907_v13  ;;  %v4870_v16 = vshrl.u32 %v4358_v2, 16  ;;  %v12972_v32 = vrot.slane %v11284_v28, 1  ;;  %v12975_v42 = vld [vmem:[#allocation14_spill] sm:$0xff]  ;;  %5279 = vmatmul.mubr.bf16.gmra.mrb[208].mxu1 %v11228_v34 }
 0x2ab   : > { %12971 = vst [vmem:[#allocation10_spill] sm:$0xff] %v11372_v29  ;;  %v12973_v12 = vrot.slane %v11243_v45, 1  ;;  %v11380_v49 = vadd.f32 %v3684_v44, %v12975_v42  ;;  %v4668_v38 = vrot.slane %v4666_v26, 4  ;;  %v12976_v13 = vshll.u32 %v12963_v31, 16 }
 0x2ac   : > { %12969 = vst [vmem:[#allocation13_spill] sm:$0xff] %v11369_v5  ;;  %v11386_v33 = vsel %vm3056_vm11, %v4889_v50, %v11369_v5  ;;  %v4811_v22 = vsel %vm3056_vm11, %v11192_v59, %v11241_v39  ;;  %v4648_v45 = vsel %vm3056_vm11, %v11215_v10, %v11354_v30  ;;  %v4832_v20 = vor.u32 %v11271_v21, %v11269_v56  ;;  %v3689_v42 = vpop.f32.mrb[84].mxu0 }
 0x2ad   : > { %v4360_v48 = vsel %vm12974_vm3, %v12973_v12, %v12972_v32  ;;  %v4198_v9 = vrot.slane %v12976_v13, 1  ;;  %v4638_v26 = vor.u32 %v11259_v41, %v11246_v1  ;;  %5286 = vmatprep.mubr.bf16.mxu1 %v4648_v45  ;;  %v4873_v50 = vshll.u32 %v4358_v2, 16  ;;  %7401 = vmatprep.mubr.bf16.mxu0 %v4811_v22  ;;  %v2784_v41 = vpop.f32.mrb[104].mxu1  ;;  %v12980_v13 = vld [vmem:[#allocation45_spill] sm:$0xff] }
 0x2ae   : > { %v4892_v40 = vshrl.u32 %v4360_v48, 16  ;;  %v4895_v10 = vshll.u32 %v4360_v48, 16  ;;  %v12978_v32 = vshrl.u32 %v10916_v61, 16  ;;  %v12979_v21 = vshll.u32 %v10916_v61, 16  ;;  %v2786_v22 = vpop.f32.mrb[105].mxu1  ;;  %v3691_v61 = vpop.f32.mrb[85].mxu0 }
 0x2af   : > { %v4199_v44 = vsel %vm12977_vm0, %v4194_v58, %v4198_v9  ;;  %v4854_v24 = vor.u32 %v4853_v53, %v4850_v63  ;;  %v11407_v12 = vor.u32 %v4668_v38, %v4665_v6  ;;  %v4872_v2 = vrot.slane %v4870_v16, 3  ;;  %v3692_v29 = vpop.f32.mrb[86].mxu0 }
 0x2b0   : > { %v4658_v56 = vrot.slane %v12978_v32, 3  ;;  %v4659_v1 = vrot.slane %v12979_v21, 4  ;;  %v4361_v58 = vrot.slane %v11296_v19, 1  ;;  %v11411_v45 = vadd.f32 %v12980_v13, %v2784_v41  ;;  %v12981_v32 = vld [vmem:[#allocation9_spill] sm:$0xff]  ;;  %v2787_v21 = vpop.f32.mrb[106].mxu1  ;;  %v3694_v61 = vpop.f32.mrb[87].mxu0 }
 0x2b1   : > { %v4685_v34 = vshrl.u32 %v4199_v44, 16  ;;  %v4688_v48 = vshll.u32 %v4199_v44, 16  ;;  %v11413_v59 = vrot.slane %v4091_v7, 1  ;;  %v11416_v5 = vadd.f32 %v3689_v42, %v12981_v32  ;;  %v2789_v13 = vpop.f32.mrb[107].mxu1  ;;  %v12984_v42 = vld [vmem:[#allocation31_spill] sm:$0xff] }
 0x2b2   : > { %v4875_v63 = vrot.slane %v4873_v50, 4  ;;  %v12982_v38 = vshrl.u32 %v12963_v31, 16  ;;  %v12983_v6 = vshll.u32 %v10998_v52, 16  ;;  %v11423_v41 = vadd.f32 %v10990_v54, %v2787_v21 }
 0x2b3   : > { %v4894_v44 = vrot.slane %v4892_v40, 3  ;;  %v4897_v7 = vrot.slane %v4895_v10, 4  ;;  %v11425_v22 = vor.u32 %v4659_v1, %v4658_v56  ;;  %v11428_v32 = vadd.f32 %v3692_v29, %v12984_v42 }
 0x2b4   : > { %v4202_v53 = vor.u32 %v12982_v38, %v4198_v9  ;;  %v4206_v16 = vrot.slane %v12983_v6, 1  ;;  %v4833_v50 = vsel %vm3056_vm11, %v11241_v39, %v4832_v20  ;;  %v4639_v9 = vsel %vm3056_vm11, %v11186_v18, %v4638_v26  ;;  %v3697_v42 = vpop.f32.mrb[88].mxu0 }
 0x2b5   : > { %v4670_v54 = vsel %vm3056_vm11, %v11354_v30, %v11407_v12  ;;  %5287 = vmatmul.mubr.bf16.gmra.mrb[212].mxu1 %v4639_v9  ;;  %v4687_v21 = vrot.slane %v4685_v34, 3  ;;  %v4690_v40 = vrot.slane %v4688_v48, 4  ;;  %v12985_v10 = vrot.slane %v11284_v28, 1  ;;  %7402 = vmatmul.mubr.bf16.gmra.mrb[192].mxu0 %v4833_v50  ;;  %v2792_v34 = vpop.f32.mrb[108].mxu1  ;;  %v3699_v9 = vpop.f32.mrb[89].mxu0 }
 0x2b6   : > { %v4364_v29 = vsel %vm12986_vm2, %v4361_v58, %v11413_v59  ;;  %v4855_v39 = vsel %vm3056_vm11, %v4832_v20, %v4854_v24  ;;  %5294 = vmatprep.mubr.bf16.mxu1 %v4670_v54  ;;  %v4876_v1 = vor.u32 %v4875_v63, %v4872_v2  ;;  %v4207_v18 = vsel %vm12987_vm5, %v4202_v53, %v4206_v16  ;;  %v12988_v20 = vld [vmem:[#allocation16_spill] sm:$0xff]  ;;  %v2794_v2 = vpop.f32.mrb[109].mxu1 }
 0x2b7   : > { %v4362_v56 = vsel %vm12909_vm1, %v12985_v10, %v4361_v58  ;;  %v12369_v38 = vshrl.u32 %v10998_v52, 16  ;;  %7405 = vmatprep.mubr.bf16.mxu0 %v4855_v39  ;;  %v11445_v30 = vor.u32 %v4897_v7, %v4894_v44  ;;  %v4661_v28 = vsel %vm3056_vm11, %v4638_v26, %v11425_v22  ;;  %v12989_v44 = vld [vmem:[#allocation28_spill] sm:$0xff]  ;;  %v2795_v54 = vpop.f32.mrb[110].mxu1  ;;  %v3700_v39 = vpop.f32.mrb[90].mxu0 }
 0x2b8   : > { %v4914_v48 = vshrl.u32 %v4362_v56, 16  ;;  %v4917_v6 = vshll.u32 %v4362_v56, 16  ;;  %v4936_v13 = vshrl.u32 %v4364_v29, 16  ;;  %v12370_v58 = vshll.u32 %v11057_v36, 16 }
 0x2b9   : > { %v11451_v61 = vadd.f32 %v12988_v20, %v2792_v34  ;;  %v11453_v63 = vor.u32 %v4690_v40, %v4687_v21  ;;  %v4707_v53 = vshrl.u32 %v4207_v18, 16  ;;  %v4710_v50 = vshll.u32 %v4207_v18, 16  ;;  %v2797_v40 = vpop.f32.mrb[111].mxu1 }
 0x2ba   : > { %v11456_v7 = vadd.f32 %v3697_v42, %v12989_v44  ;;  %v4877_v26 = vsel %vm3056_vm11, %v4854_v24, %v4876_v1  ;;  %v4939_v10 = vshll.u32 %v4364_v29, 16  ;;  %v4210_v56 = vor.u32 %v12369_v38, %v4206_v16  ;;  %v12992_v24 = vld [vmem:[#allocation24_spill] sm:$0xff]  ;;  %v3702_v29 = vpop.f32.mrb[91].mxu0 }
 0x2bb   : > { %v4899_v34 = vsel %vm3056_vm11, %v4876_v1, %v11445_v30  ;;  %v11464_v21 = vadd.f32 %v10986_v8, %v2795_v54  ;;  %v12990_v18 = vshrl.u32 %v12943_v46, 16  ;;  %v12991_v20 = vshll.u32 %v12943_v46, 16  ;;  %v7707_v8 = vld [vmem:[%s12161_s5] sm:$0xff]  }
 0x2bc   : > { %v11471_v44 = vadd.f32 %v3700_v39, %v12992_v24  ;;  %v4916_v9 = vrot.slane %v4914_v48, 3  ;;  %v4919_v16 = vrot.slane %v4917_v6, 4  ;;  %v4214_v38 = vrot.slane %v12370_v58, 1  ;;  %v7708_v48 = vld [vmem:[%s12161_s5 + $0x8] sm:$0xff]   ;;  %7417 = vmatprep.subr.bf16.mxu0 %v7707_v8 }
 0x2bd   : > { %v4680_v42 = vrot.slane %v12990_v18, 3  ;;  %v4681_v2 = vrot.slane %v12991_v20, 4  ;;  %5295 = vmatmul.mubr.bf16.gmra.mrb[216].mxu1 %v4661_v28  ;;  %v4692_v1 = vsel %vm3056_vm11, %v11407_v12, %v11453_v63  ;;  %v4938_v46 = vrot.slane %v4936_v13, 3  ;;  %7406 = vmatmul.mubr.bf16.gmra.mrb[196].mxu0 %v4877_v26  ;;  %v2800_v13 = vpop.f32.mrb[112].mxu1  ;;  %v3705_v26 = vpop.f32.mrb[92].mxu0 }
 0x2be   : > { %v4709_v54 = vrot.slane %v4707_v53, 3  ;;  %v4712_v40 = vrot.slane %v4710_v50, 4  ;;  %5302 = vmatprep.mubr.bf16.mxu1 %v4692_v1  ;;  %v4941_v6 = vrot.slane %v4939_v10, 4  ;;  %v4215_v39 = vsel %vm12993_vm7, %v4210_v56, %v4214_v38  ;;  %7409 = vmatprep.mubr.bf16.mxu0 %v4899_v34  ;;  %v2802_v56 = vpop.f32.mrb[113].mxu1  ;;  %v12994_v34 = vld [vmem:[#allocation36_spill] sm:$0xff] }
 0x2bf   : > { %v4958_v20 = vshrl.u32 %v11413_v59, 16  ;;  %v4961_v12 = vshll.u32 %v11413_v59, 16  ;;  %v4920_v53 = vor.u32 %v4919_v16, %v4916_v9  ;;  %v11489_v50 = vor.u32 %v4681_v2, %v4680_v42  ;;  %7418 = vmatpush3.bf16.msra.mxu0 %v7707_v8  ;;  %v3707_v59 = vpop.f32.mrb[93].mxu0  ;;  %v2803_v18 = vpop.f32.mrb[114].mxu1 }
 0x2c0   : > { %v11492_v10 = vadd.f32 %v11036_v57, %v2800_v13  ;;  %v11494_v24 = vor.u32 %v4712_v40, %v4709_v54  ;;  %v4729_v29 = vshrl.u32 %v4215_v39, 16  ;;  %v4732_v1 = vshll.u32 %v4215_v39, 16  ;;  %7419 = vmatprep.subr.bf16.mxu0 %v7708_v48  ;;  %v3708_v57 = vpop.f32.mrb[94].mxu0  ;;  %v2805_v54 = vpop.f32.mrb[115].mxu1  ;;  %v12997_v13 = vld [vmem:[#allocation5_spill] sm:$0xff] }
 0x2c1   : > { %v11497_v58 = vadd.f32 %v3705_v26, %v12994_v34  ;;  %v4942_v28 = vor.u32 %v4941_v6, %v4938_v46  ;;  %v12995_v42 = vshrl.u32 %v11057_v36, 16  ;;  %v12996_v9 = vshll.u32 %v11046_v62, 16  ;;  %v3710_v26 = vpop.f32.mrb[95].mxu0 }
 0x2c2   : > { %v11504_v8 = vadd.f32 %v11048_v25, %v2803_v18  ;;  %v4960_v40 = vrot.slane %v4958_v20, 3  ;;  %v4963_v39 = vrot.slane %v4961_v12, 4  ;;  %v11507_v56 = vadd.f32 %v3708_v57, %v12997_v13 }
 0x2c3   : > { %v4218_v2 = vor.u32 %v12995_v42, %v4214_v38  ;;  %v4222_v16 = vrot.slane %v12996_v9, 1  ;;  %v4683_v46 = vsel %vm3056_vm11, %v11425_v22, %v11489_v50  ;;  %v12998_v38 = vshrl.u32 %v12963_v31, 16  ;;  %7420 = vmatpush3.bf16.msra.mxu0 %v7708_v48  ;;  %v7709_v48 = vld [vmem:[%s12161_s5 + $0x10] sm:$0xff]  }
 0x2c4   : > { %v12999_v34 = vshll.u32 %v12963_v31, 16  ;;  %v4921_v25 = vsel %vm3056_vm11, %v11445_v30, %v4920_v53  ;;  %v4714_v18 = vsel %vm3056_vm11, %v11453_v63, %v11494_v24  ;;  %v4731_v20 = vrot.slane %v4729_v29, 3  ;;  %v7710_v30 = vld [vmem:[%s12161_s5 + $0x18] sm:$0xff]   ;;  %7421 = vmatprep.subr.bf16.mxu0 %v7709_v48 }
 0x2c5   : > { %v4702_v6 = vrot.slane %v12998_v38, 3  ;;  %5303 = vmatmul.mubr.bf16.gmra.mrb[220].mxu1 %v4683_v46  ;;  %v4734_v12 = vrot.slane %v4732_v1, 4  ;;  %7410 = vmatmul.mubr.bf16.gmra.mrb[200].mxu0 %v4921_v25  ;;  %v4943_v22 = vsel %vm3056_vm11, %v4920_v53, %v4942_v28  ;;  %v4223_v42 = vsel %vm13000_vm4, %v4218_v2, %v4222_v16  ;;  %v2808_v29 = vpop.f32.mrb[116].mxu1  ;;  %v3713_v53 = vpop.f32.mrb[96].mxu0  ;;  %v13001_v46 = vld [vmem:[#allocation23_spill] sm:$0xff] }
 0x2c6   : > { %v4703_v59 = vrot.slane %v12999_v34, 4  ;;  %5310 = vmatprep.mubr.bf16.mxu1 %v4714_v18  ;;  %v4224_v31 = vshrl.u32 %v11046_v62, 16  ;;  %7413 = vmatprep.mubr.bf16.mxu0 %v4943_v22  ;;  %v4964_v63 = vor.u32 %v4963_v39, %v4960_v40  ;;  %v12372_v9 = vshll.u32 %v11094_v51, 16  ;;  %v2810_v57 = vpop.f32.mrb[117].mxu1  ;;  %v3715_v34 = vpop.f32.mrb[97].mxu0 }
 0x2c7   : > { %v11532_v2 = vadd.f32 %v11030_v15, %v2808_v29  ;;  %v4735_v54 = vor.u32 %v4734_v12, %v4731_v20  ;;  %v4751_v13 = vshrl.u32 %v4223_v42, 16  ;;  %v4754_v26 = vshll.u32 %v4223_v42, 16  ;;  %7422 = vmatpush3.bf16.msra.mxu0 %v7709_v48  ;;  %v2811_v25 = vpop.f32.mrb[118].mxu1  ;;  %v3716_v39 = vpop.f32.mrb[98].mxu0  ;;  %v13003_v12 = vld [vmem:[#allocation30_spill] sm:$0xff] }
 0x2c8   : > { %v4704_v1 = vor.u32 %v4703_v59, %v4702_v6  ;;  %v11535_v38 = vadd.f32 %v3713_v53, %v13001_v46  ;;  %v4226_v40 = vor.u32 %v4224_v31, %v4222_v16  ;;  %7423 = vmatprep.subr.bf16.mxu0 %v7710_v30  ;;  %v11540_v6 = vadd.f32 %v11043_v35, %v2811_v25  ;;  %v2813_v15 = vpop.f32.mrb[119].mxu1  ;;  %v3718_v42 = vpop.f32.mrb[99].mxu0 }
 0x2c9   : > { %v13002_v59 = vshrl.u32 %v10998_v52, 16  ;;  %v4965_v20 = vsel %vm3056_vm11, %v4942_v28, %v4964_v63  ;;  %v11546_v22 = vadd.f32 %v3716_v39, %v13003_v12  ;;  %v13004_v16 = vshll.u32 %v10998_v52, 16  ;;  %v13006_v39 = vld [vmem:[#allocation46_spill] sm:$0xff] }
 0x2ca   : > { %v4705_v48 = vsel %vm3056_vm11, %v11489_v50, %v4704_v1  ;;  %v4230_v35 = vrot.slane %v12372_v9, 1  ;;  %v4736_v53 = vsel %vm3056_vm11, %v11494_v24, %v4735_v54  ;;  %v4753_v57 = vrot.slane %v4751_v13, 3 }
 0x2cb   : > { %v4724_v18 = vrot.slane %v13002_v59, 3  ;;  %v4725_v29 = vrot.slane %v13004_v16, 4  ;;  %v4756_v46 = vrot.slane %v4754_v26, 4  ;;  %7424 = vmatpush3.bf16.msra.mxu0 %v7710_v30  ;;  %v12373_v63 = vshrl.u32 %v11094_v51, 16  ;;  %v7711_v30 = vld [vmem:[%s12161_s5 + $0x20] sm:$0xff]  }
 0x2cc   : > { %v4231_v28 = vsel %vm13005_vm6, %v4226_v40, %v4230_v35  ;;  %v12371_v50 = vshll.u32 %v11108_v17, 16  ;;  %v3721_v25 = vpop.f32.mrb[100].mxu0  ;;  %v13007_v26 = vld [vmem:[#allocation35_spill] sm:$0xff]  ;;  %7425 = vmatprep.subr.bf16.mxu0 %v7711_v30 }
 0x2cd   : > { %5311 = vmatmul.mubr.bf16.gmra.mrb[224].mxu1 %v4705_v48  ;;  %7414 = vmatmul.mubr.bf16.gmra.mrb[204].mxu0 %v4965_v20  ;;  %v2816_v52 = vpop.f32.mrb[120].mxu1  ;;  %v4726_v34 = vor.u32 %v4725_v29, %v4724_v18  ;;  %v4757_v12 = vor.u32 %v4756_v46, %v4753_v57  ;;  %v4773_v24 = vshrl.u32 %v4231_v28, 16  ;;  %v4776_v13 = vshll.u32 %v4231_v28, 16  ;;  %v3723_v42 = vpop.f32.mrb[101].mxu0  ;;  %v13008_v29 = vld [vmem:[#allocation26_spill] sm:$0xff]  ;;  %v7712_v46 = vld [vmem:[%s12161_s5 + $0x28] sm:$0xff]  }
 0x2ce   : > { %5318 = vmatprep.mubr.bf16.mxu1 %v4736_v53  ;;  %v11560_v15 = vadd.f32 %v13006_v39, %v2816_v52  ;;  %v2818_v59 = vpop.f32.mrb[121].mxu1  ;;  %v11566_v40 = vadd.f32 %v3721_v25, %v13007_v26  ;;  %v4234_v18 = vor.u32 %v12373_v63, %v4230_v35  ;;  %v4238_v20 = vrot.slane %v12371_v50, 1  ;;  %v3724_v16 = vpop.f32.mrb[102].mxu0  ;;  %v13009_v28 = vld [vmem:[#allocation11_spill] sm:$0xff] }
 0x2cf   : > { %v2819_v48 = vpop.f32.mrb[122].mxu1  ;;  %v11579_v52 = vadd.f32 %v3724_v16, %v13009_v28  ;;  %v3726_v25 = vpop.f32.mrb[103].mxu0  ;;  %v4727_v39 = vsel %vm3056_vm11, %v4704_v1, %v4726_v34  ;;  %v13010_v35 = vshrl.u32 %v11057_v36, 16  ;;  %v13011_v26 = vshll.u32 %v11057_v36, 16  ;;  %7426 = vmatpush3.bf16.msra.mxu0 %v7711_v30  ;;  %v7713_v16 = vld [vmem:[%s12161_s5 + $0x30] sm:$0xff]  }
 0x2d0   : > { %v11573_v53 = vadd.f32 %v13008_v29, %v2819_v48  ;;  %v2821_v57 = vpop.f32.mrb[123].mxu1  ;;  %v4758_v48 = vsel %vm3056_vm11, %v4735_v54, %v4757_v12  ;;  %v4775_v29 = vrot.slane %v4773_v24, 3  ;;  %7427 = vmatprep.subr.bf16.mxu0 %v7712_v46  ;;  %v4239_v1 = vsel %vm13012_vm13, %v4234_v18, %v4238_v20  ;;  %v7714_v18 = vld [vmem:[%s12161_s5 + $0x38] sm:$0xff]   ;;  %v13018_v36 = vld [vmem:[#allocation17_spill] sm:$0xff] }
 0x2d1   : > { %v4746_v59 = vrot.slane %v13010_v35, 3  ;;  %v4747_v42 = vrot.slane %v13011_v26, 4  ;;  %v4778_v57 = vrot.slane %v4776_v13, 4  ;;  %v12375_v28 = vshrl.u32 %v11108_v17, 16 }
 0x2d2   : > { %v4795_v26 = vshrl.u32 %v4239_v1, 16  ;;  %v4798_v50 = vshll.u32 %v4239_v1, 16  ;;  %v13017_v1 = vshll.u32 %v11046_v62, 16 }
 0x2d3   : > { %v4748_v35 = vor.u32 %v4747_v42, %v4746_v59  ;;  %7428 = vmatpush3.bf16.msra.mxu0 %v7712_v46  ;;  %v4779_v13 = vor.u32 %v4778_v57, %v4775_v29  ;;  %v4242_v46 = vor.u32 %v12375_v28, %v4238_v20  ;;  %v4768_v57 = vrot.slane %v4224_v31, 3 }
 0x2d4   : > { %v3729_v30 = vpop.f32.mrb[104].mxu0  ;;  %7429 = vmatprep.subr.bf16.mxu0 %v7713_v16  ;;  %v12374_v31 = vshrl.u32 %v11177_v23, 16 }
 0x2d5   : > { %5319 = vmatmul.mubr.bf16.gmra.mrb[228].mxu1 %v4727_v39  ;;  %v2824_v25 = vpop.f32.mrb[124].mxu1  ;;  %v13013_v39 = vld [vmem:[#allocation19_spill] sm:$0xff]  ;;  %v3731_v59 = vpop.f32.mrb[105].mxu0 }
 0x2d6   : > { %5326 = vmatprep.mubr.bf16.mxu1 %v4758_v48  ;;  %v11594_v54 = vadd.f32 %v13013_v39, %v2824_v25  ;;  %v2826_v24 = vpop.f32.mrb[125].mxu1  ;;  %v13015_v48 = vld [vmem:[#allocation15_spill] sm:$0xff]  ;;  %v3732_v63 = vpop.f32.mrb[106].mxu0  ;;  %v13016_v25 = vld [vmem:[#allocation21_spill] sm:$0xff]  ;;  %v13019_v59 = vshll.u32 %v11177_v23, 16 }
 0x2d7   : > { %v11600_v9 = vadd.f32 %v3729_v30, %v13015_v48  ;;  %v2827_v42 = vpop.f32.mrb[126].mxu1  ;;  %v4769_v24 = vrot.slane %v13017_v1, 4  ;;  %v3734_v30 = vpop.f32.mrb[107].mxu0  ;;  %v4749_v48 = vsel %vm3056_vm11, %v4726_v34, %v4748_v35  ;;  %7430 = vmatpush3.bf16.msra.mxu0 %v7713_v16 }
 0x2d8   : > { %13014 = vst [vmem:[#allocation7_spill] sm:$0xff] %v11594_v54  ;;  %v11605_v39 = vadd.f32 %v13016_v25, %v2827_v42  ;;  %v2829_v29 = vpop.f32.mrb[127].mxu1  ;;  %v11612_v54 = vadd.f32 %v3732_v63, %v13018_v36  ;;  %v4246_v20 = vrot.slane %v13019_v59, 1  ;;  %v4780_v42 = vsel %vm3056_vm11, %v4757_v12, %v4779_v13  ;;  %7431 = vmatprep.subr.bf16.mxu0 %v7714_v18  ;;  %v13021_v12 = vld [vmem:[#allocation18_spill] sm:$0xff] }
 0x2d9   : > { %v4797_v25 = vrot.slane %v4795_v26, 3  ;;  %v4800_v29 = vrot.slane %v4798_v50, 4  ;;  %v4770_v63 = vor.u32 %v4769_v24, %v4768_v57 }
 0x2da   : > { %v4247_v62 = vsel %vm13020_vm8, %v4242_v46, %v4246_v20  ;;  %v4250_v57 = vor.u32 %v12374_v31, %v4246_v20 }
 0x2db   : > { %7432 = vmatpush3.bf16.msra.mxu0 %v7714_v18  ;;  %v4801_v16 = vor.u32 %v4800_v29, %v4797_v25  ;;  %v4820_v59 = vshll.u32 %v4247_v62, 16  ;;  %v4771_v25 = vsel %vm3056_vm11, %v4748_v35, %v4770_v63  ;;  %v13023_v29 = vld [vmem:[#allocation32_spill] sm:$0xff]  ;;  %v13028_v35 = vld [vmem:[#allocation42_spill] sm:$0xff] }
 0x2dc   : > { %v3737_v1 = vpop.f32.mrb[108].mxu0 }
 0x2dd   : > { %5327 = vmatmul.mubr.bf16.gmra.mrb[232].mxu1 %v4749_v48  ;;  %v7307_v36 = vpop.f32.mrb[128].mxu1  ;;  %v4817_v48 = vshrl.u32 %v4247_v62, 16  ;;  %v11624_v26 = vadd.f32 %v3737_v1, %v13021_v12  ;;  %v3739_v50 = vpop.f32.mrb[109].mxu0  ;;  %v13024_v1 = vld [vmem:[#allocation25_spill] sm:$0xff]  ;;  %v4822_v31 = vrot.slane %v4820_v59, 4 }
 0x2de   : > { %5334 = vmatprep.mubr.bf16.mxu1 %v4780_v42  ;;  %v11621_v34 = vadd.f32 %v7307_v36, %v11190_v27  ;;  %v3874_v30 = vpop.f32.mrb[129].mxu1  ;;  %v3740_v18 = vpop.f32.mrb[110].mxu0  ;;  %v13027_v50 = vshll.u32 %v11094_v51, 16 }
 0x2df   : > { %v11627_v42 = vadd.f32 %v3874_v30, %v11150_v11  ;;  %v7308_v46 = vpop.f32.mrb[130].mxu1  ;;  %v11636_v62 = vadd.f32 %v3740_v18, %v13023_v29  ;;  %v3742_v36 = vpop.f32.mrb[111].mxu0  ;;  %v13026_v11 = vshrl.u32 %v11094_v51, 16  ;;  %v4255_v18 = vsel %vm13029_vm12, %v4250_v57, %v13028_v35  ;;  %v13034_v35 = vld [vmem:[#allocation22_spill] sm:$0xff] }
 0x2e0   : > { %v11632_v24 = vadd.f32 %v7308_v46, %v11210_v60  ;;  %v3877_v27 = vpop.f32.mrb[131].mxu1  ;;  %v4791_v20 = vrot.slane %v13027_v50, 4  ;;  %v4802_v60 = vsel %vm3056_vm11, %v4779_v13, %v4801_v16  ;;  %v4819_v46 = vrot.slane %v4817_v48, 3  ;;  %v13030_v50 = vld [vmem:[#allocation20_spill] sm:$0xff] }
 0x2e1   : > { %v11639_v12 = vadd.f32 %v3877_v27, %v13024_v1  ;;  %v4790_v30 = vrot.slane %v13026_v11, 3  ;;  %v4842_v51 = vshll.u32 %v4255_v18, 16  ;;  %v13031_v48 = vld [vmem:[#allocation40_spill] sm:$0xff] }
 0x2e2   : > { %13022 = vst [vmem:[#allocation34_spill] sm:$0xff] %v11632_v24  ;;  %v4823_v11 = vor.u32 %v4822_v31, %v4819_v46 }
 0x2e3   : > { %13025 = vst [vmem:[#allocation3_spill] sm:$0xff] %v11639_v12  ;;  %v4792_v36 = vor.u32 %v4791_v20, %v4790_v30  ;;  %v4839_v12 = vshrl.u32 %v4255_v18, 16  ;;  %v13035_v18 = vld [vmem:[#allocation8_spill] sm:$0xff] }
 0x2e4   : > { %v3745_v28 = vpop.f32.mrb[112].mxu0 }
 0x2e5   : > { %5335 = vmatmul.mubr.bf16.gmra.mrb[236].mxu1 %v4771_v25  ;;  %v7311_v29 = vpop.f32.mrb[132].mxu1  ;;  %v11652_v25 = vadd.f32 %v3745_v28, %v13030_v50  ;;  %v3747_v13 = vpop.f32.mrb[113].mxu0 }
 0x2e6   : > { %5342 = vmatprep.mubr.bf16.mxu1 %v4802_v60  ;;  %v11649_v27 = vadd.f32 %v7311_v29, %v11313_v37  ;;  %v3890_v1 = vpop.f32.mrb[133].mxu1  ;;  %v3748_v24 = vpop.f32.mrb[114].mxu0  ;;  %v13033_v37 = vshll.u32 %v11108_v17, 16  ;;  %v4793_v29 = vsel %vm3056_vm11, %v4770_v63, %v4792_v36  ;;  %v4841_v13 = vrot.slane %v4839_v12, 3 }
 0x2e7   : > { %v11655_v59 = vadd.f32 %v3890_v1, %v13031_v48  ;;  %v7312_v60 = vpop.f32.mrb[134].mxu1  ;;  %v11663_v31 = vadd.f32 %v3748_v24, %v13034_v35  ;;  %v3750_v46 = vpop.f32.mrb[115].mxu0  ;;  %v13036_v1 = vshrl.u32 %v11108_v17, 16  ;;  %v4844_v48 = vrot.slane %v4842_v51, 4 }
 0x2e8   : > { %v11658_v57 = vadd.f32 %v7312_v60, %v11325_v0  ;;  %v3893_v30 = vpop.f32.mrb[135].mxu1  ;;  %v4813_v20 = vrot.slane %v13033_v37, 4  ;;  %v4824_v0 = vsel %vm3056_vm11, %v4801_v16, %v4823_v11  ;;  %v13037_v46 = vld [vmem:[#allocation27_spill] sm:$0xff] }
 0x2e9   : > { %v11666_v28 = vadd.f32 %v3893_v30, %v13035_v18  ;;  %v4812_v50 = vrot.slane %v13036_v1, 3  ;;  %v4845_v30 = vor.u32 %v4844_v48, %v4841_v13 }
 0x2ea   : > { %13032 = vst [vmem:[#allocation29_spill] sm:$0xff] %v11658_v57 }
 0x2eb   : > { %v4814_v37 = vor.u32 %v4813_v20, %v4812_v50  ;;  %v13038_v20 = vshrl.u32 %v11177_v23, 16 }
 0x2ec   : > { %v3753_v57 = vpop.f32.mrb[116].mxu0 }
 0x2ed   : > { %5343 = vmatmul.mubr.bf16.gmra.mrb[240].mxu1 %v4793_v29  ;;  %v7315_v60 = vpop.f32.mrb[136].mxu1  ;;  %v11676_v18 = vadd.f32 %v3753_v57, %v13037_v46  ;;  %v3755_v63 = vpop.f32.mrb[117].mxu0  ;;  %v4834_v1 = vrot.slane %v13038_v20, 3  ;;  %v4815_v13 = vsel %vm3056_vm11, %v4792_v36, %v4814_v37 }
 0x2ee   : > { %5350 = vmatprep.mubr.bf16.mxu1 %v4824_v0  ;;  %v11673_v24 = vadd.f32 %v7315_v60, %v11416_v5  ;;  %v3906_v35 = vpop.f32.mrb[137].mxu1  ;;  %v3756_v16 = vpop.f32.mrb[118].mxu0  ;;  %v13039_v5 = vld [vmem:[#allocation33_spill] sm:$0xff] }
 0x2ef   : > { %v11679_v17 = vadd.f32 %v3906_v35, %v11361_v55  ;;  %v7316_v29 = vpop.f32.mrb[138].mxu1  ;;  %v11687_v50 = vadd.f32 %v3756_v16, %v13039_v5  ;;  %v3758_v0 = vpop.f32.mrb[119].mxu0  ;;  %v13040_v55 = vshll.u32 %v11177_v23, 16  ;;  %v13041_v16 = vld [vmem:[#allocation37_spill] sm:$0xff] }
 0x2f0   : > { %v11682_v12 = vadd.f32 %v7316_v29, %v11428_v32  ;;  %v3909_v51 = vpop.f32.mrb[139].mxu1  ;;  %v4846_v32 = vsel %vm3056_vm11, %v4823_v11, %v4845_v30  ;;  %v11708_v0 = vld [vmem:[#allocation2 + $0xd8] sm:$0xf] }
 0x2f1   : > { %v11690_v57 = vadd.f32 %v3909_v51, %v11380_v49  ;;  %v4835_v48 = vrot.slane %v13040_v55, 4 }
 0x2f3   : > { %v4836_v35 = vor.u32 %v4835_v48, %v4834_v1  ;;  %v13042_v1 = vld [vmem:[#allocation38_spill] sm:$0xff] }
 0x2f4   : > { %v3761_v46 = vpop.f32.mrb[120].mxu0 }
 0x2f5   : > { %5351 = vmatmul.mubr.bf16.gmra.mrb[244].mxu1 %v4815_v13  ;;  %v7319_v60 = vpop.f32.mrb[140].mxu1  ;;  %v11700_v20 = vadd.f32 %v3761_v46, %v13041_v16  ;;  %v3763_v49 = vpop.f32.mrb[121].mxu0  ;;  %v4837_v48 = vsel %vm3056_vm11, %v4814_v37, %v4836_v35 }
 0x2f6   : > { %5358 = vmatprep.mubr.bf16.mxu1 %v4846_v32  ;;  %v11697_v63 = vadd.f32 %v7319_v60, %v11497_v58  ;;  %v3922_v29 = vpop.f32.mrb[141].mxu1  ;;  %v3764_v51 = vpop.f32.mrb[122].mxu0  ;;  %v12376_v32 = vshll.u32 %v11708_v0, 16  ;;  %v13043_v49 = vld [vmem:[#allocation39_spill] sm:$0xff] }
 0x2f7   : > { %v11703_v36 = vadd.f32 %v3922_v29, %v11456_v7  ;;  %v7320_v23 = vpop.f32.mrb[142].mxu1  ;;  %v11711_v13 = vadd.f32 %v3764_v51, %v13042_v1  ;;  %v3766_v58 = vpop.f32.mrb[123].mxu0  ;;  %v4868_v7 = vsel %vm3056_vm11, %v4845_v30, %v11330_v47 }
 0x2f8   : > { %v11706_v5 = vadd.f32 %v7320_v23, %v11507_v56  ;;  %v3925_v11 = vpop.f32.mrb[143].mxu1  ;;  %v12377_v56 = vshrl.u32 %v11296_v19, 16  ;;  %v4286_v30 = vrot.slane %v12376_v32, 1  ;;  %v13044_v58 = vld [vmem:[#allocation43_spill] sm:$0xff] }
 0x2f9   : > { %v11714_v55 = vadd.f32 %v3925_v11, %v11471_v44 }
 0x2fa   : > { %v4282_v47 = vor.u32 %v12377_v56, %v11322_v4 }
 0x2fc   : > { %v3769_v46 = vpop.f32.mrb[124].mxu0  ;;  %v4287_v4 = vsel %vm13046_vm15, %v4282_v47, %v4286_v30 }
 0x2fd   : > { %5359 = vmatmul.mubr.bf16.gmra.mrb[248].mxu1 %v4837_v48  ;;  %v7323_v60 = vpop.f32.mrb[144].mxu1  ;;  %v11725_v44 = vadd.f32 %v3769_v46, %v13043_v49  ;;  %v3771_v23 = vpop.f32.mrb[125].mxu0 }
 0x2fe   : > { %5366 = vmatprep.mubr.bf16.mxu1 %v4868_v7  ;;  %v11722_v29 = vadd.f32 %v7323_v60, %v11566_v40  ;;  %v3938_v16 = vpop.f32.mrb[145].mxu1  ;;  %v3772_v11 = vpop.f32.mrb[126].mxu0  ;;  %v13045_v60 = vld [vmem:[#allocation41_spill] sm:$0xff] }
 0x2ff   : > { %v11728_v37 = vadd.f32 %v3938_v16, %v11535_v38  ;;  %v7324_v51 = vpop.f32.mrb[146].mxu1  ;;  %v11739_v48 = vadd.f32 %v3772_v11, %v13044_v58  ;;  %v3774_v7 = vpop.f32.mrb[127].mxu0  ;;  %v4859_v46 = vsel %vm3056_vm11, %v4836_v35, %v13045_v60  ;;  %v4288_v16 = vshrl.u32 %v11708_v0, 16 }
 0x300   : > { %v11736_v40 = vadd.f32 %v7324_v51, %v11579_v52  ;;  %v3941_v1 = vpop.f32.mrb[147].mxu1  ;;  %v4927_v11 = vshrl.u32 %v4287_v4, 16  ;;  %v4930_v58 = vshll.u32 %v4287_v4, 16 }
 0x301   : > { %v11742_v38 = vadd.f32 %v3941_v1, %v11546_v22  ;;  %v13048_v22 = vld [vmem:[#allocation4_spill] sm:$0xff]  ;;  %v4290_v32 = vor.u32 %v4288_v16, %v4286_v30 }
 0x304   : > { %v3777_v49 = vpop.f32.mrb[128].mxu0 }
 0x305   : > { %5367 = vmatmul.mubr.bf16.gmra.mrb[252].mxu1 %v4859_v46  ;;  %v7327_v52 = vpop.f32.mrb[148].mxu1  ;;  %v11753_v1 = vadd.f32 %v3777_v49, %v13048_v22  ;;  %v3779_v7 = vpop.f32.mrb[129].mxu0  ;;  %v13050_v49 = vld [vmem:[#allocation12_spill] sm:$0xff]  ;;  %v4929_v22 = vrot.slane %v4927_v11, 3 }
 0x306   : > { %5374 = vmatprep.mubr.bf16.mxu1 %v11367_v3  ;;  %v11750_v23 = vadd.f32 %v7327_v52, %v11624_v26  ;;  %v3954_v51 = vpop.f32.mrb[149].mxu1  ;;  %v3780_v60 = vpop.f32.mrb[130].mxu0  ;;  %v4932_v7 = vrot.slane %v4930_v58, 4 }
 0x307   : > { %v11756_v35 = vadd.f32 %v3954_v51, %v11600_v9  ;;  %v7328_v3 = vpop.f32.mrb[150].mxu1  ;;  %v11762_v26 = vadd.f32 %v3780_v60, %v11317_v43  ;;  %v3782_v52 = vpop.f32.mrb[131].mxu0  ;;  %v4949_v9 = vshrl.u32 %v4290_v32, 16  ;;  %v4952_v51 = vshll.u32 %v4290_v32, 16 }
 0x308   : > { %13047 = vst [vmem:[#allocation14_spill] sm:$0xff] %v11750_v23  ;;  %v11759_v47 = vadd.f32 %v7328_v3, %v11636_v62  ;;  %v3957_v46 = vpop.f32.mrb[151].mxu1  ;;  %v4933_v43 = vor.u32 %v4932_v7, %v4929_v22 }
 0x309   : > { %v11765_v4 = vadd.f32 %v3957_v46, %v11612_v54  ;;  %v4951_v32 = vrot.slane %v4949_v9, 3 }
 0x30a   : > { %13049 = vst [vmem:[#allocation45_spill] sm:$0xff] %v11759_v47  ;;  %v13051_v47 = vld [vmem:[#allocation10_spill] sm:$0xff] }
 0x30c   : > { %v3785_v62 = vpop.f32.mrb[132].mxu0 }
 0x30d   : > { %5375 = vmatmul.mubr.bf16.gmra.mrb[0].mxu1 %v13050_v49  ;;  %v7331_v56 = vpop.f32.mrb[152].mxu1  ;;  %v3786_v60 = vadd.f32 %v3785_v62, %v11350_v14  ;;  %v3787_v52 = vpop.f32.mrb[133].mxu0  ;;  %v4954_v49 = vrot.slane %v4952_v51, 4  ;;  %v13052_v14 = vshrl.u32 %v11296_v19, 16  ;;  %v13054_v62 = vld [vmem:[#allocation6_spill] sm:$0xff] }
 0x30e   : > { %5382 = vmatprep.mubr.bf16.mxu1 %v11386_v33  ;;  %v11770_v3 = vadd.f32 %v7331_v56, %v11676_v18  ;;  %v3970_v30 = vpop.f32.mrb[153].mxu1  ;;  %v3788_v11 = vpop.f32.mrb[134].mxu0 }
 0x30f   : > { %v11774_v54 = vadd.f32 %v3970_v30, %v11652_v25  ;;  %v7332_v46 = vpop.f32.mrb[154].mxu1  ;;  %v3789_v23 = vadd.f32 %v3788_v11, %v13051_v47  ;;  %v3790_v18 = vpop.f32.mrb[135].mxu0  ;;  %v4922_v22 = vrot.slane %v13052_v14, 3  ;;  %v13053_v25 = vshll.u32 %v11296_v19, 16  ;;  %v13055_v30 = vld [vmem:[#allocation13_spill] sm:$0xff] }
 0x310   : > { %v11777_v58 = vadd.f32 %v7332_v46, %v11687_v50  ;;  %v3973_v33 = vpop.f32.mrb[155].mxu1  ;;  %v4934_v50 = vsel %vm3056_vm11, %v13055_v30, %v4933_v43  ;;  %v4955_v9 = vor.u32 %v4954_v49, %v4951_v32  ;;  %v4944_v14 = vrot.slane %v4288_v16, 3 }
 0x311   : > { %v11781_v56 = vadd.f32 %v3973_v33, %v11663_v31  ;;  %v4923_v7 = vrot.slane %v13053_v25, 4  ;;  %v13056_v25 = vshll.u32 %v11708_v0, 16 }
 0x313   : > { %v4924_v52 = vor.u32 %v4923_v7, %v4922_v22 }
 0x314   : > { %v3793_v47 = vpop.f32.mrb[136].mxu0 }
 0x315   : > { %5383 = vmatmul.mubr.bf16.gmra.mrb[4].mxu1 %v13054_v62  ;;  %v7335_v51 = vpop.f32.mrb[156].mxu1  ;;  %v3794_v11 = vadd.f32 %v3793_v47, %v11411_v45  ;;  %v3795_v33 = vpop.f32.mrb[137].mxu0  ;;  %v4945_v62 = vrot.slane %v13056_v25, 4 }
 0x316   : > { %5390 = vmatprep.mubr.bf16.mxu1 %v4934_v50  ;;  %v11791_v46 = vadd.f32 %v7335_v51, %v11725_v44  ;;  %v3986_v31 = vpop.f32.mrb[157].mxu1  ;;  %v3796_v30 = vpop.f32.mrb[138].mxu0  ;;  %v4956_v44 = vsel %vm3056_vm11, %v4933_v43, %v4955_v9 }
 0x317   : > { %v11795_v19 = vadd.f32 %v3986_v31, %v11700_v20  ;;  %v7336_v18 = vpop.f32.mrb[158].mxu1  ;;  %v3797_v22 = vadd.f32 %v3796_v30, %v11423_v41  ;;  %v3798_v7 = vpop.f32.mrb[139].mxu0  ;;  %v13057_v20 = vld [vmem:[#allocation44_spill] sm:$0xff]  ;;  %v4946_v0 = vor.u32 %v4945_v62, %v4944_v14 }
 0x318   : > { %v11800_v32 = vadd.f32 %v7336_v18, %v11739_v48  ;;  %v3989_v49 = vpop.f32.mrb[159].mxu1  ;;  %v4925_v50 = vsel %vm3056_vm11, %v13057_v20, %v4924_v52 }
 0x319   : > { %v11805_v45 = vadd.f32 %v3989_v49, %v11711_v13  ;;  %v4947_v13 = vsel %vm3056_vm11, %v4924_v52, %v4946_v0 }
 0x31c   : > { %v3801_v51 = vpop.f32.mrb[140].mxu0 }
 0x31d   : > { %5391 = vmatmul.mubr.bf16.gmra.mrb[8].mxu1 %v4925_v50  ;;  %v7339_v16 = vpop.f32.mrb[160].mxu1  ;;  %v3802_v31 = vadd.f32 %v3801_v51, %v11451_v61  ;;  %v3803_v43 = vpop.f32.mrb[141].mxu0 }
 0x31e   : > { %5398 = vmatprep.mubr.bf16.mxu1 %v4956_v44  ;;  %v11809_v47 = vadd.f32 %v7339_v16, %v3786_v60  ;;  %v4002_v48 = vpop.f32.mrb[161].mxu1  ;;  %v3804_v33 = vpop.f32.mrb[142].mxu0 }
 0x31f   : > { %v11813_v41 = vadd.f32 %v4002_v48, %v11753_v1  ;;  %v7340_v9 = vpop.f32.mrb[162].mxu1  ;;  %v3805_v14 = vadd.f32 %v3804_v33, %v11464_v21  ;;  %v3806_v62 = vpop.f32.mrb[143].mxu0 }
 0x320   : > { %v11816_v18 = vadd.f32 %v7340_v9, %v3789_v23  ;;  %v4005_v25 = vpop.f32.mrb[163].mxu1 }
 0x321   : > { %v11820_v60 = vadd.f32 %v4005_v25, %v11762_v26 }
 0x324   : > { %v3809_v61 = vpop.f32.mrb[144].mxu0 }
 0x325   : > { %5399 = vmatmul.mubr.bf16.gmra.mrb[12].mxu1 %v4947_v13  ;;  %v7343_v30 = vpop.f32.mrb[164].mxu1  ;;  %v3810_v44 = vadd.f32 %v3809_v61, %v11492_v10  ;;  %v3811_v7 = vpop.f32.mrb[145].mxu0 }
 0x326   : > { %v11822_v49 = vadd.f32 %v7343_v30, %v3802_v31  ;;  %v4018_v1 = vpop.f32.mrb[165].mxu1  ;;  %v3812_v20 = vpop.f32.mrb[146].mxu0 }
 0x327   : > { %v11825_v52 = vadd.f32 %v4018_v1, %v3794_v11  ;;  %v7344_v23 = vpop.f32.mrb[166].mxu1  ;;  %v3813_v0 = vadd.f32 %v3812_v20, %v11504_v8  ;;  %v3814_v26 = vpop.f32.mrb[147].mxu0 }
 0x328   : > { %v11827_v50 = vadd.f32 %v7344_v23, %v3805_v14  ;;  %v4021_v21 = vpop.f32.mrb[167].mxu1 }
 0x329   : > { %v11830_v16 = vadd.f32 %v4021_v21, %v3797_v22 }
 0x32c   : > { %v3817_v48 = vpop.f32.mrb[148].mxu0 }
 0x32d   : > { %v7347_v51 = vpop.f32.mrb[168].mxu1  ;;  %v3818_v43 = vadd.f32 %v3817_v48, %v11532_v2  ;;  %v3819_v9 = vpop.f32.mrb[149].mxu0 }
 0x32e   : > { %v4034_v31 = vpop.f32.mrb[169].mxu1  ;;  %v3820_v13 = vpop.f32.mrb[150].mxu0 }
 0x32f   : > { %v11833_v10 = vadd.f32 %v4034_v31, %v3810_v44  ;;  %v7348_v11 = vpop.f32.mrb[170].mxu1  ;;  %v3821_v25 = vadd.f32 %v3820_v13, %v11540_v6  ;;  %v3822_v14 = vpop.f32.mrb[151].mxu0  ;;  %v11836_v62 = vadd.f32 %v7347_v51, %v3818_v43  ;;  %v13058_v43 = vld [vmem:[#allocation7_spill] sm:$0xff] }
 0x330   : > { %v4037_v33 = vpop.f32.mrb[171].mxu1 }
 0x331   : > { %v11838_v8 = vadd.f32 %v4037_v33, %v3813_v0  ;;  %v11840_v22 = vadd.f32 %v7348_v11, %v3821_v25 }
 0x334   : > { %v3825_v61 = vpop.f32.mrb[152].mxu0 }
 0x335   : > { %v7351_v30 = vpop.f32.mrb[172].mxu1  ;;  %v3826_v2 = vadd.f32 %v3825_v61, %v11560_v15  ;;  %v3827_v7 = vpop.f32.mrb[153].mxu0 }
 0x336   : > { %v4050_v1 = vpop.f32.mrb[173].mxu1  ;;  %v3828_v23 = vpop.f32.mrb[154].mxu0 }
 0x337   : > { %v7352_v44 = vpop.f32.mrb[174].mxu1  ;;  %v3829_v21 = vadd.f32 %v3828_v23, %v11573_v53  ;;  %v3830_v26 = vpop.f32.mrb[155].mxu0  ;;  %v11844_v6 = vadd.f32 %v4050_v1, %v3826_v2 }
 0x338   : > { %v4053_v20 = vpop.f32.mrb[175].mxu1 }
 0x339   : > { %v11846_v51 = vadd.f32 %v4053_v20, %v3829_v21 }
 0x33c   : > { %v3833_v48 = vpop.f32.mrb[156].mxu0 }
 0x33d   : > { %v5216_v0 = vpop.f32.mrb[176].mxu1  ;;  %v3834_v9 = vadd.f32 %v3833_v48, %v13058_v43  ;;  %v3835_v11 = vpop.f32.mrb[157].mxu0  ;;  %v11857_v43 = vld [vmem:[%s12160_s4] ss:$0 sm:$0xff] }
 0x33e   : > { %v5218_v31 = vpop.f32.mrb[177].mxu1  ;;  %v3836_v33 = vpop.f32.mrb[158].mxu0 }
 0x33f   : > { %v5219_v13 = vpop.f32.mrb[178].mxu1  ;;  %v11849_v25 = vadd.f32 %v7351_v30, %v3834_v9  ;;  %v3837_v14 = vadd.f32 %v3836_v33, %v11605_v39  ;;  %v3838_v61 = vpop.f32.mrb[159].mxu0 }
 0x340   : > { %v5221_v15 = vpop.f32.mrb[179].mxu1  ;;  %v13061_v61 = vld [vmem:[#allocation3_spill] sm:$0xff] }
 0x341   : > { %v11852_v53 = vadd.f32 %v7352_v44, %v3837_v14  ;;  %v13060_v15 = vld [vmem:[#allocation34_spill] sm:$0xff] }
 0x343   : > { %13059 = vst [vmem:[#allocation9_spill] sm:$0xff] %v11852_v53 }
 0x344   : > { %v7371_v2 = vpop.f32.mrb[160].mxu0 }
 0x345   : > { %v5224_v1 = vpop.f32.mrb[180].mxu1  ;;  %v5441_v23 = vpop.f32.mrb[161].mxu0 }
 0x346   : > { %v5226_v7 = vpop.f32.mrb[181].mxu1  ;;  %v5450_v20 = vadd.f32 %v7371_v2, %v5224_v1  ;;  %v5442_v26 = vadd.f32 %v5441_v23, %v5216_v0  ;;  %v7372_v31 = vpop.f32.mrb[162].mxu0 }
 0x347   : > { %v5227_v21 = vpop.f32.mrb[182].mxu1  ;;  %v5444_v30 = vpop.f32.mrb[163].mxu0 }
 0x348   : > { %v5229_v48 = vpop.f32.mrb[183].mxu1  ;;  %v5634_v39 = vadd.f32 %v5450_v20, %v11621_v34  ;;  %v5453_v9 = vadd.f32 %v7372_v31, %v5227_v21  ;;  %v5632_v44 = vadd.f32 %v5442_v26, %v11627_v42  ;;  %v5445_v11 = vadd.f32 %v5444_v30, %v5219_v13 }
 0x34a   : > { %v5689_v33 = vadd.f32 %v11857_v43, %v5634_v39  ;;  %v5635_v14 = vadd.f32 %v5453_v9, %v13060_v15  ;;  %v5687_v0 = vadd.f32 %v11857_v43, %v5632_v44  ;;  %v5633_v1 = vadd.f32 %v5445_v11, %v13061_v61 }
 0x34c   : > { %v5690_v2 = vadd.f32 %v11857_v43, %v5635_v14  ;;  %v5688_v23 = vadd.f32 %v11857_v43, %v5633_v1  ;;  %v7375_v48 = vpop.f32.mrb[164].mxu0  ;;  %v5737_v34 = vmax.f32 %v5689_v33, 0.0  ;;  %v5735_v13 = vmax.f32 %v5687_v0, 0.0 }
 0x34d   : > { %v5232_v7 = vpop.f32.mrb[184].mxu1  ;;  %v5457_v21 = vpop.f32.mrb[165].mxu0 }
 0x34e   : > { %v5234_v53 = vpop.f32.mrb[185].mxu1  ;;  %v5738_v20 = vmax.f32 %v5690_v2, 0.0  ;;  %v5736_v26 = vmax.f32 %v5688_v23, 0.0  ;;  %v7376_v31 = vpop.f32.mrb[166].mxu0  ;;  %v5458_v30 = vadd.f32 %v5457_v21, %v5232_v7 }
 0x34f   : > { %v5235_v42 = vpop.f32.mrb[186].mxu1  ;;  %v5460_v44 = vpop.f32.mrb[167].mxu0 }
 0x350   : > { %v5237_v39 = vpop.f32.mrb[187].mxu1  ;;  %v5784_v9 = vpack.c.bf16 %v5738_v20, %v5737_v34  ;;  %v5636_v11 = vadd.f32 %v5458_v30, %v11655_v59  ;;  %v5783_v15 = vpack.c.bf16 %v5736_v26, %v5735_v13  ;;  %v5461_v14 = vadd.f32 %v5460_v44, %v5235_v42 }
 0x352   : > { %v5691_v61 = vadd.f32 %v11857_v43, %v5636_v11  ;;  %7433 = vmatprep.mubr.bf16.mxu0 %v5783_v15  ;;  %v5637_v53 = vadd.f32 %v5461_v14, %v11666_v28  ;;  %v13062_v28 = vld [vmem:[#allocation29_spill] sm:$0xff] }
 0x353   : > { %7434 = vmatmul.mubr.bf16.vlgmr.msra.gmra.mrb[208].mxu0 %v5784_v9 }
 0x354   : > { %v5692_v1 = vadd.f32 %v11857_v43, %v5637_v53  ;;  %v7379_v0 = vpop.f32.mrb[168].mxu0  ;;  %v5739_v34 = vmax.f32 %v5691_v61, 0.0 }
 0x355   : > { %v5240_v33 = vpop.f32.mrb[188].mxu1  ;;  %v5473_v7 = vpop.f32.mrb[169].mxu0 }
 0x356   : > { %v5466_v2 = vadd.f32 %v7375_v48, %v5240_v33  ;;  %v5242_v23 = vpop.f32.mrb[189].mxu1  ;;  %v5740_v20 = vmax.f32 %v5692_v1, 0.0  ;;  %v7380_v39 = vpop.f32.mrb[170].mxu0 }
 0x357   : > { %v5243_v21 = vpop.f32.mrb[190].mxu1  ;;  %v5476_v26 = vpop.f32.mrb[171].mxu0 }
 0x358   : > { %v5638_v59 = vadd.f32 %v5466_v2, %v11649_v27  ;;  %v5469_v42 = vadd.f32 %v7376_v31, %v5243_v21  ;;  %v5245_v13 = vpop.f32.mrb[191].mxu1  ;;  %v5785_v44 = vpack.c.bf16 %v5740_v20, %v5739_v34 }
 0x35a   : > { %v5693_v30 = vadd.f32 %v11857_v43, %v5638_v59  ;;  %v5639_v9 = vadd.f32 %v5469_v42, %v13062_v28  ;;  %7437 = vmatprep.mubr.bf16.mxu0 %v5785_v44 }
 0x35c   : > { %v5694_v11 = vadd.f32 %v11857_v43, %v5639_v9  ;;  %v5741_v15 = vmax.f32 %v5693_v30, 0.0  ;;  %v7383_v53 = vpop.f32.mrb[172].mxu0 }
 0x35d   : > { %v5248_v48 = vpop.f32.mrb[192].mxu1  ;;  %v5489_v1 = vpop.f32.mrb[173].mxu0 }
 0x35e   : > { %v5742_v14 = vmax.f32 %v5694_v11, 0.0  ;;  %v5474_v61 = vadd.f32 %v5473_v7, %v5248_v48  ;;  %v5250_v33 = vpop.f32.mrb[193].mxu1  ;;  %v7384_v27 = vpop.f32.mrb[174].mxu0 }
 0x35f   : > { %v5251_v23 = vpop.f32.mrb[194].mxu1  ;;  %v5492_v13 = vpop.f32.mrb[175].mxu0 }
 0x360   : > { %v5640_v31 = vadd.f32 %v5474_v61, %v11679_v17  ;;  %v5477_v2 = vadd.f32 %v5476_v26, %v5251_v23  ;;  %v5253_v21 = vpop.f32.mrb[195].mxu1  ;;  %v5786_v59 = vpack.c.bf16 %v5742_v14, %v5741_v15 }
 0x362   : > { %v5695_v34 = vadd.f32 %v11857_v43, %v5640_v31  ;;  %v5641_v20 = vadd.f32 %v5477_v2, %v11690_v57  ;;  %7438 = vmatmul.mubr.bf16.gmra.mrb[212].mxu0 %v5786_v59 }
 0x364   : > { %v5696_v42 = vadd.f32 %v11857_v43, %v5641_v20  ;;  %v5743_v28 = vmax.f32 %v5695_v34, 0.0  ;;  %v11879_v9 = vpop.f32.mrb[176].mxu0 }
 0x365   : > { %v5256_v30 = vpop.f32.mrb[196].mxu1  ;;  %v5505_v48 = vpop.f32.mrb[177].mxu0 }
 0x366   : > { %v5744_v7 = vmax.f32 %v5696_v42, 0.0  ;;  %v5482_v44 = vadd.f32 %v7379_v0, %v5256_v30  ;;  %v5258_v11 = vpop.f32.mrb[197].mxu1  ;;  %v11881_v26 = vpop.f32.mrb[178].mxu0 }
 0x367   : > { %v5259_v17 = vpop.f32.mrb[198].mxu1  ;;  %v5508_v57 = vpop.f32.mrb[179].mxu0 }
 0x368   : > { %v5642_v15 = vadd.f32 %v5482_v44, %v11673_v24  ;;  %v5485_v14 = vadd.f32 %v7380_v39, %v5259_v17  ;;  %v5261_v61 = vpop.f32.mrb[199].mxu1  ;;  %v5787_v33 = vpack.c.bf16 %v5744_v7, %v5743_v28 }
 0x36a   : > { %v5697_v23 = vadd.f32 %v11857_v43, %v5642_v15  ;;  %v5643_v31 = vadd.f32 %v5485_v14, %v11682_v12  ;;  %7441 = vmatprep.mubr.bf16.mxu0 %v5787_v33 }
 0x36c   : > { %v5698_v2 = vadd.f32 %v11857_v43, %v5643_v31  ;;  %v5745_v0 = vmax.f32 %v5697_v23, 0.0  ;;  %v11887_v34 = vpop.f32.mrb[180].mxu0 }
 0x36d   : > { %v5264_v21 = vpop.f32.mrb[200].mxu1  ;;  %v11889_v30 = vpop.f32.mrb[181].mxu0 }
 0x36e   : > { %v5746_v59 = vmax.f32 %v5698_v2, 0.0  ;;  %v5490_v20 = vadd.f32 %v5489_v1, %v5264_v21  ;;  %v5266_v42 = vpop.f32.mrb[201].mxu1  ;;  %v11891_v39 = vpop.f32.mrb[182].mxu0 }
 0x36f   : > { %v5267_v24 = vpop.f32.mrb[202].mxu1  ;;  %v11894_v11 = vpop.f32.mrb[183].mxu0 }
 0x370   : > { %v5644_v28 = vadd.f32 %v5490_v20, %v11703_v36  ;;  %v5493_v7 = vadd.f32 %v5492_v13, %v5267_v24  ;;  %v5269_v44 = vpop.f32.mrb[203].mxu1  ;;  %v5788_v12 = vpack.c.bf16 %v5746_v59, %v5745_v0 }
 0x372   : > { %v5699_v17 = vadd.f32 %v11857_v43, %v5644_v28  ;;  %v5645_v15 = vadd.f32 %v5493_v7, %v11714_v55  ;;  %7442 = vmatmul.mubr.bf16.gmra.mrb[216].mxu0 %v5788_v12 }
 0x374   : > { %v5700_v1 = vadd.f32 %v11857_v43, %v5645_v15  ;;  %v5747_v61 = vmax.f32 %v5699_v17, 0.0  ;;  %v11899_v23 = vpop.f32.mrb[184].mxu0 }
 0x375   : > { %v5272_v14 = vpop.f32.mrb[204].mxu1  ;;  %v11901_v36 = vpop.f32.mrb[185].mxu0 }
 0x376   : > { %v5748_v33 = vmax.f32 %v5700_v1, 0.0  ;;  %v5498_v31 = vadd.f32 %v7383_v53, %v5272_v14  ;;  %v5274_v2 = vpop.f32.mrb[205].mxu1  ;;  %v11903_v21 = vpop.f32.mrb[186].mxu0 }
 0x377   : > { %v5275_v13 = vpop.f32.mrb[206].mxu1  ;;  %v11906_v42 = vpop.f32.mrb[187].mxu0 }
 0x378   : > { %v5646_v0 = vadd.f32 %v5498_v31, %v11697_v63  ;;  %v5501_v59 = vadd.f32 %v7384_v27, %v5275_v13  ;;  %v5277_v20 = vpop.f32.mrb[207].mxu1  ;;  %v5789_v55 = vpack.c.bf16 %v5748_v33, %v5747_v61 }
 0x37a   : > { %v5701_v24 = vadd.f32 %v11857_v43, %v5646_v0  ;;  %v5647_v28 = vadd.f32 %v5501_v59, %v11706_v5  ;;  %7445 = vmatprep.mubr.bf16.mxu0 %v5789_v55 }
 0x37c   : > { %v5702_v53 = vadd.f32 %v11857_v43, %v5647_v28  ;;  %v5749_v44 = vmax.f32 %v5701_v24, 0.0  ;;  %v11911_v17 = vpop.f32.mrb[188].mxu0 }
 0x37d   : > { %v5280_v7 = vpop.f32.mrb[208].mxu1  ;;  %v11913_v63 = vpop.f32.mrb[189].mxu0 }
 0x37e   : > { %v5750_v12 = vmax.f32 %v5702_v53, 0.0  ;;  %v5506_v15 = vadd.f32 %v5505_v48, %v5280_v7  ;;  %v5282_v1 = vpop.f32.mrb[209].mxu1  ;;  %v11915_v14 = vpop.f32.mrb[190].mxu0 }
 0x37f   : > { %v5283_v27 = vpop.f32.mrb[210].mxu1  ;;  %v11918_v2 = vpop.f32.mrb[191].mxu0 }
 0x380   : > { %v5648_v61 = vadd.f32 %v5506_v15, %v11728_v37  ;;  %v5509_v33 = vadd.f32 %v5508_v57, %v5283_v27  ;;  %v5285_v31 = vpop.f32.mrb[211].mxu1  ;;  %v5790_v5 = vpack.c.bf16 %v5750_v12, %v5749_v44 }
 0x382   : > { %v5703_v13 = vadd.f32 %v11857_v43, %v5648_v61  ;;  %v5649_v0 = vadd.f32 %v5509_v33, %v11742_v38  ;;  %7446 = vmatmul.mubr.bf16.gmra.mrb[220].mxu0 %v5790_v5 }
 0x384   : > { %v5704_v48 = vadd.f32 %v11857_v43, %v5649_v0  ;;  %v5751_v20 = vmax.f32 %v5703_v13, 0.0 }
 0x386   : > { %v5752_v55 = vmax.f32 %v5704_v48, 0.0 }
 0x388   : > { %v5288_v59 = vpop.f32.mrb[212].mxu1  ;;  %v11923_v24 = vpop.f32.mrb[192].mxu0  ;;  %v5791_v15 = vpack.c.bf16 %v5752_v55, %v5751_v20 }
 0x389   : > { %v5514_v28 = vadd.f32 %v11879_v9, %v5288_v59  ;;  %v5290_v37 = vpop.f32.mrb[213].mxu1  ;;  %v11926_v57 = vpop.f32.mrb[193].mxu0 }
 0x38a   : > { %v5291_v53 = vpop.f32.mrb[214].mxu1  ;;  %v11928_v7 = vpop.f32.mrb[194].mxu0  ;;  %7449 = vmatprep.mubr.bf16.mxu0 %v5791_v15 }
 0x38b   : > { %v5650_v44 = vadd.f32 %v5514_v28, %v11722_v29  ;;  %v5517_v38 = vadd.f32 %v11881_v26, %v5291_v53  ;;  %v5293_v12 = vpop.f32.mrb[215].mxu1  ;;  %v11932_v1 = vpop.f32.mrb[195].mxu0 }
 0x38d   : > { %v5705_v27 = vadd.f32 %v11857_v43, %v5650_v44  ;;  %v5651_v61 = vadd.f32 %v5517_v38, %v11736_v40 }
 0x38f   : > { %v5706_v9 = vadd.f32 %v11857_v43, %v5651_v61  ;;  %v5753_v31 = vmax.f32 %v5705_v27, 0.0 }
 0x390   : > { %v5296_v33 = vpop.f32.mrb[216].mxu1  ;;  %v11937_v13 = vpop.f32.mrb[196].mxu0 }
 0x391   : > { %v5754_v5 = vmax.f32 %v5706_v9, 0.0  ;;  %v5522_v29 = vadd.f32 %v11889_v30, %v5296_v33  ;;  %v5298_v0 = vpop.f32.mrb[217].mxu1  ;;  %v11940_v26 = vpop.f32.mrb[197].mxu0 }
 0x392   : > { %v5299_v48 = vpop.f32.mrb[218].mxu1  ;;  %v11942_v59 = vpop.f32.mrb[198].mxu0 }
 0x393   : > { %v5652_v20 = vadd.f32 %v5522_v29, %v11756_v35  ;;  %v5525_v40 = vadd.f32 %v11894_v11, %v5299_v48  ;;  %v5301_v55 = vpop.f32.mrb[219].mxu1  ;;  %v5792_v28 = vpack.c.bf16 %v5754_v5, %v5753_v31  ;;  %v11946_v37 = vpop.f32.mrb[199].mxu0  ;;  %v13063_v31 = vld [vmem:[#allocation14_spill] sm:$0xff] }
 0x395   : > { %v5707_v53 = vadd.f32 %v11857_v43, %v5652_v20  ;;  %v5653_v44 = vadd.f32 %v5525_v40, %v11765_v4  ;;  %7450 = vmatmul.mubr.bf16.gmra.mrb[224].mxu0 %v5792_v28  ;;  %v13064_v40 = vld [vmem:[#allocation45_spill] sm:$0xff] }
 0x397   : > { %v5708_v30 = vadd.f32 %v11857_v43, %v5653_v44  ;;  %v5755_v12 = vmax.f32 %v5707_v53, 0.0 }
 0x398   : > { %v5304_v38 = vpop.f32.mrb[220].mxu1  ;;  %v11951_v27 = vpop.f32.mrb[200].mxu0 }
 0x399   : > { %v5756_v15 = vmax.f32 %v5708_v30, 0.0  ;;  %v5530_v35 = vadd.f32 %v11887_v34, %v5304_v38  ;;  %v5306_v61 = vpop.f32.mrb[221].mxu1  ;;  %v11954_v11 = vpop.f32.mrb[201].mxu0 }
 0x39a   : > { %v5307_v9 = vpop.f32.mrb[222].mxu1  ;;  %v11956_v33 = vpop.f32.mrb[202].mxu0 }
 0x39b   : > { %v5654_v5 = vadd.f32 %v5530_v35, %v13063_v31  ;;  %v5533_v4 = vadd.f32 %v11891_v39, %v5307_v9  ;;  %v5309_v29 = vpop.f32.mrb[223].mxu1  ;;  %v5793_v0 = vpack.c.bf16 %v5756_v15, %v5755_v12  ;;  %v11960_v48 = vpop.f32.mrb[203].mxu0 }
 0x39d   : > { %v5709_v20 = vadd.f32 %v11857_v43, %v5654_v5  ;;  %v5655_v55 = vadd.f32 %v5533_v4, %v13064_v40  ;;  %7453 = vmatprep.mubr.bf16.mxu0 %v5793_v0 }
 0x39f   : > { %v5710_v34 = vadd.f32 %v11857_v43, %v5655_v55  ;;  %v5757_v53 = vmax.f32 %v5709_v20, 0.0 }
 0x3a0   : > { %v5312_v28 = vpop.f32.mrb[224].mxu1  ;;  %v11966_v35 = vpop.f32.mrb[204].mxu0 }
 0x3a1   : > { %v5758_v44 = vmax.f32 %v5710_v34, 0.0  ;;  %v5538_v30 = vadd.f32 %v11901_v36, %v5312_v28  ;;  %v5314_v38 = vpop.f32.mrb[225].mxu1  ;;  %v11968_v61 = vpop.f32.mrb[205].mxu0 }
 0x3a2   : > { %v5315_v39 = vpop.f32.mrb[226].mxu1  ;;  %v11972_v5 = vpop.f32.mrb[206].mxu0 }
 0x3a3   : > { %v5656_v12 = vadd.f32 %v5538_v30, %v11774_v54  ;;  %v5541_v15 = vadd.f32 %v11906_v42, %v5315_v39  ;;  %v5317_v9 = vpop.f32.mrb[227].mxu1  ;;  %v5794_v31 = vpack.c.bf16 %v5758_v44, %v5757_v53  ;;  %v11974_v4 = vpop.f32.mrb[207].mxu0 }
 0x3a5   : > { %v5711_v29 = vadd.f32 %v11857_v43, %v5656_v12  ;;  %v5657_v36 = vadd.f32 %v5541_v15, %v11781_v56  ;;  %7454 = vmatmul.mubr.bf16.gmra.mrb[228].mxu0 %v5794_v31 }
 0x3a7   : > { %v5712_v0 = vadd.f32 %v11857_v43, %v5657_v36  ;;  %v5759_v40 = vmax.f32 %v5711_v29, 0.0 }
 0x3a8   : > { %v5320_v20 = vpop.f32.mrb[228].mxu1 }
 0x3a9   : > { %v5760_v55 = vmax.f32 %v5712_v0, 0.0  ;;  %v5546_v54 = vadd.f32 %v11899_v23, %v5320_v20  ;;  %v5322_v34 = vpop.f32.mrb[229].mxu1 }
 0x3aa   : > { %v5323_v42 = vpop.f32.mrb[230].mxu1 }
 0x3ab   : > { %v5658_v28 = vadd.f32 %v5546_v54, %v11770_v3  ;;  %v5549_v53 = vadd.f32 %v11903_v21, %v5323_v42  ;;  %v5325_v44 = vpop.f32.mrb[231].mxu1  ;;  %v5795_v30 = vpack.c.bf16 %v5760_v55, %v5759_v40 }
 0x3ad   : > { %v5713_v38 = vadd.f32 %v11857_v43, %v5658_v28  ;;  %v5659_v56 = vadd.f32 %v5549_v53, %v11777_v58  ;;  %7457 = vmatprep.mubr.bf16.mxu0 %v5795_v30 }
 0x3af   : > { %v5714_v39 = vadd.f32 %v11857_v43, %v5659_v56  ;;  %v5761_v15 = vmax.f32 %v5713_v38, 0.0 }
 0x3b0   : > { %v5328_v12 = vpop.f32.mrb[232].mxu1 }
 0x3b1   : > { %v5762_v9 = vmax.f32 %v5714_v39, 0.0  ;;  %v5554_v23 = vadd.f32 %v11913_v63, %v5328_v12  ;;  %v5330_v31 = vpop.f32.mrb[233].mxu1 }
 0x3b2   : > { %v5331_v29 = vpop.f32.mrb[234].mxu1 }
 0x3b3   : > { %v5660_v3 = vadd.f32 %v5554_v23, %v11795_v19  ;;  %v5557_v21 = vadd.f32 %v11918_v2, %v5331_v29  ;;  %v5333_v36 = vpop.f32.mrb[235].mxu1  ;;  %v5796_v0 = vpack.c.bf16 %v5762_v9, %v5761_v15 }
 0x3b5   : > { %v5715_v20 = vadd.f32 %v11857_v43, %v5660_v3  ;;  %v5661_v58 = vadd.f32 %v5557_v21, %v11805_v45  ;;  %7458 = vmatmul.mubr.bf16.gmra.mrb[232].mxu0 %v5796_v0 }
 0x3b7   : > { %v5716_v40 = vadd.f32 %v11857_v43, %v5661_v58  ;;  %v5763_v54 = vmax.f32 %v5715_v20, 0.0 }
 0x3b8   : > { %v5336_v55 = vpop.f32.mrb[236].mxu1 }
 0x3b9   : > { %v5764_v34 = vmax.f32 %v5716_v40, 0.0  ;;  %v5562_v63 = vadd.f32 %v11911_v17, %v5336_v55  ;;  %v5338_v42 = vpop.f32.mrb[237].mxu1 }
 0x3ba   : > { %v5339_v28 = vpop.f32.mrb[238].mxu1 }
 0x3bb   : > { %v5662_v19 = vadd.f32 %v5562_v63, %v11791_v46  ;;  %v5565_v2 = vadd.f32 %v11915_v14, %v5339_v28  ;;  %v5341_v53 = vpop.f32.mrb[239].mxu1  ;;  %v5797_v44 = vpack.c.bf16 %v5764_v34, %v5763_v54 }
 0x3bd   : > { %v5717_v30 = vadd.f32 %v11857_v43, %v5662_v19  ;;  %v5663_v45 = vadd.f32 %v5565_v2, %v11800_v32  ;;  %7461 = vmatprep.mubr.bf16.mxu0 %v5797_v44 }
 0x3bf   : > { %v5718_v38 = vadd.f32 %v11857_v43, %v5663_v45  ;;  %v5765_v39 = vmax.f32 %v5717_v30, 0.0 }
 0x3c0   : > { %v5344_v56 = vpop.f32.mrb[240].mxu1 }
 0x3c1   : > { %v5766_v12 = vmax.f32 %v5718_v38, 0.0  ;;  %v5570_v17 = vadd.f32 %v11926_v57, %v5344_v56  ;;  %v5346_v15 = vpop.f32.mrb[241].mxu1 }
 0x3c2   : > { %v5347_v9 = vpop.f32.mrb[242].mxu1 }
 0x3c3   : > { %v5664_v46 = vadd.f32 %v5570_v17, %v11813_v41  ;;  %v5573_v14 = vadd.f32 %v11932_v1, %v5347_v9  ;;  %v5349_v23 = vpop.f32.mrb[243].mxu1  ;;  %v5798_v31 = vpack.c.bf16 %v5766_v12, %v5765_v39 }
 0x3c5   : > { %v5719_v29 = vadd.f32 %v11857_v43, %v5664_v46  ;;  %v5665_v32 = vadd.f32 %v5573_v14, %v11820_v60  ;;  %7462 = vmatmul.mubr.bf16.gmra.mrb[236].mxu0 %v5798_v31 }
 0x3c7   : > { %v5720_v3 = vadd.f32 %v11857_v43, %v5665_v32  ;;  %v5767_v36 = vmax.f32 %v5719_v29, 0.0 }
 0x3c8   : > { %v5352_v21 = vpop.f32.mrb[244].mxu1 }
 0x3c9   : > { %v5768_v0 = vmax.f32 %v5720_v3, 0.0  ;;  %v5578_v57 = vadd.f32 %v11923_v24, %v5352_v21  ;;  %v5354_v20 = vpop.f32.mrb[245].mxu1 }
 0x3ca   : > { %v5355_v58 = vpop.f32.mrb[246].mxu1 }
 0x3cb   : > { %v5666_v41 = vadd.f32 %v5578_v57, %v11809_v47  ;;  %v5581_v1 = vadd.f32 %v11928_v7, %v5355_v58  ;;  %v5357_v40 = vpop.f32.mrb[247].mxu1  ;;  %v5799_v55 = vpack.c.bf16 %v5768_v0, %v5767_v36 }
 0x3cd   : > { %v5721_v54 = vadd.f32 %v11857_v43, %v5666_v41  ;;  %v5667_v60 = vadd.f32 %v5581_v1, %v11816_v18  ;;  %7465 = vmatprep.mubr.bf16.mxu0 %v5799_v55 }
 0x3cf   : > { %v5722_v34 = vadd.f32 %v11857_v43, %v5667_v60  ;;  %v5769_v42 = vmax.f32 %v5721_v54, 0.0 }
 0x3d0   : > { %v5360_v63 = vpop.f32.mrb[248].mxu1 }
 0x3d1   : > { %v5770_v28 = vmax.f32 %v5722_v34, 0.0  ;;  %v5586_v24 = vadd.f32 %v11940_v26, %v5360_v63  ;;  %v5362_v19 = vpop.f32.mrb[249].mxu1 }
 0x3d2   : > { %v5363_v2 = vpop.f32.mrb[250].mxu1 }
 0x3d3   : > { %v5668_v47 = vadd.f32 %v5586_v24, %v11825_v52  ;;  %v5589_v7 = vadd.f32 %v11946_v37, %v5363_v2  ;;  %v5365_v53 = vpop.f32.mrb[251].mxu1  ;;  %v5800_v44 = vpack.c.bf16 %v5770_v28, %v5769_v42 }
 0x3d5   : > { %v5723_v30 = vadd.f32 %v11857_v43, %v5668_v47  ;;  %v5669_v18 = vadd.f32 %v5589_v7, %v11830_v16  ;;  %7466 = vmatmul.mubr.bf16.gmra.mrb[240].mxu0 %v5800_v44 }
 0x3d7   : > { %v5724_v45 = vadd.f32 %v11857_v43, %v5669_v18  ;;  %v5771_v56 = vmax.f32 %v5723_v30, 0.0 }
 0x3d8   : > { %v5368_v38 = vpop.f32.mrb[252].mxu1 }
 0x3d9   : > { %v5772_v39 = vmax.f32 %v5724_v45, 0.0  ;;  %v5594_v26 = vadd.f32 %v11937_v13, %v5368_v38  ;;  %v5370_v12 = vpop.f32.mrb[253].mxu1 }
 0x3da   : > { %v5371_v17 = vpop.f32.mrb[254].mxu1 }
 0x3db   : > { %v5670_v52 = vadd.f32 %v5594_v26, %v11822_v49  ;;  %v5597_v37 = vadd.f32 %v11942_v59, %v5371_v17  ;;  %v5373_v15 = vpop.f32.mrb[255].mxu1  ;;  %v5801_v9 = vpack.c.bf16 %v5772_v39, %v5771_v56  ;;  %v13065_v26 = vld [vmem:[#allocation9_spill] sm:$0xff] }
 0x3dc   : > { %v12048_v15 = vld [vmem:[%s12162_s6] ss:$0 sm:$0xff] }
 0x3dd   : > { %v5725_v46 = vadd.f32 %v11857_v43, %v5670_v52  ;;  %v5671_v16 = vadd.f32 %v5597_v37, %v11827_v50  ;;  %7469 = vmatprep.mubr.bf16.mxu0 %v5801_v9  ;;  %v7749_v9 = vld [vmem:[%s7850_s12] sm:$0xff]  }
 0x3df   : > { %v5726_v14 = vadd.f32 %v11857_v43, %v5671_v16  ;;  %v5773_v31 = vmax.f32 %v5725_v46, 0.0  ;;  %v6103_v46 = vunpack.c.l.bf16 %v7749_v9 }
 0x3e0   : > { %v5376_v23 = vpop.f32.mrb[0].mxu1 }
 0x3e1   : > { %v5774_v29 = vmax.f32 %v5726_v14, 0.0  ;;  %v5602_v13 = vadd.f32 %v11954_v11, %v5376_v23  ;;  %v5378_v32 = vpop.f32.mrb[1].mxu1 }
 0x3e2   : > { %v5379_v3 = vpop.f32.mrb[2].mxu1 }
 0x3e3   : > { %v5672_v49 = vadd.f32 %v5602_v13, %v11833_v10  ;;  %v5605_v59 = vadd.f32 %v11960_v48, %v5379_v3  ;;  %v5381_v21 = vpop.f32.mrb[3].mxu1  ;;  %v5802_v36 = vpack.c.bf16 %v5774_v29, %v5773_v31 }
 0x3e5   : > { %v5727_v0 = vadd.f32 %v11857_v43, %v5672_v49  ;;  %v5673_v50 = vadd.f32 %v5605_v59, %v11838_v8  ;;  %7470 = vmatmul.mubr.bf16.gmra.mrb[244].mxu0 %v5802_v36 }
 0x3e7   : > { %v5728_v57 = vadd.f32 %v11857_v43, %v5673_v50  ;;  %v5775_v58 = vmax.f32 %v5727_v0, 0.0 }
 0x3e8   : > { %v5384_v20 = vpop.f32.mrb[4].mxu1 }
 0x3e9   : > { %v5776_v41 = vmax.f32 %v5728_v57, 0.0  ;;  %v5610_v11 = vadd.f32 %v11951_v27, %v5384_v20  ;;  %v5386_v1 = vpop.f32.mrb[5].mxu1 }
 0x3ea   : > { %v5387_v40 = vpop.f32.mrb[6].mxu1  ;;  %v7750_v1 = vld [vmem:[%s7850_s12 + $0x18] sm:$0xff]  }
 0x3eb   : > { %v5674_v10 = vadd.f32 %v5610_v11, %v11836_v62  ;;  %v5613_v48 = vadd.f32 %v11956_v33, %v5387_v40  ;;  %v5389_v55 = vpop.f32.mrb[7].mxu1  ;;  %v5803_v54 = vpack.c.bf16 %v5776_v41, %v5775_v58  ;;  %v6109_v40 = vunpack.c.l.bf16 %v7750_v1 }
 0x3ed   : > { %v5729_v60 = vadd.f32 %v11857_v43, %v5674_v10  ;;  %v5675_v8 = vadd.f32 %v5613_v48, %v11840_v22  ;;  %7473 = vmatprep.mubr.bf16.mxu0 %v5803_v54  ;;  %v7751_v48 = vld [vmem:[%s7850_s12 + $0x10] sm:$0xff]  }
 0x3ee   : > { %v6107_v55 = vunpack.c.l.bf16 %v7751_v48 }
 0x3ef   : > { %v5730_v34 = vadd.f32 %v11857_v43, %v5675_v8  ;;  %v5777_v42 = vmax.f32 %v5729_v60, 0.0  ;;  %v6110_v8 = vunpack.c.h.bf16 %v7750_v1 }
 0x3f0   : > { %v5392_v63 = vpop.f32.mrb[8].mxu1 }
 0x3f1   : > { %v5778_v28 = vmax.f32 %v5730_v34, 0.0  ;;  %v5618_v27 = vadd.f32 %v11968_v61, %v5392_v63  ;;  %v5394_v24 = vpop.f32.mrb[9].mxu1 }
 0x3f2   : > { %v5395_v19 = vpop.f32.mrb[10].mxu1 }
 0x3f3   : > { %v5676_v62 = vadd.f32 %v5618_v27, %v11844_v6  ;;  %v5621_v33 = vadd.f32 %v11974_v4, %v5395_v19  ;;  %v5397_v2 = vpop.f32.mrb[11].mxu1  ;;  %v5804_v47 = vpack.c.bf16 %v5778_v28, %v5777_v42  ;;  %v6108_v42 = vunpack.c.h.bf16 %v7751_v48 }
 0x3f5   : > { %v5731_v7 = vadd.f32 %v11857_v43, %v5676_v62  ;;  %v5677_v22 = vadd.f32 %v5621_v33, %v11846_v51  ;;  %7474 = vmatmul.mubr.bf16.gmra.mrb[248].mxu0 %v5804_v47 }
 0x3f7   : > { %v5732_v53 = vadd.f32 %v11857_v43, %v5677_v22  ;;  %v5779_v30 = vmax.f32 %v5731_v7, 0.0 }
 0x3f8   : > { %v5400_v44 = vpop.f32.mrb[12].mxu1 }
 0x3f9   : > { %v5780_v18 = vmax.f32 %v5732_v53, 0.0  ;;  %v5626_v61 = vadd.f32 %v11966_v35, %v5400_v44  ;;  %v5402_v45 = vpop.f32.mrb[13].mxu1 }
 0x3fa   : > { %v5403_v38 = vpop.f32.mrb[14].mxu1 }
 0x3fb   : > { %v5678_v6 = vadd.f32 %v5626_v61, %v11849_v25  ;;  %v5629_v4 = vadd.f32 %v11972_v5, %v5403_v38  ;;  %v5405_v56 = vpop.f32.mrb[15].mxu1  ;;  %v5805_v39 = vpack.c.bf16 %v5780_v18, %v5779_v30  ;;  %v7748_v25 = vld [vmem:[%s7850_s12 + $0x8] sm:$0xff]   ;;  %v7753_v38 = vld [vmem:[%s7850_s12 + $0x20] sm:$0xff]  }
 0x3fc   : > { %v6105_v5 = vunpack.c.l.bf16 %v7748_v25  ;;  %v6106_v31 = vunpack.c.h.bf16 %v7748_v25  ;;  %v7752_v18 = vld [vmem:[%s7850_s12 + $0x28] sm:$0xff]  }
 0x3fd   : > { %v5733_v51 = vadd.f32 %v11857_v43, %v5678_v6  ;;  %v5679_v12 = vadd.f32 %v5629_v4, %v13065_v26  ;;  %7477 = vmatprep.mubr.bf16.mxu0 %v5805_v39  ;;  %v6113_v61 = vunpack.c.l.bf16 %v7752_v18  ;;  %v6111_v6 = vunpack.c.l.bf16 %v7753_v38 }
 0x3fe   : > { %v6114_v39 = vunpack.c.h.bf16 %v7752_v18 }
 0x3ff   : > { %v5734_v17 = vadd.f32 %v11857_v43, %v5679_v12  ;;  %v5781_v52 = vmax.f32 %v5733_v51, 0.0  ;;  %v6104_v43 = vunpack.c.h.bf16 %v7749_v9  ;;  %v6112_v12 = vunpack.c.h.bf16 %v7753_v38 }
 0x401   : > { %v5782_v37 = vmax.f32 %v5734_v17, 0.0 }
 0x403   : > { %v5806_v35 = vpack.c.bf16 %v5782_v37, %v5781_v52 }
 0x405   : > { %7478 = vmatmul.mubr.bf16.gmra.mrb[252].mxu0 %v5806_v35 }
 0x426   : > { %v7435_v16 = vpop.f32.mrb[208].mxu0 }
 0x427   : > { %v5921_v14 = vadd.f32 %v7435_v16, %v12048_v15  ;;  %v5912_v23 = vpop.f32.mrb[209].mxu0 }
 0x428   : > { %v5913_v29 = vadd.f32 %v12048_v15, %v5912_v23  ;;  %v7436_v13 = vpop.f32.mrb[210].mxu0 }
 0x429   : > { %v6153_v32 = vadd.f32 %v6105_v5, %v5921_v14  ;;  %v5924_v3 = vadd.f32 %v7436_v13, %v12048_v15  ;;  %v5915_v49 = vpop.f32.mrb[211].mxu0 }
 0x42a   : > { %v6151_v59 = vadd.f32 %v6103_v46, %v5913_v29  ;;  %v5916_v21 = vadd.f32 %v12048_v15, %v5915_v49  ;;  %v7754_v29 = vld [vmem:[%s7850_s12 + $0x38] sm:$0xff]  }
 0x42b   : > { %v6154_v36 = vadd.f32 %v6106_v31, %v5924_v3  ;;  %v6201_v50 = vmax.f32 %v6153_v32, 0.0  ;;  %v6117_v13 = vunpack.c.l.bf16 %v7754_v29  ;;  %v7755_v3 = vld [vmem:[%s7850_s12 + $0x30] sm:$0xff]  }
 0x42c   : > { %v6152_v0 = vadd.f32 %v6104_v43, %v5916_v21  ;;  %v6199_v20 = vmax.f32 %v6151_v59, 0.0  ;;  %v6115_v49 = vunpack.c.l.bf16 %v7755_v3 }
 0x42d   : > { %v6202_v57 = vmax.f32 %v6154_v36, 0.0  ;;  %v6118_v36 = vunpack.c.h.bf16 %v7754_v29 }
 0x42e   : > { %v6200_v58 = vmax.f32 %v6152_v0, 0.0 }
 0x42f   : > { %v6866_v41 = vpack.c.bf16 %v6202_v57, %v6201_v50  ;;  %v6116_v57 = vunpack.c.h.bf16 %v7755_v3 }
 0x430   : > { %v6861_v11 = vpack.c.bf16 %v6200_v58, %v6199_v20 }
 0x431   : > { %6978 = vst [vmem:[%s12061_s26 + $0x8] sm:$0xff] %v6866_v41  }
 0x432   : > { %6862 = vst [vmem:[%s12061_s26] sm:$0xff] %v6861_v11  }
 0x435   : > { %v7439_v10 = vpop.f32.mrb[212].mxu0 }
 0x436   : > { %v5937_v54 = vadd.f32 %v7439_v10, %v12048_v15  ;;  %v5928_v60 = vpop.f32.mrb[213].mxu0 }
 0x437   : > { %v5929_v34 = vadd.f32 %v12048_v15, %v5928_v60  ;;  %v7440_v63 = vpop.f32.mrb[214].mxu0 }
 0x438   : > { %v6157_v28 = vadd.f32 %v6109_v40, %v5937_v54  ;;  %v5940_v27 = vadd.f32 %v7440_v63, %v12048_v15  ;;  %v5931_v24 = vpop.f32.mrb[215].mxu0  ;;  %v7756_v63 = vld [vmem:[%s7850_s12 + $0x48] sm:$0xff]  }
 0x439   : > { %v6155_v19 = vadd.f32 %v6107_v55, %v5929_v34  ;;  %v5932_v62 = vadd.f32 %v12048_v15, %v5931_v24 }
 0x43a   : > { %v6158_v33 = vadd.f32 %v6110_v8, %v5940_v27  ;;  %v6205_v47 = vmax.f32 %v6157_v28, 0.0  ;;  %v7757_v28 = vld [vmem:[%s7850_s12 + $0x40] sm:$0xff]  }
 0x43b   : > { %v6156_v2 = vadd.f32 %v6108_v42, %v5932_v62  ;;  %v6203_v22 = vmax.f32 %v6155_v19, 0.0  ;;  %v6121_v42 = vunpack.c.l.bf16 %v7756_v63  ;;  %v6119_v27 = vunpack.c.l.bf16 %v7757_v28 }
 0x43c   : > { %v6206_v7 = vmax.f32 %v6158_v33, 0.0  ;;  %v6122_v33 = vunpack.c.h.bf16 %v7756_v63 }
 0x43d   : > { %v6204_v53 = vmax.f32 %v6156_v2, 0.0  ;;  %v6120_v2 = vunpack.c.h.bf16 %v7757_v28 }
 0x43e   : > { %v6876_v44 = vpack.c.bf16 %v6206_v7, %v6205_v47 }
 0x43f   : > { %v6871_v30 = vpack.c.bf16 %v6204_v53, %v6203_v22 }
 0x440   : > { %6980 = vst [vmem:[%s12061_s26 + $0x18] sm:$0xff] %v6876_v44  }
 0x441   : > { %6979 = vst [vmem:[%s12061_s26 + $0x10] sm:$0xff] %v6871_v30  }
 0x445   : > { %v7443_v45 = vpop.f32.mrb[216].mxu0 }
 0x446   : > { %v5953_v4 = vadd.f32 %v7443_v45, %v12048_v15  ;;  %v5944_v56 = vpop.f32.mrb[217].mxu0 }
 0x447   : > { %v5945_v51 = vadd.f32 %v12048_v15, %v5944_v56  ;;  %v7444_v26 = vpop.f32.mrb[218].mxu0 }
 0x448   : > { %v6161_v17 = vadd.f32 %v6113_v61, %v5953_v4  ;;  %v5956_v52 = vadd.f32 %v7444_v26, %v12048_v15  ;;  %v5947_v37 = vpop.f32.mrb[219].mxu0  ;;  %v7758_v26 = vld [vmem:[%s7850_s12 + $0x58] sm:$0xff]  }
 0x449   : > { %v6159_v35 = vadd.f32 %v6111_v6, %v5945_v51  ;;  %v5948_v25 = vadd.f32 %v12048_v15, %v5947_v37 }
 0x44a   : > { %v6162_v5 = vadd.f32 %v6114_v39, %v5956_v52  ;;  %v6209_v46 = vmax.f32 %v6161_v17, 0.0  ;;  %v7759_v52 = vld [vmem:[%s7850_s12 + $0x50] sm:$0xff]  }
 0x44b   : > { %v6160_v9 = vadd.f32 %v6112_v12, %v5948_v25  ;;  %v6207_v14 = vmax.f32 %v6159_v35, 0.0  ;;  %v6125_v12 = vunpack.c.l.bf16 %v7758_v26  ;;  %v6123_v37 = vunpack.c.l.bf16 %v7759_v52 }
 0x44c   : > { %v6210_v16 = vmax.f32 %v6162_v5, 0.0  ;;  %v6126_v5 = vunpack.c.h.bf16 %v7758_v26 }
 0x44d   : > { %v6208_v23 = vmax.f32 %v6160_v9, 0.0 }
 0x44e   : > { %v6886_v31 = vpack.c.bf16 %v6210_v16, %v6209_v46  ;;  %v6124_v16 = vunpack.c.h.bf16 %v7759_v52 }
 0x44f   : > { %v6881_v43 = vpack.c.bf16 %v6208_v23, %v6207_v14 }
 0x450   : > { %6982 = vst [vmem:[%s12061_s26 + $0x28] sm:$0xff] %v6886_v31  }
 0x451   : > { %6981 = vst [vmem:[%s12061_s26 + $0x20] sm:$0xff] %v6881_v43  }
 0x455   : > { %v7447_v32 = vpop.f32.mrb[220].mxu0 }
 0x456   : > { %v5969_v59 = vadd.f32 %v7447_v32, %v12048_v15  ;;  %v5960_v21 = vpop.f32.mrb[221].mxu0 }
 0x457   : > { %v5961_v0 = vadd.f32 %v12048_v15, %v5960_v21  ;;  %v7448_v50 = vpop.f32.mrb[222].mxu0 }
 0x458   : > { %v6165_v20 = vadd.f32 %v6117_v13, %v5969_v59  ;;  %v5972_v58 = vadd.f32 %v7448_v50, %v12048_v15  ;;  %v5963_v41 = vpop.f32.mrb[223].mxu0  ;;  %v7760_v50 = vld [vmem:[%s7850_s12 + $0x68] sm:$0xff]  }
 0x459   : > { %v6163_v11 = vadd.f32 %v6115_v49, %v5961_v0  ;;  %v5964_v1 = vadd.f32 %v12048_v15, %v5963_v41 }
 0x45a   : > { %v6166_v40 = vadd.f32 %v6118_v36, %v5972_v58  ;;  %v6213_v48 = vmax.f32 %v6165_v20, 0.0  ;;  %v7761_v58 = vld [vmem:[%s7850_s12 + $0x60] sm:$0xff]  }
 0x45b   : > { %v6164_v10 = vadd.f32 %v6116_v57, %v5964_v1  ;;  %v6211_v54 = vmax.f32 %v6163_v11, 0.0  ;;  %v6129_v57 = vunpack.c.l.bf16 %v7760_v50  ;;  %v6127_v41 = vunpack.c.l.bf16 %v7761_v58 }
 0x45c   : > { %v6214_v55 = vmax.f32 %v6166_v40, 0.0  ;;  %v6130_v40 = vunpack.c.h.bf16 %v7760_v50 }
 0x45d   : > { %v6212_v60 = vmax.f32 %v6164_v10, 0.0 }
 0x45e   : > { %v6896_v8 = vpack.c.bf16 %v6214_v55, %v6213_v48  ;;  %v6128_v55 = vunpack.c.h.bf16 %v7761_v58 }
 0x45f   : > { %v6891_v34 = vpack.c.bf16 %v6212_v60, %v6211_v54 }
 0x460   : > { %6984 = vst [vmem:[%s12061_s26 + $0x38] sm:$0xff] %v6896_v8  }
 0x461   : > { %6983 = vst [vmem:[%s12061_s26 + $0x30] sm:$0xff] %v6891_v34  }
 0x468   : > { %v7451_v24 = vpop.f32.mrb[224].mxu0 }
 0x469   : > { %v5985_v19 = vadd.f32 %v7451_v24, %v12048_v15  ;;  %v5976_v62 = vpop.f32.mrb[225].mxu0 }
 0x46a   : > { %v5977_v47 = vadd.f32 %v12048_v15, %v5976_v62  ;;  %v7452_v7 = vpop.f32.mrb[226].mxu0 }
 0x46b   : > { %v6169_v22 = vadd.f32 %v6121_v42, %v5985_v19  ;;  %v5988_v53 = vadd.f32 %v7452_v7, %v12048_v15  ;;  %v5979_v44 = vpop.f32.mrb[227].mxu0 }
 0x46c   : > { %v6167_v30 = vadd.f32 %v6119_v27, %v5977_v47  ;;  %v5980_v18 = vadd.f32 %v12048_v15, %v5979_v44  ;;  %v7762_v47 = vld [vmem:[%s7850_s12 + $0x78] sm:$0xff]  }
 0x46d   : > { %v6170_v61 = vadd.f32 %v6122_v33, %v5988_v53  ;;  %v6217_v38 = vmax.f32 %v6169_v22, 0.0  ;;  %v6133_v7 = vunpack.c.l.bf16 %v7762_v47  ;;  %v7763_v53 = vld [vmem:[%s7850_s12 + $0x70] sm:$0xff]  }
 0x46e   : > { %v6168_v45 = vadd.f32 %v6120_v2, %v5980_v18  ;;  %v6215_v4 = vmax.f32 %v6167_v30, 0.0  ;;  %v6131_v44 = vunpack.c.l.bf16 %v7763_v53 }
 0x46f   : > { %v6218_v6 = vmax.f32 %v6170_v61, 0.0  ;;  %v6134_v61 = vunpack.c.h.bf16 %v7762_v47 }
 0x470   : > { %v6216_v56 = vmax.f32 %v6168_v45, 0.0 }
 0x471   : > { %v6906_v39 = vpack.c.bf16 %v6218_v6, %v6217_v38  ;;  %v6132_v6 = vunpack.c.h.bf16 %v7763_v53 }
 0x472   : > { %v6901_v51 = vpack.c.bf16 %v6216_v56, %v6215_v4 }
 0x473   : > { %6986 = vst [vmem:[%s12061_s26 + $0x48] sm:$0xff] %v6906_v39  }
 0x474   : > { %6985 = vst [vmem:[%s12061_s26 + $0x40] sm:$0xff] %v6901_v51  }
 0x478   : > { %v7455_v17 = vpop.f32.mrb[228].mxu0 }
 0x479   : > { %v6001_v35 = vadd.f32 %v7455_v17, %v12048_v15  ;;  %v5992_v25 = vpop.f32.mrb[229].mxu0 }
 0x47a   : > { %v5993_v9 = vadd.f32 %v12048_v15, %v5992_v25  ;;  %v7456_v46 = vpop.f32.mrb[230].mxu0 }
 0x47b   : > { %v6173_v14 = vadd.f32 %v6125_v12, %v6001_v35  ;;  %v6004_v23 = vadd.f32 %v7456_v46, %v12048_v15  ;;  %v5995_v31 = vpop.f32.mrb[231].mxu0  ;;  %v7764_v46 = vld [vmem:[%s7850_s12 + $0x88] sm:$0xff]  }
 0x47c   : > { %v6171_v43 = vadd.f32 %v6123_v37, %v5993_v9  ;;  %v5996_v29 = vadd.f32 %v12048_v15, %v5995_v31 }
 0x47d   : > { %v6174_v13 = vadd.f32 %v6126_v5, %v6004_v23  ;;  %v6221_v3 = vmax.f32 %v6173_v14, 0.0  ;;  %v7765_v23 = vld [vmem:[%s7850_s12 + $0x80] sm:$0xff]  }
 0x47e   : > { %v6172_v32 = vadd.f32 %v6124_v16, %v5996_v29  ;;  %v6219_v59 = vmax.f32 %v6171_v43, 0.0  ;;  %v6137_v16 = vunpack.c.l.bf16 %v7764_v46  ;;  %v6135_v31 = vunpack.c.l.bf16 %v7765_v23 }
 0x47f   : > { %v6222_v49 = vmax.f32 %v6174_v13, 0.0  ;;  %v6138_v13 = vunpack.c.h.bf16 %v7764_v46 }
 0x480   : > { %v6220_v21 = vmax.f32 %v6172_v32, 0.0 }
 0x481   : > { %v6916_v36 = vpack.c.bf16 %v6222_v49, %v6221_v3  ;;  %v6136_v49 = vunpack.c.h.bf16 %v7765_v23 }
 0x482   : > { %v6911_v0 = vpack.c.bf16 %v6220_v21, %v6219_v59 }
 0x483   : > { %6988 = vst [vmem:[%s12061_s26 + $0x58] sm:$0xff] %v6916_v36  }
 0x484   : > { %6987 = vst [vmem:[%s12061_s26 + $0x50] sm:$0xff] %v6911_v0  }
 0x488   : > { %v7459_v20 = vpop.f32.mrb[232].mxu0 }
 0x489   : > { %v6017_v11 = vadd.f32 %v7459_v20, %v12048_v15  ;;  %v6008_v1 = vpop.f32.mrb[233].mxu0 }
 0x48a   : > { %v6009_v10 = vadd.f32 %v12048_v15, %v6008_v1  ;;  %v7460_v48 = vpop.f32.mrb[234].mxu0 }
 0x48b   : > { %v6177_v54 = vadd.f32 %v6129_v57, %v6017_v11  ;;  %v6020_v60 = vadd.f32 %v7460_v48, %v12048_v15  ;;  %v6011_v8 = vpop.f32.mrb[235].mxu0  ;;  %v7766_v48 = vld [vmem:[%s7850_s12 + $0x98] sm:$0xff]  }
 0x48c   : > { %v6175_v34 = vadd.f32 %v6127_v41, %v6009_v10  ;;  %v6012_v63 = vadd.f32 %v12048_v15, %v6011_v8 }
 0x48d   : > { %v6178_v42 = vadd.f32 %v6130_v40, %v6020_v60  ;;  %v6225_v27 = vmax.f32 %v6177_v54, 0.0  ;;  %v7767_v60 = vld [vmem:[%s7850_s12 + $0x90] sm:$0xff]  }
 0x48e   : > { %v6176_v28 = vadd.f32 %v6128_v55, %v6012_v63  ;;  %v6223_v19 = vmax.f32 %v6175_v34, 0.0  ;;  %v6141_v55 = vunpack.c.l.bf16 %v7766_v48  ;;  %v6139_v8 = vunpack.c.l.bf16 %v7767_v60 }
 0x48f   : > { %v6226_v24 = vmax.f32 %v6178_v42, 0.0  ;;  %v6142_v42 = vunpack.c.h.bf16 %v7766_v48 }
 0x490   : > { %v6224_v62 = vmax.f32 %v6176_v28, 0.0 }
 0x491   : > { %v6926_v33 = vpack.c.bf16 %v6226_v24, %v6225_v27  ;;  %v6140_v24 = vunpack.c.h.bf16 %v7767_v60 }
 0x492   : > { %v6921_v2 = vpack.c.bf16 %v6224_v62, %v6223_v19 }
 0x493   : > { %6990 = vst [vmem:[%s12061_s26 + $0x68] sm:$0xff] %v6926_v33  }
 0x494   : > { %6989 = vst [vmem:[%s12061_s26 + $0x60] sm:$0xff] %v6921_v2  }
 0x498   : > { %v7463_v22 = vpop.f32.mrb[236].mxu0 }
 0x499   : > { %v6033_v30 = vadd.f32 %v7463_v22, %v12048_v15  ;;  %v6024_v18 = vpop.f32.mrb[237].mxu0 }
 0x49a   : > { %v6025_v45 = vadd.f32 %v12048_v15, %v6024_v18  ;;  %v7464_v38 = vpop.f32.mrb[238].mxu0 }
 0x49b   : > { %v6181_v4 = vadd.f32 %v6133_v7, %v6033_v30  ;;  %v6036_v56 = vadd.f32 %v7464_v38, %v12048_v15  ;;  %v6027_v39 = vpop.f32.mrb[239].mxu0  ;;  %v7768_v38 = vld [vmem:[%s7850_s12 + $0xa8] sm:$0xff]  }
 0x49c   : > { %v6179_v51 = vadd.f32 %v6131_v44, %v6025_v45  ;;  %v6028_v26 = vadd.f32 %v12048_v15, %v6027_v39 }
 0x49d   : > { %v6182_v12 = vadd.f32 %v6134_v61, %v6036_v56  ;;  %v6229_v52 = vmax.f32 %v6181_v4, 0.0  ;;  %v7769_v56 = vld [vmem:[%s7850_s12 + $0xa0] sm:$0xff]  }
 0x49e   : > { %v6180_v17 = vadd.f32 %v6132_v6, %v6028_v26  ;;  %v6227_v35 = vmax.f32 %v6179_v51, 0.0  ;;  %v6145_v6 = vunpack.c.l.bf16 %v7768_v38  ;;  %v6143_v39 = vunpack.c.l.bf16 %v7769_v56 }
 0x49f   : > { %v6230_v37 = vmax.f32 %v6182_v12, 0.0  ;;  %v6146_v12 = vunpack.c.h.bf16 %v7768_v38 }
 0x4a0   : > { %v6228_v25 = vmax.f32 %v6180_v17, 0.0 }
 0x4a1   : > { %v6936_v5 = vpack.c.bf16 %v6230_v37, %v6229_v52  ;;  %v6144_v37 = vunpack.c.h.bf16 %v7769_v56 }
 0x4a2   : > { %v6931_v9 = vpack.c.bf16 %v6228_v25, %v6227_v35 }
 0x4a3   : > { %6992 = vst [vmem:[%s12061_s26 + $0x78] sm:$0xff] %v6936_v5  }
 0x4a4   : > { %6991 = vst [vmem:[%s12061_s26 + $0x70] sm:$0xff] %v6931_v9  }
 0x4a8   : > { %v7467_v14 = vpop.f32.mrb[240].mxu0 }
 0x4a9   : > { %v6049_v43 = vadd.f32 %v7467_v14, %v12048_v15  ;;  %v6040_v29 = vpop.f32.mrb[241].mxu0 }
 0x4aa   : > { %v6041_v32 = vadd.f32 %v12048_v15, %v6040_v29  ;;  %v7468_v3 = vpop.f32.mrb[242].mxu0 }
 0x4ab   : > { %v6185_v59 = vadd.f32 %v6137_v16, %v6049_v43  ;;  %v6052_v21 = vadd.f32 %v7468_v3, %v12048_v15  ;;  %v6043_v36 = vpop.f32.mrb[243].mxu0  ;;  %v7770_v3 = vld [vmem:[%s7850_s12 + $0xb8] sm:$0xff]  }
 0x4ac   : > { %v6183_v0 = vadd.f32 %v6135_v31, %v6041_v32  ;;  %v6044_v50 = vadd.f32 %v12048_v15, %v6043_v36 }
 0x4ad   : > { %v6186_v57 = vadd.f32 %v6138_v13, %v6052_v21  ;;  %v6233_v58 = vmax.f32 %v6185_v59, 0.0  ;;  %v7771_v21 = vld [vmem:[%s7850_s12 + $0xb0] sm:$0xff]  }
 0x4ae   : > { %v6184_v20 = vadd.f32 %v6136_v49, %v6044_v50  ;;  %v6231_v11 = vmax.f32 %v6183_v0, 0.0  ;;  %v6149_v49 = vunpack.c.l.bf16 %v7770_v3  ;;  %v6147_v36 = vunpack.c.l.bf16 %v7771_v21 }
 0x4af   : > { %v6234_v41 = vmax.f32 %v6186_v57, 0.0  ;;  %v6150_v57 = vunpack.c.h.bf16 %v7770_v3 }
 0x4b0   : > { %v6232_v1 = vmax.f32 %v6184_v20, 0.0 }
 0x4b1   : > { %v6946_v40 = vpack.c.bf16 %v6234_v41, %v6233_v58  ;;  %v6148_v41 = vunpack.c.h.bf16 %v7771_v21 }
 0x4b2   : > { %v6941_v10 = vpack.c.bf16 %v6232_v1, %v6231_v11 }
 0x4b3   : > { %6994 = vst [vmem:[%s12061_s26 + $0x88] sm:$0xff] %v6946_v40  }
 0x4b4   : > { %6993 = vst [vmem:[%s12061_s26 + $0x80] sm:$0xff] %v6941_v10  }
 0x4b8   : > { %v7471_v54 = vpop.f32.mrb[244].mxu0 }
 0x4b9   : > { %v6065_v34 = vadd.f32 %v7471_v54, %v12048_v15  ;;  %v6056_v63 = vpop.f32.mrb[245].mxu0 }
 0x4ba   : > { %v6057_v28 = vadd.f32 %v12048_v15, %v6056_v63  ;;  %v7472_v27 = vpop.f32.mrb[246].mxu0 }
 0x4bb   : > { %v6189_v19 = vadd.f32 %v6141_v55, %v6065_v34  ;;  %v6068_v62 = vadd.f32 %v7472_v27, %v12048_v15  ;;  %v6059_v33 = vpop.f32.mrb[247].mxu0 }
 0x4bc   : > { %v6187_v2 = vadd.f32 %v6139_v8, %v6057_v28  ;;  %v6060_v47 = vadd.f32 %v12048_v15, %v6059_v33 }
 0x4bd   : > { %v6190_v7 = vadd.f32 %v6142_v42, %v6068_v62  ;;  %v6237_v53 = vmax.f32 %v6189_v19, 0.0 }
 0x4be   : > { %v6188_v22 = vadd.f32 %v6140_v24, %v6060_v47  ;;  %v6235_v30 = vmax.f32 %v6187_v2, 0.0 }
 0x4bf   : > { %v6238_v44 = vmax.f32 %v6190_v7, 0.0 }
 0x4c0   : > { %v6236_v18 = vmax.f32 %v6188_v22, 0.0 }
 0x4c1   : > { %v6956_v61 = vpack.c.bf16 %v6238_v44, %v6237_v53 }
 0x4c2   : > { %v6951_v45 = vpack.c.bf16 %v6236_v18, %v6235_v30 }
 0x4c3   : > { %6996 = vst [vmem:[%s12061_s26 + $0x98] sm:$0xff] %v6956_v61  }
 0x4c4   : > { %6995 = vst [vmem:[%s12061_s26 + $0x90] sm:$0xff] %v6951_v45  }
 0x4c8   : > { %v7475_v4 = vpop.f32.mrb[248].mxu0 }
 0x4c9   : > { %v6081_v51 = vadd.f32 %v7475_v4, %v12048_v15  ;;  %v6072_v26 = vpop.f32.mrb[249].mxu0 }
 0x4ca   : > { %v6073_v17 = vadd.f32 %v12048_v15, %v6072_v26  ;;  %v7476_v52 = vpop.f32.mrb[250].mxu0 }
 0x4cb   : > { %v6193_v35 = vadd.f32 %v6145_v6, %v6081_v51  ;;  %v6084_v25 = vadd.f32 %v7476_v52, %v12048_v15  ;;  %v6075_v5 = vpop.f32.mrb[251].mxu0 }
 0x4cc   : > { %v6191_v9 = vadd.f32 %v6143_v39, %v6073_v17  ;;  %v6076_v46 = vadd.f32 %v12048_v15, %v6075_v5 }
 0x4cd   : > { %v6194_v16 = vadd.f32 %v6146_v12, %v6084_v25  ;;  %v6241_v23 = vmax.f32 %v6193_v35, 0.0 }
 0x4ce   : > { %v6192_v14 = vadd.f32 %v6144_v37, %v6076_v46  ;;  %v6239_v43 = vmax.f32 %v6191_v9, 0.0 }
 0x4cf   : > { %v6242_v31 = vmax.f32 %v6194_v16, 0.0 }
 0x4d0   : > { %v6240_v29 = vmax.f32 %v6192_v14, 0.0 }
 0x4d1   : > { %v6966_v13 = vpack.c.bf16 %v6242_v31, %v6241_v23 }
 0x4d2   : > { %v6961_v32 = vpack.c.bf16 %v6240_v29, %v6239_v43 }
 0x4d3   : > { %6998 = vst [vmem:[%s12061_s26 + $0xa8] sm:$0xff] %v6966_v13  }
 0x4d4   : > { %6997 = vst [vmem:[%s12061_s26 + $0xa0] sm:$0xff] %v6961_v32  }
 0x4d8   : > { %v7479_v59 = vpop.f32.mrb[252].mxu0 }
 0x4d9   : > { %v6097_v0 = vadd.f32 %v7479_v59, %v12048_v15  ;;  %v6088_v50 = vpop.f32.mrb[253].mxu0 }
 0x4da   : > { %v6089_v20 = vadd.f32 %v12048_v15, %v6088_v50  ;;  %v7480_v58 = vpop.f32.mrb[254].mxu0 }
 0x4db   : > { %v6197_v11 = vadd.f32 %v6149_v49, %v6097_v0  ;;  %v6100_v1 = vadd.f32 %v7480_v58, %v12048_v15  ;;  %v6091_v40 = vpop.f32.mrb[255].mxu0 }
 0x4dc   : > { %v6195_v10 = vadd.f32 %v6147_v36, %v6089_v20  ;;  %v6092_v48 = vadd.f32 %v12048_v15, %v6091_v40 }
 0x4dd   : > { %v6198_v55 = vadd.f32 %v6150_v57, %v6100_v1  ;;  %v6245_v60 = vmax.f32 %v6197_v11, 0.0 }
 0x4de   : > { %v6196_v54 = vadd.f32 %v6148_v41, %v6092_v48  ;;  %v6243_v34 = vmax.f32 %v6195_v10, 0.0 }
 0x4df   : > { %v6246_v8 = vmax.f32 %v6198_v55, 0.0 }
 0x4e0   : > { %v6244_v63 = vmax.f32 %v6196_v54, 0.0 }
 0x4e1   : > { %v6976_v42 = vpack.c.bf16 %v6246_v8, %v6245_v60 }
 0x4e2   : > { %v6971_v28 = vpack.c.bf16 %v6244_v63, %v6243_v34 }
 0x4e3   : > { %7000 = vst [vmem:[%s12061_s26 + $0xb8] sm:$0xff] %v6976_v42  }
 0x4e4   : > { %6999 = vst [vmem:[%s12061_s26 + $0xb0] sm:$0xff] %v6971_v28  }
 0x4e5 PF: > { %s17_s24 = sadd.s32 1, %s7778_s24  }
 0x4e6   : > { %p14_p4 = scmp.ge.s32.totalorder %s17_s24, 4  }
 0x4e8   :  { %16 = sbr.rel (!%p14_p4) target bundleno = 1 (0x1), region = 80 }

</bundles_post_ra>
